<compile_context>
chip_gen: v7x
topology: tpu7x:2x2x1
jax: 0.10.0
libtpu: 0.0.40
codegen_flags: <defaults>
</compile_context>

<pallas_src>
import numpy as np
import jax
import jax.numpy as jnp
from jax.experimental import pallas as pl
from jax.experimental.pallas import tpu as pltpu


# ----------------------------------------------------------------------------
# Schedule construction (host-side parameter setup — plain numpy, matches PyTorch)
# ----------------------------------------------------------------------------
def cosine_beta_schedule(timesteps, s=0.008, raise_to_power: float = 1):
    steps = timesteps + 2
    x = np.linspace(0, steps, steps)
    alphas_cumprod = np.cos((x / steps + s) / (1 + s) * np.pi * 0.5) ** 2
    alphas_cumprod = alphas_cumprod / alphas_cumprod[0]
    betas = 1 - alphas_cumprod[1:] / alphas_cumprod[:-1]
    betas = np.clip(betas, a_min=0, a_max=0.999)
    alphas = 1.0 - betas
    alphas_cumprod = np.cumprod(alphas, axis=0)
    if raise_to_power != 1:
        alphas_cumprod = np.power(alphas_cumprod, raise_to_power)
    return alphas_cumprod


def clip_noise_schedule(alphas2, clip_value=0.001):
    alphas2 = np.concatenate([np.ones(1), alphas2], axis=0)
    alphas_step = alphas2[1:] / alphas2[:-1]
    alphas_step = np.clip(alphas_step, a_min=clip_value, a_max=1.0)
    alphas2 = np.cumprod(alphas_step, axis=0)
    return alphas2


def polynomial_schedule(timesteps: int, s=0.0001, power=3.0):
    steps = timesteps + 1
    x = np.linspace(0, steps, steps)
    alphas2 = (1 - np.power(x / steps, power)) ** 2
    alphas2 = clip_noise_schedule(alphas2, clip_value=0.001)
    precision = 1 - 2 * s
    alphas2 = precision * alphas2 + s
    return alphas2


def build_gamma(noise_schedule: str = "cosine", timesteps: int = 1000) -> np.ndarray:
    if noise_schedule == "cosine":
        alphas2 = cosine_beta_schedule(timesteps)
    elif "poly" in noise_schedule:
        splits = noise_schedule.split("_")
        power = float(splits[1])
        alphas2 = polynomial_schedule(timesteps, power=power)
    else:
        raise ValueError(noise_schedule)
    sigmas2 = 1 - alphas2
    log_alphas2 = np.log(alphas2)
    log_sigmas2 = np.log(sigmas2)
    log_alphas2_to_sigmas2 = log_alphas2 - log_sigmas2
    gamma = (-log_alphas2_to_sigmas2).astype(np.float32)  # (timesteps + 1,)
    return gamma


def _round_up(x: int, m: int) -> int:
    return ((x + m - 1) // m) * m


# ----------------------------------------------------------------------------
# Pallas kernel: exact gamma lookup via a bit-indexed select tree (lane-dense)
# ----------------------------------------------------------------------------
def _make_lookup_kernel(timesteps: int, gamma_f32: np.ndarray):
    """gamma_f32: (timesteps+1,) float32 table, baked as scalar immediates."""
    n = int(gamma_f32.shape[0])                       # timesteps + 1
    n_bits = max(1, (n - 1).bit_length())             # bits needed for the index
    size = 1 << n_bits                                # pow2-padded table size
    table = np.full((size,), gamma_f32[-1], dtype=np.float32)
    table[:n] = gamma_f32
    leaves = [float(v) for v in table]                # python floats -> literals

    def kernel(t_ref, out_ref):
        t = t_ref[...]                                                  # (tr,128) f32 dense
        t_int = jnp.round(t * float(timesteps)).astype(jnp.int32)       # (tr,128) i32
        t_int = jnp.clip(t_int, 0, timesteps)                           # clamp -> boundary gamma
        # Binary select tree over the bits of t_int: after level b, entry m of
        # `vals` holds table[(m << (b+1)) + (t_int & ((1 << (b+1)) - 1))], so
        # after n_bits levels vals[0] == table[t_int] exactly.
        vals = leaves
        for b in range(n_bits):
            bit = (t_int & (1 << b)) != 0                                # one mask per level
            vals = [jnp.where(bit, vals[2 * m + 1], vals[2 * m])
                    for m in range(len(vals) // 2)]
        out_ref[...] = vals[0].astype(jnp.float32)

    return kernel


class PredefinedNoiseSchedulePallas:
    """Predefined (non-learned) noise schedule; forward is a Pallas lookup kernel."""

    # Rows of 128 lanes per block: 16K elements / ~16 vregs per block.  Compute
    # per step (~4.5 us of selects) dwarfs the ~0.35 us grid-step overhead, and
    # batches > 32K elements give >=2 "parallel" blocks for v7x's 2 TensorCores.
    _TARGET_ROWS = 128

    def __init__(self, noise_schedule: str = "cosine", timesteps: int = 1000):
        self.timesteps = timesteps
        gamma = build_gamma(noise_schedule, timesteps)          # (timesteps + 1,) f32
        self.gamma = jnp.asarray(gamma)                         # for reference / fused path
        self._kernel = _make_lookup_kernel(timesteps, gamma)
        self._fn_cache = {}                                     # (rows_pad, tr) -> jitted fn
        # Small-batch fast path: fused XLA gather on the 4 KiB table (no Pallas
        # dispatch); exposed as forward_fused for callers with tiny B.
        self._fused = jax.jit(
            lambda t: jnp.take(
                self.gamma,
                jnp.clip(jnp.round(t * float(timesteps)).astype(jnp.int32), 0, timesteps)))

    # ---- tiling plan -------------------------------------------------------
    def _plan(self, n_elems: int):
        rows = max(1, pl.cdiv(n_elems, 128))
        if rows <= self._TARGET_ROWS:
            tr, n_blocks = _round_up(rows, 8), 1                # single grid step
        else:
            tr = self._TARGET_ROWS
            n_blocks = pl.cdiv(rows, tr)                        # "parallel" blocks
        return tr * n_blocks, tr, n_blocks

    def _get_fn(self, rows_pad: int, tr: int, n_blocks: int):
        key = (rows_pad, tr)
        fn = self._fn_cache.get(key)
        if fn is not None:
            return fn
        pallas_fn = pl.pallas_call(
            self._kernel,
            out_shape=jax.ShapeDtypeStruct((rows_pad, 128), jnp.float32),
            grid=(n_blocks,),
            in_specs=[pl.BlockSpec((tr, 128), lambda i: (i, 0))],
            out_specs=pl.BlockSpec((tr, 128), lambda i: (i, 0)),
            compiler_params=pltpu.CompilerParams(
                dimension_semantics=("parallel",) if n_blocks > 1 else ("arbitrary",)),
        )
        fn = jax.jit(pallas_fn)
        self._fn_cache[key] = fn
        return fn

    # ---- forward -----------------------------------------------------------
    def __call__(self, t_normalized: jax.Array) -> jax.Array:
        # gamma[round(t * timesteps)], shape-preserving (typically (B, 1)).
        orig_shape = t_normalized.shape
        flat = jnp.reshape(jnp.asarray(t_normalized, dtype=jnp.float32), (-1,))
        n = flat.shape[0]
        rows_pad, tr, n_blocks = self._plan(n)
        total = rows_pad * 128
        if total != n:                     # pad only when not already lane-dense
            flat = jnp.pad(flat, (0, total - n))
        out2d = self._get_fn(rows_pad, tr, n_blocks)(flat.reshape(rows_pad, 128))
        out = out2d.reshape(total)
        if total != n:
            out = out[:n]
        return out.reshape(orig_shape)

    def forward_fused(self, t_normalized: jax.Array) -> jax.Array:
        """Tiny-batch fast path: fused XLA gather (no Pallas kernel dispatch)."""
        return self._fused(jnp.asarray(t_normalized, dtype=jnp.float32))


if __name__ == "__main__":
    timesteps = 1000
    sched = PredefinedNoiseSchedulePallas(noise_schedule="cosine", timesteps=timesteps)

    # Deterministic small input: batch of 8 normalized timesteps in [0, 1].
    key = jax.random.PRNGKey(0)
    B = 8
    t_normalized = jax.random.uniform(key, (B, 1), dtype=jnp.float32)

    out = jax.block_until_ready(sched(t_normalized))
    # Second call with the same shape hits the memoized jitted pallas_call.
    out2 = jax.block_until_ready(sched(t_normalized))

    # Pure-JAX reference (same semantics as the PyTorch forward).
    t_int = jnp.clip(jnp.round(t_normalized * timesteps).astype(jnp.int32), 0, timesteps)
    ref = sched.gamma[t_int[:, 0]][:, None]

    assert out.shape == (B, 1) and out.dtype == jnp.float32
    np.testing.assert_allclose(np.asarray(out), np.asarray(ref), rtol=1e-6, atol=1e-6)
    np.testing.assert_allclose(np.asarray(out2), np.asarray(ref), rtol=1e-6, atol=1e-6)

    # Fused small-batch path agrees too.
    fused = jax.block_until_ready(sched.forward_fused(t_normalized))
    np.testing.assert_allclose(np.asarray(fused), np.asarray(ref), rtol=1e-6, atol=1e-6)

    print("KERNEL_OK")
</pallas_src>

<mosaic_0001>
module attributes {stable_mosaic.version = 11 : i64} {
  func.func @kernel(%arg0: i32, %arg1: memref<8x128xf32, #tpu.memory_space<vmem>>, %arg2: memref<8x128xf32, #tpu.memory_space<vmem>>) attributes {dimension_semantics = [#tpu.dimension_semantics<arbitrary>], iteration_bounds = array<i64: 1>, scalar_prefetch = 0 : i64, scratch_operands = 0 : i64, tpu.core_type = #tpu.core_type<tc>, window_params = [{transform_indices = @transform_0, window_bounds = array<i64: 8, 128>}, {transform_indices = @transform_1, window_bounds = array<i64: 8, 128>}]} {
    %c0 = arith.constant 0 : index
    %c0_0 = arith.constant 0 : index
    %0 = vector.load %arg1[%c0, %c0_0] : memref<8x128xf32, #tpu.memory_space<vmem>>, vector<8x128xf32>
    %cst = arith.constant 1.000000e+03 : f32
    %1 = vector.broadcast %cst : f32 to vector<8x128xf32>
    %2 = arith.mulf %0, %1 : vector<8x128xf32>
    %3 = math.roundeven %2 : vector<8x128xf32>
    %4 = arith.fptosi %3 : vector<8x128xf32> to vector<8x128xi32>
    %c0_i32 = arith.constant 0 : i32
    %c1000_i32 = arith.constant 1000 : i32
    %5 = vector.broadcast %c0_i32 : i32 to vector<8x128xi32>
    %6 = arith.maxsi %5, %4 : vector<8x128xi32>
    %7 = vector.broadcast %c1000_i32 : i32 to vector<8x128xi32>
    %8 = arith.minsi %7, %6 : vector<8x128xi32>
    %c1_i32 = arith.constant 1 : i32
    %9 = vector.broadcast %c1_i32 : i32 to vector<8x128xi32>
    %10 = arith.andi %8, %9 : vector<8x128xi32>
    %c0_i32_1 = arith.constant 0 : i32
    %11 = vector.broadcast %c0_i32_1 : i32 to vector<8x128xi32>
    %12 = arith.cmpi ne, %10, %11 : vector<8x128xi32>
    %cst_2 = arith.constant -9.3457632 : f32
    %cst_3 = arith.constant -10.0960474 : f32
    %13 = vector.broadcast %cst_2 : f32 to vector<8x128xf32>
    %14 = vector.broadcast %cst_3 : f32 to vector<8x128xf32>
    %15 = arith.select %12, %13, %14 : vector<8x128xi1>, vector<8x128xf32>
    %cst_4 = arith.constant -8.54727268 : f32
    %cst_5 = arith.constant -8.88624382 : f32
    %16 = vector.broadcast %cst_4 : f32 to vector<8x128xf32>
    %17 = vector.broadcast %cst_5 : f32 to vector<8x128xf32>
    %18 = arith.select %12, %16, %17 : vector<8x128xi1>, vector<8x128xf32>
    %cst_6 = arith.constant -8.0464859 : f32
    %cst_7 = arith.constant -8.27533721 : f32
    %19 = vector.broadcast %cst_6 : f32 to vector<8x128xf32>
    %20 = vector.broadcast %cst_7 : f32 to vector<8x128xf32>
    %21 = arith.select %12, %19, %20 : vector<8x128xi1>, vector<8x128xf32>
    %cst_8 = arith.constant -7.67175627 : f32
    %cst_9 = arith.constant -7.84786844 : f32
    %22 = vector.broadcast %cst_8 : f32 to vector<8x128xf32>
    %23 = vector.broadcast %cst_9 : f32 to vector<8x128xf32>
    %24 = arith.select %12, %22, %23 : vector<8x128xi1>, vector<8x128xf32>
    %cst_10 = arith.constant -7.3685112 : f32
    %cst_11 = arith.constant -7.51312446 : f32
    %25 = vector.broadcast %cst_10 : f32 to vector<8x128xf32>
    %26 = vector.broadcast %cst_11 : f32 to vector<8x128xf32>
    %27 = arith.select %12, %25, %26 : vector<8x128xi1>, vector<8x128xf32>
    %cst_12 = arith.constant -7.11200285 : f32
    %cst_13 = arith.constant -7.23542404 : f32
    %28 = vector.broadcast %cst_12 : f32 to vector<8x128xf32>
    %29 = vector.broadcast %cst_13 : f32 to vector<8x128xf32>
    %30 = arith.select %12, %28, %29 : vector<8x128xi1>, vector<8x128xf32>
    %cst_14 = arith.constant -6.88876152 : f32
    %cst_15 = arith.constant -6.99682236 : f32
    %31 = vector.broadcast %cst_14 : f32 to vector<8x128xf32>
    %32 = vector.broadcast %cst_15 : f32 to vector<8x128xf32>
    %33 = arith.select %12, %31, %32 : vector<8x128xi1>, vector<8x128xf32>
    %cst_16 = arith.constant -6.69057608 : f32
    %cst_17 = arith.constant -6.7869234 : f32
    %34 = vector.broadcast %cst_16 : f32 to vector<8x128xf32>
    %35 = vector.broadcast %cst_17 : f32 to vector<8x128xf32>
    %36 = arith.select %12, %34, %35 : vector<8x128xi1>, vector<8x128xf32>
    %cst_18 = arith.constant -6.51203632 : f32
    %cst_19 = arith.constant -6.59911585 : f32
    %37 = vector.broadcast %cst_18 : f32 to vector<8x128xf32>
    %38 = vector.broadcast %cst_19 : f32 to vector<8x128xf32>
    %39 = arith.select %12, %37, %38 : vector<8x128xi1>, vector<8x128xf32>
    %cst_20 = arith.constant -6.34936857 : f32
    %cst_21 = arith.constant -6.4289093 : f32
    %40 = vector.broadcast %cst_20 : f32 to vector<8x128xf32>
    %41 = vector.broadcast %cst_21 : f32 to vector<8x128xf32>
    %42 = arith.select %12, %40, %41 : vector<8x128xi1>, vector<8x128xf32>
    %cst_22 = arith.constant -6.19982719 : f32
    %cst_23 = arith.constant -6.27309942 : f32
    %43 = vector.broadcast %cst_22 : f32 to vector<8x128xf32>
    %44 = vector.broadcast %cst_23 : f32 to vector<8x128xf32>
    %45 = arith.select %12, %43, %44 : vector<8x128xi1>, vector<8x128xf32>
    %cst_24 = arith.constant -6.06134272 : f32
    %cst_25 = arith.constant -6.12931204 : f32
    %46 = vector.broadcast %cst_24 : f32 to vector<8x128xf32>
    %47 = vector.broadcast %cst_25 : f32 to vector<8x128xf32>
    %48 = arith.select %12, %46, %47 : vector<8x128xi1>, vector<8x128xf32>
    %cst_26 = arith.constant -5.93231535 : f32
    %cst_27 = arith.constant -5.99573278 : f32
    %49 = vector.broadcast %cst_26 : f32 to vector<8x128xf32>
    %50 = vector.broadcast %cst_27 : f32 to vector<8x128xf32>
    %51 = arith.select %12, %49, %50 : vector<8x128xi1>, vector<8x128xf32>
    %cst_28 = arith.constant -5.81147814 : f32
    %cst_29 = arith.constant -5.87094164 : f32
    %52 = vector.broadcast %cst_28 : f32 to vector<8x128xf32>
    %53 = vector.broadcast %cst_29 : f32 to vector<8x128xf32>
    %54 = arith.select %12, %52, %53 : vector<8x128xi1>, vector<8x128xf32>
    %cst_30 = arith.constant -5.6978097 : f32
    %cst_31 = arith.constant -5.75380373 : f32
    %55 = vector.broadcast %cst_30 : f32 to vector<8x128xf32>
    %56 = vector.broadcast %cst_31 : f32 to vector<8x128xf32>
    %57 = arith.select %12, %55, %56 : vector<8x128xi1>, vector<8x128xf32>
    %cst_32 = arith.constant -5.59047365 : f32
    %cst_33 = arith.constant -5.64339638 : f32
    %58 = vector.broadcast %cst_32 : f32 to vector<8x128xf32>
    %59 = vector.broadcast %cst_33 : f32 to vector<8x128xf32>
    %60 = arith.select %12, %58, %59 : vector<8x128xi1>, vector<8x128xf32>
    %cst_34 = arith.constant -5.48877478 : f32
    %cst_35 = arith.constant -5.53895855 : f32
    %61 = vector.broadcast %cst_34 : f32 to vector<8x128xf32>
    %62 = vector.broadcast %cst_35 : f32 to vector<8x128xf32>
    %63 = arith.select %12, %61, %62 : vector<8x128xi1>, vector<8x128xf32>
    %cst_36 = arith.constant -5.39212942 : f32
    %cst_37 = arith.constant -5.43985319 : f32
    %64 = vector.broadcast %cst_36 : f32 to vector<8x128xf32>
    %65 = vector.broadcast %cst_37 : f32 to vector<8x128xf32>
    %66 = arith.select %12, %64, %65 : vector<8x128xi1>, vector<8x128xf32>
    %cst_38 = arith.constant -5.30004168 : f32
    %cst_39 = arith.constant -5.34554386 : f32
    %67 = vector.broadcast %cst_38 : f32 to vector<8x128xf32>
    %68 = vector.broadcast %cst_39 : f32 to vector<8x128xf32>
    %69 = arith.select %12, %67, %68 : vector<8x128xi1>, vector<8x128xf32>
    %cst_40 = arith.constant -5.21208668 : f32
    %cst_41 = arith.constant -5.25557184 : f32
    %70 = vector.broadcast %cst_40 : f32 to vector<8x128xf32>
    %71 = vector.broadcast %cst_41 : f32 to vector<8x128xf32>
    %72 = arith.select %12, %70, %71 : vector<8x128xi1>, vector<8x128xf32>
    %cst_42 = arith.constant -5.12789774 : f32
    %cst_43 = arith.constant -5.16954231 : f32
    %73 = vector.broadcast %cst_42 : f32 to vector<8x128xf32>
    %74 = vector.broadcast %cst_43 : f32 to vector<8x128xf32>
    %75 = arith.select %12, %73, %74 : vector<8x128xi1>, vector<8x128xf32>
    %cst_44 = arith.constant -5.04715443 : f32
    %cst_45 = arith.constant -5.08711386 : f32
    %76 = vector.broadcast %cst_44 : f32 to vector<8x128xf32>
    %77 = vector.broadcast %cst_45 : f32 to vector<8x128xf32>
    %78 = arith.select %12, %76, %77 : vector<8x128xi1>, vector<8x128xf32>
    %cst_46 = arith.constant -4.96957779 : f32
    %cst_47 = arith.constant -5.00798655 : f32
    %79 = vector.broadcast %cst_46 : f32 to vector<8x128xf32>
    %80 = vector.broadcast %cst_47 : f32 to vector<8x128xf32>
    %81 = arith.select %12, %79, %80 : vector<8x128xi1>, vector<8x128xf32>
    %cst_48 = arith.constant -4.89492083 : f32
    %cst_49 = arith.constant -4.93189859 : f32
    %82 = vector.broadcast %cst_48 : f32 to vector<8x128xf32>
    %83 = vector.broadcast %cst_49 : f32 to vector<8x128xf32>
    %84 = arith.select %12, %82, %83 : vector<8x128xi1>, vector<8x128xf32>
    %cst_50 = arith.constant -4.82296515 : f32
    %cst_51 = arith.constant -4.85861826 : f32
    %85 = vector.broadcast %cst_50 : f32 to vector<8x128xf32>
    %86 = vector.broadcast %cst_51 : f32 to vector<8x128xf32>
    %87 = arith.select %12, %85, %86 : vector<8x128xi1>, vector<8x128xf32>
    %cst_52 = arith.constant -4.75351572 : f32
    %cst_53 = arith.constant -4.78793859 : f32
    %88 = vector.broadcast %cst_52 : f32 to vector<8x128xf32>
    %89 = vector.broadcast %cst_53 : f32 to vector<8x128xf32>
    %90 = arith.select %12, %88, %89 : vector<8x128xi1>, vector<8x128xf32>
    %cst_54 = arith.constant -4.68639851 : f32
    %cst_55 = arith.constant -4.71967602 : f32
    %91 = vector.broadcast %cst_54 : f32 to vector<8x128xf32>
    %92 = vector.broadcast %cst_55 : f32 to vector<8x128xf32>
    %93 = arith.select %12, %91, %92 : vector<8x128xi1>, vector<8x128xf32>
    %cst_56 = arith.constant -4.62145758 : f32
    %cst_57 = arith.constant -4.65366507 : f32
    %94 = vector.broadcast %cst_56 : f32 to vector<8x128xf32>
    %95 = vector.broadcast %cst_57 : f32 to vector<8x128xf32>
    %96 = arith.select %12, %94, %95 : vector<8x128xi1>, vector<8x128xf32>
    %cst_58 = arith.constant -4.55855083 : f32
    %cst_59 = arith.constant -4.5897584 : f32
    %97 = vector.broadcast %cst_58 : f32 to vector<8x128xf32>
    %98 = vector.broadcast %cst_59 : f32 to vector<8x128xf32>
    %99 = arith.select %12, %97, %98 : vector<8x128xi1>, vector<8x128xf32>
    %cst_60 = arith.constant -4.49755144 : f32
    %cst_61 = arith.constant -4.52782059 : f32
    %100 = vector.broadcast %cst_60 : f32 to vector<8x128xf32>
    %101 = vector.broadcast %cst_61 : f32 to vector<8x128xf32>
    %102 = arith.select %12, %100, %101 : vector<8x128xi1>, vector<8x128xf32>
    %cst_62 = arith.constant -4.43834352 : f32
    %cst_63 = arith.constant -4.46773052 : f32
    %103 = vector.broadcast %cst_62 : f32 to vector<8x128xf32>
    %104 = vector.broadcast %cst_63 : f32 to vector<8x128xf32>
    %105 = arith.select %12, %103, %104 : vector<8x128xi1>, vector<8x128xf32>
    %cst_64 = arith.constant -4.38082027 : f32
    %cst_65 = arith.constant -4.40937757 : f32
    %106 = vector.broadcast %cst_64 : f32 to vector<8x128xf32>
    %107 = vector.broadcast %cst_65 : f32 to vector<8x128xf32>
    %108 = arith.select %12, %106, %107 : vector<8x128xi1>, vector<8x128xf32>
    %cst_66 = arith.constant -4.32488632 : f32
    %cst_67 = arith.constant -4.35266066 : f32
    %109 = vector.broadcast %cst_66 : f32 to vector<8x128xf32>
    %110 = vector.broadcast %cst_67 : f32 to vector<8x128xf32>
    %111 = arith.select %12, %109, %110 : vector<8x128xi1>, vector<8x128xf32>
    %cst_68 = arith.constant -4.2704525 : f32
    %cst_69 = arith.constant -4.29748726 : f32
    %112 = vector.broadcast %cst_68 : f32 to vector<8x128xf32>
    %113 = vector.broadcast %cst_69 : f32 to vector<8x128xf32>
    %114 = arith.select %12, %112, %113 : vector<8x128xi1>, vector<8x128xf32>
    %cst_70 = arith.constant -4.21743822 : f32
    %cst_71 = arith.constant -4.24377298 : f32
    %115 = vector.broadcast %cst_70 : f32 to vector<8x128xf32>
    %116 = vector.broadcast %cst_71 : f32 to vector<8x128xf32>
    %117 = arith.select %12, %115, %116 : vector<8x128xi1>, vector<8x128xf32>
    %cst_72 = arith.constant -4.16576767 : f32
    %cst_73 = arith.constant -4.19143915 : f32
    %118 = vector.broadcast %cst_72 : f32 to vector<8x128xf32>
    %119 = vector.broadcast %cst_73 : f32 to vector<8x128xf32>
    %120 = arith.select %12, %118, %119 : vector<8x128xi1>, vector<8x128xf32>
    %cst_74 = arith.constant -4.11537218 : f32
    %cst_75 = arith.constant -4.14041471 : f32
    %121 = vector.broadcast %cst_74 : f32 to vector<8x128xf32>
    %122 = vector.broadcast %cst_75 : f32 to vector<8x128xf32>
    %123 = arith.select %12, %121, %122 : vector<8x128xi1>, vector<8x128xf32>
    %cst_76 = arith.constant -4.06618834 : f32
    %cst_77 = arith.constant -4.09063292 : f32
    %124 = vector.broadcast %cst_76 : f32 to vector<8x128xf32>
    %125 = vector.broadcast %cst_77 : f32 to vector<8x128xf32>
    %126 = arith.select %12, %124, %125 : vector<8x128xi1>, vector<8x128xf32>
    %cst_78 = arith.constant -4.01815653 : f32
    %cst_79 = arith.constant -4.04203176 : f32
    %127 = vector.broadcast %cst_78 : f32 to vector<8x128xf32>
    %128 = vector.broadcast %cst_79 : f32 to vector<8x128xf32>
    %129 = arith.select %12, %127, %128 : vector<8x128xi1>, vector<8x128xf32>
    %cst_80 = arith.constant -3.97122169 : f32
    %cst_81 = arith.constant -3.99455523 : f32
    %130 = vector.broadcast %cst_80 : f32 to vector<8x128xf32>
    %131 = vector.broadcast %cst_81 : f32 to vector<8x128xf32>
    %132 = arith.select %12, %130, %131 : vector<8x128xi1>, vector<8x128xf32>
    %cst_82 = arith.constant -3.92533278 : f32
    %cst_83 = arith.constant -3.94814944 : f32
    %133 = vector.broadcast %cst_82 : f32 to vector<8x128xf32>
    %134 = vector.broadcast %cst_83 : f32 to vector<8x128xf32>
    %135 = arith.select %12, %133, %134 : vector<8x128xi1>, vector<8x128xf32>
    %cst_84 = arith.constant -3.88044214 : f32
    %cst_85 = arith.constant -3.90276551 : f32
    %136 = vector.broadcast %cst_84 : f32 to vector<8x128xf32>
    %137 = vector.broadcast %cst_85 : f32 to vector<8x128xf32>
    %138 = arith.select %12, %136, %137 : vector<8x128xi1>, vector<8x128xf32>
    %cst_86 = arith.constant -3.83650517 : f32
    %cst_87 = arith.constant -3.85835695 : f32
    %139 = vector.broadcast %cst_86 : f32 to vector<8x128xf32>
    %140 = vector.broadcast %cst_87 : f32 to vector<8x128xf32>
    %141 = arith.select %12, %139, %140 : vector<8x128xi1>, vector<8x128xf32>
    %cst_88 = arith.constant -3.79348016 : f32
    %cst_89 = arith.constant -3.81488109 : f32
    %142 = vector.broadcast %cst_88 : f32 to vector<8x128xf32>
    %143 = vector.broadcast %cst_89 : f32 to vector<8x128xf32>
    %144 = arith.select %12, %142, %143 : vector<8x128xi1>, vector<8x128xf32>
    %cst_90 = arith.constant -3.75132823 : f32
    %cst_91 = arith.constant -3.77229738 : f32
    %145 = vector.broadcast %cst_90 : f32 to vector<8x128xf32>
    %146 = vector.broadcast %cst_91 : f32 to vector<8x128xf32>
    %147 = arith.select %12, %145, %146 : vector<8x128xi1>, vector<8x128xf32>
    %cst_92 = arith.constant -3.71001315 : f32
    %cst_93 = arith.constant -3.73056841 : f32
    %148 = vector.broadcast %cst_92 : f32 to vector<8x128xf32>
    %149 = vector.broadcast %cst_93 : f32 to vector<8x128xf32>
    %150 = arith.select %12, %148, %149 : vector<8x128xi1>, vector<8x128xf32>
    %cst_94 = arith.constant -3.669500e+00 : f32
    %cst_95 = arith.constant -3.6896584 : f32
    %151 = vector.broadcast %cst_94 : f32 to vector<8x128xf32>
    %152 = vector.broadcast %cst_95 : f32 to vector<8x128xf32>
    %153 = arith.select %12, %151, %152 : vector<8x128xi1>, vector<8x128xf32>
    %cst_96 = arith.constant -3.62975693 : f32
    %cst_97 = arith.constant -3.64953423 : f32
    %154 = vector.broadcast %cst_96 : f32 to vector<8x128xf32>
    %155 = vector.broadcast %cst_97 : f32 to vector<8x128xf32>
    %156 = arith.select %12, %154, %155 : vector<8x128xi1>, vector<8x128xf32>
    %cst_98 = arith.constant -3.59075332 : f32
    %cst_99 = arith.constant -3.6101644 : f32
    %157 = vector.broadcast %cst_98 : f32 to vector<8x128xf32>
    %158 = vector.broadcast %cst_99 : f32 to vector<8x128xf32>
    %159 = arith.select %12, %157, %158 : vector<8x128xi1>, vector<8x128xf32>
    %cst_100 = arith.constant -3.55246067 : f32
    %cst_101 = arith.constant -3.57151985 : f32
    %160 = vector.broadcast %cst_100 : f32 to vector<8x128xf32>
    %161 = vector.broadcast %cst_101 : f32 to vector<8x128xf32>
    %162 = arith.select %12, %160, %161 : vector<8x128xi1>, vector<8x128xf32>
    %cst_102 = arith.constant -3.51485181 : f32
    %cst_103 = arith.constant -3.53357244 : f32
    %163 = vector.broadcast %cst_102 : f32 to vector<8x128xf32>
    %164 = vector.broadcast %cst_103 : f32 to vector<8x128xf32>
    %165 = arith.select %12, %163, %164 : vector<8x128xi1>, vector<8x128xf32>
    %cst_104 = arith.constant -3.47790146 : f32
    %cst_105 = arith.constant -3.49629593 : f32
    %166 = vector.broadcast %cst_104 : f32 to vector<8x128xf32>
    %167 = vector.broadcast %cst_105 : f32 to vector<8x128xf32>
    %168 = arith.select %12, %166, %167 : vector<8x128xi1>, vector<8x128xf32>
    %cst_106 = arith.constant -3.44158506 : f32
    %cst_107 = arith.constant -3.45966554 : f32
    %169 = vector.broadcast %cst_106 : f32 to vector<8x128xf32>
    %170 = vector.broadcast %cst_107 : f32 to vector<8x128xf32>
    %171 = arith.select %12, %169, %170 : vector<8x128xi1>, vector<8x128xf32>
    %cst_108 = arith.constant -3.405880e+00 : f32
    %cst_109 = arith.constant -3.42365742 : f32
    %172 = vector.broadcast %cst_108 : f32 to vector<8x128xf32>
    %173 = vector.broadcast %cst_109 : f32 to vector<8x128xf32>
    %174 = arith.select %12, %172, %173 : vector<8x128xi1>, vector<8x128xf32>
    %cst_110 = arith.constant -3.37076449 : f32
    %cst_111 = arith.constant -3.38824987 : f32
    %175 = vector.broadcast %cst_110 : f32 to vector<8x128xf32>
    %176 = vector.broadcast %cst_111 : f32 to vector<8x128xf32>
    %177 = arith.select %12, %175, %176 : vector<8x128xi1>, vector<8x128xf32>
    %cst_112 = arith.constant -3.33621812 : f32
    %cst_113 = arith.constant -3.35342145 : f32
    %178 = vector.broadcast %cst_112 : f32 to vector<8x128xf32>
    %179 = vector.broadcast %cst_113 : f32 to vector<8x128xf32>
    %180 = arith.select %12, %178, %179 : vector<8x128xi1>, vector<8x128xf32>
    %cst_114 = arith.constant -3.30222106 : f32
    %cst_115 = arith.constant -3.31915212 : f32
    %181 = vector.broadcast %cst_114 : f32 to vector<8x128xf32>
    %182 = vector.broadcast %cst_115 : f32 to vector<8x128xf32>
    %183 = arith.select %12, %181, %182 : vector<8x128xi1>, vector<8x128xf32>
    %cst_116 = arith.constant -3.26875496 : f32
    %cst_117 = arith.constant -3.2854228 : f32
    %184 = vector.broadcast %cst_116 : f32 to vector<8x128xf32>
    %185 = vector.broadcast %cst_117 : f32 to vector<8x128xf32>
    %186 = arith.select %12, %184, %185 : vector<8x128xi1>, vector<8x128xf32>
    %cst_118 = arith.constant -3.23580194 : f32
    %cst_119 = arith.constant -3.25221539 : f32
    %187 = vector.broadcast %cst_118 : f32 to vector<8x128xf32>
    %188 = vector.broadcast %cst_119 : f32 to vector<8x128xf32>
    %189 = arith.select %12, %187, %188 : vector<8x128xi1>, vector<8x128xf32>
    %cst_120 = arith.constant -3.20334554 : f32
    %cst_121 = arith.constant -3.2195127 : f32
    %190 = vector.broadcast %cst_120 : f32 to vector<8x128xf32>
    %191 = vector.broadcast %cst_121 : f32 to vector<8x128xf32>
    %192 = arith.select %12, %190, %191 : vector<8x128xi1>, vector<8x128xf32>
    %cst_122 = arith.constant -3.17136931 : f32
    %cst_123 = arith.constant -3.1872983 : f32
    %193 = vector.broadcast %cst_122 : f32 to vector<8x128xf32>
    %194 = vector.broadcast %cst_123 : f32 to vector<8x128xf32>
    %195 = arith.select %12, %193, %194 : vector<8x128xi1>, vector<8x128xf32>
    %cst_124 = arith.constant -3.13985848 : f32
    %cst_125 = arith.constant -3.15555668 : f32
    %196 = vector.broadcast %cst_124 : f32 to vector<8x128xf32>
    %197 = vector.broadcast %cst_125 : f32 to vector<8x128xf32>
    %198 = arith.select %12, %196, %197 : vector<8x128xi1>, vector<8x128xf32>
    %cst_126 = arith.constant -3.10879803 : f32
    %cst_127 = arith.constant -3.12427282 : f32
    %199 = vector.broadcast %cst_126 : f32 to vector<8x128xf32>
    %200 = vector.broadcast %cst_127 : f32 to vector<8x128xf32>
    %201 = arith.select %12, %199, %200 : vector<8x128xi1>, vector<8x128xf32>
    %cst_128 = arith.constant -3.07817411 : f32
    %cst_129 = arith.constant -3.09343219 : f32
    %202 = vector.broadcast %cst_128 : f32 to vector<8x128xf32>
    %203 = vector.broadcast %cst_129 : f32 to vector<8x128xf32>
    %204 = arith.select %12, %202, %203 : vector<8x128xi1>, vector<8x128xf32>
    %cst_130 = arith.constant -3.04797339 : f32
    %cst_131 = arith.constant -3.06302166 : f32
    %205 = vector.broadcast %cst_130 : f32 to vector<8x128xf32>
    %206 = vector.broadcast %cst_131 : f32 to vector<8x128xf32>
    %207 = arith.select %12, %205, %206 : vector<8x128xi1>, vector<8x128xf32>
    %cst_132 = arith.constant -3.01818347 : f32
    %cst_133 = arith.constant -3.03302789 : f32
    %208 = vector.broadcast %cst_132 : f32 to vector<8x128xf32>
    %209 = vector.broadcast %cst_133 : f32 to vector<8x128xf32>
    %210 = arith.select %12, %208, %209 : vector<8x128xi1>, vector<8x128xf32>
    %cst_134 = arith.constant -2.9887917 : f32
    %cst_135 = arith.constant -3.00343847 : f32
    %211 = vector.broadcast %cst_134 : f32 to vector<8x128xf32>
    %212 = vector.broadcast %cst_135 : f32 to vector<8x128xf32>
    %213 = arith.select %12, %211, %212 : vector<8x128xi1>, vector<8x128xf32>
    %cst_136 = arith.constant -2.95978689 : f32
    %cst_137 = arith.constant -2.97424173 : f32
    %214 = vector.broadcast %cst_136 : f32 to vector<8x128xf32>
    %215 = vector.broadcast %cst_137 : f32 to vector<8x128xf32>
    %216 = arith.select %12, %214, %215 : vector<8x128xi1>, vector<8x128xf32>
    %cst_138 = arith.constant -2.93115735 : f32
    %cst_139 = arith.constant -2.94542575 : f32
    %217 = vector.broadcast %cst_138 : f32 to vector<8x128xf32>
    %218 = vector.broadcast %cst_139 : f32 to vector<8x128xf32>
    %219 = arith.select %12, %217, %218 : vector<8x128xi1>, vector<8x128xf32>
    %cst_140 = arith.constant -2.90289283 : f32
    %cst_141 = arith.constant -2.916980e+00 : f32
    %220 = vector.broadcast %cst_140 : f32 to vector<8x128xf32>
    %221 = vector.broadcast %cst_141 : f32 to vector<8x128xf32>
    %222 = arith.select %12, %220, %221 : vector<8x128xi1>, vector<8x128xf32>
    %cst_142 = arith.constant -2.8749826 : f32
    %cst_143 = arith.constant -2.88889408 : f32
    %223 = vector.broadcast %cst_142 : f32 to vector<8x128xf32>
    %224 = vector.broadcast %cst_143 : f32 to vector<8x128xf32>
    %225 = arith.select %12, %223, %224 : vector<8x128xi1>, vector<8x128xf32>
    %cst_144 = arith.constant -2.84741712 : f32
    %cst_145 = arith.constant -2.86115742 : f32
    %226 = vector.broadcast %cst_144 : f32 to vector<8x128xf32>
    %227 = vector.broadcast %cst_145 : f32 to vector<8x128xf32>
    %228 = arith.select %12, %226, %227 : vector<8x128xi1>, vector<8x128xf32>
    %cst_146 = arith.constant -2.82018685 : f32
    %cst_147 = arith.constant -2.83376074 : f32
    %229 = vector.broadcast %cst_146 : f32 to vector<8x128xf32>
    %230 = vector.broadcast %cst_147 : f32 to vector<8x128xf32>
    %231 = arith.select %12, %229, %230 : vector<8x128xi1>, vector<8x128xf32>
    %cst_148 = arith.constant -2.79328275 : f32
    %cst_149 = arith.constant -2.80669451 : f32
    %232 = vector.broadcast %cst_148 : f32 to vector<8x128xf32>
    %233 = vector.broadcast %cst_149 : f32 to vector<8x128xf32>
    %234 = arith.select %12, %232, %233 : vector<8x128xi1>, vector<8x128xf32>
    %cst_150 = arith.constant -2.76669574 : f32
    %cst_151 = arith.constant -2.77995014 : f32
    %235 = vector.broadcast %cst_150 : f32 to vector<8x128xf32>
    %236 = vector.broadcast %cst_151 : f32 to vector<8x128xf32>
    %237 = arith.select %12, %235, %236 : vector<8x128xi1>, vector<8x128xf32>
    %cst_152 = arith.constant -2.74041772 : f32
    %cst_153 = arith.constant -2.75351858 : f32
    %238 = vector.broadcast %cst_152 : f32 to vector<8x128xf32>
    %239 = vector.broadcast %cst_153 : f32 to vector<8x128xf32>
    %240 = arith.select %12, %238, %239 : vector<8x128xi1>, vector<8x128xf32>
    %cst_154 = arith.constant -2.71444035 : f32
    %cst_155 = arith.constant -2.72739196 : f32
    %241 = vector.broadcast %cst_154 : f32 to vector<8x128xf32>
    %242 = vector.broadcast %cst_155 : f32 to vector<8x128xf32>
    %243 = arith.select %12, %241, %242 : vector<8x128xi1>, vector<8x128xf32>
    %cst_156 = arith.constant -2.68875599 : f32
    %cst_157 = arith.constant -2.70156217 : f32
    %244 = vector.broadcast %cst_156 : f32 to vector<8x128xf32>
    %245 = vector.broadcast %cst_157 : f32 to vector<8x128xf32>
    %246 = arith.select %12, %244, %245 : vector<8x128xi1>, vector<8x128xf32>
    %cst_158 = arith.constant -2.66335702 : f32
    %cst_159 = arith.constant -2.67602134 : f32
    %247 = vector.broadcast %cst_158 : f32 to vector<8x128xf32>
    %248 = vector.broadcast %cst_159 : f32 to vector<8x128xf32>
    %249 = arith.select %12, %247, %248 : vector<8x128xi1>, vector<8x128xf32>
    %cst_160 = arith.constant -2.63823628 : f32
    %cst_161 = arith.constant -2.65076232 : f32
    %250 = vector.broadcast %cst_160 : f32 to vector<8x128xf32>
    %251 = vector.broadcast %cst_161 : f32 to vector<8x128xf32>
    %252 = arith.select %12, %250, %251 : vector<8x128xi1>, vector<8x128xf32>
    %cst_162 = arith.constant -2.61338663 : f32
    %cst_163 = arith.constant -2.62577796 : f32
    %253 = vector.broadcast %cst_162 : f32 to vector<8x128xf32>
    %254 = vector.broadcast %cst_163 : f32 to vector<8x128xf32>
    %255 = arith.select %12, %253, %254 : vector<8x128xi1>, vector<8x128xf32>
    %cst_164 = arith.constant -2.58880138 : f32
    %cst_165 = arith.constant -2.60106134 : f32
    %256 = vector.broadcast %cst_164 : f32 to vector<8x128xf32>
    %257 = vector.broadcast %cst_165 : f32 to vector<8x128xf32>
    %258 = arith.select %12, %256, %257 : vector<8x128xi1>, vector<8x128xf32>
    %cst_166 = arith.constant -2.56447411 : f32
    %cst_167 = arith.constant -2.57660604 : f32
    %259 = vector.broadcast %cst_166 : f32 to vector<8x128xf32>
    %260 = vector.broadcast %cst_167 : f32 to vector<8x128xf32>
    %261 = arith.select %12, %259, %260 : vector<8x128xi1>, vector<8x128xf32>
    %cst_168 = arith.constant -2.54039836 : f32
    %cst_169 = arith.constant -2.55240512 : f32
    %262 = vector.broadcast %cst_168 : f32 to vector<8x128xf32>
    %263 = vector.broadcast %cst_169 : f32 to vector<8x128xf32>
    %264 = arith.select %12, %262, %263 : vector<8x128xi1>, vector<8x128xf32>
    %cst_170 = arith.constant -2.51656795 : f32
    %cst_171 = arith.constant -2.52845287 : f32
    %265 = vector.broadcast %cst_170 : f32 to vector<8x128xf32>
    %266 = vector.broadcast %cst_171 : f32 to vector<8x128xf32>
    %267 = arith.select %12, %265, %266 : vector<8x128xi1>, vector<8x128xf32>
    %cst_172 = arith.constant -2.49297738 : f32
    %cst_173 = arith.constant -2.5047431 : f32
    %268 = vector.broadcast %cst_172 : f32 to vector<8x128xf32>
    %269 = vector.broadcast %cst_173 : f32 to vector<8x128xf32>
    %270 = arith.select %12, %268, %269 : vector<8x128xi1>, vector<8x128xf32>
    %cst_174 = arith.constant -2.4696207 : f32
    %cst_175 = arith.constant -2.481270e+00 : f32
    %271 = vector.broadcast %cst_174 : f32 to vector<8x128xf32>
    %272 = vector.broadcast %cst_175 : f32 to vector<8x128xf32>
    %273 = arith.select %12, %271, %272 : vector<8x128xi1>, vector<8x128xf32>
    %cst_176 = arith.constant -2.44649243 : f32
    %cst_177 = arith.constant -2.45802832 : f32
    %274 = vector.broadcast %cst_176 : f32 to vector<8x128xf32>
    %275 = vector.broadcast %cst_177 : f32 to vector<8x128xf32>
    %276 = arith.select %12, %274, %275 : vector<8x128xi1>, vector<8x128xf32>
    %cst_178 = arith.constant -2.42358732 : f32
    %cst_179 = arith.constant -2.43501234 : f32
    %277 = vector.broadcast %cst_178 : f32 to vector<8x128xf32>
    %278 = vector.broadcast %cst_179 : f32 to vector<8x128xf32>
    %279 = arith.select %12, %277, %278 : vector<8x128xi1>, vector<8x128xf32>
    %cst_180 = arith.constant -2.40090036 : f32
    %cst_181 = arith.constant -2.4122169 : f32
    %280 = vector.broadcast %cst_180 : f32 to vector<8x128xf32>
    %281 = vector.broadcast %cst_181 : f32 to vector<8x128xf32>
    %282 = arith.select %12, %280, %281 : vector<8x128xi1>, vector<8x128xf32>
    %cst_182 = arith.constant -2.37842631 : f32
    %cst_183 = arith.constant -2.38963699 : f32
    %283 = vector.broadcast %cst_182 : f32 to vector<8x128xf32>
    %284 = vector.broadcast %cst_183 : f32 to vector<8x128xf32>
    %285 = arith.select %12, %283, %284 : vector<8x128xi1>, vector<8x128xf32>
    %cst_184 = arith.constant -2.35616016 : f32
    %cst_185 = arith.constant -2.36726761 : f32
    %286 = vector.broadcast %cst_184 : f32 to vector<8x128xf32>
    %287 = vector.broadcast %cst_185 : f32 to vector<8x128xf32>
    %288 = arith.select %12, %286, %287 : vector<8x128xi1>, vector<8x128xf32>
    %cst_186 = arith.constant -2.33409786 : f32
    %cst_187 = arith.constant -2.34510398 : f32
    %289 = vector.broadcast %cst_186 : f32 to vector<8x128xf32>
    %290 = vector.broadcast %cst_187 : f32 to vector<8x128xf32>
    %291 = arith.select %12, %289, %290 : vector<8x128xi1>, vector<8x128xf32>
    %cst_188 = arith.constant -2.3122344 : f32
    %cst_189 = arith.constant -2.32314157 : f32
    %292 = vector.broadcast %cst_188 : f32 to vector<8x128xf32>
    %293 = vector.broadcast %cst_189 : f32 to vector<8x128xf32>
    %294 = arith.select %12, %292, %293 : vector<8x128xi1>, vector<8x128xf32>
    %cst_190 = arith.constant -2.29056549 : f32
    %cst_191 = arith.constant -2.30137587 : f32
    %295 = vector.broadcast %cst_190 : f32 to vector<8x128xf32>
    %296 = vector.broadcast %cst_191 : f32 to vector<8x128xf32>
    %297 = arith.select %12, %295, %296 : vector<8x128xi1>, vector<8x128xf32>
    %cst_192 = arith.constant -2.26908684 : f32
    %cst_193 = arith.constant -2.27980256 : f32
    %298 = vector.broadcast %cst_192 : f32 to vector<8x128xf32>
    %299 = vector.broadcast %cst_193 : f32 to vector<8x128xf32>
    %300 = arith.select %12, %298, %299 : vector<8x128xi1>, vector<8x128xf32>
    %cst_194 = arith.constant -2.24779439 : f32
    %cst_195 = arith.constant -2.25841761 : f32
    %301 = vector.broadcast %cst_194 : f32 to vector<8x128xf32>
    %302 = vector.broadcast %cst_195 : f32 to vector<8x128xf32>
    %303 = arith.select %12, %301, %302 : vector<8x128xi1>, vector<8x128xf32>
    %cst_196 = arith.constant -2.22668409 : f32
    %cst_197 = arith.constant -2.23721671 : f32
    %304 = vector.broadcast %cst_196 : f32 to vector<8x128xf32>
    %305 = vector.broadcast %cst_197 : f32 to vector<8x128xf32>
    %306 = arith.select %12, %304, %305 : vector<8x128xi1>, vector<8x128xf32>
    %cst_198 = arith.constant -2.2057519 : f32
    %cst_199 = arith.constant -2.21619582 : f32
    %307 = vector.broadcast %cst_198 : f32 to vector<8x128xf32>
    %308 = vector.broadcast %cst_199 : f32 to vector<8x128xf32>
    %309 = arith.select %12, %307, %308 : vector<8x128xi1>, vector<8x128xf32>
    %cst_200 = arith.constant -2.18499422 : f32
    %cst_201 = arith.constant -2.19535136 : f32
    %310 = vector.broadcast %cst_200 : f32 to vector<8x128xf32>
    %311 = vector.broadcast %cst_201 : f32 to vector<8x128xf32>
    %312 = arith.select %12, %310, %311 : vector<8x128xi1>, vector<8x128xf32>
    %cst_202 = arith.constant -2.16440725 : f32
    %cst_203 = arith.constant -2.17467976 : f32
    %313 = vector.broadcast %cst_202 : f32 to vector<8x128xf32>
    %314 = vector.broadcast %cst_203 : f32 to vector<8x128xf32>
    %315 = arith.select %12, %313, %314 : vector<8x128xi1>, vector<8x128xf32>
    %cst_204 = arith.constant -2.14398766 : f32
    %cst_205 = arith.constant -2.15417671 : f32
    %316 = vector.broadcast %cst_204 : f32 to vector<8x128xf32>
    %317 = vector.broadcast %cst_205 : f32 to vector<8x128xf32>
    %318 = arith.select %12, %316, %317 : vector<8x128xi1>, vector<8x128xf32>
    %cst_206 = arith.constant -2.12373161 : f32
    %cst_207 = arith.constant -2.13383937 : f32
    %319 = vector.broadcast %cst_206 : f32 to vector<8x128xf32>
    %320 = vector.broadcast %cst_207 : f32 to vector<8x128xf32>
    %321 = arith.select %12, %319, %320 : vector<8x128xi1>, vector<8x128xf32>
    %cst_208 = arith.constant -2.10363579 : f32
    %cst_209 = arith.constant -2.11366391 : f32
    %322 = vector.broadcast %cst_208 : f32 to vector<8x128xf32>
    %323 = vector.broadcast %cst_209 : f32 to vector<8x128xf32>
    %324 = arith.select %12, %322, %323 : vector<8x128xi1>, vector<8x128xf32>
    %cst_210 = arith.constant -2.08369708 : f32
    %cst_211 = arith.constant -2.093647 : f32
    %325 = vector.broadcast %cst_210 : f32 to vector<8x128xf32>
    %326 = vector.broadcast %cst_211 : f32 to vector<8x128xf32>
    %327 = arith.select %12, %325, %326 : vector<8x128xi1>, vector<8x128xf32>
    %cst_212 = arith.constant -2.06391215 : f32
    %cst_213 = arith.constant -2.07378578 : f32
    %328 = vector.broadcast %cst_212 : f32 to vector<8x128xf32>
    %329 = vector.broadcast %cst_213 : f32 to vector<8x128xf32>
    %330 = arith.select %12, %328, %329 : vector<8x128xi1>, vector<8x128xf32>
    %cst_214 = arith.constant -2.04427814 : f32
    %cst_215 = arith.constant -2.05407643 : f32
    %331 = vector.broadcast %cst_214 : f32 to vector<8x128xf32>
    %332 = vector.broadcast %cst_215 : f32 to vector<8x128xf32>
    %333 = arith.select %12, %331, %332 : vector<8x128xi1>, vector<8x128xf32>
    %cst_216 = arith.constant -2.02479172 : f32
    %cst_217 = arith.constant -2.03451657 : f32
    %334 = vector.broadcast %cst_216 : f32 to vector<8x128xf32>
    %335 = vector.broadcast %cst_217 : f32 to vector<8x128xf32>
    %336 = arith.select %12, %334, %335 : vector<8x128xi1>, vector<8x128xf32>
    %cst_218 = arith.constant -2.00544977 : f32
    %cst_219 = arith.constant -2.01510286 : f32
    %337 = vector.broadcast %cst_218 : f32 to vector<8x128xf32>
    %338 = vector.broadcast %cst_219 : f32 to vector<8x128xf32>
    %339 = arith.select %12, %337, %338 : vector<8x128xi1>, vector<8x128xf32>
    %cst_220 = arith.constant -1.98624992 : f32
    %cst_221 = arith.constant -1.99583232 : f32
    %340 = vector.broadcast %cst_220 : f32 to vector<8x128xf32>
    %341 = vector.broadcast %cst_221 : f32 to vector<8x128xf32>
    %342 = arith.select %12, %340, %341 : vector<8x128xi1>, vector<8x128xf32>
    %cst_222 = arith.constant -1.96718907 : f32
    %cst_223 = arith.constant -1.97670233 : f32
    %343 = vector.broadcast %cst_222 : f32 to vector<8x128xf32>
    %344 = vector.broadcast %cst_223 : f32 to vector<8x128xf32>
    %345 = arith.select %12, %343, %344 : vector<8x128xi1>, vector<8x128xf32>
    %cst_224 = arith.constant -1.94826448 : f32
    %cst_225 = arith.constant -1.95770991 : f32
    %346 = vector.broadcast %cst_224 : f32 to vector<8x128xf32>
    %347 = vector.broadcast %cst_225 : f32 to vector<8x128xf32>
    %348 = arith.select %12, %346, %347 : vector<8x128xi1>, vector<8x128xf32>
    %cst_226 = arith.constant -1.92947352 : f32
    %cst_227 = arith.constant -1.93885243 : f32
    %349 = vector.broadcast %cst_226 : f32 to vector<8x128xf32>
    %350 = vector.broadcast %cst_227 : f32 to vector<8x128xf32>
    %351 = arith.select %12, %349, %350 : vector<8x128xi1>, vector<8x128xf32>
    %cst_228 = arith.constant -1.91081357 : f32
    %cst_229 = arith.constant -1.92012727 : f32
    %352 = vector.broadcast %cst_228 : f32 to vector<8x128xf32>
    %353 = vector.broadcast %cst_229 : f32 to vector<8x128xf32>
    %354 = arith.select %12, %352, %353 : vector<8x128xi1>, vector<8x128xf32>
    %cst_230 = arith.constant -1.89228225 : f32
    %cst_231 = arith.constant -1.90153193 : f32
    %355 = vector.broadcast %cst_230 : f32 to vector<8x128xf32>
    %356 = vector.broadcast %cst_231 : f32 to vector<8x128xf32>
    %357 = arith.select %12, %355, %356 : vector<8x128xi1>, vector<8x128xf32>
    %cst_232 = arith.constant -1.87387681 : f32
    %cst_233 = arith.constant -1.88306391 : f32
    %358 = vector.broadcast %cst_232 : f32 to vector<8x128xf32>
    %359 = vector.broadcast %cst_233 : f32 to vector<8x128xf32>
    %360 = arith.select %12, %358, %359 : vector<8x128xi1>, vector<8x128xf32>
    %cst_234 = arith.constant -1.85559511 : f32
    %cst_235 = arith.constant -1.8647207 : f32
    %361 = vector.broadcast %cst_234 : f32 to vector<8x128xf32>
    %362 = vector.broadcast %cst_235 : f32 to vector<8x128xf32>
    %363 = arith.select %12, %361, %362 : vector<8x128xi1>, vector<8x128xf32>
    %cst_236 = arith.constant -1.83743465 : f32
    %cst_237 = arith.constant -1.84649992 : f32
    %364 = vector.broadcast %cst_236 : f32 to vector<8x128xf32>
    %365 = vector.broadcast %cst_237 : f32 to vector<8x128xf32>
    %366 = arith.select %12, %364, %365 : vector<8x128xi1>, vector<8x128xf32>
    %cst_238 = arith.constant -1.81939316 : f32
    %cst_239 = arith.constant -1.82839918 : f32
    %367 = vector.broadcast %cst_238 : f32 to vector<8x128xf32>
    %368 = vector.broadcast %cst_239 : f32 to vector<8x128xf32>
    %369 = arith.select %12, %367, %368 : vector<8x128xi1>, vector<8x128xf32>
    %cst_240 = arith.constant -1.80146849 : f32
    %cst_241 = arith.constant -1.81041634 : f32
    %370 = vector.broadcast %cst_240 : f32 to vector<8x128xf32>
    %371 = vector.broadcast %cst_241 : f32 to vector<8x128xf32>
    %372 = arith.select %12, %370, %371 : vector<8x128xi1>, vector<8x128xf32>
    %cst_242 = arith.constant -1.78365827 : f32
    %cst_243 = arith.constant -1.79254913 : f32
    %373 = vector.broadcast %cst_242 : f32 to vector<8x128xf32>
    %374 = vector.broadcast %cst_243 : f32 to vector<8x128xf32>
    %375 = arith.select %12, %373, %374 : vector<8x128xi1>, vector<8x128xf32>
    %cst_244 = arith.constant -1.76596045 : f32
    %cst_245 = arith.constant -1.77479541 : f32
    %376 = vector.broadcast %cst_244 : f32 to vector<8x128xf32>
    %377 = vector.broadcast %cst_245 : f32 to vector<8x128xf32>
    %378 = arith.select %12, %376, %377 : vector<8x128xi1>, vector<8x128xf32>
    %cst_246 = arith.constant -1.74837303 : f32
    %cst_247 = arith.constant -1.75715303 : f32
    %379 = vector.broadcast %cst_246 : f32 to vector<8x128xf32>
    %380 = vector.broadcast %cst_247 : f32 to vector<8x128xf32>
    %381 = arith.select %12, %379, %380 : vector<8x128xi1>, vector<8x128xf32>
    %cst_248 = arith.constant -1.73089385 : f32
    %cst_249 = arith.constant -1.739620e+00 : f32
    %382 = vector.broadcast %cst_248 : f32 to vector<8x128xf32>
    %383 = vector.broadcast %cst_249 : f32 to vector<8x128xf32>
    %384 = arith.select %12, %382, %383 : vector<8x128xi1>, vector<8x128xf32>
    %cst_250 = arith.constant -1.71352088 : f32
    %cst_251 = arith.constant -1.72219419 : f32
    %385 = vector.broadcast %cst_250 : f32 to vector<8x128xf32>
    %386 = vector.broadcast %cst_251 : f32 to vector<8x128xf32>
    %387 = arith.select %12, %385, %386 : vector<8x128xi1>, vector<8x128xf32>
    %cst_252 = arith.constant -1.69625223 : f32
    %cst_253 = arith.constant -1.70487368 : f32
    %388 = vector.broadcast %cst_252 : f32 to vector<8x128xf32>
    %389 = vector.broadcast %cst_253 : f32 to vector<8x128xf32>
    %390 = arith.select %12, %388, %389 : vector<8x128xi1>, vector<8x128xf32>
    %cst_254 = arith.constant -1.67908609 : f32
    %cst_255 = arith.constant -1.68765652 : f32
    %391 = vector.broadcast %cst_254 : f32 to vector<8x128xf32>
    %392 = vector.broadcast %cst_255 : f32 to vector<8x128xf32>
    %393 = arith.select %12, %391, %392 : vector<8x128xi1>, vector<8x128xf32>
    %cst_256 = arith.constant -1.66202044 : f32
    %cst_257 = arith.constant -1.67054081 : f32
    %394 = vector.broadcast %cst_256 : f32 to vector<8x128xf32>
    %395 = vector.broadcast %cst_257 : f32 to vector<8x128xf32>
    %396 = arith.select %12, %394, %395 : vector<8x128xi1>, vector<8x128xf32>
    %cst_258 = arith.constant -1.64505339 : f32
    %cst_259 = arith.constant -1.65352464 : f32
    %397 = vector.broadcast %cst_258 : f32 to vector<8x128xf32>
    %398 = vector.broadcast %cst_259 : f32 to vector<8x128xf32>
    %399 = arith.select %12, %397, %398 : vector<8x128xi1>, vector<8x128xf32>
    %cst_260 = arith.constant -1.62818336 : f32
    %cst_261 = arith.constant -1.63660645 : f32
    %400 = vector.broadcast %cst_260 : f32 to vector<8x128xf32>
    %401 = vector.broadcast %cst_261 : f32 to vector<8x128xf32>
    %402 = arith.select %12, %400, %401 : vector<8x128xi1>, vector<8x128xf32>
    %cst_262 = arith.constant -1.61140859 : f32
    %cst_263 = arith.constant -1.61978424 : f32
    %403 = vector.broadcast %cst_262 : f32 to vector<8x128xf32>
    %404 = vector.broadcast %cst_263 : f32 to vector<8x128xf32>
    %405 = arith.select %12, %403, %404 : vector<8x128xi1>, vector<8x128xf32>
    %cst_264 = arith.constant -1.59472716 : f32
    %cst_265 = arith.constant -1.60305631 : f32
    %406 = vector.broadcast %cst_264 : f32 to vector<8x128xf32>
    %407 = vector.broadcast %cst_265 : f32 to vector<8x128xf32>
    %408 = arith.select %12, %406, %407 : vector<8x128xi1>, vector<8x128xf32>
    %cst_266 = arith.constant -1.57813764 : f32
    %cst_267 = arith.constant -1.58642101 : f32
    %409 = vector.broadcast %cst_266 : f32 to vector<8x128xf32>
    %410 = vector.broadcast %cst_267 : f32 to vector<8x128xf32>
    %411 = arith.select %12, %409, %410 : vector<8x128xi1>, vector<8x128xf32>
    %cst_268 = arith.constant -1.56163812 : f32
    %cst_269 = arith.constant -1.56987667 : f32
    %412 = vector.broadcast %cst_268 : f32 to vector<8x128xf32>
    %413 = vector.broadcast %cst_269 : f32 to vector<8x128xf32>
    %414 = arith.select %12, %412, %413 : vector<8x128xi1>, vector<8x128xf32>
    %cst_270 = arith.constant -1.54522717 : f32
    %cst_271 = arith.constant -1.55342174 : f32
    %415 = vector.broadcast %cst_270 : f32 to vector<8x128xf32>
    %416 = vector.broadcast %cst_271 : f32 to vector<8x128xf32>
    %417 = arith.select %12, %415, %416 : vector<8x128xi1>, vector<8x128xf32>
    %cst_272 = arith.constant -1.52890325 : f32
    %cst_273 = arith.constant -1.53705442 : f32
    %418 = vector.broadcast %cst_272 : f32 to vector<8x128xf32>
    %419 = vector.broadcast %cst_273 : f32 to vector<8x128xf32>
    %420 = arith.select %12, %418, %419 : vector<8x128xi1>, vector<8x128xf32>
    %cst_274 = arith.constant -1.51266468 : f32
    %cst_275 = arith.constant -1.52077341 : f32
    %421 = vector.broadcast %cst_274 : f32 to vector<8x128xf32>
    %422 = vector.broadcast %cst_275 : f32 to vector<8x128xf32>
    %423 = arith.select %12, %421, %422 : vector<8x128xi1>, vector<8x128xf32>
    %cst_276 = arith.constant -1.496510e+00 : f32
    %cst_277 = arith.constant -1.50457692 : f32
    %424 = vector.broadcast %cst_276 : f32 to vector<8x128xf32>
    %425 = vector.broadcast %cst_277 : f32 to vector<8x128xf32>
    %426 = arith.select %12, %424, %425 : vector<8x128xi1>, vector<8x128xf32>
    %cst_278 = arith.constant -1.48043776 : f32
    %cst_279 = arith.constant -1.48846364 : f32
    %427 = vector.broadcast %cst_278 : f32 to vector<8x128xf32>
    %428 = vector.broadcast %cst_279 : f32 to vector<8x128xf32>
    %429 = arith.select %12, %427, %428 : vector<8x128xi1>, vector<8x128xf32>
    %cst_280 = arith.constant -1.46444643 : f32
    %cst_281 = arith.constant -1.47243202 : f32
    %430 = vector.broadcast %cst_280 : f32 to vector<8x128xf32>
    %431 = vector.broadcast %cst_281 : f32 to vector<8x128xf32>
    %432 = arith.select %12, %430, %431 : vector<8x128xi1>, vector<8x128xf32>
    %cst_282 = arith.constant -1.44853473 : f32
    %cst_283 = arith.constant -1.45648074 : f32
    %433 = vector.broadcast %cst_282 : f32 to vector<8x128xf32>
    %434 = vector.broadcast %cst_283 : f32 to vector<8x128xf32>
    %435 = arith.select %12, %433, %434 : vector<8x128xi1>, vector<8x128xf32>
    %cst_284 = arith.constant -1.43270099 : f32
    %cst_285 = arith.constant -1.44060814 : f32
    %436 = vector.broadcast %cst_284 : f32 to vector<8x128xf32>
    %437 = vector.broadcast %cst_285 : f32 to vector<8x128xf32>
    %438 = arith.select %12, %436, %437 : vector<8x128xi1>, vector<8x128xf32>
    %cst_286 = arith.constant -1.41694415 : f32
    %cst_287 = arith.constant -1.42481303 : f32
    %439 = vector.broadcast %cst_286 : f32 to vector<8x128xf32>
    %440 = vector.broadcast %cst_287 : f32 to vector<8x128xf32>
    %441 = arith.select %12, %439, %440 : vector<8x128xi1>, vector<8x128xf32>
    %cst_288 = arith.constant -1.40126264 : f32
    %cst_289 = arith.constant -1.4090941 : f32
    %442 = vector.broadcast %cst_288 : f32 to vector<8x128xf32>
    %443 = vector.broadcast %cst_289 : f32 to vector<8x128xf32>
    %444 = arith.select %12, %442, %443 : vector<8x128xi1>, vector<8x128xf32>
    %cst_290 = arith.constant -1.38565528 : f32
    %cst_291 = arith.constant -1.39344978 : f32
    %445 = vector.broadcast %cst_290 : f32 to vector<8x128xf32>
    %446 = vector.broadcast %cst_291 : f32 to vector<8x128xf32>
    %447 = arith.select %12, %445, %446 : vector<8x128xi1>, vector<8x128xf32>
    %cst_292 = arith.constant -1.37012064 : f32
    %cst_293 = arith.constant -1.3778789 : f32
    %448 = vector.broadcast %cst_292 : f32 to vector<8x128xf32>
    %449 = vector.broadcast %cst_293 : f32 to vector<8x128xf32>
    %450 = arith.select %12, %448, %449 : vector<8x128xi1>, vector<8x128xf32>
    %cst_294 = arith.constant -1.35465753 : f32
    %cst_295 = arith.constant -1.36238027 : f32
    %451 = vector.broadcast %cst_294 : f32 to vector<8x128xf32>
    %452 = vector.broadcast %cst_295 : f32 to vector<8x128xf32>
    %453 = arith.select %12, %451, %452 : vector<8x128xi1>, vector<8x128xf32>
    %cst_296 = arith.constant -1.33926475 : f32
    %cst_297 = arith.constant -1.34695244 : f32
    %454 = vector.broadcast %cst_296 : f32 to vector<8x128xf32>
    %455 = vector.broadcast %cst_297 : f32 to vector<8x128xf32>
    %456 = arith.select %12, %454, %455 : vector<8x128xi1>, vector<8x128xf32>
    %cst_298 = arith.constant -1.32394087 : f32
    %cst_299 = arith.constant -1.33159423 : f32
    %457 = vector.broadcast %cst_298 : f32 to vector<8x128xf32>
    %458 = vector.broadcast %cst_299 : f32 to vector<8x128xf32>
    %459 = arith.select %12, %457, %458 : vector<8x128xi1>, vector<8x128xf32>
    %cst_300 = arith.constant -1.30868495 : f32
    %cst_301 = arith.constant -1.31630456 : f32
    %460 = vector.broadcast %cst_300 : f32 to vector<8x128xf32>
    %461 = vector.broadcast %cst_301 : f32 to vector<8x128xf32>
    %462 = arith.select %12, %460, %461 : vector<8x128xi1>, vector<8x128xf32>
    %cst_302 = arith.constant -1.29349566 : f32
    %cst_303 = arith.constant -1.30108202 : f32
    %463 = vector.broadcast %cst_302 : f32 to vector<8x128xf32>
    %464 = vector.broadcast %cst_303 : f32 to vector<8x128xf32>
    %465 = arith.select %12, %463, %464 : vector<8x128xi1>, vector<8x128xf32>
    %cst_304 = arith.constant -1.27837169 : f32
    %cst_305 = arith.constant -1.28592551 : f32
    %466 = vector.broadcast %cst_304 : f32 to vector<8x128xf32>
    %467 = vector.broadcast %cst_305 : f32 to vector<8x128xf32>
    %468 = arith.select %12, %466, %467 : vector<8x128xi1>, vector<8x128xf32>
    %cst_306 = arith.constant -1.26331222 : f32
    %cst_307 = arith.constant -1.27083397 : f32
    %469 = vector.broadcast %cst_306 : f32 to vector<8x128xf32>
    %470 = vector.broadcast %cst_307 : f32 to vector<8x128xf32>
    %471 = arith.select %12, %469, %470 : vector<8x128xi1>, vector<8x128xf32>
    %cst_308 = arith.constant -1.24831593 : f32
    %cst_309 = arith.constant -1.25580621 : f32
    %472 = vector.broadcast %cst_308 : f32 to vector<8x128xf32>
    %473 = vector.broadcast %cst_309 : f32 to vector<8x128xf32>
    %474 = arith.select %12, %472, %473 : vector<8x128xi1>, vector<8x128xf32>
    %cst_310 = arith.constant -1.23338163 : f32
    %cst_311 = arith.constant -1.24084115 : f32
    %475 = vector.broadcast %cst_310 : f32 to vector<8x128xf32>
    %476 = vector.broadcast %cst_311 : f32 to vector<8x128xf32>
    %477 = arith.select %12, %475, %476 : vector<8x128xi1>, vector<8x128xf32>
    %cst_312 = arith.constant -1.21850848 : f32
    %cst_313 = arith.constant -1.22593749 : f32
    %478 = vector.broadcast %cst_312 : f32 to vector<8x128xf32>
    %479 = vector.broadcast %cst_313 : f32 to vector<8x128xf32>
    %480 = arith.select %12, %478, %479 : vector<8x128xi1>, vector<8x128xf32>
    %cst_314 = arith.constant -1.20369518 : f32
    %cst_315 = arith.constant -1.21109438 : f32
    %481 = vector.broadcast %cst_314 : f32 to vector<8x128xf32>
    %482 = vector.broadcast %cst_315 : f32 to vector<8x128xf32>
    %483 = arith.select %12, %481, %482 : vector<8x128xi1>, vector<8x128xf32>
    %cst_316 = arith.constant -1.18894076 : f32
    %cst_317 = arith.constant -1.19631076 : f32
    %484 = vector.broadcast %cst_316 : f32 to vector<8x128xf32>
    %485 = vector.broadcast %cst_317 : f32 to vector<8x128xf32>
    %486 = arith.select %12, %484, %485 : vector<8x128xi1>, vector<8x128xf32>
    %cst_318 = arith.constant -1.17424428 : f32
    %cst_319 = arith.constant -1.18158543 : f32
    %487 = vector.broadcast %cst_318 : f32 to vector<8x128xf32>
    %488 = vector.broadcast %cst_319 : f32 to vector<8x128xf32>
    %489 = arith.select %12, %487, %488 : vector<8x128xi1>, vector<8x128xf32>
    %cst_320 = arith.constant -1.15960455 : f32
    %cst_321 = arith.constant -1.16691744 : f32
    %490 = vector.broadcast %cst_320 : f32 to vector<8x128xf32>
    %491 = vector.broadcast %cst_321 : f32 to vector<8x128xf32>
    %492 = arith.select %12, %490, %491 : vector<8x128xi1>, vector<8x128xf32>
    %cst_322 = arith.constant -1.14502072 : f32
    %cst_323 = arith.constant -1.15230572 : f32
    %493 = vector.broadcast %cst_322 : f32 to vector<8x128xf32>
    %494 = vector.broadcast %cst_323 : f32 to vector<8x128xf32>
    %495 = arith.select %12, %493, %494 : vector<8x128xi1>, vector<8x128xf32>
    %cst_324 = arith.constant -1.13049173 : f32
    %cst_325 = arith.constant -1.13774943 : f32
    %496 = vector.broadcast %cst_324 : f32 to vector<8x128xf32>
    %497 = vector.broadcast %cst_325 : f32 to vector<8x128xf32>
    %498 = arith.select %12, %496, %497 : vector<8x128xi1>, vector<8x128xf32>
    %cst_326 = arith.constant -1.11601663 : f32
    %cst_327 = arith.constant -1.1232475 : f32
    %499 = vector.broadcast %cst_326 : f32 to vector<8x128xf32>
    %500 = vector.broadcast %cst_327 : f32 to vector<8x128xf32>
    %501 = arith.select %12, %499, %500 : vector<8x128xi1>, vector<8x128xf32>
    %cst_328 = arith.constant -1.10159433 : f32
    %cst_329 = arith.constant -1.10879898 : f32
    %502 = vector.broadcast %cst_328 : f32 to vector<8x128xf32>
    %503 = vector.broadcast %cst_329 : f32 to vector<8x128xf32>
    %504 = arith.select %12, %502, %503 : vector<8x128xi1>, vector<8x128xf32>
    %cst_330 = arith.constant -1.08722413 : f32
    %cst_331 = arith.constant -1.09440279 : f32
    %505 = vector.broadcast %cst_330 : f32 to vector<8x128xf32>
    %506 = vector.broadcast %cst_331 : f32 to vector<8x128xf32>
    %507 = arith.select %12, %505, %506 : vector<8x128xi1>, vector<8x128xf32>
    %cst_332 = arith.constant -1.07290494 : f32
    %cst_333 = arith.constant -1.08005822 : f32
    %508 = vector.broadcast %cst_332 : f32 to vector<8x128xf32>
    %509 = vector.broadcast %cst_333 : f32 to vector<8x128xf32>
    %510 = arith.select %12, %508, %509 : vector<8x128xi1>, vector<8x128xf32>
    %cst_334 = arith.constant -1.05863595 : f32
    %cst_335 = arith.constant -1.06576419 : f32
    %511 = vector.broadcast %cst_334 : f32 to vector<8x128xf32>
    %512 = vector.broadcast %cst_335 : f32 to vector<8x128xf32>
    %513 = arith.select %12, %511, %512 : vector<8x128xi1>, vector<8x128xf32>
    %cst_336 = arith.constant -1.04441607 : f32
    %cst_337 = arith.constant -1.05151987 : f32
    %514 = vector.broadcast %cst_336 : f32 to vector<8x128xf32>
    %515 = vector.broadcast %cst_337 : f32 to vector<8x128xf32>
    %516 = arith.select %12, %514, %515 : vector<8x128xi1>, vector<8x128xf32>
    %cst_338 = arith.constant -1.03024459 : f32
    %cst_339 = arith.constant -1.03732431 : f32
    %517 = vector.broadcast %cst_338 : f32 to vector<8x128xf32>
    %518 = vector.broadcast %cst_339 : f32 to vector<8x128xf32>
    %519 = arith.select %12, %517, %518 : vector<8x128xi1>, vector<8x128xf32>
    %cst_340 = arith.constant -1.01612055 : f32
    %cst_341 = arith.constant -1.02317667 : f32
    %520 = vector.broadcast %cst_340 : f32 to vector<8x128xf32>
    %521 = vector.broadcast %cst_341 : f32 to vector<8x128xf32>
    %522 = arith.select %12, %520, %521 : vector<8x128xi1>, vector<8x128xf32>
    %cst_342 = arith.constant -1.00204325 : f32
    %cst_343 = arith.constant -1.00907612 : f32
    %523 = vector.broadcast %cst_342 : f32 to vector<8x128xf32>
    %524 = vector.broadcast %cst_343 : f32 to vector<8x128xf32>
    %525 = arith.select %12, %523, %524 : vector<8x128xi1>, vector<8x128xf32>
    %cst_344 = arith.constant -0.988011598 : f32
    %cst_345 = arith.constant -0.99502176 : f32
    %526 = vector.broadcast %cst_344 : f32 to vector<8x128xf32>
    %527 = vector.broadcast %cst_345 : f32 to vector<8x128xf32>
    %528 = arith.select %12, %526, %527 : vector<8x128xi1>, vector<8x128xf32>
    %cst_346 = arith.constant -0.974024891 : f32
    %cst_347 = arith.constant -0.981012701 : f32
    %529 = vector.broadcast %cst_346 : f32 to vector<8x128xf32>
    %530 = vector.broadcast %cst_347 : f32 to vector<8x128xf32>
    %531 = arith.select %12, %529, %530 : vector<8x128xi1>, vector<8x128xf32>
    %cst_348 = arith.constant -0.960082292 : f32
    %cst_349 = arith.constant -0.967048108 : f32
    %532 = vector.broadcast %cst_348 : f32 to vector<8x128xf32>
    %533 = vector.broadcast %cst_349 : f32 to vector<8x128xf32>
    %534 = arith.select %12, %532, %533 : vector<8x128xi1>, vector<8x128xf32>
    %cst_350 = arith.constant -0.946182966 : f32
    %cst_351 = arith.constant -0.953127264 : f32
    %535 = vector.broadcast %cst_350 : f32 to vector<8x128xf32>
    %536 = vector.broadcast %cst_351 : f32 to vector<8x128xf32>
    %537 = arith.select %12, %535, %536 : vector<8x128xi1>, vector<8x128xf32>
    %cst_352 = arith.constant -0.932326138 : f32
    %cst_353 = arith.constant -0.939249277 : f32
    %538 = vector.broadcast %cst_352 : f32 to vector<8x128xf32>
    %539 = vector.broadcast %cst_353 : f32 to vector<8x128xf32>
    %540 = arith.select %12, %538, %539 : vector<8x128xi1>, vector<8x128xf32>
    %cst_354 = arith.constant -0.918510973 : f32
    %cst_355 = arith.constant -0.92541337 : f32
    %541 = vector.broadcast %cst_354 : f32 to vector<8x128xf32>
    %542 = vector.broadcast %cst_355 : f32 to vector<8x128xf32>
    %543 = arith.select %12, %541, %542 : vector<8x128xi1>, vector<8x128xf32>
    %cst_356 = arith.constant -0.904736697 : f32
    %cst_357 = arith.constant -0.911618769 : f32
    %544 = vector.broadcast %cst_356 : f32 to vector<8x128xf32>
    %545 = vector.broadcast %cst_357 : f32 to vector<8x128xf32>
    %546 = arith.select %12, %544, %545 : vector<8x128xi1>, vector<8x128xf32>
    %cst_358 = arith.constant -0.891002595 : f32
    %cst_359 = arith.constant -0.897864699 : f32
    %547 = vector.broadcast %cst_358 : f32 to vector<8x128xf32>
    %548 = vector.broadcast %cst_359 : f32 to vector<8x128xf32>
    %549 = arith.select %12, %547, %548 : vector<8x128xi1>, vector<8x128xf32>
    %cst_360 = arith.constant -0.877307832 : f32
    %cst_361 = arith.constant -0.884150326 : f32
    %550 = vector.broadcast %cst_360 : f32 to vector<8x128xf32>
    %551 = vector.broadcast %cst_361 : f32 to vector<8x128xf32>
    %552 = arith.select %12, %550, %551 : vector<8x128xi1>, vector<8x128xf32>
    %cst_362 = arith.constant -0.863651692 : f32
    %cst_363 = arith.constant -0.870474934 : f32
    %553 = vector.broadcast %cst_362 : f32 to vector<8x128xf32>
    %554 = vector.broadcast %cst_363 : f32 to vector<8x128xf32>
    %555 = arith.select %12, %553, %554 : vector<8x128xi1>, vector<8x128xf32>
    %cst_364 = arith.constant -0.850033402 : f32
    %cst_365 = arith.constant -0.856837809 : f32
    %556 = vector.broadcast %cst_364 : f32 to vector<8x128xf32>
    %557 = vector.broadcast %cst_365 : f32 to vector<8x128xf32>
    %558 = arith.select %12, %556, %557 : vector<8x128xi1>, vector<8x128xf32>
    %cst_366 = arith.constant -0.836452186 : f32
    %cst_367 = arith.constant -0.843238174 : f32
    %559 = vector.broadcast %cst_366 : f32 to vector<8x128xf32>
    %560 = vector.broadcast %cst_367 : f32 to vector<8x128xf32>
    %561 = arith.select %12, %559, %560 : vector<8x128xi1>, vector<8x128xf32>
    %cst_368 = arith.constant -0.822907447 : f32
    %cst_369 = arith.constant -0.829675316 : f32
    %562 = vector.broadcast %cst_368 : f32 to vector<8x128xf32>
    %563 = vector.broadcast %cst_369 : f32 to vector<8x128xf32>
    %564 = arith.select %12, %562, %563 : vector<8x128xi1>, vector<8x128xf32>
    %cst_370 = arith.constant -0.809398413 : f32
    %cst_371 = arith.constant -0.81614852 : f32
    %565 = vector.broadcast %cst_370 : f32 to vector<8x128xf32>
    %566 = vector.broadcast %cst_371 : f32 to vector<8x128xf32>
    %567 = arith.select %12, %565, %566 : vector<8x128xi1>, vector<8x128xf32>
    %cst_372 = arith.constant -0.795924305 : f32
    %cst_373 = arith.constant -8.026570e-01 : f32
    %568 = vector.broadcast %cst_372 : f32 to vector<8x128xf32>
    %569 = vector.broadcast %cst_373 : f32 to vector<8x128xf32>
    %570 = arith.select %12, %568, %569 : vector<8x128xi1>, vector<8x128xf32>
    %cst_374 = arith.constant -0.782484471 : f32
    %cst_375 = arith.constant -0.789200127 : f32
    %571 = vector.broadcast %cst_374 : f32 to vector<8x128xf32>
    %572 = vector.broadcast %cst_375 : f32 to vector<8x128xf32>
    %573 = arith.select %12, %571, %572 : vector<8x128xi1>, vector<8x128xf32>
    %cst_376 = arith.constant -0.769078254 : f32
    %cst_377 = arith.constant -0.77577722 : f32
    %574 = vector.broadcast %cst_376 : f32 to vector<8x128xf32>
    %575 = vector.broadcast %cst_377 : f32 to vector<8x128xf32>
    %576 = arith.select %12, %574, %575 : vector<8x128xi1>, vector<8x128xf32>
    %cst_378 = arith.constant -0.75570488 : f32
    %cst_379 = arith.constant -0.762387514 : f32
    %577 = vector.broadcast %cst_378 : f32 to vector<8x128xf32>
    %578 = vector.broadcast %cst_379 : f32 to vector<8x128xf32>
    %579 = arith.select %12, %577, %578 : vector<8x128xi1>, vector<8x128xf32>
    %cst_380 = arith.constant -0.742363811 : f32
    %cst_381 = arith.constant -0.749030352 : f32
    %580 = vector.broadcast %cst_380 : f32 to vector<8x128xf32>
    %581 = vector.broadcast %cst_381 : f32 to vector<8x128xf32>
    %582 = arith.select %12, %580, %581 : vector<8x128xi1>, vector<8x128xf32>
    %cst_382 = arith.constant -0.729054213 : f32
    %cst_383 = arith.constant -0.735705077 : f32
    %583 = vector.broadcast %cst_382 : f32 to vector<8x128xf32>
    %584 = vector.broadcast %cst_383 : f32 to vector<8x128xf32>
    %585 = arith.select %12, %583, %584 : vector<8x128xi1>, vector<8x128xf32>
    %cst_384 = arith.constant -0.715775549 : f32
    %cst_385 = arith.constant -0.722411036 : f32
    %586 = vector.broadcast %cst_384 : f32 to vector<8x128xf32>
    %587 = vector.broadcast %cst_385 : f32 to vector<8x128xf32>
    %588 = arith.select %12, %586, %587 : vector<8x128xi1>, vector<8x128xf32>
    %cst_386 = arith.constant -0.702527105 : f32
    %cst_387 = arith.constant -0.709147573 : f32
    %589 = vector.broadcast %cst_386 : f32 to vector<8x128xf32>
    %590 = vector.broadcast %cst_387 : f32 to vector<8x128xf32>
    %591 = arith.select %12, %589, %590 : vector<8x128xi1>, vector<8x128xf32>
    %cst_388 = arith.constant -0.689308226 : f32
    %cst_389 = arith.constant -0.69591397 : f32
    %592 = vector.broadcast %cst_388 : f32 to vector<8x128xf32>
    %593 = vector.broadcast %cst_389 : f32 to vector<8x128xf32>
    %594 = arith.select %12, %592, %593 : vector<8x128xi1>, vector<8x128xf32>
    %cst_390 = arith.constant -0.676118255 : f32
    %cst_391 = arith.constant -0.682709634 : f32
    %595 = vector.broadcast %cst_390 : f32 to vector<8x128xf32>
    %596 = vector.broadcast %cst_391 : f32 to vector<8x128xf32>
    %597 = arith.select %12, %595, %596 : vector<8x128xi1>, vector<8x128xf32>
    %cst_392 = arith.constant -0.662956655 : f32
    %cst_393 = arith.constant -0.669533968 : f32
    %598 = vector.broadcast %cst_392 : f32 to vector<8x128xf32>
    %599 = vector.broadcast %cst_393 : f32 to vector<8x128xf32>
    %600 = arith.select %12, %598, %599 : vector<8x128xi1>, vector<8x128xf32>
    %cst_394 = arith.constant -0.649822652 : f32
    %cst_395 = arith.constant -0.656386256 : f32
    %601 = vector.broadcast %cst_394 : f32 to vector<8x128xf32>
    %602 = vector.broadcast %cst_395 : f32 to vector<8x128xf32>
    %603 = arith.select %12, %601, %602 : vector<8x128xi1>, vector<8x128xf32>
    %cst_396 = arith.constant -0.63671577 : f32
    %cst_397 = arith.constant -0.643265843 : f32
    %604 = vector.broadcast %cst_396 : f32 to vector<8x128xf32>
    %605 = vector.broadcast %cst_397 : f32 to vector<8x128xf32>
    %606 = arith.select %12, %604, %605 : vector<8x128xi1>, vector<8x128xf32>
    %cst_398 = arith.constant -0.623635292 : f32
    %cst_399 = arith.constant -0.630172252 : f32
    %607 = vector.broadcast %cst_398 : f32 to vector<8x128xf32>
    %608 = vector.broadcast %cst_399 : f32 to vector<8x128xf32>
    %609 = arith.select %12, %607, %608 : vector<8x128xi1>, vector<8x128xf32>
    %cst_400 = arith.constant -0.610580623 : f32
    %cst_401 = arith.constant -0.617104769 : f32
    %610 = vector.broadcast %cst_400 : f32 to vector<8x128xf32>
    %611 = vector.broadcast %cst_401 : f32 to vector<8x128xf32>
    %612 = arith.select %12, %610, %611 : vector<8x128xi1>, vector<8x128xf32>
    %cst_402 = arith.constant -0.597551167 : f32
    %cst_403 = arith.constant -0.604062736 : f32
    %613 = vector.broadcast %cst_402 : f32 to vector<8x128xf32>
    %614 = vector.broadcast %cst_403 : f32 to vector<8x128xf32>
    %615 = arith.select %12, %613, %614 : vector<8x128xi1>, vector<8x128xf32>
    %cst_404 = arith.constant -0.584546268 : f32
    %cst_405 = arith.constant -0.591045678 : f32
    %616 = vector.broadcast %cst_404 : f32 to vector<8x128xf32>
    %617 = vector.broadcast %cst_405 : f32 to vector<8x128xf32>
    %618 = arith.select %12, %616, %617 : vector<8x128xi1>, vector<8x128xf32>
    %cst_406 = arith.constant -0.571565449 : f32
    %cst_407 = arith.constant -0.578052938 : f32
    %619 = vector.broadcast %cst_406 : f32 to vector<8x128xf32>
    %620 = vector.broadcast %cst_407 : f32 to vector<8x128xf32>
    %621 = arith.select %12, %619, %620 : vector<8x128xi1>, vector<8x128xf32>
    %cst_408 = arith.constant -0.558608055 : f32
    %cst_409 = arith.constant -0.565083861 : f32
    %622 = vector.broadcast %cst_408 : f32 to vector<8x128xf32>
    %623 = vector.broadcast %cst_409 : f32 to vector<8x128xf32>
    %624 = arith.select %12, %622, %623 : vector<8x128xi1>, vector<8x128xf32>
    %cst_410 = arith.constant -0.54567349 : f32
    %cst_411 = arith.constant -5.521380e-01 : f32
    %625 = vector.broadcast %cst_410 : f32 to vector<8x128xf32>
    %626 = vector.broadcast %cst_411 : f32 to vector<8x128xf32>
    %627 = arith.select %12, %625, %626 : vector<8x128xi1>, vector<8x128xf32>
    %cst_412 = arith.constant -0.532761157 : f32
    %cst_413 = arith.constant -0.539214551 : f32
    %628 = vector.broadcast %cst_412 : f32 to vector<8x128xf32>
    %629 = vector.broadcast %cst_413 : f32 to vector<8x128xf32>
    %630 = arith.select %12, %628, %629 : vector<8x128xi1>, vector<8x128xf32>
    %cst_414 = arith.constant -0.51987052 : f32
    %cst_415 = arith.constant -0.526313186 : f32
    %631 = vector.broadcast %cst_414 : f32 to vector<8x128xf32>
    %632 = vector.broadcast %cst_415 : f32 to vector<8x128xf32>
    %633 = arith.select %12, %631, %632 : vector<8x128xi1>, vector<8x128xf32>
    %cst_416 = arith.constant -5.070010e-01 : f32
    %cst_417 = arith.constant -0.513433158 : f32
    %634 = vector.broadcast %cst_416 : f32 to vector<8x128xf32>
    %635 = vector.broadcast %cst_417 : f32 to vector<8x128xf32>
    %636 = arith.select %12, %634, %635 : vector<8x128xi1>, vector<8x128xf32>
    %cst_418 = arith.constant -0.494152039 : f32
    %cst_419 = arith.constant -5.005740e-01 : f32
    %637 = vector.broadcast %cst_418 : f32 to vector<8x128xf32>
    %638 = vector.broadcast %cst_419 : f32 to vector<8x128xf32>
    %639 = arith.select %12, %637, %638 : vector<8x128xi1>, vector<8x128xf32>
    %cst_420 = arith.constant -0.481323034 : f32
    %cst_421 = arith.constant -0.487735063 : f32
    %640 = vector.broadcast %cst_420 : f32 to vector<8x128xf32>
    %641 = vector.broadcast %cst_421 : f32 to vector<8x128xf32>
    %642 = arith.select %12, %640, %641 : vector<8x128xi1>, vector<8x128xf32>
    %cst_422 = arith.constant -0.468513459 : f32
    %cst_423 = arith.constant -0.474915832 : f32
    %643 = vector.broadcast %cst_422 : f32 to vector<8x128xf32>
    %644 = vector.broadcast %cst_423 : f32 to vector<8x128xf32>
    %645 = arith.select %12, %643, %644 : vector<8x128xi1>, vector<8x128xf32>
    %cst_424 = arith.constant -0.455722749 : f32
    %cst_425 = arith.constant -0.462115765 : f32
    %646 = vector.broadcast %cst_424 : f32 to vector<8x128xf32>
    %647 = vector.broadcast %cst_425 : f32 to vector<8x128xf32>
    %648 = arith.select %12, %646, %647 : vector<8x128xi1>, vector<8x128xf32>
    %cst_426 = arith.constant -0.442950338 : f32
    %cst_427 = arith.constant -0.449334294 : f32
    %649 = vector.broadcast %cst_426 : f32 to vector<8x128xf32>
    %650 = vector.broadcast %cst_427 : f32 to vector<8x128xf32>
    %651 = arith.select %12, %649, %650 : vector<8x128xi1>, vector<8x128xf32>
    %cst_428 = arith.constant -0.430195719 : f32
    %cst_429 = arith.constant -0.436570853 : f32
    %652 = vector.broadcast %cst_428 : f32 to vector<8x128xf32>
    %653 = vector.broadcast %cst_429 : f32 to vector<8x128xf32>
    %654 = arith.select %12, %652, %653 : vector<8x128xi1>, vector<8x128xf32>
    %cst_430 = arith.constant -0.417458326 : f32
    %cst_431 = arith.constant -0.423824906 : f32
    %655 = vector.broadcast %cst_430 : f32 to vector<8x128xf32>
    %656 = vector.broadcast %cst_431 : f32 to vector<8x128xf32>
    %657 = arith.select %12, %655, %656 : vector<8x128xi1>, vector<8x128xf32>
    %cst_432 = arith.constant -0.404737622 : f32
    %cst_433 = arith.constant -0.411095917 : f32
    %658 = vector.broadcast %cst_432 : f32 to vector<8x128xf32>
    %659 = vector.broadcast %cst_433 : f32 to vector<8x128xf32>
    %660 = arith.select %12, %658, %659 : vector<8x128xi1>, vector<8x128xf32>
    %cst_434 = arith.constant -0.39203307 : f32
    %cst_435 = arith.constant -0.398383349 : f32
    %661 = vector.broadcast %cst_434 : f32 to vector<8x128xf32>
    %662 = vector.broadcast %cst_435 : f32 to vector<8x128xf32>
    %663 = arith.select %12, %661, %662 : vector<8x128xi1>, vector<8x128xf32>
    %cst_436 = arith.constant -0.379344136 : f32
    %cst_437 = arith.constant -0.385686696 : f32
    %664 = vector.broadcast %cst_436 : f32 to vector<8x128xf32>
    %665 = vector.broadcast %cst_437 : f32 to vector<8x128xf32>
    %666 = arith.select %12, %664, %665 : vector<8x128xi1>, vector<8x128xf32>
    %cst_438 = arith.constant -0.366670281 : f32
    %cst_439 = arith.constant -0.37300536 : f32
    %667 = vector.broadcast %cst_438 : f32 to vector<8x128xf32>
    %668 = vector.broadcast %cst_439 : f32 to vector<8x128xf32>
    %669 = arith.select %12, %667, %668 : vector<8x128xi1>, vector<8x128xf32>
    %cst_440 = arith.constant -3.540110e-01 : f32
    %cst_441 = arith.constant -0.360338867 : f32
    %670 = vector.broadcast %cst_440 : f32 to vector<8x128xf32>
    %671 = vector.broadcast %cst_441 : f32 to vector<8x128xf32>
    %672 = arith.select %12, %670, %671 : vector<8x128xi1>, vector<8x128xf32>
    %cst_442 = arith.constant -0.341365755 : f32
    %cst_443 = arith.constant -0.347686648 : f32
    %673 = vector.broadcast %cst_442 : f32 to vector<8x128xf32>
    %674 = vector.broadcast %cst_443 : f32 to vector<8x128xf32>
    %675 = arith.select %12, %673, %674 : vector<8x128xi1>, vector<8x128xf32>
    %cst_444 = arith.constant -0.32873404 : f32
    %cst_445 = arith.constant -0.335048229 : f32
    %676 = vector.broadcast %cst_444 : f32 to vector<8x128xf32>
    %677 = vector.broadcast %cst_445 : f32 to vector<8x128xf32>
    %678 = arith.select %12, %676, %677 : vector<8x128xi1>, vector<8x128xf32>
    %cst_446 = arith.constant -0.31611532 : f32
    %cst_447 = arith.constant -0.322423071 : f32
    %679 = vector.broadcast %cst_446 : f32 to vector<8x128xf32>
    %680 = vector.broadcast %cst_447 : f32 to vector<8x128xf32>
    %681 = arith.select %12, %679, %680 : vector<8x128xi1>, vector<8x128xf32>
    %cst_448 = arith.constant -0.303509057 : f32
    %cst_449 = arith.constant -0.309810668 : f32
    %682 = vector.broadcast %cst_448 : f32 to vector<8x128xf32>
    %683 = vector.broadcast %cst_449 : f32 to vector<8x128xf32>
    %684 = arith.select %12, %682, %683 : vector<8x128xi1>, vector<8x128xf32>
    %cst_450 = arith.constant -0.290914804 : f32
    %cst_451 = arith.constant -0.297210455 : f32
    %685 = vector.broadcast %cst_450 : f32 to vector<8x128xf32>
    %686 = vector.broadcast %cst_451 : f32 to vector<8x128xf32>
    %687 = arith.select %12, %685, %686 : vector<8x128xi1>, vector<8x128xf32>
    %cst_452 = arith.constant -2.783320e-01 : f32
    %cst_453 = arith.constant -0.284621984 : f32
    %688 = vector.broadcast %cst_452 : f32 to vector<8x128xf32>
    %689 = vector.broadcast %cst_453 : f32 to vector<8x128xf32>
    %690 = arith.select %12, %688, %689 : vector<8x128xi1>, vector<8x128xf32>
    %cst_454 = arith.constant -0.265760124 : f32
    %cst_455 = arith.constant -0.272044718 : f32
    %691 = vector.broadcast %cst_454 : f32 to vector<8x128xf32>
    %692 = vector.broadcast %cst_455 : f32 to vector<8x128xf32>
    %693 = arith.select %12, %691, %692 : vector<8x128xi1>, vector<8x128xf32>
    %cst_456 = arith.constant -0.253198713 : f32
    %cst_457 = arith.constant -0.259478152 : f32
    %694 = vector.broadcast %cst_456 : f32 to vector<8x128xf32>
    %695 = vector.broadcast %cst_457 : f32 to vector<8x128xf32>
    %696 = arith.select %12, %694, %695 : vector<8x128xi1>, vector<8x128xf32>
    %cst_458 = arith.constant -0.240647256 : f32
    %cst_459 = arith.constant -0.246921778 : f32
    %697 = vector.broadcast %cst_458 : f32 to vector<8x128xf32>
    %698 = vector.broadcast %cst_459 : f32 to vector<8x128xf32>
    %699 = arith.select %12, %697, %698 : vector<8x128xi1>, vector<8x128xf32>
    %cst_460 = arith.constant -0.228105232 : f32
    %cst_461 = arith.constant -0.234375089 : f32
    %700 = vector.broadcast %cst_460 : f32 to vector<8x128xf32>
    %701 = vector.broadcast %cst_461 : f32 to vector<8x128xf32>
    %702 = arith.select %12, %700, %701 : vector<8x128xi1>, vector<8x128xf32>
    %cst_462 = arith.constant -0.215572149 : f32
    %cst_463 = arith.constant -0.22183761 : f32
    %703 = vector.broadcast %cst_462 : f32 to vector<8x128xf32>
    %704 = vector.broadcast %cst_463 : f32 to vector<8x128xf32>
    %705 = arith.select %12, %703, %704 : vector<8x128xi1>, vector<8x128xf32>
    %cst_464 = arith.constant -0.203047514 : f32
    %cst_465 = arith.constant -0.209308803 : f32
    %706 = vector.broadcast %cst_464 : f32 to vector<8x128xf32>
    %707 = vector.broadcast %cst_465 : f32 to vector<8x128xf32>
    %708 = arith.select %12, %706, %707 : vector<8x128xi1>, vector<8x128xf32>
    %cst_466 = arith.constant -0.190530807 : f32
    %cst_467 = arith.constant -0.196788192 : f32
    %709 = vector.broadcast %cst_466 : f32 to vector<8x128xf32>
    %710 = vector.broadcast %cst_467 : f32 to vector<8x128xf32>
    %711 = arith.select %12, %709, %710 : vector<8x128xi1>, vector<8x128xf32>
    %cst_468 = arith.constant -0.178021565 : f32
    %cst_469 = arith.constant -0.184275284 : f32
    %712 = vector.broadcast %cst_468 : f32 to vector<8x128xf32>
    %713 = vector.broadcast %cst_469 : f32 to vector<8x128xf32>
    %714 = arith.select %12, %712, %713 : vector<8x128xi1>, vector<8x128xf32>
    %cst_470 = arith.constant -0.165519282 : f32
    %cst_471 = arith.constant -0.171769574 : f32
    %715 = vector.broadcast %cst_470 : f32 to vector<8x128xf32>
    %716 = vector.broadcast %cst_471 : f32 to vector<8x128xf32>
    %717 = arith.select %12, %715, %716 : vector<8x128xi1>, vector<8x128xf32>
    %cst_472 = arith.constant -0.153023452 : f32
    %cst_473 = arith.constant -0.159270585 : f32
    %718 = vector.broadcast %cst_472 : f32 to vector<8x128xf32>
    %719 = vector.broadcast %cst_473 : f32 to vector<8x128xf32>
    %720 = arith.select %12, %718, %719 : vector<8x128xi1>, vector<8x128xf32>
    %cst_474 = arith.constant -0.140533596 : f32
    %cst_475 = arith.constant -0.146777809 : f32
    %721 = vector.broadcast %cst_474 : f32 to vector<8x128xf32>
    %722 = vector.broadcast %cst_475 : f32 to vector<8x128xf32>
    %723 = arith.select %12, %721, %722 : vector<8x128xi1>, vector<8x128xf32>
    %cst_476 = arith.constant -0.128049225 : f32
    %cst_477 = arith.constant -0.134290755 : f32
    %724 = vector.broadcast %cst_476 : f32 to vector<8x128xf32>
    %725 = vector.broadcast %cst_477 : f32 to vector<8x128xf32>
    %726 = arith.select %12, %724, %725 : vector<8x128xi1>, vector<8x128xf32>
    %cst_478 = arith.constant -0.11556986 : f32
    %cst_479 = arith.constant -0.121808946 : f32
    %727 = vector.broadcast %cst_478 : f32 to vector<8x128xf32>
    %728 = vector.broadcast %cst_479 : f32 to vector<8x128xf32>
    %729 = arith.select %12, %727, %728 : vector<8x128xi1>, vector<8x128xf32>
    %cst_480 = arith.constant -0.103094988 : f32
    %cst_481 = arith.constant -0.109331891 : f32
    %730 = vector.broadcast %cst_480 : f32 to vector<8x128xf32>
    %731 = vector.broadcast %cst_481 : f32 to vector<8x128xf32>
    %732 = arith.select %12, %730, %731 : vector<8x128xi1>, vector<8x128xf32>
    %cst_482 = arith.constant -0.0906241387 : f32
    %cst_483 = arith.constant -0.09685909 : f32
    %733 = vector.broadcast %cst_482 : f32 to vector<8x128xf32>
    %734 = vector.broadcast %cst_483 : f32 to vector<8x128xf32>
    %735 = arith.select %12, %733, %734 : vector<8x128xi1>, vector<8x128xf32>
    %cst_484 = arith.constant -0.0781568289 : f32
    %cst_485 = arith.constant -0.084390074 : f32
    %736 = vector.broadcast %cst_484 : f32 to vector<8x128xf32>
    %737 = vector.broadcast %cst_485 : f32 to vector<8x128xf32>
    %738 = arith.select %12, %736, %737 : vector<8x128xi1>, vector<8x128xf32>
    %cst_486 = arith.constant -0.0656925589 : f32
    %cst_487 = arith.constant -0.0719243437 : f32
    %739 = vector.broadcast %cst_486 : f32 to vector<8x128xf32>
    %740 = vector.broadcast %cst_487 : f32 to vector<8x128xf32>
    %741 = arith.select %12, %739, %740 : vector<8x128xi1>, vector<8x128xf32>
    %cst_488 = arith.constant -0.0532308556 : f32
    %cst_489 = arith.constant -0.0594614185 : f32
    %742 = vector.broadcast %cst_488 : f32 to vector<8x128xf32>
    %743 = vector.broadcast %cst_489 : f32 to vector<8x128xf32>
    %744 = arith.select %12, %742, %743 : vector<8x128xi1>, vector<8x128xf32>
    %cst_490 = arith.constant -0.0407712311 : f32
    %cst_491 = arith.constant -0.0470008142 : f32
    %745 = vector.broadcast %cst_490 : f32 to vector<8x128xf32>
    %746 = vector.broadcast %cst_491 : f32 to vector<8x128xf32>
    %747 = arith.select %12, %745, %746 : vector<8x128xi1>, vector<8x128xf32>
    %cst_492 = arith.constant -0.0283131991 : f32
    %cst_493 = arith.constant -0.0345420465 : f32
    %748 = vector.broadcast %cst_492 : f32 to vector<8x128xf32>
    %749 = vector.broadcast %cst_493 : f32 to vector<8x128xf32>
    %750 = arith.select %12, %748, %749 : vector<8x128xi1>, vector<8x128xf32>
    %cst_494 = arith.constant -0.0158562791 : f32
    %cst_495 = arith.constant -0.022084631 : f32
    %751 = vector.broadcast %cst_494 : f32 to vector<8x128xf32>
    %752 = vector.broadcast %cst_495 : f32 to vector<8x128xf32>
    %753 = arith.select %12, %751, %752 : vector<8x128xi1>, vector<8x128xf32>
    %cst_496 = arith.constant -0.00339998584 : f32
    %cst_497 = arith.constant -0.00962808449 : f32
    %754 = vector.broadcast %cst_496 : f32 to vector<8x128xf32>
    %755 = vector.broadcast %cst_497 : f32 to vector<8x128xf32>
    %756 = arith.select %12, %754, %755 : vector<8x128xi1>, vector<8x128xf32>
    %cst_498 = arith.constant 0.00905616302 : f32
    %cst_499 = arith.constant 0.00282807625 : f32
    %757 = vector.broadcast %cst_498 : f32 to vector<8x128xf32>
    %758 = vector.broadcast %cst_499 : f32 to vector<8x128xf32>
    %759 = arith.select %12, %757, %758 : vector<8x128xi1>, vector<8x128xf32>
    %cst_500 = arith.constant 0.0215126518 : f32
    %cst_501 = arith.constant 0.0152843343 : f32
    %760 = vector.broadcast %cst_500 : f32 to vector<8x128xf32>
    %761 = vector.broadcast %cst_501 : f32 to vector<8x128xf32>
    %762 = arith.select %12, %760, %761 : vector<8x128xi1>, vector<8x128xf32>
    %cst_502 = arith.constant 0.0339699611 : f32
    %cst_503 = arith.constant 0.0277411733 : f32
    %763 = vector.broadcast %cst_502 : f32 to vector<8x128xf32>
    %764 = vector.broadcast %cst_503 : f32 to vector<8x128xf32>
    %765 = arith.select %12, %763, %764 : vector<8x128xi1>, vector<8x128xf32>
    %cst_504 = arith.constant 0.0464285798 : f32
    %cst_505 = arith.constant 0.0401990786 : f32
    %766 = vector.broadcast %cst_504 : f32 to vector<8x128xf32>
    %767 = vector.broadcast %cst_505 : f32 to vector<8x128xf32>
    %768 = arith.select %12, %766, %767 : vector<8x128xi1>, vector<8x128xf32>
    %cst_506 = arith.constant 0.0588889867 : f32
    %cst_507 = arith.constant 0.0526585281 : f32
    %769 = vector.broadcast %cst_506 : f32 to vector<8x128xf32>
    %770 = vector.broadcast %cst_507 : f32 to vector<8x128xf32>
    %771 = arith.select %12, %769, %770 : vector<8x128xi1>, vector<8x128xf32>
    %cst_508 = arith.constant 0.0713516697 : f32
    %cst_509 = arith.constant 0.0651200115 : f32
    %772 = vector.broadcast %cst_508 : f32 to vector<8x128xf32>
    %773 = vector.broadcast %cst_509 : f32 to vector<8x128xf32>
    %774 = arith.select %12, %772, %773 : vector<8x128xi1>, vector<8x128xf32>
    %cst_510 = arith.constant 0.0838171095 : f32
    %cst_511 = arith.constant 0.0775840133 : f32
    %775 = vector.broadcast %cst_510 : f32 to vector<8x128xf32>
    %776 = vector.broadcast %cst_511 : f32 to vector<8x128xf32>
    %777 = arith.select %12, %775, %776 : vector<8x128xi1>, vector<8x128xf32>
    %cst_512 = arith.constant 0.0962857902 : f32
    %cst_513 = arith.constant 0.0900510177 : f32
    %778 = vector.broadcast %cst_512 : f32 to vector<8x128xf32>
    %779 = vector.broadcast %cst_513 : f32 to vector<8x128xf32>
    %780 = arith.select %12, %778, %779 : vector<8x128xi1>, vector<8x128xf32>
    %cst_514 = arith.constant 0.108758204 : f32
    %cst_515 = arith.constant 0.102521501 : f32
    %781 = vector.broadcast %cst_514 : f32 to vector<8x128xf32>
    %782 = vector.broadcast %cst_515 : f32 to vector<8x128xf32>
    %783 = arith.select %12, %781, %782 : vector<8x128xi1>, vector<8x128xf32>
    %cst_516 = arith.constant 0.121234834 : f32
    %cst_517 = arith.constant 0.114995964 : f32
    %784 = vector.broadcast %cst_516 : f32 to vector<8x128xf32>
    %785 = vector.broadcast %cst_517 : f32 to vector<8x128xf32>
    %786 = arith.select %12, %784, %785 : vector<8x128xi1>, vector<8x128xf32>
    %cst_518 = arith.constant 0.133716166 : f32
    %cst_519 = arith.constant 0.127474889 : f32
    %787 = vector.broadcast %cst_518 : f32 to vector<8x128xf32>
    %788 = vector.broadcast %cst_519 : f32 to vector<8x128xf32>
    %789 = arith.select %12, %787, %788 : vector<8x128xi1>, vector<8x128xf32>
    %cst_520 = arith.constant 0.146202698 : f32
    %cst_521 = arith.constant 0.139958754 : f32
    %790 = vector.broadcast %cst_520 : f32 to vector<8x128xf32>
    %791 = vector.broadcast %cst_521 : f32 to vector<8x128xf32>
    %792 = arith.select %12, %790, %791 : vector<8x128xi1>, vector<8x128xf32>
    %cst_522 = arith.constant 0.158694893 : f32
    %cst_523 = arith.constant 0.152448058 : f32
    %793 = vector.broadcast %cst_522 : f32 to vector<8x128xf32>
    %794 = vector.broadcast %cst_523 : f32 to vector<8x128xf32>
    %795 = arith.select %12, %793, %794 : vector<8x128xi1>, vector<8x128xf32>
    %cst_524 = arith.constant 0.171193272 : f32
    %cst_525 = arith.constant 0.164943278 : f32
    %796 = vector.broadcast %cst_524 : f32 to vector<8x128xf32>
    %797 = vector.broadcast %cst_525 : f32 to vector<8x128xf32>
    %798 = arith.select %12, %796, %797 : vector<8x128xi1>, vector<8x128xf32>
    %cst_526 = arith.constant 0.183698311 : f32
    %cst_527 = arith.constant 0.177444935 : f32
    %799 = vector.broadcast %cst_526 : f32 to vector<8x128xf32>
    %800 = vector.broadcast %cst_527 : f32 to vector<8x128xf32>
    %801 = arith.select %12, %799, %800 : vector<8x128xi1>, vector<8x128xf32>
    %cst_528 = arith.constant 0.196210504 : f32
    %cst_529 = arith.constant 0.189953491 : f32
    %802 = vector.broadcast %cst_528 : f32 to vector<8x128xf32>
    %803 = vector.broadcast %cst_529 : f32 to vector<8x128xf32>
    %804 = arith.select %12, %802, %803 : vector<8x128xi1>, vector<8x128xf32>
    %cst_530 = arith.constant 0.208730355 : f32
    %cst_531 = arith.constant 0.202469438 : f32
    %805 = vector.broadcast %cst_530 : f32 to vector<8x128xf32>
    %806 = vector.broadcast %cst_531 : f32 to vector<8x128xf32>
    %807 = arith.select %12, %805, %806 : vector<8x128xi1>, vector<8x128xf32>
    %cst_532 = arith.constant 0.221258342 : f32
    %cst_533 = arith.constant 0.214993298 : f32
    %808 = vector.broadcast %cst_532 : f32 to vector<8x128xf32>
    %809 = vector.broadcast %cst_533 : f32 to vector<8x128xf32>
    %810 = arith.select %12, %808, %809 : vector<8x128xi1>, vector<8x128xf32>
    %cst_534 = arith.constant 0.233794972 : f32
    %cst_535 = arith.constant 0.227525547 : f32
    %811 = vector.broadcast %cst_534 : f32 to vector<8x128xf32>
    %812 = vector.broadcast %cst_535 : f32 to vector<8x128xf32>
    %813 = arith.select %12, %811, %812 : vector<8x128xi1>, vector<8x128xf32>
    %cst_536 = arith.constant 0.246340752 : f32
    %cst_537 = arith.constant 0.240066692 : f32
    %814 = vector.broadcast %cst_536 : f32 to vector<8x128xf32>
    %815 = vector.broadcast %cst_537 : f32 to vector<8x128xf32>
    %816 = arith.select %12, %814, %815 : vector<8x128xi1>, vector<8x128xf32>
    %cst_538 = arith.constant 0.258896172 : f32
    %cst_539 = arith.constant 0.25261721 : f32
    %817 = vector.broadcast %cst_538 : f32 to vector<8x128xf32>
    %818 = vector.broadcast %cst_539 : f32 to vector<8x128xf32>
    %819 = arith.select %12, %817, %818 : vector<8x128xi1>, vector<8x128xf32>
    %cst_540 = arith.constant 0.271461725 : f32
    %cst_541 = arith.constant 0.265177637 : f32
    %820 = vector.broadcast %cst_540 : f32 to vector<8x128xf32>
    %821 = vector.broadcast %cst_541 : f32 to vector<8x128xf32>
    %822 = arith.select %12, %820, %821 : vector<8x128xi1>, vector<8x128xf32>
    %cst_542 = arith.constant 0.284037948 : f32
    %cst_543 = arith.constant 0.277748466 : f32
    %823 = vector.broadcast %cst_542 : f32 to vector<8x128xf32>
    %824 = vector.broadcast %cst_543 : f32 to vector<8x128xf32>
    %825 = arith.select %12, %823, %824 : vector<8x128xi1>, vector<8x128xf32>
    %cst_544 = arith.constant 0.296625316 : f32
    %cst_545 = arith.constant 0.290330201 : f32
    %826 = vector.broadcast %cst_544 : f32 to vector<8x128xf32>
    %827 = vector.broadcast %cst_545 : f32 to vector<8x128xf32>
    %828 = arith.select %12, %826, %827 : vector<8x128xi1>, vector<8x128xf32>
    %cst_546 = arith.constant 0.309224337 : f32
    %cst_547 = arith.constant 0.302923322 : f32
    %829 = vector.broadcast %cst_546 : f32 to vector<8x128xf32>
    %830 = vector.broadcast %cst_547 : f32 to vector<8x128xf32>
    %831 = arith.select %12, %829, %830 : vector<8x128xi1>, vector<8x128xf32>
    %cst_548 = arith.constant 0.321835548 : f32
    %cst_549 = arith.constant 0.315528393 : f32
    %832 = vector.broadcast %cst_548 : f32 to vector<8x128xf32>
    %833 = vector.broadcast %cst_549 : f32 to vector<8x128xf32>
    %834 = arith.select %12, %832, %833 : vector<8x128xi1>, vector<8x128xf32>
    %cst_550 = arith.constant 0.334459454 : f32
    %cst_551 = arith.constant 0.328145891 : f32
    %835 = vector.broadcast %cst_550 : f32 to vector<8x128xf32>
    %836 = vector.broadcast %cst_551 : f32 to vector<8x128xf32>
    %837 = arith.select %12, %835, %836 : vector<8x128xi1>, vector<8x128xf32>
    %cst_552 = arith.constant 0.347096562 : f32
    %cst_553 = arith.constant 0.340776324 : f32
    %838 = vector.broadcast %cst_552 : f32 to vector<8x128xf32>
    %839 = vector.broadcast %cst_553 : f32 to vector<8x128xf32>
    %840 = arith.select %12, %838, %839 : vector<8x128xi1>, vector<8x128xf32>
    %cst_554 = arith.constant 0.35974738 : f32
    %cst_555 = arith.constant 0.353420228 : f32
    %841 = vector.broadcast %cst_554 : f32 to vector<8x128xf32>
    %842 = vector.broadcast %cst_555 : f32 to vector<8x128xf32>
    %843 = arith.select %12, %841, %842 : vector<8x128xi1>, vector<8x128xf32>
    %cst_556 = arith.constant 0.372412473 : f32
    %cst_557 = arith.constant 0.366078109 : f32
    %844 = vector.broadcast %cst_556 : f32 to vector<8x128xf32>
    %845 = vector.broadcast %cst_557 : f32 to vector<8x128xf32>
    %846 = arith.select %12, %844, %845 : vector<8x128xi1>, vector<8x128xf32>
    %cst_558 = arith.constant 0.385092318 : f32
    %cst_559 = arith.constant 0.378750533 : f32
    %847 = vector.broadcast %cst_558 : f32 to vector<8x128xf32>
    %848 = vector.broadcast %cst_559 : f32 to vector<8x128xf32>
    %849 = arith.select %12, %847, %848 : vector<8x128xi1>, vector<8x128xf32>
    %cst_560 = arith.constant 0.397787482 : f32
    %cst_561 = arith.constant 0.391437948 : f32
    %850 = vector.broadcast %cst_560 : f32 to vector<8x128xf32>
    %851 = vector.broadcast %cst_561 : f32 to vector<8x128xf32>
    %852 = arith.select %12, %850, %851 : vector<8x128xi1>, vector<8x128xf32>
    %cst_562 = arith.constant 0.41049847 : f32
    %cst_563 = arith.constant 0.404140979 : f32
    %853 = vector.broadcast %cst_562 : f32 to vector<8x128xf32>
    %854 = vector.broadcast %cst_563 : f32 to vector<8x128xf32>
    %855 = arith.select %12, %853, %854 : vector<8x128xi1>, vector<8x128xf32>
    %cst_564 = arith.constant 0.42322582 : f32
    %cst_565 = arith.constant 0.416860074 : f32
    %856 = vector.broadcast %cst_564 : f32 to vector<8x128xf32>
    %857 = vector.broadcast %cst_565 : f32 to vector<8x128xf32>
    %858 = arith.select %12, %856, %857 : vector<8x128xi1>, vector<8x128xf32>
    %cst_566 = arith.constant 0.435970068 : f32
    %cst_567 = arith.constant 0.429595798 : f32
    %859 = vector.broadcast %cst_566 : f32 to vector<8x128xf32>
    %860 = vector.broadcast %cst_567 : f32 to vector<8x128xf32>
    %861 = arith.select %12, %859, %860 : vector<8x128xi1>, vector<8x128xf32>
    %cst_568 = arith.constant 0.44873178 : f32
    %cst_569 = arith.constant 0.442348719 : f32
    %862 = vector.broadcast %cst_568 : f32 to vector<8x128xf32>
    %863 = vector.broadcast %cst_569 : f32 to vector<8x128xf32>
    %864 = arith.select %12, %862, %863 : vector<8x128xi1>, vector<8x128xf32>
    %cst_570 = arith.constant 0.461511463 : f32
    %cst_571 = arith.constant 0.455119342 : f32
    %865 = vector.broadcast %cst_570 : f32 to vector<8x128xf32>
    %866 = vector.broadcast %cst_571 : f32 to vector<8x128xf32>
    %867 = arith.select %12, %865, %866 : vector<8x128xi1>, vector<8x128xf32>
    %cst_572 = arith.constant 0.474309683 : f32
    %cst_573 = arith.constant 0.467908204 : f32
    %868 = vector.broadcast %cst_572 : f32 to vector<8x128xf32>
    %869 = vector.broadcast %cst_573 : f32 to vector<8x128xf32>
    %870 = arith.select %12, %868, %869 : vector<8x128xi1>, vector<8x128xf32>
    %cst_574 = arith.constant 0.487126976 : f32
    %cst_575 = arith.constant 0.480715901 : f32
    %871 = vector.broadcast %cst_574 : f32 to vector<8x128xf32>
    %872 = vector.broadcast %cst_575 : f32 to vector<8x128xf32>
    %873 = arith.select %12, %871, %872 : vector<8x128xi1>, vector<8x128xf32>
    %cst_576 = arith.constant 0.499963939 : f32
    %cst_577 = arith.constant 0.493542969 : f32
    %874 = vector.broadcast %cst_576 : f32 to vector<8x128xf32>
    %875 = vector.broadcast %cst_577 : f32 to vector<8x128xf32>
    %876 = arith.select %12, %874, %875 : vector<8x128xi1>, vector<8x128xf32>
    %cst_578 = arith.constant 0.512821078 : f32
    %cst_579 = arith.constant 0.506389916 : f32
    %877 = vector.broadcast %cst_578 : f32 to vector<8x128xf32>
    %878 = vector.broadcast %cst_579 : f32 to vector<8x128xf32>
    %879 = arith.select %12, %877, %878 : vector<8x128xi1>, vector<8x128xf32>
    %cst_580 = arith.constant 5.256990e-01 : f32
    %cst_581 = arith.constant 0.519257426 : f32
    %880 = vector.broadcast %cst_580 : f32 to vector<8x128xf32>
    %881 = vector.broadcast %cst_581 : f32 to vector<8x128xf32>
    %882 = arith.select %12, %880, %881 : vector<8x128xi1>, vector<8x128xf32>
    %cst_582 = arith.constant 0.538598239 : f32
    %cst_583 = arith.constant 0.532145917 : f32
    %883 = vector.broadcast %cst_582 : f32 to vector<8x128xf32>
    %884 = vector.broadcast %cst_583 : f32 to vector<8x128xf32>
    %885 = arith.select %12, %883, %884 : vector<8x128xi1>, vector<8x128xf32>
    %cst_584 = arith.constant 0.551519394 : f32
    %cst_585 = arith.constant 0.545056045 : f32
    %886 = vector.broadcast %cst_584 : f32 to vector<8x128xf32>
    %887 = vector.broadcast %cst_585 : f32 to vector<8x128xf32>
    %888 = arith.select %12, %886, %887 : vector<8x128xi1>, vector<8x128xf32>
    %cst_586 = arith.constant 5.644630e-01 : f32
    %cst_587 = arith.constant 0.557988405 : f32
    %889 = vector.broadcast %cst_586 : f32 to vector<8x128xf32>
    %890 = vector.broadcast %cst_587 : f32 to vector<8x128xf32>
    %891 = arith.select %12, %889, %890 : vector<8x128xi1>, vector<8x128xf32>
    %cst_588 = arith.constant 0.577429771 : f32
    %cst_589 = arith.constant 0.570943475 : f32
    %892 = vector.broadcast %cst_588 : f32 to vector<8x128xf32>
    %893 = vector.broadcast %cst_589 : f32 to vector<8x128xf32>
    %894 = arith.select %12, %892, %893 : vector<8x128xi1>, vector<8x128xf32>
    %cst_590 = arith.constant 0.590420127 : f32
    %cst_591 = arith.constant 0.583921969 : f32
    %895 = vector.broadcast %cst_590 : f32 to vector<8x128xf32>
    %896 = vector.broadcast %cst_591 : f32 to vector<8x128xf32>
    %897 = arith.select %12, %895, %896 : vector<8x128xi1>, vector<8x128xf32>
    %cst_592 = arith.constant 0.603434741 : f32
    %cst_593 = arith.constant 0.596924365 : f32
    %898 = vector.broadcast %cst_592 : f32 to vector<8x128xf32>
    %899 = vector.broadcast %cst_593 : f32 to vector<8x128xf32>
    %900 = arith.select %12, %898, %899 : vector<8x128xi1>, vector<8x128xf32>
    %cst_594 = arith.constant 0.616474211 : f32
    %cst_595 = arith.constant 0.609951317 : f32
    %901 = vector.broadcast %cst_594 : f32 to vector<8x128xf32>
    %902 = vector.broadcast %cst_595 : f32 to vector<8x128xf32>
    %903 = arith.select %12, %901, %902 : vector<8x128xi1>, vector<8x128xf32>
    %cst_596 = arith.constant 0.629539072 : f32
    %cst_597 = arith.constant 0.623003423 : f32
    %904 = vector.broadcast %cst_596 : f32 to vector<8x128xf32>
    %905 = vector.broadcast %cst_597 : f32 to vector<8x128xf32>
    %906 = arith.select %12, %904, %905 : vector<8x128xi1>, vector<8x128xf32>
    %cst_598 = arith.constant 0.64263004 : f32
    %cst_599 = arith.constant 0.636081278 : f32
    %907 = vector.broadcast %cst_598 : f32 to vector<8x128xf32>
    %908 = vector.broadcast %cst_599 : f32 to vector<8x128xf32>
    %909 = arith.select %12, %907, %908 : vector<8x128xi1>, vector<8x128xf32>
    %cst_600 = arith.constant 0.655747711 : f32
    %cst_601 = arith.constant 0.649185478 : f32
    %910 = vector.broadcast %cst_600 : f32 to vector<8x128xf32>
    %911 = vector.broadcast %cst_601 : f32 to vector<8x128xf32>
    %912 = arith.select %12, %910, %911 : vector<8x128xi1>, vector<8x128xf32>
    %cst_602 = arith.constant 0.668892622 : f32
    %cst_603 = arith.constant 0.66231668 : f32
    %913 = vector.broadcast %cst_602 : f32 to vector<8x128xf32>
    %914 = vector.broadcast %cst_603 : f32 to vector<8x128xf32>
    %915 = arith.select %12, %913, %914 : vector<8x128xi1>, vector<8x128xf32>
    %cst_604 = arith.constant 0.682065427 : f32
    %cst_605 = arith.constant 0.675475478 : f32
    %916 = vector.broadcast %cst_604 : f32 to vector<8x128xf32>
    %917 = vector.broadcast %cst_605 : f32 to vector<8x128xf32>
    %918 = arith.select %12, %916, %917 : vector<8x128xi1>, vector<8x128xf32>
    %cst_606 = arith.constant 0.695266843 : f32
    %cst_607 = arith.constant 0.688662529 : f32
    %919 = vector.broadcast %cst_606 : f32 to vector<8x128xf32>
    %920 = vector.broadcast %cst_607 : f32 to vector<8x128xf32>
    %921 = arith.select %12, %919, %920 : vector<8x128xi1>, vector<8x128xf32>
    %cst_608 = arith.constant 0.708497405 : f32
    %cst_609 = arith.constant 0.701878428 : f32
    %922 = vector.broadcast %cst_608 : f32 to vector<8x128xf32>
    %923 = vector.broadcast %cst_609 : f32 to vector<8x128xf32>
    %924 = arith.select %12, %922, %923 : vector<8x128xi1>, vector<8x128xf32>
    %cst_610 = arith.constant 0.721757829 : f32
    %cst_611 = arith.constant 0.715123832 : f32
    %925 = vector.broadcast %cst_610 : f32 to vector<8x128xf32>
    %926 = vector.broadcast %cst_611 : f32 to vector<8x128xf32>
    %927 = arith.select %12, %925, %926 : vector<8x128xi1>, vector<8x128xf32>
    %cst_612 = arith.constant 0.735048711 : f32
    %cst_613 = arith.constant 0.728399396 : f32
    %928 = vector.broadcast %cst_612 : f32 to vector<8x128xf32>
    %929 = vector.broadcast %cst_613 : f32 to vector<8x128xf32>
    %930 = arith.select %12, %928, %929 : vector<8x128xi1>, vector<8x128xf32>
    %cst_614 = arith.constant 0.748370707 : f32
    %cst_615 = arith.constant 0.741705775 : f32
    %931 = vector.broadcast %cst_614 : f32 to vector<8x128xf32>
    %932 = vector.broadcast %cst_615 : f32 to vector<8x128xf32>
    %933 = arith.select %12, %931, %932 : vector<8x128xi1>, vector<8x128xf32>
    %cst_616 = arith.constant 0.761724531 : f32
    %cst_617 = arith.constant 0.755043626 : f32
    %934 = vector.broadcast %cst_616 : f32 to vector<8x128xf32>
    %935 = vector.broadcast %cst_617 : f32 to vector<8x128xf32>
    %936 = arith.select %12, %934, %935 : vector<8x128xi1>, vector<8x128xf32>
    %cst_618 = arith.constant 0.77511084 : f32
    %cst_619 = arith.constant 0.768413603 : f32
    %937 = vector.broadcast %cst_618 : f32 to vector<8x128xf32>
    %938 = vector.broadcast %cst_619 : f32 to vector<8x128xf32>
    %939 = arith.select %12, %937, %938 : vector<8x128xi1>, vector<8x128xf32>
    %cst_620 = arith.constant 0.78853029 : f32
    %cst_621 = arith.constant 0.781816363 : f32
    %940 = vector.broadcast %cst_620 : f32 to vector<8x128xf32>
    %941 = vector.broadcast %cst_621 : f32 to vector<8x128xf32>
    %942 = arith.select %12, %940, %941 : vector<8x128xi1>, vector<8x128xf32>
    %cst_622 = arith.constant 0.801983654 : f32
    %cst_623 = arith.constant 0.79525268 : f32
    %943 = vector.broadcast %cst_622 : f32 to vector<8x128xf32>
    %944 = vector.broadcast %cst_623 : f32 to vector<8x128xf32>
    %945 = arith.select %12, %943, %944 : vector<8x128xi1>, vector<8x128xf32>
    %cst_624 = arith.constant 0.81547147 : f32
    %cst_625 = arith.constant 0.808723211 : f32
    %946 = vector.broadcast %cst_624 : f32 to vector<8x128xf32>
    %947 = vector.broadcast %cst_625 : f32 to vector<8x128xf32>
    %948 = arith.select %12, %946, %947 : vector<8x128xi1>, vector<8x128xf32>
    %cst_626 = arith.constant 0.828994572 : f32
    %cst_627 = arith.constant 0.82222861 : f32
    %949 = vector.broadcast %cst_626 : f32 to vector<8x128xf32>
    %950 = vector.broadcast %cst_627 : f32 to vector<8x128xf32>
    %951 = arith.select %12, %949, %950 : vector<8x128xi1>, vector<8x128xf32>
    %cst_628 = arith.constant 0.842553675 : f32
    %cst_629 = arith.constant 0.835769593 : f32
    %952 = vector.broadcast %cst_628 : f32 to vector<8x128xf32>
    %953 = vector.broadcast %cst_629 : f32 to vector<8x128xf32>
    %954 = arith.select %12, %952, %953 : vector<8x128xi1>, vector<8x128xf32>
    %cst_630 = arith.constant 0.856149375 : f32
    %cst_631 = arith.constant 0.849346876 : f32
    %955 = vector.broadcast %cst_630 : f32 to vector<8x128xf32>
    %956 = vector.broadcast %cst_631 : f32 to vector<8x128xf32>
    %957 = arith.select %12, %955, %956 : vector<8x128xi1>, vector<8x128xf32>
    %cst_632 = arith.constant 0.869782567 : f32
    %cst_633 = arith.constant 0.862961232 : f32
    %958 = vector.broadcast %cst_632 : f32 to vector<8x128xf32>
    %959 = vector.broadcast %cst_633 : f32 to vector<8x128xf32>
    %960 = arith.select %12, %958, %959 : vector<8x128xi1>, vector<8x128xf32>
    %cst_634 = arith.constant 0.883453845 : f32
    %cst_635 = arith.constant 0.876613379 : f32
    %961 = vector.broadcast %cst_634 : f32 to vector<8x128xf32>
    %962 = vector.broadcast %cst_635 : f32 to vector<8x128xf32>
    %963 = arith.select %12, %961, %962 : vector<8x128xi1>, vector<8x128xf32>
    %cst_636 = arith.constant 0.897164046 : f32
    %cst_637 = arith.constant 8.903040e-01 : f32
    %964 = vector.broadcast %cst_636 : f32 to vector<8x128xf32>
    %965 = vector.broadcast %cst_637 : f32 to vector<8x128xf32>
    %966 = arith.select %12, %964, %965 : vector<8x128xi1>, vector<8x128xf32>
    %cst_638 = arith.constant 0.910913884 : f32
    %cst_639 = arith.constant 0.904033958 : f32
    %967 = vector.broadcast %cst_638 : f32 to vector<8x128xf32>
    %968 = vector.broadcast %cst_639 : f32 to vector<8x128xf32>
    %969 = arith.select %12, %967, %968 : vector<8x128xi1>, vector<8x128xf32>
    %cst_640 = arith.constant 0.924704134 : f32
    %cst_641 = arith.constant 0.917803883 : f32
    %970 = vector.broadcast %cst_640 : f32 to vector<8x128xf32>
    %971 = vector.broadcast %cst_641 : f32 to vector<8x128xf32>
    %972 = arith.select %12, %970, %971 : vector<8x128xi1>, vector<8x128xf32>
    %cst_642 = arith.constant 0.938535571 : f32
    %cst_643 = arith.constant 0.931614696 : f32
    %973 = vector.broadcast %cst_642 : f32 to vector<8x128xf32>
    %974 = vector.broadcast %cst_643 : f32 to vector<8x128xf32>
    %975 = arith.select %12, %973, %974 : vector<8x128xi1>, vector<8x128xf32>
    %cst_644 = arith.constant 9.524090e-01 : f32
    %cst_645 = arith.constant 0.945466995 : f32
    %976 = vector.broadcast %cst_644 : f32 to vector<8x128xf32>
    %977 = vector.broadcast %cst_645 : f32 to vector<8x128xf32>
    %978 = arith.select %12, %976, %977 : vector<8x128xi1>, vector<8x128xf32>
    %cst_646 = arith.constant 0.966325223 : f32
    %cst_647 = arith.constant 0.959361732 : f32
    %979 = vector.broadcast %cst_646 : f32 to vector<8x128xf32>
    %980 = vector.broadcast %cst_647 : f32 to vector<8x128xf32>
    %981 = arith.select %12, %979, %980 : vector<8x128xi1>, vector<8x128xf32>
    %cst_648 = arith.constant 0.980285048 : f32
    %cst_649 = arith.constant 0.973299622 : f32
    %982 = vector.broadcast %cst_648 : f32 to vector<8x128xf32>
    %983 = vector.broadcast %cst_649 : f32 to vector<8x128xf32>
    %984 = arith.select %12, %982, %983 : vector<8x128xi1>, vector<8x128xf32>
    %cst_650 = arith.constant 0.994289219 : f32
    %cst_651 = arith.constant 0.98728156 : f32
    %985 = vector.broadcast %cst_650 : f32 to vector<8x128xf32>
    %986 = vector.broadcast %cst_651 : f32 to vector<8x128xf32>
    %987 = arith.select %12, %985, %986 : vector<8x128xi1>, vector<8x128xf32>
    %cst_652 = arith.constant 1.00833869 : f32
    %cst_653 = arith.constant 1.0013082 : f32
    %988 = vector.broadcast %cst_652 : f32 to vector<8x128xf32>
    %989 = vector.broadcast %cst_653 : f32 to vector<8x128xf32>
    %990 = arith.select %12, %988, %989 : vector<8x128xi1>, vector<8x128xf32>
    %cst_654 = arith.constant 1.02243423 : f32
    %cst_655 = arith.constant 1.01538062 : f32
    %991 = vector.broadcast %cst_654 : f32 to vector<8x128xf32>
    %992 = vector.broadcast %cst_655 : f32 to vector<8x128xf32>
    %993 = arith.select %12, %991, %992 : vector<8x128xi1>, vector<8x128xf32>
    %cst_656 = arith.constant 1.03657663 : f32
    %cst_657 = arith.constant 1.02949953 : f32
    %994 = vector.broadcast %cst_656 : f32 to vector<8x128xf32>
    %995 = vector.broadcast %cst_657 : f32 to vector<8x128xf32>
    %996 = arith.select %12, %994, %995 : vector<8x128xi1>, vector<8x128xf32>
    %cst_658 = arith.constant 1.05076683 : f32
    %cst_659 = arith.constant 1.04366577 : f32
    %997 = vector.broadcast %cst_658 : f32 to vector<8x128xf32>
    %998 = vector.broadcast %cst_659 : f32 to vector<8x128xf32>
    %999 = arith.select %12, %997, %998 : vector<8x128xi1>, vector<8x128xf32>
    %cst_660 = arith.constant 1.06500578 : f32
    %cst_661 = arith.constant 1.05788016 : f32
    %1000 = vector.broadcast %cst_660 : f32 to vector<8x128xf32>
    %1001 = vector.broadcast %cst_661 : f32 to vector<8x128xf32>
    %1002 = arith.select %12, %1000, %1001 : vector<8x128xi1>, vector<8x128xf32>
    %cst_662 = arith.constant 1.0792942 : f32
    %cst_663 = arith.constant 1.07214379 : f32
    %1003 = vector.broadcast %cst_662 : f32 to vector<8x128xf32>
    %1004 = vector.broadcast %cst_663 : f32 to vector<8x128xf32>
    %1005 = arith.select %12, %1003, %1004 : vector<8x128xi1>, vector<8x128xf32>
    %cst_664 = arith.constant 1.09363317 : f32
    %cst_665 = arith.constant 1.08645737 : f32
    %1006 = vector.broadcast %cst_664 : f32 to vector<8x128xf32>
    %1007 = vector.broadcast %cst_665 : f32 to vector<8x128xf32>
    %1008 = arith.select %12, %1006, %1007 : vector<8x128xi1>, vector<8x128xf32>
    %cst_666 = arith.constant 1.10802352 : f32
    %cst_667 = arith.constant 1.10082185 : f32
    %1009 = vector.broadcast %cst_666 : f32 to vector<8x128xf32>
    %1010 = vector.broadcast %cst_667 : f32 to vector<8x128xf32>
    %1011 = arith.select %12, %1009, %1010 : vector<8x128xi1>, vector<8x128xf32>
    %cst_668 = arith.constant 1.12246621 : f32
    %cst_669 = arith.constant 1.11523831 : f32
    %1012 = vector.broadcast %cst_668 : f32 to vector<8x128xf32>
    %1013 = vector.broadcast %cst_669 : f32 to vector<8x128xf32>
    %1014 = arith.select %12, %1012, %1013 : vector<8x128xi1>, vector<8x128xf32>
    %cst_670 = arith.constant 1.13696206 : f32
    %cst_671 = arith.constant 1.12970746 : f32
    %1015 = vector.broadcast %cst_670 : f32 to vector<8x128xf32>
    %1016 = vector.broadcast %cst_671 : f32 to vector<8x128xf32>
    %1017 = arith.select %12, %1015, %1016 : vector<8x128xi1>, vector<8x128xf32>
    %cst_672 = arith.constant 1.15151227 : f32
    %cst_673 = arith.constant 1.14423037 : f32
    %1018 = vector.broadcast %cst_672 : f32 to vector<8x128xf32>
    %1019 = vector.broadcast %cst_673 : f32 to vector<8x128xf32>
    %1020 = arith.select %12, %1018, %1019 : vector<8x128xi1>, vector<8x128xf32>
    %cst_674 = arith.constant 1.16611755 : f32
    %cst_675 = arith.constant 1.15880799 : f32
    %1021 = vector.broadcast %cst_674 : f32 to vector<8x128xf32>
    %1022 = vector.broadcast %cst_675 : f32 to vector<8x128xf32>
    %1023 = arith.select %12, %1021, %1022 : vector<8x128xi1>, vector<8x128xf32>
    %cst_676 = arith.constant 1.1807791 : f32
    %cst_677 = arith.constant 1.17344129 : f32
    %1024 = vector.broadcast %cst_676 : f32 to vector<8x128xf32>
    %1025 = vector.broadcast %cst_677 : f32 to vector<8x128xf32>
    %1026 = arith.select %12, %1024, %1025 : vector<8x128xi1>, vector<8x128xf32>
    %cst_678 = arith.constant 1.19549787 : f32
    %cst_679 = arith.constant 1.18813133 : f32
    %1027 = vector.broadcast %cst_678 : f32 to vector<8x128xf32>
    %1028 = vector.broadcast %cst_679 : f32 to vector<8x128xf32>
    %1029 = arith.select %12, %1027, %1028 : vector<8x128xi1>, vector<8x128xf32>
    %cst_680 = arith.constant 1.21027482 : f32
    %cst_681 = arith.constant 1.20287907 : f32
    %1030 = vector.broadcast %cst_680 : f32 to vector<8x128xf32>
    %1031 = vector.broadcast %cst_681 : f32 to vector<8x128xf32>
    %1032 = arith.select %12, %1030, %1031 : vector<8x128xi1>, vector<8x128xf32>
    %cst_682 = arith.constant 1.22511113 : f32
    %cst_683 = arith.constant 1.21768546 : f32
    %1033 = vector.broadcast %cst_682 : f32 to vector<8x128xf32>
    %1034 = vector.broadcast %cst_683 : f32 to vector<8x128xf32>
    %1035 = arith.select %12, %1033, %1034 : vector<8x128xi1>, vector<8x128xf32>
    %cst_684 = arith.constant 1.24000764 : f32
    %cst_685 = arith.constant 1.23255181 : f32
    %1036 = vector.broadcast %cst_684 : f32 to vector<8x128xf32>
    %1037 = vector.broadcast %cst_685 : f32 to vector<8x128xf32>
    %1038 = arith.select %12, %1036, %1037 : vector<8x128xi1>, vector<8x128xf32>
    %cst_686 = arith.constant 1.25496554 : f32
    %cst_687 = arith.constant 1.24747884 : f32
    %1039 = vector.broadcast %cst_686 : f32 to vector<8x128xf32>
    %1040 = vector.broadcast %cst_687 : f32 to vector<8x128xf32>
    %1041 = arith.select %12, %1039, %1040 : vector<8x128xi1>, vector<8x128xf32>
    %cst_688 = arith.constant 1.26998603 : f32
    %cst_689 = arith.constant 1.26246798 : f32
    %1042 = vector.broadcast %cst_688 : f32 to vector<8x128xf32>
    %1043 = vector.broadcast %cst_689 : f32 to vector<8x128xf32>
    %1044 = arith.select %12, %1042, %1043 : vector<8x128xi1>, vector<8x128xf32>
    %cst_690 = arith.constant 1.28507006 : f32
    %cst_691 = arith.constant 1.27752006 : f32
    %1045 = vector.broadcast %cst_690 : f32 to vector<8x128xf32>
    %1046 = vector.broadcast %cst_691 : f32 to vector<8x128xf32>
    %1047 = arith.select %12, %1045, %1046 : vector<8x128xi1>, vector<8x128xf32>
    %cst_692 = arith.constant 1.30021882 : f32
    %cst_693 = arith.constant 1.29263628 : f32
    %1048 = vector.broadcast %cst_692 : f32 to vector<8x128xf32>
    %1049 = vector.broadcast %cst_693 : f32 to vector<8x128xf32>
    %1050 = arith.select %12, %1048, %1049 : vector<8x128xi1>, vector<8x128xf32>
    %cst_694 = arith.constant 1.3154335 : f32
    %cst_695 = arith.constant 1.30781794 : f32
    %1051 = vector.broadcast %cst_694 : f32 to vector<8x128xf32>
    %1052 = vector.broadcast %cst_695 : f32 to vector<8x128xf32>
    %1053 = arith.select %12, %1051, %1052 : vector<8x128xi1>, vector<8x128xf32>
    %cst_696 = arith.constant 1.33071518 : f32
    %cst_697 = arith.constant 1.32306588 : f32
    %1054 = vector.broadcast %cst_696 : f32 to vector<8x128xf32>
    %1055 = vector.broadcast %cst_697 : f32 to vector<8x128xf32>
    %1056 = arith.select %12, %1054, %1055 : vector<8x128xi1>, vector<8x128xf32>
    %cst_698 = arith.constant 1.34606516 : f32
    %cst_699 = arith.constant 1.33838165 : f32
    %1057 = vector.broadcast %cst_698 : f32 to vector<8x128xf32>
    %1058 = vector.broadcast %cst_699 : f32 to vector<8x128xf32>
    %1059 = arith.select %12, %1057, %1058 : vector<8x128xi1>, vector<8x128xf32>
    %cst_700 = arith.constant 1.36148465 : f32
    %cst_701 = arith.constant 1.3537662 : f32
    %1060 = vector.broadcast %cst_700 : f32 to vector<8x128xf32>
    %1061 = vector.broadcast %cst_701 : f32 to vector<8x128xf32>
    %1062 = arith.select %12, %1060, %1061 : vector<8x128xi1>, vector<8x128xf32>
    %cst_702 = arith.constant 1.3769747 : f32
    %cst_703 = arith.constant 1.36922073 : f32
    %1063 = vector.broadcast %cst_702 : f32 to vector<8x128xf32>
    %1064 = vector.broadcast %cst_703 : f32 to vector<8x128xf32>
    %1065 = arith.select %12, %1063, %1064 : vector<8x128xi1>, vector<8x128xf32>
    %cst_704 = arith.constant 1.39253676 : f32
    %cst_705 = arith.constant 1.38474667 : f32
    %1066 = vector.broadcast %cst_704 : f32 to vector<8x128xf32>
    %1067 = vector.broadcast %cst_705 : f32 to vector<8x128xf32>
    %1068 = arith.select %12, %1066, %1067 : vector<8x128xi1>, vector<8x128xf32>
    %cst_706 = arith.constant 1.40817213 : f32
    %cst_707 = arith.constant 1.40034521 : f32
    %1069 = vector.broadcast %cst_706 : f32 to vector<8x128xf32>
    %1070 = vector.broadcast %cst_707 : f32 to vector<8x128xf32>
    %1071 = arith.select %12, %1069, %1070 : vector<8x128xi1>, vector<8x128xf32>
    %cst_708 = arith.constant 1.42388201 : f32
    %cst_709 = arith.constant 1.41601765 : f32
    %1072 = vector.broadcast %cst_708 : f32 to vector<8x128xf32>
    %1073 = vector.broadcast %cst_709 : f32 to vector<8x128xf32>
    %1074 = arith.select %12, %1072, %1073 : vector<8x128xi1>, vector<8x128xf32>
    %cst_710 = arith.constant 1.4396677 : f32
    %cst_711 = arith.constant 1.4317652 : f32
    %1075 = vector.broadcast %cst_710 : f32 to vector<8x128xf32>
    %1076 = vector.broadcast %cst_711 : f32 to vector<8x128xf32>
    %1077 = arith.select %12, %1075, %1076 : vector<8x128xi1>, vector<8x128xf32>
    %cst_712 = arith.constant 1.45553064 : f32
    %cst_713 = arith.constant 1.4475894 : f32
    %1078 = vector.broadcast %cst_712 : f32 to vector<8x128xf32>
    %1079 = vector.broadcast %cst_713 : f32 to vector<8x128xf32>
    %1080 = arith.select %12, %1078, %1079 : vector<8x128xi1>, vector<8x128xf32>
    %cst_714 = arith.constant 1.47147214 : f32
    %cst_715 = arith.constant 1.46349144 : f32
    %1081 = vector.broadcast %cst_714 : f32 to vector<8x128xf32>
    %1082 = vector.broadcast %cst_715 : f32 to vector<8x128xf32>
    %1083 = arith.select %12, %1081, %1082 : vector<8x128xi1>, vector<8x128xf32>
    %cst_716 = arith.constant 1.48749363 : f32
    %cst_717 = arith.constant 1.47947288 : f32
    %1084 = vector.broadcast %cst_716 : f32 to vector<8x128xf32>
    %1085 = vector.broadcast %cst_717 : f32 to vector<8x128xf32>
    %1086 = arith.select %12, %1084, %1085 : vector<8x128xi1>, vector<8x128xf32>
    %cst_718 = arith.constant 1.50359666 : f32
    %cst_719 = arith.constant 1.4955349 : f32
    %1087 = vector.broadcast %cst_718 : f32 to vector<8x128xf32>
    %1088 = vector.broadcast %cst_719 : f32 to vector<8x128xf32>
    %1089 = arith.select %12, %1087, %1088 : vector<8x128xi1>, vector<8x128xf32>
    %cst_720 = arith.constant 1.51978254 : f32
    %cst_721 = arith.constant 1.51167917 : f32
    %1090 = vector.broadcast %cst_720 : f32 to vector<8x128xf32>
    %1091 = vector.broadcast %cst_721 : f32 to vector<8x128xf32>
    %1092 = arith.select %12, %1090, %1091 : vector<8x128xi1>, vector<8x128xf32>
    %cst_722 = arith.constant 1.53605282 : f32
    %cst_723 = arith.constant 1.52790713 : f32
    %1093 = vector.broadcast %cst_722 : f32 to vector<8x128xf32>
    %1094 = vector.broadcast %cst_723 : f32 to vector<8x128xf32>
    %1095 = arith.select %12, %1093, %1094 : vector<8x128xi1>, vector<8x128xf32>
    %cst_724 = arith.constant 1.55240905 : f32
    %cst_725 = arith.constant 1.54422021 : f32
    %1096 = vector.broadcast %cst_724 : f32 to vector<8x128xf32>
    %1097 = vector.broadcast %cst_725 : f32 to vector<8x128xf32>
    %1098 = arith.select %12, %1096, %1097 : vector<8x128xi1>, vector<8x128xf32>
    %cst_726 = arith.constant 1.56885278 : f32
    %cst_727 = arith.constant 1.560620e+00 : f32
    %1099 = vector.broadcast %cst_726 : f32 to vector<8x128xf32>
    %1100 = vector.broadcast %cst_727 : f32 to vector<8x128xf32>
    %1101 = arith.select %12, %1099, %1100 : vector<8x128xi1>, vector<8x128xf32>
    %cst_728 = arith.constant 1.58538556 : f32
    %cst_729 = arith.constant 1.57710791 : f32
    %1102 = vector.broadcast %cst_728 : f32 to vector<8x128xf32>
    %1103 = vector.broadcast %cst_729 : f32 to vector<8x128xf32>
    %1104 = arith.select %12, %1102, %1103 : vector<8x128xi1>, vector<8x128xf32>
    %cst_730 = arith.constant 1.60200906 : f32
    %cst_731 = arith.constant 1.59368587 : f32
    %1105 = vector.broadcast %cst_730 : f32 to vector<8x128xf32>
    %1106 = vector.broadcast %cst_731 : f32 to vector<8x128xf32>
    %1107 = arith.select %12, %1105, %1106 : vector<8x128xi1>, vector<8x128xf32>
    %cst_732 = arith.constant 1.61872482 : f32
    %cst_733 = arith.constant 1.61035526 : f32
    %1108 = vector.broadcast %cst_732 : f32 to vector<8x128xf32>
    %1109 = vector.broadcast %cst_733 : f32 to vector<8x128xf32>
    %1110 = arith.select %12, %1108, %1109 : vector<8x128xi1>, vector<8x128xf32>
    %cst_734 = arith.constant 1.63553464 : f32
    %cst_735 = arith.constant 1.62711787 : f32
    %1111 = vector.broadcast %cst_734 : f32 to vector<8x128xf32>
    %1112 = vector.broadcast %cst_735 : f32 to vector<8x128xf32>
    %1113 = arith.select %12, %1111, %1112 : vector<8x128xi1>, vector<8x128xf32>
    %cst_736 = arith.constant 1.65244019 : f32
    %cst_737 = arith.constant 1.64397526 : f32
    %1114 = vector.broadcast %cst_736 : f32 to vector<8x128xf32>
    %1115 = vector.broadcast %cst_737 : f32 to vector<8x128xf32>
    %1116 = arith.select %12, %1114, %1115 : vector<8x128xi1>, vector<8x128xf32>
    %cst_738 = arith.constant 1.66944325 : f32
    %cst_739 = arith.constant 1.66092932 : f32
    %1117 = vector.broadcast %cst_738 : f32 to vector<8x128xf32>
    %1118 = vector.broadcast %cst_739 : f32 to vector<8x128xf32>
    %1119 = arith.select %12, %1117, %1118 : vector<8x128xi1>, vector<8x128xf32>
    %cst_740 = arith.constant 1.68654549 : f32
    %cst_741 = arith.constant 1.67798185 : f32
    %1120 = vector.broadcast %cst_740 : f32 to vector<8x128xf32>
    %1121 = vector.broadcast %cst_741 : f32 to vector<8x128xf32>
    %1122 = arith.select %12, %1120, %1121 : vector<8x128xi1>, vector<8x128xf32>
    %cst_742 = arith.constant 1.70374906 : f32
    %cst_743 = arith.constant 1.69513452 : f32
    %1123 = vector.broadcast %cst_742 : f32 to vector<8x128xf32>
    %1124 = vector.broadcast %cst_743 : f32 to vector<8x128xf32>
    %1125 = arith.select %12, %1123, %1124 : vector<8x128xi1>, vector<8x128xf32>
    %cst_744 = arith.constant 1.72105551 : f32
    %cst_745 = arith.constant 1.71238935 : f32
    %1126 = vector.broadcast %cst_744 : f32 to vector<8x128xf32>
    %1127 = vector.broadcast %cst_745 : f32 to vector<8x128xf32>
    %1128 = arith.select %12, %1126, %1127 : vector<8x128xi1>, vector<8x128xf32>
    %cst_746 = arith.constant 1.73846698 : f32
    %cst_747 = arith.constant 1.72974801 : f32
    %1129 = vector.broadcast %cst_746 : f32 to vector<8x128xf32>
    %1130 = vector.broadcast %cst_747 : f32 to vector<8x128xf32>
    %1131 = arith.select %12, %1129, %1130 : vector<8x128xi1>, vector<8x128xf32>
    %cst_748 = arith.constant 1.75598538 : f32
    %cst_749 = arith.constant 1.74721265 : f32
    %1132 = vector.broadcast %cst_748 : f32 to vector<8x128xf32>
    %1133 = vector.broadcast %cst_749 : f32 to vector<8x128xf32>
    %1134 = arith.select %12, %1132, %1133 : vector<8x128xi1>, vector<8x128xf32>
    %cst_750 = arith.constant 1.77361262 : f32
    %cst_751 = arith.constant 1.76478529 : f32
    %1135 = vector.broadcast %cst_750 : f32 to vector<8x128xf32>
    %1136 = vector.broadcast %cst_751 : f32 to vector<8x128xf32>
    %1137 = arith.select %12, %1135, %1136 : vector<8x128xi1>, vector<8x128xf32>
    %cst_752 = arith.constant 1.79135084 : f32
    %cst_753 = arith.constant 1.78246772 : f32
    %1138 = vector.broadcast %cst_752 : f32 to vector<8x128xf32>
    %1139 = vector.broadcast %cst_753 : f32 to vector<8x128xf32>
    %1140 = arith.select %12, %1138, %1139 : vector<8x128xi1>, vector<8x128xf32>
    %cst_754 = arith.constant 1.80920219 : f32
    %cst_755 = arith.constant 1.80026221 : f32
    %1141 = vector.broadcast %cst_754 : f32 to vector<8x128xf32>
    %1142 = vector.broadcast %cst_755 : f32 to vector<8x128xf32>
    %1143 = arith.select %12, %1141, %1142 : vector<8x128xi1>, vector<8x128xf32>
    %cst_756 = arith.constant 1.8271687 : f32
    %cst_757 = arith.constant 1.81817091 : f32
    %1144 = vector.broadcast %cst_756 : f32 to vector<8x128xf32>
    %1145 = vector.broadcast %cst_757 : f32 to vector<8x128xf32>
    %1146 = arith.select %12, %1144, %1145 : vector<8x128xi1>, vector<8x128xf32>
    %cst_758 = arith.constant 1.84525263 : f32
    %cst_759 = arith.constant 1.83619583 : f32
    %1147 = vector.broadcast %cst_758 : f32 to vector<8x128xf32>
    %1148 = vector.broadcast %cst_759 : f32 to vector<8x128xf32>
    %1149 = arith.select %12, %1147, %1148 : vector<8x128xi1>, vector<8x128xf32>
    %cst_760 = arith.constant 1.86345625 : f32
    %cst_761 = arith.constant 1.85433936 : f32
    %1150 = vector.broadcast %cst_760 : f32 to vector<8x128xf32>
    %1151 = vector.broadcast %cst_761 : f32 to vector<8x128xf32>
    %1152 = arith.select %12, %1150, %1151 : vector<8x128xi1>, vector<8x128xf32>
    %cst_762 = arith.constant 1.88178194 : f32
    %cst_763 = arith.constant 1.87260365 : f32
    %1153 = vector.broadcast %cst_762 : f32 to vector<8x128xf32>
    %1154 = vector.broadcast %cst_763 : f32 to vector<8x128xf32>
    %1155 = arith.select %12, %1153, %1154 : vector<8x128xi1>, vector<8x128xf32>
    %cst_764 = arith.constant 1.90023184 : f32
    %cst_765 = arith.constant 1.89099121 : f32
    %1156 = vector.broadcast %cst_764 : f32 to vector<8x128xf32>
    %1157 = vector.broadcast %cst_765 : f32 to vector<8x128xf32>
    %1158 = arith.select %12, %1156, %1157 : vector<8x128xi1>, vector<8x128xf32>
    %cst_766 = arith.constant 1.91880858 : f32
    %cst_767 = arith.constant 1.90950429 : f32
    %1159 = vector.broadcast %cst_766 : f32 to vector<8x128xf32>
    %1160 = vector.broadcast %cst_767 : f32 to vector<8x128xf32>
    %1161 = arith.select %12, %1159, %1160 : vector<8x128xi1>, vector<8x128xf32>
    %cst_768 = arith.constant 1.93751466 : f32
    %cst_769 = arith.constant 1.92814529 : f32
    %1162 = vector.broadcast %cst_768 : f32 to vector<8x128xf32>
    %1163 = vector.broadcast %cst_769 : f32 to vector<8x128xf32>
    %1164 = arith.select %12, %1162, %1163 : vector<8x128xi1>, vector<8x128xf32>
    %cst_770 = arith.constant 1.95635247 : f32
    %cst_771 = arith.constant 1.94691694 : f32
    %1165 = vector.broadcast %cst_770 : f32 to vector<8x128xf32>
    %1166 = vector.broadcast %cst_771 : f32 to vector<8x128xf32>
    %1167 = arith.select %12, %1165, %1166 : vector<8x128xi1>, vector<8x128xf32>
    %cst_772 = arith.constant 1.97532475 : f32
    %cst_773 = arith.constant 1.96582162 : f32
    %1168 = vector.broadcast %cst_772 : f32 to vector<8x128xf32>
    %1169 = vector.broadcast %cst_773 : f32 to vector<8x128xf32>
    %1170 = arith.select %12, %1168, %1169 : vector<8x128xi1>, vector<8x128xf32>
    %cst_774 = arith.constant 1.99443412 : f32
    %cst_775 = arith.constant 1.98486221 : f32
    %1171 = vector.broadcast %cst_774 : f32 to vector<8x128xf32>
    %1172 = vector.broadcast %cst_775 : f32 to vector<8x128xf32>
    %1173 = arith.select %12, %1171, %1172 : vector<8x128xi1>, vector<8x128xf32>
    %cst_776 = arith.constant 2.01368332 : f32
    %cst_777 = arith.constant 2.00404119 : f32
    %1174 = vector.broadcast %cst_776 : f32 to vector<8x128xf32>
    %1175 = vector.broadcast %cst_777 : f32 to vector<8x128xf32>
    %1176 = arith.select %12, %1174, %1175 : vector<8x128xi1>, vector<8x128xf32>
    %cst_778 = arith.constant 2.03307533 : f32
    %cst_779 = arith.constant 2.02336144 : f32
    %1177 = vector.broadcast %cst_778 : f32 to vector<8x128xf32>
    %1178 = vector.broadcast %cst_779 : f32 to vector<8x128xf32>
    %1179 = arith.select %12, %1177, %1178 : vector<8x128xi1>, vector<8x128xf32>
    %cst_780 = arith.constant 2.05261278 : f32
    %cst_781 = arith.constant 2.0428257 : f32
    %1180 = vector.broadcast %cst_780 : f32 to vector<8x128xf32>
    %1181 = vector.broadcast %cst_781 : f32 to vector<8x128xf32>
    %1182 = arith.select %12, %1180, %1181 : vector<8x128xi1>, vector<8x128xf32>
    %cst_782 = arith.constant 2.07229877 : f32
    %cst_783 = arith.constant 2.06243706 : f32
    %1183 = vector.broadcast %cst_782 : f32 to vector<8x128xf32>
    %1184 = vector.broadcast %cst_783 : f32 to vector<8x128xf32>
    %1185 = arith.select %12, %1183, %1184 : vector<8x128xi1>, vector<8x128xf32>
    %cst_784 = arith.constant 2.09213638 : f32
    %cst_785 = arith.constant 2.08219838 : f32
    %1186 = vector.broadcast %cst_784 : f32 to vector<8x128xf32>
    %1187 = vector.broadcast %cst_785 : f32 to vector<8x128xf32>
    %1188 = arith.select %12, %1186, %1187 : vector<8x128xi1>, vector<8x128xf32>
    %cst_786 = arith.constant 2.11212873 : f32
    %cst_787 = arith.constant 2.10211301 : f32
    %1189 = vector.broadcast %cst_786 : f32 to vector<8x128xf32>
    %1190 = vector.broadcast %cst_787 : f32 to vector<8x128xf32>
    %1191 = arith.select %12, %1189, %1190 : vector<8x128xi1>, vector<8x128xf32>
    %cst_788 = arith.constant 2.13227916 : f32
    %cst_789 = arith.constant 2.12218404 : f32
    %1192 = vector.broadcast %cst_788 : f32 to vector<8x128xf32>
    %1193 = vector.broadcast %cst_789 : f32 to vector<8x128xf32>
    %1194 = arith.select %12, %1192, %1193 : vector<8x128xi1>, vector<8x128xf32>
    %cst_790 = arith.constant 2.15259051 : f32
    %cst_791 = arith.constant 2.14241433 : f32
    %1195 = vector.broadcast %cst_790 : f32 to vector<8x128xf32>
    %1196 = vector.broadcast %cst_791 : f32 to vector<8x128xf32>
    %1197 = arith.select %12, %1195, %1196 : vector<8x128xi1>, vector<8x128xf32>
    %cst_792 = arith.constant 2.17306685 : f32
    %cst_793 = arith.constant 2.16280794 : f32
    %1198 = vector.broadcast %cst_792 : f32 to vector<8x128xf32>
    %1199 = vector.broadcast %cst_793 : f32 to vector<8x128xf32>
    %1200 = arith.select %12, %1198, %1199 : vector<8x128xi1>, vector<8x128xf32>
    %cst_794 = arith.constant 2.19371104 : f32
    %cst_795 = arith.constant 2.18336773 : f32
    %1201 = vector.broadcast %cst_794 : f32 to vector<8x128xf32>
    %1202 = vector.broadcast %cst_795 : f32 to vector<8x128xf32>
    %1203 = arith.select %12, %1201, %1202 : vector<8x128xi1>, vector<8x128xf32>
    %cst_796 = arith.constant 2.21452713 : f32
    %cst_797 = arith.constant 2.20409751 : f32
    %1204 = vector.broadcast %cst_796 : f32 to vector<8x128xf32>
    %1205 = vector.broadcast %cst_797 : f32 to vector<8x128xf32>
    %1206 = arith.select %12, %1204, %1205 : vector<8x128xi1>, vector<8x128xf32>
    %cst_798 = arith.constant 2.23551869 : f32
    %cst_799 = arith.constant 2.22500086 : f32
    %1207 = vector.broadcast %cst_798 : f32 to vector<8x128xf32>
    %1208 = vector.broadcast %cst_799 : f32 to vector<8x128xf32>
    %1209 = arith.select %12, %1207, %1208 : vector<8x128xi1>, vector<8x128xf32>
    %cst_800 = arith.constant 2.25668955 : f32
    %cst_801 = arith.constant 2.24608159 : f32
    %1210 = vector.broadcast %cst_800 : f32 to vector<8x128xf32>
    %1211 = vector.broadcast %cst_801 : f32 to vector<8x128xf32>
    %1212 = arith.select %12, %1210, %1211 : vector<8x128xi1>, vector<8x128xf32>
    %cst_802 = arith.constant 2.27804375 : f32
    %cst_803 = arith.constant 2.26734352 : f32
    %1213 = vector.broadcast %cst_802 : f32 to vector<8x128xf32>
    %1214 = vector.broadcast %cst_803 : f32 to vector<8x128xf32>
    %1215 = arith.select %12, %1213, %1214 : vector<8x128xi1>, vector<8x128xf32>
    %cst_804 = arith.constant 2.29958487 : f32
    %cst_805 = arith.constant 2.2887907 : f32
    %1216 = vector.broadcast %cst_804 : f32 to vector<8x128xf32>
    %1217 = vector.broadcast %cst_805 : f32 to vector<8x128xf32>
    %1218 = arith.select %12, %1216, %1217 : vector<8x128xi1>, vector<8x128xf32>
    %cst_806 = arith.constant 2.32131767 : f32
    %cst_807 = arith.constant 2.31042719 : f32
    %1219 = vector.broadcast %cst_806 : f32 to vector<8x128xf32>
    %1220 = vector.broadcast %cst_807 : f32 to vector<8x128xf32>
    %1221 = arith.select %12, %1219, %1220 : vector<8x128xi1>, vector<8x128xf32>
    %cst_808 = arith.constant 2.34324598 : f32
    %cst_809 = arith.constant 2.33225703 : f32
    %1222 = vector.broadcast %cst_808 : f32 to vector<8x128xf32>
    %1223 = vector.broadcast %cst_809 : f32 to vector<8x128xf32>
    %1224 = arith.select %12, %1222, %1223 : vector<8x128xi1>, vector<8x128xf32>
    %cst_810 = arith.constant 2.36537433 : f32
    %cst_811 = arith.constant 2.354285 : f32
    %1225 = vector.broadcast %cst_810 : f32 to vector<8x128xf32>
    %1226 = vector.broadcast %cst_811 : f32 to vector<8x128xf32>
    %1227 = arith.select %12, %1225, %1226 : vector<8x128xi1>, vector<8x128xf32>
    %cst_812 = arith.constant 2.38770747 : f32
    %cst_813 = arith.constant 2.37651515 : f32
    %1228 = vector.broadcast %cst_812 : f32 to vector<8x128xf32>
    %1229 = vector.broadcast %cst_813 : f32 to vector<8x128xf32>
    %1230 = arith.select %12, %1228, %1229 : vector<8x128xi1>, vector<8x128xf32>
    %cst_814 = arith.constant 2.410250e+00 : f32
    %cst_815 = arith.constant 2.39895225 : f32
    %1231 = vector.broadcast %cst_814 : f32 to vector<8x128xf32>
    %1232 = vector.broadcast %cst_815 : f32 to vector<8x128xf32>
    %1233 = arith.select %12, %1231, %1232 : vector<8x128xi1>, vector<8x128xf32>
    %cst_816 = arith.constant 2.43300676 : f32
    %cst_817 = arith.constant 2.4216013 : f32
    %1234 = vector.broadcast %cst_816 : f32 to vector<8x128xf32>
    %1235 = vector.broadcast %cst_817 : f32 to vector<8x128xf32>
    %1236 = arith.select %12, %1234, %1235 : vector<8x128xi1>, vector<8x128xf32>
    %cst_818 = arith.constant 2.45598269 : f32
    %cst_819 = arith.constant 2.44446707 : f32
    %1237 = vector.broadcast %cst_818 : f32 to vector<8x128xf32>
    %1238 = vector.broadcast %cst_819 : f32 to vector<8x128xf32>
    %1239 = arith.select %12, %1237, %1238 : vector<8x128xi1>, vector<8x128xf32>
    %cst_820 = arith.constant 2.4791832 : f32
    %cst_821 = arith.constant 2.46755457 : f32
    %1240 = vector.broadcast %cst_820 : f32 to vector<8x128xf32>
    %1241 = vector.broadcast %cst_821 : f32 to vector<8x128xf32>
    %1242 = arith.select %12, %1240, %1241 : vector<8x128xi1>, vector<8x128xf32>
    %cst_822 = arith.constant 2.50261331 : f32
    %cst_823 = arith.constant 2.49086905 : f32
    %1243 = vector.broadcast %cst_822 : f32 to vector<8x128xf32>
    %1244 = vector.broadcast %cst_823 : f32 to vector<8x128xf32>
    %1245 = arith.select %12, %1243, %1244 : vector<8x128xi1>, vector<8x128xf32>
    %cst_824 = arith.constant 2.52627873 : f32
    %cst_825 = arith.constant 2.51441622 : f32
    %1246 = vector.broadcast %cst_824 : f32 to vector<8x128xf32>
    %1247 = vector.broadcast %cst_825 : f32 to vector<8x128xf32>
    %1248 = arith.select %12, %1246, %1247 : vector<8x128xi1>, vector<8x128xf32>
    %cst_826 = arith.constant 2.5501852 : f32
    %cst_827 = arith.constant 2.53820133 : f32
    %1249 = vector.broadcast %cst_826 : f32 to vector<8x128xf32>
    %1250 = vector.broadcast %cst_827 : f32 to vector<8x128xf32>
    %1251 = arith.select %12, %1249, %1250 : vector<8x128xi1>, vector<8x128xf32>
    %cst_828 = arith.constant 2.57433844 : f32
    %cst_829 = arith.constant 2.56223059 : f32
    %1252 = vector.broadcast %cst_828 : f32 to vector<8x128xf32>
    %1253 = vector.broadcast %cst_829 : f32 to vector<8x128xf32>
    %1254 = arith.select %12, %1252, %1253 : vector<8x128xi1>, vector<8x128xf32>
    %cst_830 = arith.constant 2.59874463 : f32
    %cst_831 = arith.constant 2.58650947 : f32
    %1255 = vector.broadcast %cst_830 : f32 to vector<8x128xf32>
    %1256 = vector.broadcast %cst_831 : f32 to vector<8x128xf32>
    %1257 = arith.select %12, %1255, %1256 : vector<8x128xi1>, vector<8x128xf32>
    %cst_832 = arith.constant 2.62341046 : f32
    %cst_833 = arith.constant 2.61104465 : f32
    %1258 = vector.broadcast %cst_832 : f32 to vector<8x128xf32>
    %1259 = vector.broadcast %cst_833 : f32 to vector<8x128xf32>
    %1260 = arith.select %12, %1258, %1259 : vector<8x128xi1>, vector<8x128xf32>
    %cst_834 = arith.constant 2.64834189 : f32
    %cst_835 = arith.constant 2.63584256 : f32
    %1261 = vector.broadcast %cst_834 : f32 to vector<8x128xf32>
    %1262 = vector.broadcast %cst_835 : f32 to vector<8x128xf32>
    %1263 = arith.select %12, %1261, %1262 : vector<8x128xi1>, vector<8x128xf32>
    %cst_836 = arith.constant 2.67354608 : f32
    %cst_837 = arith.constant 2.66090941 : f32
    %1264 = vector.broadcast %cst_836 : f32 to vector<8x128xf32>
    %1265 = vector.broadcast %cst_837 : f32 to vector<8x128xf32>
    %1266 = arith.select %12, %1264, %1265 : vector<8x128xi1>, vector<8x128xf32>
    %cst_838 = arith.constant 2.699030e+00 : f32
    %cst_839 = arith.constant 2.68625259 : f32
    %1267 = vector.broadcast %cst_838 : f32 to vector<8x128xf32>
    %1268 = vector.broadcast %cst_839 : f32 to vector<8x128xf32>
    %1269 = arith.select %12, %1267, %1268 : vector<8x128xi1>, vector<8x128xf32>
    %cst_840 = arith.constant 2.72480083 : f32
    %cst_841 = arith.constant 2.71187901 : f32
    %1270 = vector.broadcast %cst_840 : f32 to vector<8x128xf32>
    %1271 = vector.broadcast %cst_841 : f32 to vector<8x128xf32>
    %1272 = arith.select %12, %1270, %1271 : vector<8x128xi1>, vector<8x128xf32>
    %cst_842 = arith.constant 2.75086617 : f32
    %cst_843 = arith.constant 2.73779607 : f32
    %1273 = vector.broadcast %cst_842 : f32 to vector<8x128xf32>
    %1274 = vector.broadcast %cst_843 : f32 to vector<8x128xf32>
    %1275 = arith.select %12, %1273, %1274 : vector<8x128xi1>, vector<8x128xf32>
    %cst_844 = arith.constant 2.77723384 : f32
    %cst_845 = arith.constant 2.76401162 : f32
    %1276 = vector.broadcast %cst_844 : f32 to vector<8x128xf32>
    %1277 = vector.broadcast %cst_845 : f32 to vector<8x128xf32>
    %1278 = arith.select %12, %1276, %1277 : vector<8x128xi1>, vector<8x128xf32>
    %cst_846 = arith.constant 2.80391216 : f32
    %cst_847 = arith.constant 2.79053378 : f32
    %1279 = vector.broadcast %cst_846 : f32 to vector<8x128xf32>
    %1280 = vector.broadcast %cst_847 : f32 to vector<8x128xf32>
    %1281 = arith.select %12, %1279, %1280 : vector<8x128xi1>, vector<8x128xf32>
    %cst_848 = arith.constant 2.83090949 : f32
    %cst_849 = arith.constant 2.81737041 : f32
    %1282 = vector.broadcast %cst_848 : f32 to vector<8x128xf32>
    %1283 = vector.broadcast %cst_849 : f32 to vector<8x128xf32>
    %1284 = arith.select %12, %1282, %1283 : vector<8x128xi1>, vector<8x128xf32>
    %cst_850 = arith.constant 2.85823441 : f32
    %cst_851 = arith.constant 2.84453034 : f32
    %1285 = vector.broadcast %cst_850 : f32 to vector<8x128xf32>
    %1286 = vector.broadcast %cst_851 : f32 to vector<8x128xf32>
    %1287 = arith.select %12, %1285, %1286 : vector<8x128xi1>, vector<8x128xf32>
    %cst_852 = arith.constant 2.88589644 : f32
    %cst_853 = arith.constant 2.87202287 : f32
    %1288 = vector.broadcast %cst_852 : f32 to vector<8x128xf32>
    %1289 = vector.broadcast %cst_853 : f32 to vector<8x128xf32>
    %1290 = arith.select %12, %1288, %1289 : vector<8x128xi1>, vector<8x128xf32>
    %cst_854 = arith.constant 2.91390491 : f32
    %cst_855 = arith.constant 2.89985681 : f32
    %1291 = vector.broadcast %cst_854 : f32 to vector<8x128xf32>
    %1292 = vector.broadcast %cst_855 : f32 to vector<8x128xf32>
    %1293 = arith.select %12, %1291, %1292 : vector<8x128xi1>, vector<8x128xf32>
    %cst_856 = arith.constant 2.94226956 : f32
    %cst_857 = arith.constant 2.92804217 : f32
    %1294 = vector.broadcast %cst_856 : f32 to vector<8x128xf32>
    %1295 = vector.broadcast %cst_857 : f32 to vector<8x128xf32>
    %1296 = arith.select %12, %1294, %1295 : vector<8x128xi1>, vector<8x128xf32>
    %cst_858 = arith.constant 2.97100115 : f32
    %cst_859 = arith.constant 2.95658875 : f32
    %1297 = vector.broadcast %cst_858 : f32 to vector<8x128xf32>
    %1298 = vector.broadcast %cst_859 : f32 to vector<8x128xf32>
    %1299 = arith.select %12, %1297, %1298 : vector<8x128xi1>, vector<8x128xf32>
    %cst_860 = arith.constant 3.000110e+00 : f32
    %cst_861 = arith.constant 2.98550749 : f32
    %1300 = vector.broadcast %cst_860 : f32 to vector<8x128xf32>
    %1301 = vector.broadcast %cst_861 : f32 to vector<8x128xf32>
    %1302 = arith.select %12, %1300, %1301 : vector<8x128xi1>, vector<8x128xf32>
    %cst_862 = arith.constant 3.0296073 : f32
    %cst_863 = arith.constant 3.01480913 : f32
    %1303 = vector.broadcast %cst_862 : f32 to vector<8x128xf32>
    %1304 = vector.broadcast %cst_863 : f32 to vector<8x128xf32>
    %1305 = arith.select %12, %1303, %1304 : vector<8x128xi1>, vector<8x128xf32>
    %cst_864 = arith.constant 3.05950499 : f32
    %cst_865 = arith.constant 3.04450536 : f32
    %1306 = vector.broadcast %cst_864 : f32 to vector<8x128xf32>
    %1307 = vector.broadcast %cst_865 : f32 to vector<8x128xf32>
    %1308 = arith.select %12, %1306, %1307 : vector<8x128xi1>, vector<8x128xf32>
    %cst_866 = arith.constant 3.08981514 : f32
    %cst_867 = arith.constant 3.07460761 : f32
    %1309 = vector.broadcast %cst_866 : f32 to vector<8x128xf32>
    %1310 = vector.broadcast %cst_867 : f32 to vector<8x128xf32>
    %1311 = arith.select %12, %1309, %1310 : vector<8x128xi1>, vector<8x128xf32>
    %cst_868 = arith.constant 3.12055063 : f32
    %cst_869 = arith.constant 3.10512877 : f32
    %1312 = vector.broadcast %cst_868 : f32 to vector<8x128xf32>
    %1313 = vector.broadcast %cst_869 : f32 to vector<8x128xf32>
    %1314 = arith.select %12, %1312, %1313 : vector<8x128xi1>, vector<8x128xf32>
    %cst_870 = arith.constant 3.15172458 : f32
    %cst_871 = arith.constant 3.13608193 : f32
    %1315 = vector.broadcast %cst_870 : f32 to vector<8x128xf32>
    %1316 = vector.broadcast %cst_871 : f32 to vector<8x128xf32>
    %1317 = arith.select %12, %1315, %1316 : vector<8x128xi1>, vector<8x128xf32>
    %cst_872 = arith.constant 3.18335104 : f32
    %cst_873 = arith.constant 3.16748047 : f32
    %1318 = vector.broadcast %cst_872 : f32 to vector<8x128xf32>
    %1319 = vector.broadcast %cst_873 : f32 to vector<8x128xf32>
    %1320 = arith.select %12, %1318, %1319 : vector<8x128xi1>, vector<8x128xf32>
    %cst_874 = arith.constant 3.2154448 : f32
    %cst_875 = arith.constant 3.19933867 : f32
    %1321 = vector.broadcast %cst_874 : f32 to vector<8x128xf32>
    %1322 = vector.broadcast %cst_875 : f32 to vector<8x128xf32>
    %1323 = arith.select %12, %1321, %1322 : vector<8x128xi1>, vector<8x128xf32>
    %cst_876 = arith.constant 3.24802089 : f32
    %cst_877 = arith.constant 3.23167157 : f32
    %1324 = vector.broadcast %cst_876 : f32 to vector<8x128xf32>
    %1325 = vector.broadcast %cst_877 : f32 to vector<8x128xf32>
    %1326 = arith.select %12, %1324, %1325 : vector<8x128xi1>, vector<8x128xf32>
    %cst_878 = arith.constant 3.28109527 : f32
    %cst_879 = arith.constant 3.26449466 : f32
    %1327 = vector.broadcast %cst_878 : f32 to vector<8x128xf32>
    %1328 = vector.broadcast %cst_879 : f32 to vector<8x128xf32>
    %1329 = arith.select %12, %1327, %1328 : vector<8x128xi1>, vector<8x128xf32>
    %cst_880 = arith.constant 3.31468511 : f32
    %cst_881 = arith.constant 3.29782486 : f32
    %1330 = vector.broadcast %cst_880 : f32 to vector<8x128xf32>
    %1331 = vector.broadcast %cst_881 : f32 to vector<8x128xf32>
    %1332 = arith.select %12, %1330, %1331 : vector<8x128xi1>, vector<8x128xf32>
    %cst_882 = arith.constant 3.34880781 : f32
    %cst_883 = arith.constant 3.33167863 : f32
    %1333 = vector.broadcast %cst_882 : f32 to vector<8x128xf32>
    %1334 = vector.broadcast %cst_883 : f32 to vector<8x128xf32>
    %1335 = arith.select %12, %1333, %1334 : vector<8x128xi1>, vector<8x128xf32>
    %cst_884 = arith.constant 3.38348174 : f32
    %cst_885 = arith.constant 3.3660748 : f32
    %1336 = vector.broadcast %cst_884 : f32 to vector<8x128xf32>
    %1337 = vector.broadcast %cst_885 : f32 to vector<8x128xf32>
    %1338 = arith.select %12, %1336, %1337 : vector<8x128xi1>, vector<8x128xf32>
    %cst_886 = arith.constant 3.41872692 : f32
    %cst_887 = arith.constant 3.40103173 : f32
    %1339 = vector.broadcast %cst_886 : f32 to vector<8x128xf32>
    %1340 = vector.broadcast %cst_887 : f32 to vector<8x128xf32>
    %1341 = arith.select %12, %1339, %1340 : vector<8x128xi1>, vector<8x128xf32>
    %cst_888 = arith.constant 3.45456338 : f32
    %cst_889 = arith.constant 3.436570e+00 : f32
    %1342 = vector.broadcast %cst_888 : f32 to vector<8x128xf32>
    %1343 = vector.broadcast %cst_889 : f32 to vector<8x128xf32>
    %1344 = arith.select %12, %1342, %1343 : vector<8x128xi1>, vector<8x128xf32>
    %cst_890 = arith.constant 3.49101305 : f32
    %cst_891 = arith.constant 3.47271013 : f32
    %1345 = vector.broadcast %cst_890 : f32 to vector<8x128xf32>
    %1346 = vector.broadcast %cst_891 : f32 to vector<8x128xf32>
    %1347 = arith.select %12, %1345, %1346 : vector<8x128xi1>, vector<8x128xf32>
    %cst_892 = arith.constant 3.52809858 : f32
    %cst_893 = arith.constant 3.50947499 : f32
    %1348 = vector.broadcast %cst_892 : f32 to vector<8x128xf32>
    %1349 = vector.broadcast %cst_893 : f32 to vector<8x128xf32>
    %1350 = arith.select %12, %1348, %1349 : vector<8x128xi1>, vector<8x128xf32>
    %cst_894 = arith.constant 3.5658443 : f32
    %cst_895 = arith.constant 3.5468874 : f32
    %1351 = vector.broadcast %cst_894 : f32 to vector<8x128xf32>
    %1352 = vector.broadcast %cst_895 : f32 to vector<8x128xf32>
    %1353 = arith.select %12, %1351, %1352 : vector<8x128xi1>, vector<8x128xf32>
    %cst_896 = arith.constant 3.60427523 : f32
    %cst_897 = arith.constant 3.58497238 : f32
    %1354 = vector.broadcast %cst_896 : f32 to vector<8x128xf32>
    %1355 = vector.broadcast %cst_897 : f32 to vector<8x128xf32>
    %1356 = arith.select %12, %1354, %1355 : vector<8x128xi1>, vector<8x128xf32>
    %cst_898 = arith.constant 3.64341855 : f32
    %cst_899 = arith.constant 3.62375617 : f32
    %1357 = vector.broadcast %cst_898 : f32 to vector<8x128xf32>
    %1358 = vector.broadcast %cst_899 : f32 to vector<8x128xf32>
    %1359 = arith.select %12, %1357, %1358 : vector<8x128xi1>, vector<8x128xf32>
    %cst_900 = arith.constant 3.68330264 : f32
    %cst_901 = arith.constant 3.66326618 : f32
    %1360 = vector.broadcast %cst_900 : f32 to vector<8x128xf32>
    %1361 = vector.broadcast %cst_901 : f32 to vector<8x128xf32>
    %1362 = arith.select %12, %1360, %1361 : vector<8x128xi1>, vector<8x128xf32>
    %cst_902 = arith.constant 3.72395778 : f32
    %cst_903 = arith.constant 3.70353198 : f32
    %1363 = vector.broadcast %cst_902 : f32 to vector<8x128xf32>
    %1364 = vector.broadcast %cst_903 : f32 to vector<8x128xf32>
    %1365 = arith.select %12, %1363, %1364 : vector<8x128xi1>, vector<8x128xf32>
    %cst_904 = arith.constant 3.76541615 : f32
    %cst_905 = arith.constant 3.74458456 : f32
    %1366 = vector.broadcast %cst_904 : f32 to vector<8x128xf32>
    %1367 = vector.broadcast %cst_905 : f32 to vector<8x128xf32>
    %1368 = arith.select %12, %1366, %1367 : vector<8x128xi1>, vector<8x128xf32>
    %cst_906 = arith.constant 3.80771136 : f32
    %cst_907 = arith.constant 3.78645682 : f32
    %1369 = vector.broadcast %cst_906 : f32 to vector<8x128xf32>
    %1370 = vector.broadcast %cst_907 : f32 to vector<8x128xf32>
    %1371 = arith.select %12, %1369, %1370 : vector<8x128xi1>, vector<8x128xf32>
    %cst_908 = arith.constant 3.850880e+00 : f32
    %cst_909 = arith.constant 3.82918406 : f32
    %1372 = vector.broadcast %cst_908 : f32 to vector<8x128xf32>
    %1373 = vector.broadcast %cst_909 : f32 to vector<8x128xf32>
    %1374 = arith.select %12, %1372, %1373 : vector<8x128xi1>, vector<8x128xf32>
    %cst_910 = arith.constant 3.8949604 : f32
    %cst_911 = arith.constant 3.87280369 : f32
    %1375 = vector.broadcast %cst_910 : f32 to vector<8x128xf32>
    %1376 = vector.broadcast %cst_911 : f32 to vector<8x128xf32>
    %1377 = arith.select %12, %1375, %1376 : vector<8x128xi1>, vector<8x128xf32>
    %cst_912 = arith.constant 3.93999386 : f32
    %cst_913 = arith.constant 3.9173553 : f32
    %1378 = vector.broadcast %cst_912 : f32 to vector<8x128xf32>
    %1379 = vector.broadcast %cst_913 : f32 to vector<8x128xf32>
    %1380 = arith.select %12, %1378, %1379 : vector<8x128xi1>, vector<8x128xf32>
    %cst_914 = arith.constant 3.98602414 : f32
    %cst_915 = arith.constant 3.96288157 : f32
    %1381 = vector.broadcast %cst_914 : f32 to vector<8x128xf32>
    %1382 = vector.broadcast %cst_915 : f32 to vector<8x128xf32>
    %1383 = arith.select %12, %1381, %1382 : vector<8x128xi1>, vector<8x128xf32>
    %cst_916 = arith.constant 4.0330987 : f32
    %cst_917 = arith.constant 4.00942755 : f32
    %1384 = vector.broadcast %cst_916 : f32 to vector<8x128xf32>
    %1385 = vector.broadcast %cst_917 : f32 to vector<8x128xf32>
    %1386 = arith.select %12, %1384, %1385 : vector<8x128xi1>, vector<8x128xf32>
    %cst_918 = arith.constant 4.08126736 : f32
    %cst_919 = arith.constant 4.0570426 : f32
    %1387 = vector.broadcast %cst_918 : f32 to vector<8x128xf32>
    %1388 = vector.broadcast %cst_919 : f32 to vector<8x128xf32>
    %1389 = arith.select %12, %1387, %1388 : vector<8x128xi1>, vector<8x128xf32>
    %cst_920 = arith.constant 4.13058424 : f32
    %cst_921 = arith.constant 4.10577869 : f32
    %1390 = vector.broadcast %cst_920 : f32 to vector<8x128xf32>
    %1391 = vector.broadcast %cst_921 : f32 to vector<8x128xf32>
    %1392 = arith.select %12, %1390, %1391 : vector<8x128xi1>, vector<8x128xf32>
    %cst_922 = arith.constant 4.18110752 : f32
    %cst_923 = arith.constant 4.15569115 : f32
    %1393 = vector.broadcast %cst_922 : f32 to vector<8x128xf32>
    %1394 = vector.broadcast %cst_923 : f32 to vector<8x128xf32>
    %1395 = arith.select %12, %1393, %1394 : vector<8x128xi1>, vector<8x128xf32>
    %cst_924 = arith.constant 4.232900e+00 : f32
    %cst_925 = arith.constant 4.20684147 : f32
    %1396 = vector.broadcast %cst_924 : f32 to vector<8x128xf32>
    %1397 = vector.broadcast %cst_925 : f32 to vector<8x128xf32>
    %1398 = arith.select %12, %1396, %1397 : vector<8x128xi1>, vector<8x128xf32>
    %cst_926 = arith.constant 4.28602934 : f32
    %cst_927 = arith.constant 4.25929356 : f32
    %1399 = vector.broadcast %cst_926 : f32 to vector<8x128xf32>
    %1400 = vector.broadcast %cst_927 : f32 to vector<8x128xf32>
    %1401 = arith.select %12, %1399, %1400 : vector<8x128xi1>, vector<8x128xf32>
    %cst_928 = arith.constant 4.34056807 : f32
    %cst_929 = arith.constant 4.31311798 : f32
    %1402 = vector.broadcast %cst_928 : f32 to vector<8x128xf32>
    %1403 = vector.broadcast %cst_929 : f32 to vector<8x128xf32>
    %1404 = arith.select %12, %1402, %1403 : vector<8x128xi1>, vector<8x128xf32>
    %cst_930 = arith.constant 4.39659548 : f32
    %cst_931 = arith.constant 4.36839056 : f32
    %1405 = vector.broadcast %cst_930 : f32 to vector<8x128xf32>
    %1406 = vector.broadcast %cst_931 : f32 to vector<8x128xf32>
    %1407 = arith.select %12, %1405, %1406 : vector<8x128xi1>, vector<8x128xf32>
    %cst_932 = arith.constant 4.45419693 : f32
    %cst_933 = arith.constant 4.42519379 : f32
    %1408 = vector.broadcast %cst_932 : f32 to vector<8x128xf32>
    %1409 = vector.broadcast %cst_933 : f32 to vector<8x128xf32>
    %1410 = arith.select %12, %1408, %1409 : vector<8x128xi1>, vector<8x128xf32>
    %cst_934 = arith.constant 4.51346684 : f32
    %cst_935 = arith.constant 4.48361731 : f32
    %1411 = vector.broadcast %cst_934 : f32 to vector<8x128xf32>
    %1412 = vector.broadcast %cst_935 : f32 to vector<8x128xf32>
    %1413 = arith.select %12, %1411, %1412 : vector<8x128xi1>, vector<8x128xf32>
    %cst_936 = arith.constant 4.57450628 : f32
    %cst_937 = arith.constant 4.54375839 : f32
    %1414 = vector.broadcast %cst_936 : f32 to vector<8x128xf32>
    %1415 = vector.broadcast %cst_937 : f32 to vector<8x128xf32>
    %1416 = arith.select %12, %1414, %1415 : vector<8x128xi1>, vector<8x128xf32>
    %cst_938 = arith.constant 4.63742685 : f32
    %cst_939 = arith.constant 4.60572386 : f32
    %1417 = vector.broadcast %cst_938 : f32 to vector<8x128xf32>
    %1418 = vector.broadcast %cst_939 : f32 to vector<8x128xf32>
    %1419 = arith.select %12, %1417, %1418 : vector<8x128xi1>, vector<8x128xf32>
    %cst_940 = arith.constant 4.70235109 : f32
    %cst_941 = arith.constant 4.66963053 : f32
    %1420 = vector.broadcast %cst_940 : f32 to vector<8x128xf32>
    %1421 = vector.broadcast %cst_941 : f32 to vector<8x128xf32>
    %1422 = arith.select %12, %1420, %1421 : vector<8x128xi1>, vector<8x128xf32>
    %cst_942 = arith.constant 4.76941347 : f32
    %cst_943 = arith.constant 4.73560619 : f32
    %1423 = vector.broadcast %cst_942 : f32 to vector<8x128xf32>
    %1424 = vector.broadcast %cst_943 : f32 to vector<8x128xf32>
    %1425 = arith.select %12, %1423, %1424 : vector<8x128xi1>, vector<8x128xf32>
    %cst_944 = arith.constant 4.83876228 : f32
    %cst_945 = arith.constant 4.803792 : f32
    %1426 = vector.broadcast %cst_944 : f32 to vector<8x128xf32>
    %1427 = vector.broadcast %cst_945 : f32 to vector<8x128xf32>
    %1428 = arith.select %12, %1426, %1427 : vector<8x128xi1>, vector<8x128xf32>
    %cst_946 = arith.constant 4.91056156 : f32
    %cst_947 = arith.constant 4.87434483 : f32
    %1429 = vector.broadcast %cst_946 : f32 to vector<8x128xf32>
    %1430 = vector.broadcast %cst_947 : f32 to vector<8x128xf32>
    %1431 = arith.select %12, %1429, %1430 : vector<8x128xi1>, vector<8x128xf32>
    %cst_948 = arith.constant 4.98499441 : f32
    %cst_949 = arith.constant 4.94743681 : f32
    %1432 = vector.broadcast %cst_948 : f32 to vector<8x128xf32>
    %1433 = vector.broadcast %cst_949 : f32 to vector<8x128xf32>
    %1434 = arith.select %12, %1432, %1433 : vector<8x128xi1>, vector<8x128xf32>
    %cst_950 = arith.constant 5.06226397 : f32
    %cst_951 = arith.constant 5.02326107 : f32
    %1435 = vector.broadcast %cst_950 : f32 to vector<8x128xf32>
    %1436 = vector.broadcast %cst_951 : f32 to vector<8x128xf32>
    %1437 = arith.select %12, %1435, %1436 : vector<8x128xi1>, vector<8x128xf32>
    %cst_952 = arith.constant 5.14259911 : f32
    %cst_953 = arith.constant 5.10203314 : f32
    %1438 = vector.broadcast %cst_952 : f32 to vector<8x128xf32>
    %1439 = vector.broadcast %cst_953 : f32 to vector<8x128xf32>
    %1440 = arith.select %12, %1438, %1439 : vector<8x128xi1>, vector<8x128xf32>
    %cst_954 = arith.constant 5.22625542 : f32
    %cst_955 = arith.constant 5.18399477 : f32
    %1441 = vector.broadcast %cst_954 : f32 to vector<8x128xf32>
    %1442 = vector.broadcast %cst_955 : f32 to vector<8x128xf32>
    %1443 = arith.select %12, %1441, %1442 : vector<8x128xi1>, vector<8x128xf32>
    %cst_956 = arith.constant 5.31352377 : f32
    %cst_957 = arith.constant 5.26941872 : f32
    %1444 = vector.broadcast %cst_956 : f32 to vector<8x128xf32>
    %1445 = vector.broadcast %cst_957 : f32 to vector<8x128xf32>
    %1446 = arith.select %12, %1444, %1445 : vector<8x128xi1>, vector<8x128xf32>
    %cst_958 = arith.constant 5.40473366 : f32
    %cst_959 = arith.constant 5.35861349 : f32
    %1447 = vector.broadcast %cst_958 : f32 to vector<8x128xf32>
    %1448 = vector.broadcast %cst_959 : f32 to vector<8x128xf32>
    %1449 = arith.select %12, %1447, %1448 : vector<8x128xi1>, vector<8x128xf32>
    %cst_960 = arith.constant 5.50026178 : f32
    %cst_961 = arith.constant 5.45193243 : f32
    %1450 = vector.broadcast %cst_960 : f32 to vector<8x128xf32>
    %1451 = vector.broadcast %cst_961 : f32 to vector<8x128xf32>
    %1452 = arith.select %12, %1450, %1451 : vector<8x128xi1>, vector<8x128xf32>
    %cst_962 = arith.constant 5.60054159 : f32
    %cst_963 = arith.constant 5.54977798 : f32
    %1453 = vector.broadcast %cst_962 : f32 to vector<8x128xf32>
    %1454 = vector.broadcast %cst_963 : f32 to vector<8x128xf32>
    %1455 = arith.select %12, %1453, %1454 : vector<8x128xi1>, vector<8x128xf32>
    %cst_964 = arith.constant 5.70607519 : f32
    %cst_965 = arith.constant 5.65261745 : f32
    %1456 = vector.broadcast %cst_964 : f32 to vector<8x128xf32>
    %1457 = vector.broadcast %cst_965 : f32 to vector<8x128xf32>
    %1458 = arith.select %12, %1456, %1457 : vector<8x128xi1>, vector<8x128xf32>
    %cst_966 = arith.constant 5.81744766 : f32
    %cst_967 = arith.constant 5.7609911 : f32
    %1459 = vector.broadcast %cst_966 : f32 to vector<8x128xf32>
    %1460 = vector.broadcast %cst_967 : f32 to vector<8x128xf32>
    %1461 = arith.select %12, %1459, %1460 : vector<8x128xi1>, vector<8x128xf32>
    %cst_968 = arith.constant 5.93534899 : f32
    %cst_969 = arith.constant 5.87553453 : f32
    %1462 = vector.broadcast %cst_968 : f32 to vector<8x128xf32>
    %1463 = vector.broadcast %cst_969 : f32 to vector<8x128xf32>
    %1464 = arith.select %12, %1462, %1463 : vector<8x128xi1>, vector<8x128xf32>
    %cst_970 = arith.constant 6.06059694 : f32
    %cst_971 = arith.constant 5.99699736 : f32
    %1465 = vector.broadcast %cst_970 : f32 to vector<8x128xf32>
    %1466 = vector.broadcast %cst_971 : f32 to vector<8x128xf32>
    %1467 = arith.select %12, %1465, %1466 : vector<8x128xi1>, vector<8x128xf32>
    %cst_972 = arith.constant 6.19417381 : f32
    %cst_973 = arith.constant 6.12627506 : f32
    %1468 = vector.broadcast %cst_972 : f32 to vector<8x128xf32>
    %1469 = vector.broadcast %cst_973 : f32 to vector<8x128xf32>
    %1470 = arith.select %12, %1468, %1469 : vector<8x128xi1>, vector<8x128xf32>
    %cst_974 = arith.constant 6.33727264 : f32
    %cst_975 = arith.constant 6.26444864 : f32
    %1471 = vector.broadcast %cst_974 : f32 to vector<8x128xf32>
    %1472 = vector.broadcast %cst_975 : f32 to vector<8x128xf32>
    %1473 = arith.select %12, %1471, %1472 : vector<8x128xi1>, vector<8x128xf32>
    %cst_976 = arith.constant 6.49136305 : f32
    %cst_977 = arith.constant 6.41283893 : f32
    %1474 = vector.broadcast %cst_976 : f32 to vector<8x128xf32>
    %1475 = vector.broadcast %cst_977 : f32 to vector<8x128xf32>
    %1476 = arith.select %12, %1474, %1475 : vector<8x128xi1>, vector<8x128xf32>
    %cst_978 = arith.constant 6.65828133 : f32
    %cst_979 = arith.constant 6.57308626 : f32
    %1477 = vector.broadcast %cst_978 : f32 to vector<8x128xf32>
    %1478 = vector.broadcast %cst_979 : f32 to vector<8x128xf32>
    %1479 = arith.select %12, %1477, %1478 : vector<8x128xi1>, vector<8x128xf32>
    %cst_980 = arith.constant 6.84036731 : f32
    %cst_981 = arith.constant 6.74725771 : f32
    %1480 = vector.broadcast %cst_980 : f32 to vector<8x128xf32>
    %1481 = vector.broadcast %cst_981 : f32 to vector<8x128xf32>
    %1482 = arith.select %12, %1480, %1481 : vector<8x128xi1>, vector<8x128xf32>
    %cst_982 = arith.constant 7.04066371 : f32
    %cst_983 = arith.constant 6.93801403 : f32
    %1483 = vector.broadcast %cst_982 : f32 to vector<8x128xf32>
    %1484 = vector.broadcast %cst_983 : f32 to vector<8x128xf32>
    %1485 = arith.select %12, %1483, %1484 : vector<8x128xi1>, vector<8x128xf32>
    %cst_984 = arith.constant 7.26323128 : f32
    %cst_985 = arith.constant 7.14885807 : f32
    %1486 = vector.broadcast %cst_984 : f32 to vector<8x128xf32>
    %1487 = vector.broadcast %cst_985 : f32 to vector<8x128xf32>
    %1488 = arith.select %12, %1486, %1487 : vector<8x128xi1>, vector<8x128xf32>
    %cst_986 = arith.constant 7.51366091 : f32
    %cst_987 = arith.constant 7.38453388 : f32
    %1489 = vector.broadcast %cst_986 : f32 to vector<8x128xf32>
    %1490 = vector.broadcast %cst_987 : f32 to vector<8x128xf32>
    %1491 = arith.select %12, %1489, %1490 : vector<8x128xi1>, vector<8x128xf32>
    %cst_988 = arith.constant 7.79995298 : f32
    %cst_989 = arith.constant 7.65169382 : f32
    %1492 = vector.broadcast %cst_988 : f32 to vector<8x128xf32>
    %1493 = vector.broadcast %cst_989 : f32 to vector<8x128xf32>
    %1494 = arith.select %12, %1492, %1493 : vector<8x128xi1>, vector<8x128xf32>
    %cst_990 = arith.constant 8.13413906 : f32
    %cst_991 = arith.constant 7.96007919 : f32
    %1495 = vector.broadcast %cst_990 : f32 to vector<8x128xf32>
    %1496 = vector.broadcast %cst_991 : f32 to vector<8x128xf32>
    %1497 = arith.select %12, %1495, %1496 : vector<8x128xi1>, vector<8x128xf32>
    %cst_992 = arith.constant 8.53554534 : f32
    %cst_993 = arith.constant 8.32479286 : f32
    %1498 = vector.broadcast %cst_992 : f32 to vector<8x128xf32>
    %1499 = vector.broadcast %cst_993 : f32 to vector<8x128xf32>
    %1500 = arith.select %12, %1498, %1499 : vector<8x128xi1>, vector<8x128xf32>
    %cst_994 = arith.constant 9.03822517 : f32
    %cst_995 = arith.constant 8.77113819 : f32
    %1501 = vector.broadcast %cst_994 : f32 to vector<8x128xf32>
    %1502 = vector.broadcast %cst_995 : f32 to vector<8x128xf32>
    %1503 = arith.select %12, %1501, %1502 : vector<8x128xi1>, vector<8x128xf32>
    %cst_996 = arith.constant 9.71120929 : f32
    %cst_997 = arith.constant 9.34654808 : f32
    %1504 = vector.broadcast %cst_996 : f32 to vector<8x128xf32>
    %1505 = vector.broadcast %cst_997 : f32 to vector<8x128xf32>
    %1506 = arith.select %12, %1504, %1505 : vector<8x128xi1>, vector<8x128xf32>
    %cst_998 = arith.constant 10.7328863 : f32
    %cst_999 = arith.constant 10.1575108 : f32
    %1507 = vector.broadcast %cst_998 : f32 to vector<8x128xf32>
    %1508 = vector.broadcast %cst_999 : f32 to vector<8x128xf32>
    %1509 = arith.select %12, %1507, %1508 : vector<8x128xi1>, vector<8x128xf32>
    %cst_1000 = arith.constant 12.9301233 : f32
    %cst_1001 = arith.constant 11.5438242 : f32
    %1510 = vector.broadcast %cst_1000 : f32 to vector<8x128xf32>
    %1511 = vector.broadcast %cst_1001 : f32 to vector<8x128xf32>
    %1512 = arith.select %12, %1510, %1511 : vector<8x128xi1>, vector<8x128xf32>
    %cst_1002 = arith.constant 19.8378811 : f32
    %cst_1003 = arith.constant 19.8378811 : f32
    %1513 = vector.broadcast %cst_1002 : f32 to vector<8x128xf32>
    %1514 = vector.broadcast %cst_1003 : f32 to vector<8x128xf32>
    %1515 = arith.select %12, %1513, %1514 : vector<8x128xi1>, vector<8x128xf32>
    %cst_1004 = arith.constant 19.8378811 : f32
    %cst_1005 = arith.constant 19.8378811 : f32
    %1516 = vector.broadcast %cst_1004 : f32 to vector<8x128xf32>
    %1517 = vector.broadcast %cst_1005 : f32 to vector<8x128xf32>
    %1518 = arith.select %12, %1516, %1517 : vector<8x128xi1>, vector<8x128xf32>
    %cst_1006 = arith.constant 19.8378811 : f32
    %cst_1007 = arith.constant 19.8378811 : f32
    %1519 = vector.broadcast %cst_1006 : f32 to vector<8x128xf32>
    %1520 = vector.broadcast %cst_1007 : f32 to vector<8x128xf32>
    %1521 = arith.select %12, %1519, %1520 : vector<8x128xi1>, vector<8x128xf32>
    %cst_1008 = arith.constant 19.8378811 : f32
    %cst_1009 = arith.constant 19.8378811 : f32
    %1522 = vector.broadcast %cst_1008 : f32 to vector<8x128xf32>
    %1523 = vector.broadcast %cst_1009 : f32 to vector<8x128xf32>
    %1524 = arith.select %12, %1522, %1523 : vector<8x128xi1>, vector<8x128xf32>
    %cst_1010 = arith.constant 19.8378811 : f32
    %cst_1011 = arith.constant 19.8378811 : f32
    %1525 = vector.broadcast %cst_1010 : f32 to vector<8x128xf32>
    %1526 = vector.broadcast %cst_1011 : f32 to vector<8x128xf32>
    %1527 = arith.select %12, %1525, %1526 : vector<8x128xi1>, vector<8x128xf32>
    %cst_1012 = arith.constant 19.8378811 : f32
    %cst_1013 = arith.constant 19.8378811 : f32
    %1528 = vector.broadcast %cst_1012 : f32 to vector<8x128xf32>
    %1529 = vector.broadcast %cst_1013 : f32 to vector<8x128xf32>
    %1530 = arith.select %12, %1528, %1529 : vector<8x128xi1>, vector<8x128xf32>
    %cst_1014 = arith.constant 19.8378811 : f32
    %cst_1015 = arith.constant 19.8378811 : f32
    %1531 = vector.broadcast %cst_1014 : f32 to vector<8x128xf32>
    %1532 = vector.broadcast %cst_1015 : f32 to vector<8x128xf32>
    %1533 = arith.select %12, %1531, %1532 : vector<8x128xi1>, vector<8x128xf32>
    %cst_1016 = arith.constant 19.8378811 : f32
    %cst_1017 = arith.constant 19.8378811 : f32
    %1534 = vector.broadcast %cst_1016 : f32 to vector<8x128xf32>
    %1535 = vector.broadcast %cst_1017 : f32 to vector<8x128xf32>
    %1536 = arith.select %12, %1534, %1535 : vector<8x128xi1>, vector<8x128xf32>
    %cst_1018 = arith.constant 19.8378811 : f32
    %cst_1019 = arith.constant 19.8378811 : f32
    %1537 = vector.broadcast %cst_1018 : f32 to vector<8x128xf32>
    %1538 = vector.broadcast %cst_1019 : f32 to vector<8x128xf32>
    %1539 = arith.select %12, %1537, %1538 : vector<8x128xi1>, vector<8x128xf32>
    %cst_1020 = arith.constant 19.8378811 : f32
    %cst_1021 = arith.constant 19.8378811 : f32
    %1540 = vector.broadcast %cst_1020 : f32 to vector<8x128xf32>
    %1541 = vector.broadcast %cst_1021 : f32 to vector<8x128xf32>
    %1542 = arith.select %12, %1540, %1541 : vector<8x128xi1>, vector<8x128xf32>
    %cst_1022 = arith.constant 19.8378811 : f32
    %cst_1023 = arith.constant 19.8378811 : f32
    %1543 = vector.broadcast %cst_1022 : f32 to vector<8x128xf32>
    %1544 = vector.broadcast %cst_1023 : f32 to vector<8x128xf32>
    %1545 = arith.select %12, %1543, %1544 : vector<8x128xi1>, vector<8x128xf32>
    %cst_1024 = arith.constant 19.8378811 : f32
    %cst_1025 = arith.constant 19.8378811 : f32
    %1546 = vector.broadcast %cst_1024 : f32 to vector<8x128xf32>
    %1547 = vector.broadcast %cst_1025 : f32 to vector<8x128xf32>
    %1548 = arith.select %12, %1546, %1547 : vector<8x128xi1>, vector<8x128xf32>
    %c2_i32 = arith.constant 2 : i32
    %1549 = vector.broadcast %c2_i32 : i32 to vector<8x128xi32>
    %1550 = arith.andi %8, %1549 : vector<8x128xi32>
    %c0_i32_1026 = arith.constant 0 : i32
    %1551 = vector.broadcast %c0_i32_1026 : i32 to vector<8x128xi32>
    %1552 = arith.cmpi ne, %1550, %1551 : vector<8x128xi32>
    %1553 = arith.select %1552, %18, %15 : vector<8x128xi1>, vector<8x128xf32>
    %1554 = arith.select %1552, %24, %21 : vector<8x128xi1>, vector<8x128xf32>
    %1555 = arith.select %1552, %30, %27 : vector<8x128xi1>, vector<8x128xf32>
    %1556 = arith.select %1552, %36, %33 : vector<8x128xi1>, vector<8x128xf32>
    %1557 = arith.select %1552, %42, %39 : vector<8x128xi1>, vector<8x128xf32>
    %1558 = arith.select %1552, %48, %45 : vector<8x128xi1>, vector<8x128xf32>
    %1559 = arith.select %1552, %54, %51 : vector<8x128xi1>, vector<8x128xf32>
    %1560 = arith.select %1552, %60, %57 : vector<8x128xi1>, vector<8x128xf32>
    %1561 = arith.select %1552, %66, %63 : vector<8x128xi1>, vector<8x128xf32>
    %1562 = arith.select %1552, %72, %69 : vector<8x128xi1>, vector<8x128xf32>
    %1563 = arith.select %1552, %78, %75 : vector<8x128xi1>, vector<8x128xf32>
    %1564 = arith.select %1552, %84, %81 : vector<8x128xi1>, vector<8x128xf32>
    %1565 = arith.select %1552, %90, %87 : vector<8x128xi1>, vector<8x128xf32>
    %1566 = arith.select %1552, %96, %93 : vector<8x128xi1>, vector<8x128xf32>
    %1567 = arith.select %1552, %102, %99 : vector<8x128xi1>, vector<8x128xf32>
    %1568 = arith.select %1552, %108, %105 : vector<8x128xi1>, vector<8x128xf32>
    %1569 = arith.select %1552, %114, %111 : vector<8x128xi1>, vector<8x128xf32>
    %1570 = arith.select %1552, %120, %117 : vector<8x128xi1>, vector<8x128xf32>
    %1571 = arith.select %1552, %126, %123 : vector<8x128xi1>, vector<8x128xf32>
    %1572 = arith.select %1552, %132, %129 : vector<8x128xi1>, vector<8x128xf32>
    %1573 = arith.select %1552, %138, %135 : vector<8x128xi1>, vector<8x128xf32>
    %1574 = arith.select %1552, %144, %141 : vector<8x128xi1>, vector<8x128xf32>
    %1575 = arith.select %1552, %150, %147 : vector<8x128xi1>, vector<8x128xf32>
    %1576 = arith.select %1552, %156, %153 : vector<8x128xi1>, vector<8x128xf32>
    %1577 = arith.select %1552, %162, %159 : vector<8x128xi1>, vector<8x128xf32>
    %1578 = arith.select %1552, %168, %165 : vector<8x128xi1>, vector<8x128xf32>
    %1579 = arith.select %1552, %174, %171 : vector<8x128xi1>, vector<8x128xf32>
    %1580 = arith.select %1552, %180, %177 : vector<8x128xi1>, vector<8x128xf32>
    %1581 = arith.select %1552, %186, %183 : vector<8x128xi1>, vector<8x128xf32>
    %1582 = arith.select %1552, %192, %189 : vector<8x128xi1>, vector<8x128xf32>
    %1583 = arith.select %1552, %198, %195 : vector<8x128xi1>, vector<8x128xf32>
    %1584 = arith.select %1552, %204, %201 : vector<8x128xi1>, vector<8x128xf32>
    %1585 = arith.select %1552, %210, %207 : vector<8x128xi1>, vector<8x128xf32>
    %1586 = arith.select %1552, %216, %213 : vector<8x128xi1>, vector<8x128xf32>
    %1587 = arith.select %1552, %222, %219 : vector<8x128xi1>, vector<8x128xf32>
    %1588 = arith.select %1552, %228, %225 : vector<8x128xi1>, vector<8x128xf32>
    %1589 = arith.select %1552, %234, %231 : vector<8x128xi1>, vector<8x128xf32>
    %1590 = arith.select %1552, %240, %237 : vector<8x128xi1>, vector<8x128xf32>
    %1591 = arith.select %1552, %246, %243 : vector<8x128xi1>, vector<8x128xf32>
    %1592 = arith.select %1552, %252, %249 : vector<8x128xi1>, vector<8x128xf32>
    %1593 = arith.select %1552, %258, %255 : vector<8x128xi1>, vector<8x128xf32>
    %1594 = arith.select %1552, %264, %261 : vector<8x128xi1>, vector<8x128xf32>
    %1595 = arith.select %1552, %270, %267 : vector<8x128xi1>, vector<8x128xf32>
    %1596 = arith.select %1552, %276, %273 : vector<8x128xi1>, vector<8x128xf32>
    %1597 = arith.select %1552, %282, %279 : vector<8x128xi1>, vector<8x128xf32>
    %1598 = arith.select %1552, %288, %285 : vector<8x128xi1>, vector<8x128xf32>
    %1599 = arith.select %1552, %294, %291 : vector<8x128xi1>, vector<8x128xf32>
    %1600 = arith.select %1552, %300, %297 : vector<8x128xi1>, vector<8x128xf32>
    %1601 = arith.select %1552, %306, %303 : vector<8x128xi1>, vector<8x128xf32>
    %1602 = arith.select %1552, %312, %309 : vector<8x128xi1>, vector<8x128xf32>
    %1603 = arith.select %1552, %318, %315 : vector<8x128xi1>, vector<8x128xf32>
    %1604 = arith.select %1552, %324, %321 : vector<8x128xi1>, vector<8x128xf32>
    %1605 = arith.select %1552, %330, %327 : vector<8x128xi1>, vector<8x128xf32>
    %1606 = arith.select %1552, %336, %333 : vector<8x128xi1>, vector<8x128xf32>
    %1607 = arith.select %1552, %342, %339 : vector<8x128xi1>, vector<8x128xf32>
    %1608 = arith.select %1552, %348, %345 : vector<8x128xi1>, vector<8x128xf32>
    %1609 = arith.select %1552, %354, %351 : vector<8x128xi1>, vector<8x128xf32>
    %1610 = arith.select %1552, %360, %357 : vector<8x128xi1>, vector<8x128xf32>
    %1611 = arith.select %1552, %366, %363 : vector<8x128xi1>, vector<8x128xf32>
    %1612 = arith.select %1552, %372, %369 : vector<8x128xi1>, vector<8x128xf32>
    %1613 = arith.select %1552, %378, %375 : vector<8x128xi1>, vector<8x128xf32>
    %1614 = arith.select %1552, %384, %381 : vector<8x128xi1>, vector<8x128xf32>
    %1615 = arith.select %1552, %390, %387 : vector<8x128xi1>, vector<8x128xf32>
    %1616 = arith.select %1552, %396, %393 : vector<8x128xi1>, vector<8x128xf32>
    %1617 = arith.select %1552, %402, %399 : vector<8x128xi1>, vector<8x128xf32>
    %1618 = arith.select %1552, %408, %405 : vector<8x128xi1>, vector<8x128xf32>
    %1619 = arith.select %1552, %414, %411 : vector<8x128xi1>, vector<8x128xf32>
    %1620 = arith.select %1552, %420, %417 : vector<8x128xi1>, vector<8x128xf32>
    %1621 = arith.select %1552, %426, %423 : vector<8x128xi1>, vector<8x128xf32>
    %1622 = arith.select %1552, %432, %429 : vector<8x128xi1>, vector<8x128xf32>
    %1623 = arith.select %1552, %438, %435 : vector<8x128xi1>, vector<8x128xf32>
    %1624 = arith.select %1552, %444, %441 : vector<8x128xi1>, vector<8x128xf32>
    %1625 = arith.select %1552, %450, %447 : vector<8x128xi1>, vector<8x128xf32>
    %1626 = arith.select %1552, %456, %453 : vector<8x128xi1>, vector<8x128xf32>
    %1627 = arith.select %1552, %462, %459 : vector<8x128xi1>, vector<8x128xf32>
    %1628 = arith.select %1552, %468, %465 : vector<8x128xi1>, vector<8x128xf32>
    %1629 = arith.select %1552, %474, %471 : vector<8x128xi1>, vector<8x128xf32>
    %1630 = arith.select %1552, %480, %477 : vector<8x128xi1>, vector<8x128xf32>
    %1631 = arith.select %1552, %486, %483 : vector<8x128xi1>, vector<8x128xf32>
    %1632 = arith.select %1552, %492, %489 : vector<8x128xi1>, vector<8x128xf32>
    %1633 = arith.select %1552, %498, %495 : vector<8x128xi1>, vector<8x128xf32>
    %1634 = arith.select %1552, %504, %501 : vector<8x128xi1>, vector<8x128xf32>
    %1635 = arith.select %1552, %510, %507 : vector<8x128xi1>, vector<8x128xf32>
    %1636 = arith.select %1552, %516, %513 : vector<8x128xi1>, vector<8x128xf32>
    %1637 = arith.select %1552, %522, %519 : vector<8x128xi1>, vector<8x128xf32>
    %1638 = arith.select %1552, %528, %525 : vector<8x128xi1>, vector<8x128xf32>
    %1639 = arith.select %1552, %534, %531 : vector<8x128xi1>, vector<8x128xf32>
    %1640 = arith.select %1552, %540, %537 : vector<8x128xi1>, vector<8x128xf32>
    %1641 = arith.select %1552, %546, %543 : vector<8x128xi1>, vector<8x128xf32>
    %1642 = arith.select %1552, %552, %549 : vector<8x128xi1>, vector<8x128xf32>
    %1643 = arith.select %1552, %558, %555 : vector<8x128xi1>, vector<8x128xf32>
    %1644 = arith.select %1552, %564, %561 : vector<8x128xi1>, vector<8x128xf32>
    %1645 = arith.select %1552, %570, %567 : vector<8x128xi1>, vector<8x128xf32>
    %1646 = arith.select %1552, %576, %573 : vector<8x128xi1>, vector<8x128xf32>
    %1647 = arith.select %1552, %582, %579 : vector<8x128xi1>, vector<8x128xf32>
    %1648 = arith.select %1552, %588, %585 : vector<8x128xi1>, vector<8x128xf32>
    %1649 = arith.select %1552, %594, %591 : vector<8x128xi1>, vector<8x128xf32>
    %1650 = arith.select %1552, %600, %597 : vector<8x128xi1>, vector<8x128xf32>
    %1651 = arith.select %1552, %606, %603 : vector<8x128xi1>, vector<8x128xf32>
    %1652 = arith.select %1552, %612, %609 : vector<8x128xi1>, vector<8x128xf32>
    %1653 = arith.select %1552, %618, %615 : vector<8x128xi1>, vector<8x128xf32>
    %1654 = arith.select %1552, %624, %621 : vector<8x128xi1>, vector<8x128xf32>
    %1655 = arith.select %1552, %630, %627 : vector<8x128xi1>, vector<8x128xf32>
    %1656 = arith.select %1552, %636, %633 : vector<8x128xi1>, vector<8x128xf32>
    %1657 = arith.select %1552, %642, %639 : vector<8x128xi1>, vector<8x128xf32>
    %1658 = arith.select %1552, %648, %645 : vector<8x128xi1>, vector<8x128xf32>
    %1659 = arith.select %1552, %654, %651 : vector<8x128xi1>, vector<8x128xf32>
    %1660 = arith.select %1552, %660, %657 : vector<8x128xi1>, vector<8x128xf32>
    %1661 = arith.select %1552, %666, %663 : vector<8x128xi1>, vector<8x128xf32>
    %1662 = arith.select %1552, %672, %669 : vector<8x128xi1>, vector<8x128xf32>
    %1663 = arith.select %1552, %678, %675 : vector<8x128xi1>, vector<8x128xf32>
    %1664 = arith.select %1552, %684, %681 : vector<8x128xi1>, vector<8x128xf32>
    %1665 = arith.select %1552, %690, %687 : vector<8x128xi1>, vector<8x128xf32>
    %1666 = arith.select %1552, %696, %693 : vector<8x128xi1>, vector<8x128xf32>
    %1667 = arith.select %1552, %702, %699 : vector<8x128xi1>, vector<8x128xf32>
    %1668 = arith.select %1552, %708, %705 : vector<8x128xi1>, vector<8x128xf32>
    %1669 = arith.select %1552, %714, %711 : vector<8x128xi1>, vector<8x128xf32>
    %1670 = arith.select %1552, %720, %717 : vector<8x128xi1>, vector<8x128xf32>
    %1671 = arith.select %1552, %726, %723 : vector<8x128xi1>, vector<8x128xf32>
    %1672 = arith.select %1552, %732, %729 : vector<8x128xi1>, vector<8x128xf32>
    %1673 = arith.select %1552, %738, %735 : vector<8x128xi1>, vector<8x128xf32>
    %1674 = arith.select %1552, %744, %741 : vector<8x128xi1>, vector<8x128xf32>
    %1675 = arith.select %1552, %750, %747 : vector<8x128xi1>, vector<8x128xf32>
    %1676 = arith.select %1552, %756, %753 : vector<8x128xi1>, vector<8x128xf32>
    %1677 = arith.select %1552, %762, %759 : vector<8x128xi1>, vector<8x128xf32>
    %1678 = arith.select %1552, %768, %765 : vector<8x128xi1>, vector<8x128xf32>
    %1679 = arith.select %1552, %774, %771 : vector<8x128xi1>, vector<8x128xf32>
    %1680 = arith.select %1552, %780, %777 : vector<8x128xi1>, vector<8x128xf32>
    %1681 = arith.select %1552, %786, %783 : vector<8x128xi1>, vector<8x128xf32>
    %1682 = arith.select %1552, %792, %789 : vector<8x128xi1>, vector<8x128xf32>
    %1683 = arith.select %1552, %798, %795 : vector<8x128xi1>, vector<8x128xf32>
    %1684 = arith.select %1552, %804, %801 : vector<8x128xi1>, vector<8x128xf32>
    %1685 = arith.select %1552, %810, %807 : vector<8x128xi1>, vector<8x128xf32>
    %1686 = arith.select %1552, %816, %813 : vector<8x128xi1>, vector<8x128xf32>
    %1687 = arith.select %1552, %822, %819 : vector<8x128xi1>, vector<8x128xf32>
    %1688 = arith.select %1552, %828, %825 : vector<8x128xi1>, vector<8x128xf32>
    %1689 = arith.select %1552, %834, %831 : vector<8x128xi1>, vector<8x128xf32>
    %1690 = arith.select %1552, %840, %837 : vector<8x128xi1>, vector<8x128xf32>
    %1691 = arith.select %1552, %846, %843 : vector<8x128xi1>, vector<8x128xf32>
    %1692 = arith.select %1552, %852, %849 : vector<8x128xi1>, vector<8x128xf32>
    %1693 = arith.select %1552, %858, %855 : vector<8x128xi1>, vector<8x128xf32>
    %1694 = arith.select %1552, %864, %861 : vector<8x128xi1>, vector<8x128xf32>
    %1695 = arith.select %1552, %870, %867 : vector<8x128xi1>, vector<8x128xf32>
    %1696 = arith.select %1552, %876, %873 : vector<8x128xi1>, vector<8x128xf32>
    %1697 = arith.select %1552, %882, %879 : vector<8x128xi1>, vector<8x128xf32>
    %1698 = arith.select %1552, %888, %885 : vector<8x128xi1>, vector<8x128xf32>
    %1699 = arith.select %1552, %894, %891 : vector<8x128xi1>, vector<8x128xf32>
    %1700 = arith.select %1552, %900, %897 : vector<8x128xi1>, vector<8x128xf32>
    %1701 = arith.select %1552, %906, %903 : vector<8x128xi1>, vector<8x128xf32>
    %1702 = arith.select %1552, %912, %909 : vector<8x128xi1>, vector<8x128xf32>
    %1703 = arith.select %1552, %918, %915 : vector<8x128xi1>, vector<8x128xf32>
    %1704 = arith.select %1552, %924, %921 : vector<8x128xi1>, vector<8x128xf32>
    %1705 = arith.select %1552, %930, %927 : vector<8x128xi1>, vector<8x128xf32>
    %1706 = arith.select %1552, %936, %933 : vector<8x128xi1>, vector<8x128xf32>
    %1707 = arith.select %1552, %942, %939 : vector<8x128xi1>, vector<8x128xf32>
    %1708 = arith.select %1552, %948, %945 : vector<8x128xi1>, vector<8x128xf32>
    %1709 = arith.select %1552, %954, %951 : vector<8x128xi1>, vector<8x128xf32>
    %1710 = arith.select %1552, %960, %957 : vector<8x128xi1>, vector<8x128xf32>
    %1711 = arith.select %1552, %966, %963 : vector<8x128xi1>, vector<8x128xf32>
    %1712 = arith.select %1552, %972, %969 : vector<8x128xi1>, vector<8x128xf32>
    %1713 = arith.select %1552, %978, %975 : vector<8x128xi1>, vector<8x128xf32>
    %1714 = arith.select %1552, %984, %981 : vector<8x128xi1>, vector<8x128xf32>
    %1715 = arith.select %1552, %990, %987 : vector<8x128xi1>, vector<8x128xf32>
    %1716 = arith.select %1552, %996, %993 : vector<8x128xi1>, vector<8x128xf32>
    %1717 = arith.select %1552, %1002, %999 : vector<8x128xi1>, vector<8x128xf32>
    %1718 = arith.select %1552, %1008, %1005 : vector<8x128xi1>, vector<8x128xf32>
    %1719 = arith.select %1552, %1014, %1011 : vector<8x128xi1>, vector<8x128xf32>
    %1720 = arith.select %1552, %1020, %1017 : vector<8x128xi1>, vector<8x128xf32>
    %1721 = arith.select %1552, %1026, %1023 : vector<8x128xi1>, vector<8x128xf32>
    %1722 = arith.select %1552, %1032, %1029 : vector<8x128xi1>, vector<8x128xf32>
    %1723 = arith.select %1552, %1038, %1035 : vector<8x128xi1>, vector<8x128xf32>
    %1724 = arith.select %1552, %1044, %1041 : vector<8x128xi1>, vector<8x128xf32>
    %1725 = arith.select %1552, %1050, %1047 : vector<8x128xi1>, vector<8x128xf32>
    %1726 = arith.select %1552, %1056, %1053 : vector<8x128xi1>, vector<8x128xf32>
    %1727 = arith.select %1552, %1062, %1059 : vector<8x128xi1>, vector<8x128xf32>
    %1728 = arith.select %1552, %1068, %1065 : vector<8x128xi1>, vector<8x128xf32>
    %1729 = arith.select %1552, %1074, %1071 : vector<8x128xi1>, vector<8x128xf32>
    %1730 = arith.select %1552, %1080, %1077 : vector<8x128xi1>, vector<8x128xf32>
    %1731 = arith.select %1552, %1086, %1083 : vector<8x128xi1>, vector<8x128xf32>
    %1732 = arith.select %1552, %1092, %1089 : vector<8x128xi1>, vector<8x128xf32>
    %1733 = arith.select %1552, %1098, %1095 : vector<8x128xi1>, vector<8x128xf32>
    %1734 = arith.select %1552, %1104, %1101 : vector<8x128xi1>, vector<8x128xf32>
    %1735 = arith.select %1552, %1110, %1107 : vector<8x128xi1>, vector<8x128xf32>
    %1736 = arith.select %1552, %1116, %1113 : vector<8x128xi1>, vector<8x128xf32>
    %1737 = arith.select %1552, %1122, %1119 : vector<8x128xi1>, vector<8x128xf32>
    %1738 = arith.select %1552, %1128, %1125 : vector<8x128xi1>, vector<8x128xf32>
    %1739 = arith.select %1552, %1134, %1131 : vector<8x128xi1>, vector<8x128xf32>
    %1740 = arith.select %1552, %1140, %1137 : vector<8x128xi1>, vector<8x128xf32>
    %1741 = arith.select %1552, %1146, %1143 : vector<8x128xi1>, vector<8x128xf32>
    %1742 = arith.select %1552, %1152, %1149 : vector<8x128xi1>, vector<8x128xf32>
    %1743 = arith.select %1552, %1158, %1155 : vector<8x128xi1>, vector<8x128xf32>
    %1744 = arith.select %1552, %1164, %1161 : vector<8x128xi1>, vector<8x128xf32>
    %1745 = arith.select %1552, %1170, %1167 : vector<8x128xi1>, vector<8x128xf32>
    %1746 = arith.select %1552, %1176, %1173 : vector<8x128xi1>, vector<8x128xf32>
    %1747 = arith.select %1552, %1182, %1179 : vector<8x128xi1>, vector<8x128xf32>
    %1748 = arith.select %1552, %1188, %1185 : vector<8x128xi1>, vector<8x128xf32>
    %1749 = arith.select %1552, %1194, %1191 : vector<8x128xi1>, vector<8x128xf32>
    %1750 = arith.select %1552, %1200, %1197 : vector<8x128xi1>, vector<8x128xf32>
    %1751 = arith.select %1552, %1206, %1203 : vector<8x128xi1>, vector<8x128xf32>
    %1752 = arith.select %1552, %1212, %1209 : vector<8x128xi1>, vector<8x128xf32>
    %1753 = arith.select %1552, %1218, %1215 : vector<8x128xi1>, vector<8x128xf32>
    %1754 = arith.select %1552, %1224, %1221 : vector<8x128xi1>, vector<8x128xf32>
    %1755 = arith.select %1552, %1230, %1227 : vector<8x128xi1>, vector<8x128xf32>
    %1756 = arith.select %1552, %1236, %1233 : vector<8x128xi1>, vector<8x128xf32>
    %1757 = arith.select %1552, %1242, %1239 : vector<8x128xi1>, vector<8x128xf32>
    %1758 = arith.select %1552, %1248, %1245 : vector<8x128xi1>, vector<8x128xf32>
    %1759 = arith.select %1552, %1254, %1251 : vector<8x128xi1>, vector<8x128xf32>
    %1760 = arith.select %1552, %1260, %1257 : vector<8x128xi1>, vector<8x128xf32>
    %1761 = arith.select %1552, %1266, %1263 : vector<8x128xi1>, vector<8x128xf32>
    %1762 = arith.select %1552, %1272, %1269 : vector<8x128xi1>, vector<8x128xf32>
    %1763 = arith.select %1552, %1278, %1275 : vector<8x128xi1>, vector<8x128xf32>
    %1764 = arith.select %1552, %1284, %1281 : vector<8x128xi1>, vector<8x128xf32>
    %1765 = arith.select %1552, %1290, %1287 : vector<8x128xi1>, vector<8x128xf32>
    %1766 = arith.select %1552, %1296, %1293 : vector<8x128xi1>, vector<8x128xf32>
    %1767 = arith.select %1552, %1302, %1299 : vector<8x128xi1>, vector<8x128xf32>
    %1768 = arith.select %1552, %1308, %1305 : vector<8x128xi1>, vector<8x128xf32>
    %1769 = arith.select %1552, %1314, %1311 : vector<8x128xi1>, vector<8x128xf32>
    %1770 = arith.select %1552, %1320, %1317 : vector<8x128xi1>, vector<8x128xf32>
    %1771 = arith.select %1552, %1326, %1323 : vector<8x128xi1>, vector<8x128xf32>
    %1772 = arith.select %1552, %1332, %1329 : vector<8x128xi1>, vector<8x128xf32>
    %1773 = arith.select %1552, %1338, %1335 : vector<8x128xi1>, vector<8x128xf32>
    %1774 = arith.select %1552, %1344, %1341 : vector<8x128xi1>, vector<8x128xf32>
    %1775 = arith.select %1552, %1350, %1347 : vector<8x128xi1>, vector<8x128xf32>
    %1776 = arith.select %1552, %1356, %1353 : vector<8x128xi1>, vector<8x128xf32>
    %1777 = arith.select %1552, %1362, %1359 : vector<8x128xi1>, vector<8x128xf32>
    %1778 = arith.select %1552, %1368, %1365 : vector<8x128xi1>, vector<8x128xf32>
    %1779 = arith.select %1552, %1374, %1371 : vector<8x128xi1>, vector<8x128xf32>
    %1780 = arith.select %1552, %1380, %1377 : vector<8x128xi1>, vector<8x128xf32>
    %1781 = arith.select %1552, %1386, %1383 : vector<8x128xi1>, vector<8x128xf32>
    %1782 = arith.select %1552, %1392, %1389 : vector<8x128xi1>, vector<8x128xf32>
    %1783 = arith.select %1552, %1398, %1395 : vector<8x128xi1>, vector<8x128xf32>
    %1784 = arith.select %1552, %1404, %1401 : vector<8x128xi1>, vector<8x128xf32>
    %1785 = arith.select %1552, %1410, %1407 : vector<8x128xi1>, vector<8x128xf32>
    %1786 = arith.select %1552, %1416, %1413 : vector<8x128xi1>, vector<8x128xf32>
    %1787 = arith.select %1552, %1422, %1419 : vector<8x128xi1>, vector<8x128xf32>
    %1788 = arith.select %1552, %1428, %1425 : vector<8x128xi1>, vector<8x128xf32>
    %1789 = arith.select %1552, %1434, %1431 : vector<8x128xi1>, vector<8x128xf32>
    %1790 = arith.select %1552, %1440, %1437 : vector<8x128xi1>, vector<8x128xf32>
    %1791 = arith.select %1552, %1446, %1443 : vector<8x128xi1>, vector<8x128xf32>
    %1792 = arith.select %1552, %1452, %1449 : vector<8x128xi1>, vector<8x128xf32>
    %1793 = arith.select %1552, %1458, %1455 : vector<8x128xi1>, vector<8x128xf32>
    %1794 = arith.select %1552, %1464, %1461 : vector<8x128xi1>, vector<8x128xf32>
    %1795 = arith.select %1552, %1470, %1467 : vector<8x128xi1>, vector<8x128xf32>
    %1796 = arith.select %1552, %1476, %1473 : vector<8x128xi1>, vector<8x128xf32>
    %1797 = arith.select %1552, %1482, %1479 : vector<8x128xi1>, vector<8x128xf32>
    %1798 = arith.select %1552, %1488, %1485 : vector<8x128xi1>, vector<8x128xf32>
    %1799 = arith.select %1552, %1494, %1491 : vector<8x128xi1>, vector<8x128xf32>
    %1800 = arith.select %1552, %1500, %1497 : vector<8x128xi1>, vector<8x128xf32>
    %1801 = arith.select %1552, %1506, %1503 : vector<8x128xi1>, vector<8x128xf32>
    %1802 = arith.select %1552, %1512, %1509 : vector<8x128xi1>, vector<8x128xf32>
    %1803 = arith.select %1552, %1518, %1515 : vector<8x128xi1>, vector<8x128xf32>
    %1804 = arith.select %1552, %1524, %1521 : vector<8x128xi1>, vector<8x128xf32>
    %1805 = arith.select %1552, %1530, %1527 : vector<8x128xi1>, vector<8x128xf32>
    %1806 = arith.select %1552, %1536, %1533 : vector<8x128xi1>, vector<8x128xf32>
    %1807 = arith.select %1552, %1542, %1539 : vector<8x128xi1>, vector<8x128xf32>
    %1808 = arith.select %1552, %1548, %1545 : vector<8x128xi1>, vector<8x128xf32>
    %c4_i32 = arith.constant 4 : i32
    %1809 = vector.broadcast %c4_i32 : i32 to vector<8x128xi32>
    %1810 = arith.andi %8, %1809 : vector<8x128xi32>
    %c0_i32_1027 = arith.constant 0 : i32
    %1811 = vector.broadcast %c0_i32_1027 : i32 to vector<8x128xi32>
    %1812 = arith.cmpi ne, %1810, %1811 : vector<8x128xi32>
    %1813 = arith.select %1812, %1554, %1553 : vector<8x128xi1>, vector<8x128xf32>
    %1814 = arith.select %1812, %1556, %1555 : vector<8x128xi1>, vector<8x128xf32>
    %1815 = arith.select %1812, %1558, %1557 : vector<8x128xi1>, vector<8x128xf32>
    %1816 = arith.select %1812, %1560, %1559 : vector<8x128xi1>, vector<8x128xf32>
    %1817 = arith.select %1812, %1562, %1561 : vector<8x128xi1>, vector<8x128xf32>
    %1818 = arith.select %1812, %1564, %1563 : vector<8x128xi1>, vector<8x128xf32>
    %1819 = arith.select %1812, %1566, %1565 : vector<8x128xi1>, vector<8x128xf32>
    %1820 = arith.select %1812, %1568, %1567 : vector<8x128xi1>, vector<8x128xf32>
    %1821 = arith.select %1812, %1570, %1569 : vector<8x128xi1>, vector<8x128xf32>
    %1822 = arith.select %1812, %1572, %1571 : vector<8x128xi1>, vector<8x128xf32>
    %1823 = arith.select %1812, %1574, %1573 : vector<8x128xi1>, vector<8x128xf32>
    %1824 = arith.select %1812, %1576, %1575 : vector<8x128xi1>, vector<8x128xf32>
    %1825 = arith.select %1812, %1578, %1577 : vector<8x128xi1>, vector<8x128xf32>
    %1826 = arith.select %1812, %1580, %1579 : vector<8x128xi1>, vector<8x128xf32>
    %1827 = arith.select %1812, %1582, %1581 : vector<8x128xi1>, vector<8x128xf32>
    %1828 = arith.select %1812, %1584, %1583 : vector<8x128xi1>, vector<8x128xf32>
    %1829 = arith.select %1812, %1586, %1585 : vector<8x128xi1>, vector<8x128xf32>
    %1830 = arith.select %1812, %1588, %1587 : vector<8x128xi1>, vector<8x128xf32>
    %1831 = arith.select %1812, %1590, %1589 : vector<8x128xi1>, vector<8x128xf32>
    %1832 = arith.select %1812, %1592, %1591 : vector<8x128xi1>, vector<8x128xf32>
    %1833 = arith.select %1812, %1594, %1593 : vector<8x128xi1>, vector<8x128xf32>
    %1834 = arith.select %1812, %1596, %1595 : vector<8x128xi1>, vector<8x128xf32>
    %1835 = arith.select %1812, %1598, %1597 : vector<8x128xi1>, vector<8x128xf32>
    %1836 = arith.select %1812, %1600, %1599 : vector<8x128xi1>, vector<8x128xf32>
    %1837 = arith.select %1812, %1602, %1601 : vector<8x128xi1>, vector<8x128xf32>
    %1838 = arith.select %1812, %1604, %1603 : vector<8x128xi1>, vector<8x128xf32>
    %1839 = arith.select %1812, %1606, %1605 : vector<8x128xi1>, vector<8x128xf32>
    %1840 = arith.select %1812, %1608, %1607 : vector<8x128xi1>, vector<8x128xf32>
    %1841 = arith.select %1812, %1610, %1609 : vector<8x128xi1>, vector<8x128xf32>
    %1842 = arith.select %1812, %1612, %1611 : vector<8x128xi1>, vector<8x128xf32>
    %1843 = arith.select %1812, %1614, %1613 : vector<8x128xi1>, vector<8x128xf32>
    %1844 = arith.select %1812, %1616, %1615 : vector<8x128xi1>, vector<8x128xf32>
    %1845 = arith.select %1812, %1618, %1617 : vector<8x128xi1>, vector<8x128xf32>
    %1846 = arith.select %1812, %1620, %1619 : vector<8x128xi1>, vector<8x128xf32>
    %1847 = arith.select %1812, %1622, %1621 : vector<8x128xi1>, vector<8x128xf32>
    %1848 = arith.select %1812, %1624, %1623 : vector<8x128xi1>, vector<8x128xf32>
    %1849 = arith.select %1812, %1626, %1625 : vector<8x128xi1>, vector<8x128xf32>
    %1850 = arith.select %1812, %1628, %1627 : vector<8x128xi1>, vector<8x128xf32>
    %1851 = arith.select %1812, %1630, %1629 : vector<8x128xi1>, vector<8x128xf32>
    %1852 = arith.select %1812, %1632, %1631 : vector<8x128xi1>, vector<8x128xf32>
    %1853 = arith.select %1812, %1634, %1633 : vector<8x128xi1>, vector<8x128xf32>
    %1854 = arith.select %1812, %1636, %1635 : vector<8x128xi1>, vector<8x128xf32>
    %1855 = arith.select %1812, %1638, %1637 : vector<8x128xi1>, vector<8x128xf32>
    %1856 = arith.select %1812, %1640, %1639 : vector<8x128xi1>, vector<8x128xf32>
    %1857 = arith.select %1812, %1642, %1641 : vector<8x128xi1>, vector<8x128xf32>
    %1858 = arith.select %1812, %1644, %1643 : vector<8x128xi1>, vector<8x128xf32>
    %1859 = arith.select %1812, %1646, %1645 : vector<8x128xi1>, vector<8x128xf32>
    %1860 = arith.select %1812, %1648, %1647 : vector<8x128xi1>, vector<8x128xf32>
    %1861 = arith.select %1812, %1650, %1649 : vector<8x128xi1>, vector<8x128xf32>
    %1862 = arith.select %1812, %1652, %1651 : vector<8x128xi1>, vector<8x128xf32>
    %1863 = arith.select %1812, %1654, %1653 : vector<8x128xi1>, vector<8x128xf32>
    %1864 = arith.select %1812, %1656, %1655 : vector<8x128xi1>, vector<8x128xf32>
    %1865 = arith.select %1812, %1658, %1657 : vector<8x128xi1>, vector<8x128xf32>
    %1866 = arith.select %1812, %1660, %1659 : vector<8x128xi1>, vector<8x128xf32>
    %1867 = arith.select %1812, %1662, %1661 : vector<8x128xi1>, vector<8x128xf32>
    %1868 = arith.select %1812, %1664, %1663 : vector<8x128xi1>, vector<8x128xf32>
    %1869 = arith.select %1812, %1666, %1665 : vector<8x128xi1>, vector<8x128xf32>
    %1870 = arith.select %1812, %1668, %1667 : vector<8x128xi1>, vector<8x128xf32>
    %1871 = arith.select %1812, %1670, %1669 : vector<8x128xi1>, vector<8x128xf32>
    %1872 = arith.select %1812, %1672, %1671 : vector<8x128xi1>, vector<8x128xf32>
    %1873 = arith.select %1812, %1674, %1673 : vector<8x128xi1>, vector<8x128xf32>
    %1874 = arith.select %1812, %1676, %1675 : vector<8x128xi1>, vector<8x128xf32>
    %1875 = arith.select %1812, %1678, %1677 : vector<8x128xi1>, vector<8x128xf32>
    %1876 = arith.select %1812, %1680, %1679 : vector<8x128xi1>, vector<8x128xf32>
    %1877 = arith.select %1812, %1682, %1681 : vector<8x128xi1>, vector<8x128xf32>
    %1878 = arith.select %1812, %1684, %1683 : vector<8x128xi1>, vector<8x128xf32>
    %1879 = arith.select %1812, %1686, %1685 : vector<8x128xi1>, vector<8x128xf32>
    %1880 = arith.select %1812, %1688, %1687 : vector<8x128xi1>, vector<8x128xf32>
    %1881 = arith.select %1812, %1690, %1689 : vector<8x128xi1>, vector<8x128xf32>
    %1882 = arith.select %1812, %1692, %1691 : vector<8x128xi1>, vector<8x128xf32>
    %1883 = arith.select %1812, %1694, %1693 : vector<8x128xi1>, vector<8x128xf32>
    %1884 = arith.select %1812, %1696, %1695 : vector<8x128xi1>, vector<8x128xf32>
    %1885 = arith.select %1812, %1698, %1697 : vector<8x128xi1>, vector<8x128xf32>
    %1886 = arith.select %1812, %1700, %1699 : vector<8x128xi1>, vector<8x128xf32>
    %1887 = arith.select %1812, %1702, %1701 : vector<8x128xi1>, vector<8x128xf32>
    %1888 = arith.select %1812, %1704, %1703 : vector<8x128xi1>, vector<8x128xf32>
    %1889 = arith.select %1812, %1706, %1705 : vector<8x128xi1>, vector<8x128xf32>
    %1890 = arith.select %1812, %1708, %1707 : vector<8x128xi1>, vector<8x128xf32>
    %1891 = arith.select %1812, %1710, %1709 : vector<8x128xi1>, vector<8x128xf32>
    %1892 = arith.select %1812, %1712, %1711 : vector<8x128xi1>, vector<8x128xf32>
    %1893 = arith.select %1812, %1714, %1713 : vector<8x128xi1>, vector<8x128xf32>
    %1894 = arith.select %1812, %1716, %1715 : vector<8x128xi1>, vector<8x128xf32>
    %1895 = arith.select %1812, %1718, %1717 : vector<8x128xi1>, vector<8x128xf32>
    %1896 = arith.select %1812, %1720, %1719 : vector<8x128xi1>, vector<8x128xf32>
    %1897 = arith.select %1812, %1722, %1721 : vector<8x128xi1>, vector<8x128xf32>
    %1898 = arith.select %1812, %1724, %1723 : vector<8x128xi1>, vector<8x128xf32>
    %1899 = arith.select %1812, %1726, %1725 : vector<8x128xi1>, vector<8x128xf32>
    %1900 = arith.select %1812, %1728, %1727 : vector<8x128xi1>, vector<8x128xf32>
    %1901 = arith.select %1812, %1730, %1729 : vector<8x128xi1>, vector<8x128xf32>
    %1902 = arith.select %1812, %1732, %1731 : vector<8x128xi1>, vector<8x128xf32>
    %1903 = arith.select %1812, %1734, %1733 : vector<8x128xi1>, vector<8x128xf32>
    %1904 = arith.select %1812, %1736, %1735 : vector<8x128xi1>, vector<8x128xf32>
    %1905 = arith.select %1812, %1738, %1737 : vector<8x128xi1>, vector<8x128xf32>
    %1906 = arith.select %1812, %1740, %1739 : vector<8x128xi1>, vector<8x128xf32>
    %1907 = arith.select %1812, %1742, %1741 : vector<8x128xi1>, vector<8x128xf32>
    %1908 = arith.select %1812, %1744, %1743 : vector<8x128xi1>, vector<8x128xf32>
    %1909 = arith.select %1812, %1746, %1745 : vector<8x128xi1>, vector<8x128xf32>
    %1910 = arith.select %1812, %1748, %1747 : vector<8x128xi1>, vector<8x128xf32>
    %1911 = arith.select %1812, %1750, %1749 : vector<8x128xi1>, vector<8x128xf32>
    %1912 = arith.select %1812, %1752, %1751 : vector<8x128xi1>, vector<8x128xf32>
    %1913 = arith.select %1812, %1754, %1753 : vector<8x128xi1>, vector<8x128xf32>
    %1914 = arith.select %1812, %1756, %1755 : vector<8x128xi1>, vector<8x128xf32>
    %1915 = arith.select %1812, %1758, %1757 : vector<8x128xi1>, vector<8x128xf32>
    %1916 = arith.select %1812, %1760, %1759 : vector<8x128xi1>, vector<8x128xf32>
    %1917 = arith.select %1812, %1762, %1761 : vector<8x128xi1>, vector<8x128xf32>
    %1918 = arith.select %1812, %1764, %1763 : vector<8x128xi1>, vector<8x128xf32>
    %1919 = arith.select %1812, %1766, %1765 : vector<8x128xi1>, vector<8x128xf32>
    %1920 = arith.select %1812, %1768, %1767 : vector<8x128xi1>, vector<8x128xf32>
    %1921 = arith.select %1812, %1770, %1769 : vector<8x128xi1>, vector<8x128xf32>
    %1922 = arith.select %1812, %1772, %1771 : vector<8x128xi1>, vector<8x128xf32>
    %1923 = arith.select %1812, %1774, %1773 : vector<8x128xi1>, vector<8x128xf32>
    %1924 = arith.select %1812, %1776, %1775 : vector<8x128xi1>, vector<8x128xf32>
    %1925 = arith.select %1812, %1778, %1777 : vector<8x128xi1>, vector<8x128xf32>
    %1926 = arith.select %1812, %1780, %1779 : vector<8x128xi1>, vector<8x128xf32>
    %1927 = arith.select %1812, %1782, %1781 : vector<8x128xi1>, vector<8x128xf32>
    %1928 = arith.select %1812, %1784, %1783 : vector<8x128xi1>, vector<8x128xf32>
    %1929 = arith.select %1812, %1786, %1785 : vector<8x128xi1>, vector<8x128xf32>
    %1930 = arith.select %1812, %1788, %1787 : vector<8x128xi1>, vector<8x128xf32>
    %1931 = arith.select %1812, %1790, %1789 : vector<8x128xi1>, vector<8x128xf32>
    %1932 = arith.select %1812, %1792, %1791 : vector<8x128xi1>, vector<8x128xf32>
    %1933 = arith.select %1812, %1794, %1793 : vector<8x128xi1>, vector<8x128xf32>
    %1934 = arith.select %1812, %1796, %1795 : vector<8x128xi1>, vector<8x128xf32>
    %1935 = arith.select %1812, %1798, %1797 : vector<8x128xi1>, vector<8x128xf32>
    %1936 = arith.select %1812, %1800, %1799 : vector<8x128xi1>, vector<8x128xf32>
    %1937 = arith.select %1812, %1802, %1801 : vector<8x128xi1>, vector<8x128xf32>
    %1938 = arith.select %1812, %1804, %1803 : vector<8x128xi1>, vector<8x128xf32>
    %1939 = arith.select %1812, %1806, %1805 : vector<8x128xi1>, vector<8x128xf32>
    %1940 = arith.select %1812, %1808, %1807 : vector<8x128xi1>, vector<8x128xf32>
    %c8_i32 = arith.constant 8 : i32
    %1941 = vector.broadcast %c8_i32 : i32 to vector<8x128xi32>
    %1942 = arith.andi %8, %1941 : vector<8x128xi32>
    %c0_i32_1028 = arith.constant 0 : i32
    %1943 = vector.broadcast %c0_i32_1028 : i32 to vector<8x128xi32>
    %1944 = arith.cmpi ne, %1942, %1943 : vector<8x128xi32>
    %1945 = arith.select %1944, %1814, %1813 : vector<8x128xi1>, vector<8x128xf32>
    %1946 = arith.select %1944, %1816, %1815 : vector<8x128xi1>, vector<8x128xf32>
    %1947 = arith.select %1944, %1818, %1817 : vector<8x128xi1>, vector<8x128xf32>
    %1948 = arith.select %1944, %1820, %1819 : vector<8x128xi1>, vector<8x128xf32>
    %1949 = arith.select %1944, %1822, %1821 : vector<8x128xi1>, vector<8x128xf32>
    %1950 = arith.select %1944, %1824, %1823 : vector<8x128xi1>, vector<8x128xf32>
    %1951 = arith.select %1944, %1826, %1825 : vector<8x128xi1>, vector<8x128xf32>
    %1952 = arith.select %1944, %1828, %1827 : vector<8x128xi1>, vector<8x128xf32>
    %1953 = arith.select %1944, %1830, %1829 : vector<8x128xi1>, vector<8x128xf32>
    %1954 = arith.select %1944, %1832, %1831 : vector<8x128xi1>, vector<8x128xf32>
    %1955 = arith.select %1944, %1834, %1833 : vector<8x128xi1>, vector<8x128xf32>
    %1956 = arith.select %1944, %1836, %1835 : vector<8x128xi1>, vector<8x128xf32>
    %1957 = arith.select %1944, %1838, %1837 : vector<8x128xi1>, vector<8x128xf32>
    %1958 = arith.select %1944, %1840, %1839 : vector<8x128xi1>, vector<8x128xf32>
    %1959 = arith.select %1944, %1842, %1841 : vector<8x128xi1>, vector<8x128xf32>
    %1960 = arith.select %1944, %1844, %1843 : vector<8x128xi1>, vector<8x128xf32>
    %1961 = arith.select %1944, %1846, %1845 : vector<8x128xi1>, vector<8x128xf32>
    %1962 = arith.select %1944, %1848, %1847 : vector<8x128xi1>, vector<8x128xf32>
    %1963 = arith.select %1944, %1850, %1849 : vector<8x128xi1>, vector<8x128xf32>
    %1964 = arith.select %1944, %1852, %1851 : vector<8x128xi1>, vector<8x128xf32>
    %1965 = arith.select %1944, %1854, %1853 : vector<8x128xi1>, vector<8x128xf32>
    %1966 = arith.select %1944, %1856, %1855 : vector<8x128xi1>, vector<8x128xf32>
    %1967 = arith.select %1944, %1858, %1857 : vector<8x128xi1>, vector<8x128xf32>
    %1968 = arith.select %1944, %1860, %1859 : vector<8x128xi1>, vector<8x128xf32>
    %1969 = arith.select %1944, %1862, %1861 : vector<8x128xi1>, vector<8x128xf32>
    %1970 = arith.select %1944, %1864, %1863 : vector<8x128xi1>, vector<8x128xf32>
    %1971 = arith.select %1944, %1866, %1865 : vector<8x128xi1>, vector<8x128xf32>
    %1972 = arith.select %1944, %1868, %1867 : vector<8x128xi1>, vector<8x128xf32>
    %1973 = arith.select %1944, %1870, %1869 : vector<8x128xi1>, vector<8x128xf32>
    %1974 = arith.select %1944, %1872, %1871 : vector<8x128xi1>, vector<8x128xf32>
    %1975 = arith.select %1944, %1874, %1873 : vector<8x128xi1>, vector<8x128xf32>
    %1976 = arith.select %1944, %1876, %1875 : vector<8x128xi1>, vector<8x128xf32>
    %1977 = arith.select %1944, %1878, %1877 : vector<8x128xi1>, vector<8x128xf32>
    %1978 = arith.select %1944, %1880, %1879 : vector<8x128xi1>, vector<8x128xf32>
    %1979 = arith.select %1944, %1882, %1881 : vector<8x128xi1>, vector<8x128xf32>
    %1980 = arith.select %1944, %1884, %1883 : vector<8x128xi1>, vector<8x128xf32>
    %1981 = arith.select %1944, %1886, %1885 : vector<8x128xi1>, vector<8x128xf32>
    %1982 = arith.select %1944, %1888, %1887 : vector<8x128xi1>, vector<8x128xf32>
    %1983 = arith.select %1944, %1890, %1889 : vector<8x128xi1>, vector<8x128xf32>
    %1984 = arith.select %1944, %1892, %1891 : vector<8x128xi1>, vector<8x128xf32>
    %1985 = arith.select %1944, %1894, %1893 : vector<8x128xi1>, vector<8x128xf32>
    %1986 = arith.select %1944, %1896, %1895 : vector<8x128xi1>, vector<8x128xf32>
    %1987 = arith.select %1944, %1898, %1897 : vector<8x128xi1>, vector<8x128xf32>
    %1988 = arith.select %1944, %1900, %1899 : vector<8x128xi1>, vector<8x128xf32>
    %1989 = arith.select %1944, %1902, %1901 : vector<8x128xi1>, vector<8x128xf32>
    %1990 = arith.select %1944, %1904, %1903 : vector<8x128xi1>, vector<8x128xf32>
    %1991 = arith.select %1944, %1906, %1905 : vector<8x128xi1>, vector<8x128xf32>
    %1992 = arith.select %1944, %1908, %1907 : vector<8x128xi1>, vector<8x128xf32>
    %1993 = arith.select %1944, %1910, %1909 : vector<8x128xi1>, vector<8x128xf32>
    %1994 = arith.select %1944, %1912, %1911 : vector<8x128xi1>, vector<8x128xf32>
    %1995 = arith.select %1944, %1914, %1913 : vector<8x128xi1>, vector<8x128xf32>
    %1996 = arith.select %1944, %1916, %1915 : vector<8x128xi1>, vector<8x128xf32>
    %1997 = arith.select %1944, %1918, %1917 : vector<8x128xi1>, vector<8x128xf32>
    %1998 = arith.select %1944, %1920, %1919 : vector<8x128xi1>, vector<8x128xf32>
    %1999 = arith.select %1944, %1922, %1921 : vector<8x128xi1>, vector<8x128xf32>
    %2000 = arith.select %1944, %1924, %1923 : vector<8x128xi1>, vector<8x128xf32>
    %2001 = arith.select %1944, %1926, %1925 : vector<8x128xi1>, vector<8x128xf32>
    %2002 = arith.select %1944, %1928, %1927 : vector<8x128xi1>, vector<8x128xf32>
    %2003 = arith.select %1944, %1930, %1929 : vector<8x128xi1>, vector<8x128xf32>
    %2004 = arith.select %1944, %1932, %1931 : vector<8x128xi1>, vector<8x128xf32>
    %2005 = arith.select %1944, %1934, %1933 : vector<8x128xi1>, vector<8x128xf32>
    %2006 = arith.select %1944, %1936, %1935 : vector<8x128xi1>, vector<8x128xf32>
    %2007 = arith.select %1944, %1938, %1937 : vector<8x128xi1>, vector<8x128xf32>
    %2008 = arith.select %1944, %1940, %1939 : vector<8x128xi1>, vector<8x128xf32>
    %c16_i32 = arith.constant 16 : i32
    %2009 = vector.broadcast %c16_i32 : i32 to vector<8x128xi32>
    %2010 = arith.andi %8, %2009 : vector<8x128xi32>
    %c0_i32_1029 = arith.constant 0 : i32
    %2011 = vector.broadcast %c0_i32_1029 : i32 to vector<8x128xi32>
    %2012 = arith.cmpi ne, %2010, %2011 : vector<8x128xi32>
    %2013 = arith.select %2012, %1946, %1945 : vector<8x128xi1>, vector<8x128xf32>
    %2014 = arith.select %2012, %1948, %1947 : vector<8x128xi1>, vector<8x128xf32>
    %2015 = arith.select %2012, %1950, %1949 : vector<8x128xi1>, vector<8x128xf32>
    %2016 = arith.select %2012, %1952, %1951 : vector<8x128xi1>, vector<8x128xf32>
    %2017 = arith.select %2012, %1954, %1953 : vector<8x128xi1>, vector<8x128xf32>
    %2018 = arith.select %2012, %1956, %1955 : vector<8x128xi1>, vector<8x128xf32>
    %2019 = arith.select %2012, %1958, %1957 : vector<8x128xi1>, vector<8x128xf32>
    %2020 = arith.select %2012, %1960, %1959 : vector<8x128xi1>, vector<8x128xf32>
    %2021 = arith.select %2012, %1962, %1961 : vector<8x128xi1>, vector<8x128xf32>
    %2022 = arith.select %2012, %1964, %1963 : vector<8x128xi1>, vector<8x128xf32>
    %2023 = arith.select %2012, %1966, %1965 : vector<8x128xi1>, vector<8x128xf32>
    %2024 = arith.select %2012, %1968, %1967 : vector<8x128xi1>, vector<8x128xf32>
    %2025 = arith.select %2012, %1970, %1969 : vector<8x128xi1>, vector<8x128xf32>
    %2026 = arith.select %2012, %1972, %1971 : vector<8x128xi1>, vector<8x128xf32>
    %2027 = arith.select %2012, %1974, %1973 : vector<8x128xi1>, vector<8x128xf32>
    %2028 = arith.select %2012, %1976, %1975 : vector<8x128xi1>, vector<8x128xf32>
    %2029 = arith.select %2012, %1978, %1977 : vector<8x128xi1>, vector<8x128xf32>
    %2030 = arith.select %2012, %1980, %1979 : vector<8x128xi1>, vector<8x128xf32>
    %2031 = arith.select %2012, %1982, %1981 : vector<8x128xi1>, vector<8x128xf32>
    %2032 = arith.select %2012, %1984, %1983 : vector<8x128xi1>, vector<8x128xf32>
    %2033 = arith.select %2012, %1986, %1985 : vector<8x128xi1>, vector<8x128xf32>
    %2034 = arith.select %2012, %1988, %1987 : vector<8x128xi1>, vector<8x128xf32>
    %2035 = arith.select %2012, %1990, %1989 : vector<8x128xi1>, vector<8x128xf32>
    %2036 = arith.select %2012, %1992, %1991 : vector<8x128xi1>, vector<8x128xf32>
    %2037 = arith.select %2012, %1994, %1993 : vector<8x128xi1>, vector<8x128xf32>
    %2038 = arith.select %2012, %1996, %1995 : vector<8x128xi1>, vector<8x128xf32>
    %2039 = arith.select %2012, %1998, %1997 : vector<8x128xi1>, vector<8x128xf32>
    %2040 = arith.select %2012, %2000, %1999 : vector<8x128xi1>, vector<8x128xf32>
    %2041 = arith.select %2012, %2002, %2001 : vector<8x128xi1>, vector<8x128xf32>
    %2042 = arith.select %2012, %2004, %2003 : vector<8x128xi1>, vector<8x128xf32>
    %2043 = arith.select %2012, %2006, %2005 : vector<8x128xi1>, vector<8x128xf32>
    %2044 = arith.select %2012, %2008, %2007 : vector<8x128xi1>, vector<8x128xf32>
    %c32_i32 = arith.constant 32 : i32
    %2045 = vector.broadcast %c32_i32 : i32 to vector<8x128xi32>
    %2046 = arith.andi %8, %2045 : vector<8x128xi32>
    %c0_i32_1030 = arith.constant 0 : i32
    %2047 = vector.broadcast %c0_i32_1030 : i32 to vector<8x128xi32>
    %2048 = arith.cmpi ne, %2046, %2047 : vector<8x128xi32>
    %2049 = arith.select %2048, %2014, %2013 : vector<8x128xi1>, vector<8x128xf32>
    %2050 = arith.select %2048, %2016, %2015 : vector<8x128xi1>, vector<8x128xf32>
    %2051 = arith.select %2048, %2018, %2017 : vector<8x128xi1>, vector<8x128xf32>
    %2052 = arith.select %2048, %2020, %2019 : vector<8x128xi1>, vector<8x128xf32>
    %2053 = arith.select %2048, %2022, %2021 : vector<8x128xi1>, vector<8x128xf32>
    %2054 = arith.select %2048, %2024, %2023 : vector<8x128xi1>, vector<8x128xf32>
    %2055 = arith.select %2048, %2026, %2025 : vector<8x128xi1>, vector<8x128xf32>
    %2056 = arith.select %2048, %2028, %2027 : vector<8x128xi1>, vector<8x128xf32>
    %2057 = arith.select %2048, %2030, %2029 : vector<8x128xi1>, vector<8x128xf32>
    %2058 = arith.select %2048, %2032, %2031 : vector<8x128xi1>, vector<8x128xf32>
    %2059 = arith.select %2048, %2034, %2033 : vector<8x128xi1>, vector<8x128xf32>
    %2060 = arith.select %2048, %2036, %2035 : vector<8x128xi1>, vector<8x128xf32>
    %2061 = arith.select %2048, %2038, %2037 : vector<8x128xi1>, vector<8x128xf32>
    %2062 = arith.select %2048, %2040, %2039 : vector<8x128xi1>, vector<8x128xf32>
    %2063 = arith.select %2048, %2042, %2041 : vector<8x128xi1>, vector<8x128xf32>
    %2064 = arith.select %2048, %2044, %2043 : vector<8x128xi1>, vector<8x128xf32>
    %c64_i32 = arith.constant 64 : i32
    %2065 = vector.broadcast %c64_i32 : i32 to vector<8x128xi32>
    %2066 = arith.andi %8, %2065 : vector<8x128xi32>
    %c0_i32_1031 = arith.constant 0 : i32
    %2067 = vector.broadcast %c0_i32_1031 : i32 to vector<8x128xi32>
    %2068 = arith.cmpi ne, %2066, %2067 : vector<8x128xi32>
    %2069 = arith.select %2068, %2050, %2049 : vector<8x128xi1>, vector<8x128xf32>
    %2070 = arith.select %2068, %2052, %2051 : vector<8x128xi1>, vector<8x128xf32>
    %2071 = arith.select %2068, %2054, %2053 : vector<8x128xi1>, vector<8x128xf32>
    %2072 = arith.select %2068, %2056, %2055 : vector<8x128xi1>, vector<8x128xf32>
    %2073 = arith.select %2068, %2058, %2057 : vector<8x128xi1>, vector<8x128xf32>
    %2074 = arith.select %2068, %2060, %2059 : vector<8x128xi1>, vector<8x128xf32>
    %2075 = arith.select %2068, %2062, %2061 : vector<8x128xi1>, vector<8x128xf32>
    %2076 = arith.select %2068, %2064, %2063 : vector<8x128xi1>, vector<8x128xf32>
    %c128_i32 = arith.constant 128 : i32
    %2077 = vector.broadcast %c128_i32 : i32 to vector<8x128xi32>
    %2078 = arith.andi %8, %2077 : vector<8x128xi32>
    %c0_i32_1032 = arith.constant 0 : i32
    %2079 = vector.broadcast %c0_i32_1032 : i32 to vector<8x128xi32>
    %2080 = arith.cmpi ne, %2078, %2079 : vector<8x128xi32>
    %2081 = arith.select %2080, %2070, %2069 : vector<8x128xi1>, vector<8x128xf32>
    %2082 = arith.select %2080, %2072, %2071 : vector<8x128xi1>, vector<8x128xf32>
    %2083 = arith.select %2080, %2074, %2073 : vector<8x128xi1>, vector<8x128xf32>
    %2084 = arith.select %2080, %2076, %2075 : vector<8x128xi1>, vector<8x128xf32>
    %c256_i32 = arith.constant 256 : i32
    %2085 = vector.broadcast %c256_i32 : i32 to vector<8x128xi32>
    %2086 = arith.andi %8, %2085 : vector<8x128xi32>
    %c0_i32_1033 = arith.constant 0 : i32
    %2087 = vector.broadcast %c0_i32_1033 : i32 to vector<8x128xi32>
    %2088 = arith.cmpi ne, %2086, %2087 : vector<8x128xi32>
    %2089 = arith.select %2088, %2082, %2081 : vector<8x128xi1>, vector<8x128xf32>
    %2090 = arith.select %2088, %2084, %2083 : vector<8x128xi1>, vector<8x128xf32>
    %c512_i32 = arith.constant 512 : i32
    %2091 = vector.broadcast %c512_i32 : i32 to vector<8x128xi32>
    %2092 = arith.andi %8, %2091 : vector<8x128xi32>
    %c0_i32_1034 = arith.constant 0 : i32
    %2093 = vector.broadcast %c0_i32_1034 : i32 to vector<8x128xi32>
    %2094 = arith.cmpi ne, %2092, %2093 : vector<8x128xi32>
    %2095 = arith.select %2094, %2090, %2089 : vector<8x128xi1>, vector<8x128xf32>
    %c0_1035 = arith.constant 0 : index
    %c0_1036 = arith.constant 0 : index
    %2096 = vector.load %arg2[%c0_1035, %c0_1036] : memref<8x128xf32, #tpu.memory_space<vmem>>, vector<8x128xf32>
    tpu.vector_store %arg2[%c0_1035, %c0_1036], %2095 {strides = array<i32>} : memref<8x128xf32, #tpu.memory_space<vmem>>, vector<8x128xf32>,
    return
  }
  func.func @transform_0(%arg0: i32) -> (i32, i32) {
    %c0_i32 = arith.constant 0 : i32
    %c0_i32_0 = arith.constant 0 : i32
    return %arg0, %c0_i32 : i32, i32
  }
  func.func @transform_1(%arg0: i32) -> (i32, i32) {
    %c0_i32 = arith.constant 0 : i32
    %c0_i32_0 = arith.constant 0 : i32
    return %arg0, %c0_i32 : i32, i32
  }
}

</mosaic_0001>

<bundles_post_ra>
// kernel: tpu_custom_call.1
= control target key start
LH: loop header
LB: loop body
LE: loop exit
PB: predicated region body
PF: predicated region fallthrough
CT: control target
= control target key end

     0   :  { %6 = vsyncpa [#allocation3], 0  ;;  %s7342_s0 = inlined_call_operand.hbm [shape: f32[8,128], index: 0, kind: input, shape index: {}]   ;;  %s7343_s1 = inlined_call_operand.hbm [shape: f32[8,128], index: 1, kind: output, shape index: {}]  }
   0x1   :  { %7 = vsyncpa [#allocation4], 0  ;;  %s1618_s6 = smov [#allocation2]   ;;  %s1570_s10 = scalar_lea.hbm %s7342_s0, 128 }
   0x2   :  { %s14_s7 = sshll.u32 %s1618_s6, 4  ;;  %p1571_p0 = scmp.ne.s32.totalorder %s7342_s0, %s1570_s10  ;;  %s15_s7 = int_to_ptr.vmem [resolvable:$true] %s14_s7 }
   0x3   :  { %p1574_p1 = scmp.lt.u32.totalorder %s1570_s10, %s7342_s0 }
   0x5   :  { %p1576_p2 = pnand %p1574_p1, %p1571_p0 }
   0x7   :  { %1579 = shalt.err (!%p1576_p2)
}
   0x8   :  { %s1580_s15 = scalar_lea.vmem %s15_s7, 128  ;;  %p1585_p4 = scmp.lt.s32.totalorder %s15_s7, %s15_s7 }
   0x9   :  { %p1581_p3 = scmp.ne.s32.totalorder %s15_s7, %s1580_s15  ;;  %p1586_p5 = scmp.lt.s32.totalorder %s1580_s15, %s1580_s15 }
   0xb   :  { %p1587_p6 = por %p1586_p5, %p1585_p4 }
   0xd   :  { %p1588_p7 = pnand %p1587_p6, %p1581_p3 }
   0xf   :  { %1591 = shalt.err (!%p1588_p7)
}
  0x10   :  { %17 = dma.hbm_to_vmem [thread:$0]  %s7342_s0, 128, %s15_s7, [#allocation3]  }
  0x11   :  { %1614 = dma.done.wait [#allocation3], 128  }
  0x12   :  { %1615 = vsyncadd [#allocation3], 4294967168  ;;  %v21_v0 = vld [vmem:[#allocation2] sm:$0xff]  ;;  %v1619_v7 = vmov -10.096047   ;;  %s2119_s0 = smov [#allocation5]  }
  0x13   :  { %v22_v1 = vmul.f32 1000.0, %v21_v0  ;;  %v1620_v9 = vmov -8.886244   ;;  %v1621_v11 = vmov -8.275337   ;;  %s1056_s18 = sshll.u32 %s2119_s0, 4  ;;  %s1057_s18 = int_to_ptr.vmem [resolvable:$true] %s1056_s18 }
  0x14   :  { %v1622_v13 = vmov -7.8478684   ;;  %v1623_v15 = vmov -7.5131245   ;;  %v1624_v17 = vmov -7.235424   ;;  %p1597_p9 = scmp.lt.s32.totalorder %s1057_s18, %s1057_s18 }
  0x15   :  { %v1067_v2 = vcvt.f32.s32 %v22_v1  ;;  %v1625_v19 = vmov -6.9968224   ;;  %v1626_v21 = vmov -6.7869234   ;;  %v1627_v23 = vmov -6.599116  }
  0x16   :  { %v1628_v25 = vmov -6.4289093   ;;  %v1629_v27 = vmov -6.2730994   ;;  %v1630_v29 = vmov -6.129312  }
  0x17   :  { %vm24_vm0 = vcmp.gt.s32.totalorder %v1067_v2, 0  ;;  %v1631_v31 = vmov -5.995733   ;;  %v1632_v33 = vmov -5.8709416   ;;  %s1592_s19 = scalar_lea.vmem %s1057_s18, 128 }
  0x18   :  { %v25_v3 = vsel %vm24_vm0, %v1067_v2, 0  ;;  %v1633_v35 = vmov -5.7538037   ;;  %v1634_v37 = vmov -5.6433964   ;;  %p1593_p8 = scmp.ne.s32.totalorder %s1057_s18, %s1592_s19  ;;  %p1598_p10 = scmp.lt.s32.totalorder %s1592_s19, %s1592_s19 }
  0x19   :  { %vm26_vm1 = vcmp.lt.s32.totalorder %v25_v3, 1000  ;;  %v1635_v39 = vmov -5.5389585   ;;  %v1636_v41 = vmov -5.439853  }
  0x1a   :  { %v2142_v4 = vsel %vm26_vm1, %v25_v3, 1000  ;;  %v1637_v43 = vmov -5.345544   ;;  %v1638_v45 = vmov -5.255572   ;;  %p1599_p11 = por %p1598_p10, %p1597_p9 }
  0x1b   :  { %7813 = vst [vmem:[#allocation8_spill] sm:$0xff] %v2142_v4  ;;  %v28_v5 = vand.u32 1, %v2142_v4  ;;  %v1639_v47 = vmov -5.1695423   ;;  %v1640_v49 = vmov -5.087114  }
  0x1c   :  { %v1641_v51 = vmov -5.0079865   ;;  %v1642_v53 = vmov -4.9318986   ;;  %v1643_v55 = vmov -4.8586183   ;;  %p1600_p12 = pnand %p1599_p11, %p1593_p8 }
  0x1d   :  { %vm2145_vm2 = vcmp.ne.s32.totalorder %v28_v5, 0  ;;  %v1644_v57 = vmov -4.7879386   ;;  %v1645_v59 = vmov -4.719676  }
  0x1e   :  { %v2151_v8 = vsel %vm2145_vm2, -9.345763, %v1619_v7  ;;  %v2155_v10 = vsel %vm2145_vm2, -8.547273, %v1620_v9  ;;  %v2159_v12 = vsel %vm2145_vm2, -8.046486, %v1621_v11 }
  0x1f   :  { %v2163_v14 = vsel %vm2145_vm2, -7.6717563, %v1622_v13  ;;  %v2167_v16 = vsel %vm2145_vm2, -7.368511, %v1623_v15  ;;  %v2171_v18 = vsel %vm2145_vm2, -7.112003, %v1624_v17 }
  0x20   :  { %v2175_v20 = vsel %vm2145_vm2, -6.8887615, %v1625_v19  ;;  %v2179_v22 = vsel %vm2145_vm2, -6.690576, %v1626_v21  ;;  %v2183_v24 = vsel %vm2145_vm2, -6.5120363, %v1627_v23 }
  0x21   :  { %v2187_v26 = vsel %vm2145_vm2, -6.3493686, %v1628_v25  ;;  %v2191_v28 = vsel %vm2145_vm2, -6.199827, %v1629_v27  ;;  %v2195_v30 = vsel %vm2145_vm2, -6.0613427, %v1630_v29 }
  0x22   :  { %v2199_v32 = vsel %vm2145_vm2, -5.9323153, %v1631_v31  ;;  %v2203_v34 = vsel %vm2145_vm2, -5.811478, %v1632_v33  ;;  %v2207_v36 = vsel %vm2145_vm2, -5.6978097, %v1633_v35 }
  0x23   :  { %v2211_v38 = vsel %vm2145_vm2, -5.5904737, %v1634_v37  ;;  %v2215_v40 = vsel %vm2145_vm2, -5.488775, %v1635_v39  ;;  %v2219_v42 = vsel %vm2145_vm2, -5.3921294, %v1636_v41 }
  0x24   :  { %v2223_v44 = vsel %vm2145_vm2, -5.3000417, %v1637_v43  ;;  %v2227_v46 = vsel %vm2145_vm2, -5.2120867, %v1638_v45  ;;  %v2231_v48 = vsel %vm2145_vm2, -5.1278977, %v1639_v47 }
  0x25   :  { %v2235_v50 = vsel %vm2145_vm2, -5.0471544, %v1640_v49  ;;  %v2239_v52 = vsel %vm2145_vm2, -4.969578, %v1641_v51  ;;  %v2243_v54 = vsel %vm2145_vm2, -4.894921, %v1642_v53 }
  0x26   :  { %v2247_v56 = vsel %vm2145_vm2, -4.822965, %v1643_v55  ;;  %v2251_v58 = vsel %vm2145_vm2, -4.7535157, %v1644_v57  ;;  %v2255_v60 = vsel %vm2145_vm2, -4.6863985, %v1645_v59 }
  0x27   :  { %v1646_v61 = vmov -4.653665   ;;  %v1647_v63 = vmov -4.5897584   ;;  %v1648_v1 = vmov -4.5278206  }
  0x28   :  { %v2259_v62 = vsel %vm2145_vm2, -4.6214576, %v1646_v61  ;;  %v2263_v0 = vsel %vm2145_vm2, -4.558551, %v1647_v63  ;;  %v2267_v2 = vsel %vm2145_vm2, -4.4975514, %v1648_v1 }
  0x29   :  { %v1649_v3 = vmov -4.4677305   ;;  %v1650_v7 = vmov -4.4093776   ;;  %v1651_v11 = vmov -4.3526607  }
  0x2a   :  { %v2271_v5 = vsel %vm2145_vm2, -4.4383435, %v1649_v3  ;;  %v2275_v9 = vsel %vm2145_vm2, -4.3808203, %v1650_v7  ;;  %v2279_v13 = vsel %vm2145_vm2, -4.3248863, %v1651_v11 }
  0x2b   :  { %v1652_v15 = vmov -4.2974873   ;;  %v1653_v19 = vmov -4.243773   ;;  %v1654_v23 = vmov -4.191439  }
  0x2c   :  { %v2283_v17 = vsel %vm2145_vm2, -4.2704525, %v1652_v15  ;;  %v2287_v21 = vsel %vm2145_vm2, -4.217438, %v1653_v19  ;;  %v2291_v25 = vsel %vm2145_vm2, -4.1657677, %v1654_v23 }
  0x2d   :  { %v1655_v27 = vmov -4.1404147   ;;  %v1656_v31 = vmov -4.090633   ;;  %v1657_v35 = vmov -4.042032  }
  0x2e   :  { %v2295_v29 = vsel %vm2145_vm2, -4.115372, %v1655_v27  ;;  %v2299_v33 = vsel %vm2145_vm2, -4.0661883, %v1656_v31  ;;  %v2303_v37 = vsel %vm2145_vm2, -4.0181565, %v1657_v35 }
  0x2f   :  { %v1658_v39 = vmov -3.9945552   ;;  %v1659_v43 = vmov -3.9481494   ;;  %v1660_v47 = vmov -3.9027655  }
  0x30   :  { %v2307_v41 = vsel %vm2145_vm2, -3.9712217, %v1658_v39  ;;  %v2311_v45 = vsel %vm2145_vm2, -3.9253328, %v1659_v43  ;;  %v2315_v49 = vsel %vm2145_vm2, -3.8804421, %v1660_v47 }
  0x31   :  { %v1661_v51 = vmov -3.858357   ;;  %v1662_v55 = vmov -3.814881   ;;  %v1663_v59 = vmov -3.7722974  }
  0x32   :  { %v2319_v53 = vsel %vm2145_vm2, -3.8365052, %v1661_v51  ;;  %v2323_v57 = vsel %vm2145_vm2, -3.7934802, %v1662_v55  ;;  %v2327_v61 = vsel %vm2145_vm2, -3.7513282, %v1663_v59 }
  0x33   :  { %v1664_v63 = vmov -3.7305684   ;;  %v1665_v3 = vmov -3.6896584   ;;  %v1666_v11 = vmov -3.6495342  }
  0x34   :  { %v2331_v1 = vsel %vm2145_vm2, -3.7100132, %v1664_v63  ;;  %v2335_v7 = vsel %vm2145_vm2, -3.6695, %v1665_v3  ;;  %v2339_v15 = vsel %vm2145_vm2, -3.629757, %v1666_v11 }
  0x35   :  { %7816 = vst [vmem:[#allocation9_spill] sm:$0xff] %v2335_v7  ;;  %7817 = vst [vmem:[#allocation10_spill] sm:$0xff] %v2339_v15  ;;  %v1667_v19 = vmov -3.6101644   ;;  %v1668_v27 = vmov -3.5715199  }
  0x36   :  { %v2343_v23 = vsel %vm2145_vm2, -3.5907533, %v1667_v19  ;;  %v2347_v31 = vsel %vm2145_vm2, -3.5524607, %v1668_v27  ;;  %v1669_v35 = vmov -3.5335724  }
  0x37   :  { %7818 = vst [vmem:[#allocation11_spill] sm:$0xff] %v2343_v23  ;;  %7819 = vst [vmem:[#allocation12_spill] sm:$0xff] %v2347_v31  ;;  %v2351_v39 = vsel %vm2145_vm2, -3.5148518, %v1669_v35  ;;  %v1670_v43 = vmov -3.496296  }
  0x38   :  { %7820 = vst [vmem:[#allocation13_spill] sm:$0xff] %v2351_v39  ;;  %v2355_v47 = vsel %vm2145_vm2, -3.4779015, %v1670_v43  ;;  %v1671_v51 = vmov -3.4596655   ;;  %v8634_v7 = vand.u32 4, %v2142_v4 }
  0x39   :  { %7821 = vst [vmem:[#allocation14_spill] sm:$0xff] %v2355_v47  ;;  %v2359_v55 = vsel %vm2145_vm2, -3.441585, %v1671_v51  ;;  %v1672_v59 = vmov -3.4236574  }
  0x3a   :  { %7822 = vst [vmem:[#allocation15_spill] sm:$0xff] %v2359_v55  ;;  %v2363_v63 = vsel %vm2145_vm2, -3.40588, %v1672_v59  ;;  %v1673_v3 = vmov -3.3882499   ;;  %vm4993_vm4 = vcmp.ne.s32.totalorder %v8634_v7, 0 }
  0x3b   :  { %7823 = vst [vmem:[#allocation16_spill] sm:$0xff] %v2363_v63  ;;  %v2367_v11 = vsel %vm2145_vm2, -3.3707645, %v1673_v3  ;;  %v1674_v19 = vmov -3.3534214  }
  0x3c   :  { %7824 = vst [vmem:[#allocation17_spill] sm:$0xff] %v2367_v11  ;;  %v2371_v27 = vsel %vm2145_vm2, -3.336218, %v1674_v19  ;;  %v1675_v35 = vmov -3.319152  }
  0x3d   :  { %7825 = vst [vmem:[#allocation18_spill] sm:$0xff] %v2371_v27  ;;  %v2375_v43 = vsel %vm2145_vm2, -3.302221, %v1675_v35  ;;  %v1676_v51 = vmov -3.2854228  }
  0x3e   :  { %7826 = vst [vmem:[#allocation19_spill] sm:$0xff] %v2375_v43  ;;  %v2379_v59 = vsel %vm2145_vm2, -3.268755, %v1676_v51  ;;  %v1677_v63 = vmov -3.2522154  }
  0x3f   :  { %7827 = vst [vmem:[#allocation20_spill] sm:$0xff] %v2379_v59  ;;  %v2383_v3 = vsel %vm2145_vm2, -3.235802, %v1677_v63  ;;  %v1678_v11 = vmov -3.2195127  }
  0x40   :  { %7828 = vst [vmem:[#allocation21_spill] sm:$0xff] %v2383_v3  ;;  %v2387_v19 = vsel %vm2145_vm2, -3.2033455, %v1678_v11  ;;  %v1679_v27 = vmov -3.1872983  }
  0x41   :  { %7829 = vst [vmem:[#allocation22_spill] sm:$0xff] %v2387_v19  ;;  %v2391_v35 = vsel %vm2145_vm2, -3.1713693, %v1679_v27  ;;  %v1680_v43 = vmov -3.1555567  }
  0x42   :  { %7830 = vst [vmem:[#allocation23_spill] sm:$0xff] %v2391_v35  ;;  %v2395_v51 = vsel %vm2145_vm2, -3.1398585, %v1680_v43  ;;  %v1681_v59 = vmov -3.1242728  }
  0x43   :  { %7831 = vst [vmem:[#allocation24_spill] sm:$0xff] %v2395_v51  ;;  %v2399_v63 = vsel %vm2145_vm2, -3.108798, %v1681_v59  ;;  %v1682_v3 = vmov -3.0934322  }
  0x44   :  { %7832 = vst [vmem:[#allocation25_spill] sm:$0xff] %v2399_v63  ;;  %v2403_v11 = vsel %vm2145_vm2, -3.078174, %v1682_v3  ;;  %v1683_v19 = vmov -3.0630217  }
  0x45   :  { %7833 = vst [vmem:[#allocation26_spill] sm:$0xff] %v2403_v11  ;;  %v2407_v27 = vsel %vm2145_vm2, -3.0479734, %v1683_v19  ;;  %v1684_v35 = vmov -3.033028  }
  0x46   :  { %7834 = vst [vmem:[#allocation27_spill] sm:$0xff] %v2407_v27  ;;  %v2411_v43 = vsel %vm2145_vm2, -3.0181835, %v1684_v35  ;;  %v1685_v51 = vmov -3.0034385  }
  0x47   :  { %7835 = vst [vmem:[#allocation28_spill] sm:$0xff] %v2411_v43  ;;  %v2415_v59 = vsel %vm2145_vm2, -2.9887917, %v1685_v51  ;;  %v1686_v63 = vmov -2.9742417  }
  0x48   :  { %7836 = vst [vmem:[#allocation29_spill] sm:$0xff] %v2415_v59  ;;  %v2419_v3 = vsel %vm2145_vm2, -2.959787, %v1686_v63  ;;  %v1687_v11 = vmov -2.9454257  }
  0x49   :  { %7837 = vst [vmem:[#allocation30_spill] sm:$0xff] %v2419_v3  ;;  %v2423_v19 = vsel %vm2145_vm2, -2.9311574, %v1687_v11  ;;  %v1688_v27 = vmov -2.91698  }
  0x4a   :  { %7838 = vst [vmem:[#allocation31_spill] sm:$0xff] %v2423_v19  ;;  %v2427_v35 = vsel %vm2145_vm2, -2.9028928, %v1688_v27  ;;  %v1689_v43 = vmov -2.888894  }
  0x4b   :  { %7839 = vst [vmem:[#allocation32_spill] sm:$0xff] %v2427_v35  ;;  %v2431_v51 = vsel %vm2145_vm2, -2.8749826, %v1689_v43  ;;  %v1690_v59 = vmov -2.8611574  }
  0x4c   :  { %7840 = vst [vmem:[#allocation33_spill] sm:$0xff] %v2431_v51  ;;  %v2435_v63 = vsel %vm2145_vm2, -2.847417, %v1690_v59  ;;  %v1691_v3 = vmov -2.8337607  }
  0x4d   :  { %7841 = vst [vmem:[#allocation34_spill] sm:$0xff] %v2435_v63  ;;  %v2439_v11 = vsel %vm2145_vm2, -2.8201869, %v1691_v3  ;;  %v1692_v19 = vmov -2.8066945  }
  0x4e   :  { %7842 = vst [vmem:[#allocation35_spill] sm:$0xff] %v2439_v11  ;;  %v2443_v27 = vsel %vm2145_vm2, -2.7932827, %v1692_v19  ;;  %v1693_v35 = vmov -2.7799501  }
  0x4f   :  { %7843 = vst [vmem:[#allocation36_spill] sm:$0xff] %v2443_v27  ;;  %v2447_v43 = vsel %vm2145_vm2, -2.7666957, %v1693_v35  ;;  %v1694_v51 = vmov -2.7535186  }
  0x50   :  { %7844 = vst [vmem:[#allocation37_spill] sm:$0xff] %v2447_v43  ;;  %v2451_v59 = vsel %vm2145_vm2, -2.7404177, %v1694_v51  ;;  %v1695_v63 = vmov -2.727392  }
  0x51   :  { %7845 = vst [vmem:[#allocation38_spill] sm:$0xff] %v2451_v59  ;;  %v2455_v3 = vsel %vm2145_vm2, -2.7144403, %v1695_v63  ;;  %v1696_v11 = vmov -2.7015622  }
  0x52   :  { %7846 = vst [vmem:[#allocation39_spill] sm:$0xff] %v2455_v3  ;;  %v2459_v19 = vsel %vm2145_vm2, -2.688756, %v1696_v11  ;;  %v1697_v27 = vmov -2.6760213  }
  0x53   :  { %7847 = vst [vmem:[#allocation40_spill] sm:$0xff] %v2459_v19  ;;  %v2463_v35 = vsel %vm2145_vm2, -2.663357, %v1697_v27  ;;  %v1698_v43 = vmov -2.6507623  }
  0x54   :  { %7848 = vst [vmem:[#allocation41_spill] sm:$0xff] %v2463_v35  ;;  %v2467_v51 = vsel %vm2145_vm2, -2.6382363, %v1698_v43  ;;  %v1699_v59 = vmov -2.625778  }
  0x55   :  { %7849 = vst [vmem:[#allocation42_spill] sm:$0xff] %v2467_v51  ;;  %v2471_v63 = vsel %vm2145_vm2, -2.6133866, %v1699_v59  ;;  %v1700_v3 = vmov -2.6010613  }
  0x56   :  { %7850 = vst [vmem:[#allocation43_spill] sm:$0xff] %v2471_v63  ;;  %v2475_v11 = vsel %vm2145_vm2, -2.5888014, %v1700_v3  ;;  %v1701_v19 = vmov -2.576606  }
  0x57   :  { %7851 = vst [vmem:[#allocation44_spill] sm:$0xff] %v2475_v11  ;;  %v2479_v27 = vsel %vm2145_vm2, -2.564474, %v1701_v19  ;;  %v1702_v35 = vmov -2.552405  }
  0x58   :  { %7852 = vst [vmem:[#allocation45_spill] sm:$0xff] %v2479_v27  ;;  %v2483_v43 = vsel %vm2145_vm2, -2.5403984, %v1702_v35  ;;  %v1703_v51 = vmov -2.5284529  }
  0x59   :  { %7853 = vst [vmem:[#allocation46_spill] sm:$0xff] %v2483_v43  ;;  %v2487_v59 = vsel %vm2145_vm2, -2.516568, %v1703_v51  ;;  %v1704_v63 = vmov -2.504743  }
  0x5a   :  { %7854 = vst [vmem:[#allocation47_spill] sm:$0xff] %v2487_v59  ;;  %v2491_v3 = vsel %vm2145_vm2, -2.4929774, %v1704_v63  ;;  %v1705_v11 = vmov -2.48127  }
  0x5b   :  { %7855 = vst [vmem:[#allocation48_spill] sm:$0xff] %v2491_v3  ;;  %v2495_v19 = vsel %vm2145_vm2, -2.4696207, %v1705_v11  ;;  %v1706_v27 = vmov -2.4580283  }
  0x5c   :  { %7856 = vst [vmem:[#allocation49_spill] sm:$0xff] %v2495_v19  ;;  %v2499_v35 = vsel %vm2145_vm2, -2.4464924, %v1706_v27  ;;  %v1707_v43 = vmov -2.4350123  }
  0x5d   :  { %7857 = vst [vmem:[#allocation50_spill] sm:$0xff] %v2499_v35  ;;  %v2503_v51 = vsel %vm2145_vm2, -2.4235873, %v1707_v43  ;;  %v1708_v59 = vmov -2.412217  }
  0x5e   :  { %7858 = vst [vmem:[#allocation51_spill] sm:$0xff] %v2503_v51  ;;  %v2507_v63 = vsel %vm2145_vm2, -2.4009004, %v1708_v59  ;;  %v1709_v3 = vmov -2.389637  }
  0x5f   :  { %7859 = vst [vmem:[#allocation52_spill] sm:$0xff] %v2507_v63  ;;  %v2511_v11 = vsel %vm2145_vm2, -2.3784263, %v1709_v3  ;;  %v1710_v19 = vmov -2.3672676  }
  0x60   :  { %7860 = vst [vmem:[#allocation53_spill] sm:$0xff] %v2511_v11  ;;  %v2515_v27 = vsel %vm2145_vm2, -2.3561602, %v1710_v19  ;;  %v1711_v35 = vmov -2.345104  }
  0x61   :  { %7861 = vst [vmem:[#allocation54_spill] sm:$0xff] %v2515_v27  ;;  %v2519_v43 = vsel %vm2145_vm2, -2.3340979, %v1711_v35  ;;  %v1712_v51 = vmov -2.3231416  }
  0x62   :  { %7862 = vst [vmem:[#allocation55_spill] sm:$0xff] %v2519_v43  ;;  %v2523_v59 = vsel %vm2145_vm2, -2.3122344, %v1712_v51  ;;  %v1713_v63 = vmov -2.3013759  }
  0x63   :  { %7863 = vst [vmem:[#allocation56_spill] sm:$0xff] %v2523_v59  ;;  %v2527_v3 = vsel %vm2145_vm2, -2.2905655, %v1713_v63  ;;  %v1714_v11 = vmov -2.2798026  }
  0x64   :  { %7864 = vst [vmem:[#allocation57_spill] sm:$0xff] %v2527_v3  ;;  %v2531_v19 = vsel %vm2145_vm2, -2.2690868, %v1714_v11  ;;  %v1715_v27 = vmov -2.2584176  }
  0x65   :  { %7865 = vst [vmem:[#allocation58_spill] sm:$0xff] %v2531_v19  ;;  %v2535_v35 = vsel %vm2145_vm2, -2.2477944, %v1715_v27  ;;  %v1716_v43 = vmov -2.2372167  }
  0x66   :  { %7866 = vst [vmem:[#allocation59_spill] sm:$0xff] %v2535_v35  ;;  %v2539_v51 = vsel %vm2145_vm2, -2.226684, %v1716_v43  ;;  %v1717_v59 = vmov -2.2161958  }
  0x67   :  { %7867 = vst [vmem:[#allocation60_spill] sm:$0xff] %v2539_v51  ;;  %v2543_v63 = vsel %vm2145_vm2, -2.205752, %v1717_v59  ;;  %v1718_v3 = vmov -2.1953514  }
  0x68   :  { %7868 = vst [vmem:[#allocation61_spill] sm:$0xff] %v2543_v63  ;;  %v2547_v11 = vsel %vm2145_vm2, -2.1849942, %v1718_v3  ;;  %v1719_v19 = vmov -2.1746798  }
  0x69   :  { %7869 = vst [vmem:[#allocation62_spill] sm:$0xff] %v2547_v11  ;;  %v2551_v27 = vsel %vm2145_vm2, -2.1644073, %v1719_v19  ;;  %v1720_v35 = vmov -2.1541767  }
  0x6a   :  { %7870 = vst [vmem:[#allocation63_spill] sm:$0xff] %v2551_v27  ;;  %v2555_v43 = vsel %vm2145_vm2, -2.1439877, %v1720_v35  ;;  %v1721_v51 = vmov -2.1338394  }
  0x6b   :  { %7871 = vst [vmem:[#allocation64_spill] sm:$0xff] %v2555_v43  ;;  %v2559_v59 = vsel %vm2145_vm2, -2.1237316, %v1721_v51  ;;  %v1722_v63 = vmov -2.113664  }
  0x6c   :  { %7872 = vst [vmem:[#allocation65_spill] sm:$0xff] %v2559_v59  ;;  %v2563_v3 = vsel %vm2145_vm2, -2.1036358, %v1722_v63  ;;  %v1723_v11 = vmov -2.093647  }
  0x6d   :  { %7873 = vst [vmem:[#allocation66_spill] sm:$0xff] %v2563_v3  ;;  %v2567_v19 = vsel %vm2145_vm2, -2.083697, %v1723_v11  ;;  %v1724_v27 = vmov -2.0737858  }
  0x6e   :  { %7874 = vst [vmem:[#allocation67_spill] sm:$0xff] %v2567_v19  ;;  %v2571_v35 = vsel %vm2145_vm2, -2.0639122, %v1724_v27  ;;  %v1725_v43 = vmov -2.0540764  }
  0x6f   :  { %7875 = vst [vmem:[#allocation68_spill] sm:$0xff] %v2571_v35  ;;  %v2575_v51 = vsel %vm2145_vm2, -2.0442781, %v1725_v43  ;;  %v1726_v59 = vmov -2.0345166  }
  0x70   :  { %7876 = vst [vmem:[#allocation69_spill] sm:$0xff] %v2575_v51  ;;  %v2579_v63 = vsel %vm2145_vm2, -2.0247917, %v1726_v59  ;;  %v1727_v3 = vmov -2.0151029  }
  0x71   :  { %7877 = vst [vmem:[#allocation70_spill] sm:$0xff] %v2579_v63  ;;  %v2583_v11 = vsel %vm2145_vm2, -2.0054498, %v1727_v3  ;;  %v1728_v19 = vmov -1.9958323  }
  0x72   :  { %7878 = vst [vmem:[#allocation71_spill] sm:$0xff] %v2583_v11  ;;  %v2587_v27 = vsel %vm2145_vm2, -1.9862499, %v1728_v19  ;;  %v1729_v35 = vmov -1.9767023  }
  0x73   :  { %7879 = vst [vmem:[#allocation72_spill] sm:$0xff] %v2587_v27  ;;  %v2591_v43 = vsel %vm2145_vm2, -1.9671891, %v1729_v35  ;;  %v1730_v51 = vmov -1.9577099  }
  0x74   :  { %7880 = vst [vmem:[#allocation73_spill] sm:$0xff] %v2591_v43  ;;  %v2595_v59 = vsel %vm2145_vm2, -1.9482645, %v1730_v51  ;;  %v1731_v63 = vmov -1.9388524  }
  0x75   :  { %7881 = vst [vmem:[#allocation74_spill] sm:$0xff] %v2595_v59  ;;  %v2599_v3 = vsel %vm2145_vm2, -1.9294735, %v1731_v63  ;;  %v1732_v11 = vmov -1.9201273  }
  0x76   :  { %7882 = vst [vmem:[#allocation75_spill] sm:$0xff] %v2599_v3  ;;  %v2603_v19 = vsel %vm2145_vm2, -1.9108136, %v1732_v11  ;;  %v1733_v27 = vmov -1.9015319  }
  0x77   :  { %7883 = vst [vmem:[#allocation76_spill] sm:$0xff] %v2603_v19  ;;  %v2607_v35 = vsel %vm2145_vm2, -1.8922822, %v1733_v27  ;;  %v1734_v43 = vmov -1.8830639  }
  0x78   :  { %7884 = vst [vmem:[#allocation77_spill] sm:$0xff] %v2607_v35  ;;  %v2611_v51 = vsel %vm2145_vm2, -1.8738768, %v1734_v43  ;;  %v1735_v59 = vmov -1.8647207  }
  0x79   :  { %7885 = vst [vmem:[#allocation78_spill] sm:$0xff] %v2611_v51  ;;  %v2615_v63 = vsel %vm2145_vm2, -1.8555951, %v1735_v59  ;;  %v1736_v3 = vmov -1.8464999  }
  0x7a   :  { %7886 = vst [vmem:[#allocation79_spill] sm:$0xff] %v2615_v63  ;;  %v2619_v11 = vsel %vm2145_vm2, -1.8374346, %v1736_v3  ;;  %v1737_v19 = vmov -1.8283992  }
  0x7b   :  { %7887 = vst [vmem:[#allocation80_spill] sm:$0xff] %v2619_v11  ;;  %v2623_v27 = vsel %vm2145_vm2, -1.8193932, %v1737_v19  ;;  %v1738_v35 = vmov -1.8104163  }
  0x7c   :  { %7888 = vst [vmem:[#allocation81_spill] sm:$0xff] %v2623_v27  ;;  %v2627_v43 = vsel %vm2145_vm2, -1.8014685, %v1738_v35  ;;  %v1739_v51 = vmov -1.7925491  }
  0x7d   :  { %7889 = vst [vmem:[#allocation82_spill] sm:$0xff] %v2627_v43  ;;  %v2631_v59 = vsel %vm2145_vm2, -1.7836583, %v1739_v51  ;;  %v1740_v63 = vmov -1.7747954  }
  0x7e   :  { %7890 = vst [vmem:[#allocation83_spill] sm:$0xff] %v2631_v59  ;;  %v2635_v3 = vsel %vm2145_vm2, -1.7659605, %v1740_v63  ;;  %v1741_v11 = vmov -1.757153  }
  0x7f   :  { %7891 = vst [vmem:[#allocation84_spill] sm:$0xff] %v2635_v3  ;;  %v2639_v19 = vsel %vm2145_vm2, -1.748373, %v1741_v11  ;;  %v1742_v27 = vmov -1.73962  }
  0x80   :  { %7892 = vst [vmem:[#allocation85_spill] sm:$0xff] %v2639_v19  ;;  %v2643_v35 = vsel %vm2145_vm2, -1.7308939, %v1742_v27  ;;  %v1743_v43 = vmov -1.7221942  }
  0x81   :  { %7893 = vst [vmem:[#allocation86_spill] sm:$0xff] %v2643_v35  ;;  %v2647_v51 = vsel %vm2145_vm2, -1.7135209, %v1743_v43  ;;  %v1744_v59 = vmov -1.7048737  }
  0x82   :  { %7894 = vst [vmem:[#allocation87_spill] sm:$0xff] %v2647_v51  ;;  %v2651_v63 = vsel %vm2145_vm2, -1.6962522, %v1744_v59  ;;  %v1745_v3 = vmov -1.6876565  }
  0x83   :  { %7895 = vst [vmem:[#allocation88_spill] sm:$0xff] %v2651_v63  ;;  %v2655_v11 = vsel %vm2145_vm2, -1.6790861, %v1745_v3  ;;  %v1746_v19 = vmov -1.6705408  }
  0x84   :  { %7896 = vst [vmem:[#allocation89_spill] sm:$0xff] %v2655_v11  ;;  %v2659_v27 = vsel %vm2145_vm2, -1.6620204, %v1746_v19  ;;  %v1747_v35 = vmov -1.6535246  }
  0x85   :  { %7897 = vst [vmem:[#allocation90_spill] sm:$0xff] %v2659_v27  ;;  %v2663_v43 = vsel %vm2145_vm2, -1.6450534, %v1747_v35  ;;  %v1748_v51 = vmov -1.6366065  }
  0x86   :  { %7898 = vst [vmem:[#allocation91_spill] sm:$0xff] %v2663_v43  ;;  %v2667_v59 = vsel %vm2145_vm2, -1.6281834, %v1748_v51  ;;  %v1749_v63 = vmov -1.6197842  }
  0x87   :  { %7899 = vst [vmem:[#allocation92_spill] sm:$0xff] %v2667_v59  ;;  %v2671_v3 = vsel %vm2145_vm2, -1.6114086, %v1749_v63  ;;  %v1750_v11 = vmov -1.6030563  }
  0x88   :  { %7900 = vst [vmem:[#allocation93_spill] sm:$0xff] %v2671_v3  ;;  %v2675_v19 = vsel %vm2145_vm2, -1.5947272, %v1750_v11  ;;  %v1751_v27 = vmov -1.586421  }
  0x89   :  { %7901 = vst [vmem:[#allocation94_spill] sm:$0xff] %v2675_v19  ;;  %v2679_v35 = vsel %vm2145_vm2, -1.5781376, %v1751_v27  ;;  %v1752_v43 = vmov -1.5698767  }
  0x8a   :  { %7902 = vst [vmem:[#allocation95_spill] sm:$0xff] %v2679_v35  ;;  %v2683_v51 = vsel %vm2145_vm2, -1.5616381, %v1752_v43  ;;  %v1753_v59 = vmov -1.5534217  }
  0x8b   :  { %7903 = vst [vmem:[#allocation96_spill] sm:$0xff] %v2683_v51  ;;  %v2687_v63 = vsel %vm2145_vm2, -1.5452272, %v1753_v59  ;;  %v1754_v3 = vmov -1.5370544  }
  0x8c   :  { %7904 = vst [vmem:[#allocation97_spill] sm:$0xff] %v2687_v63  ;;  %v2691_v11 = vsel %vm2145_vm2, -1.5289032, %v1754_v3  ;;  %v1755_v19 = vmov -1.5207734  }
  0x8d   :  { %7905 = vst [vmem:[#allocation98_spill] sm:$0xff] %v2691_v11  ;;  %v2695_v27 = vsel %vm2145_vm2, -1.5126647, %v1755_v19  ;;  %v1756_v35 = vmov -1.5045769  }
  0x8e   :  { %7906 = vst [vmem:[#allocation99_spill] sm:$0xff] %v2695_v27  ;;  %v2699_v43 = vsel %vm2145_vm2, -1.49651, %v1756_v35  ;;  %v1757_v51 = vmov -1.4884636  }
  0x8f   :  { %7907 = vst [vmem:[#allocation100_spill] sm:$0xff] %v2699_v43  ;;  %v2703_v59 = vsel %vm2145_vm2, -1.4804378, %v1757_v51  ;;  %v1758_v63 = vmov -1.472432  }
  0x90   :  { %7908 = vst [vmem:[#allocation101_spill] sm:$0xff] %v2703_v59  ;;  %v2707_v3 = vsel %vm2145_vm2, -1.4644464, %v1758_v63  ;;  %v1759_v11 = vmov -1.4564807  }
  0x91   :  { %7909 = vst [vmem:[#allocation102_spill] sm:$0xff] %v2707_v3  ;;  %v2711_v19 = vsel %vm2145_vm2, -1.4485347, %v1759_v11  ;;  %v1760_v27 = vmov -1.4406081  }
  0x92   :  { %7910 = vst [vmem:[#allocation103_spill] sm:$0xff] %v2711_v19  ;;  %v2715_v35 = vsel %vm2145_vm2, -1.432701, %v1760_v27  ;;  %v1761_v43 = vmov -1.424813  }
  0x93   :  { %7911 = vst [vmem:[#allocation104_spill] sm:$0xff] %v2715_v35  ;;  %v2719_v51 = vsel %vm2145_vm2, -1.4169441, %v1761_v43  ;;  %v1762_v59 = vmov -1.4090941  }
  0x94   :  { %7912 = vst [vmem:[#allocation105_spill] sm:$0xff] %v2719_v51  ;;  %v2723_v63 = vsel %vm2145_vm2, -1.4012626, %v1762_v59  ;;  %v1763_v3 = vmov -1.3934498  }
  0x95   :  { %7913 = vst [vmem:[#allocation106_spill] sm:$0xff] %v2723_v63  ;;  %v2727_v11 = vsel %vm2145_vm2, -1.3856553, %v1763_v3  ;;  %v1764_v19 = vmov -1.3778789  }
  0x96   :  { %7914 = vst [vmem:[#allocation107_spill] sm:$0xff] %v2727_v11  ;;  %v2731_v27 = vsel %vm2145_vm2, -1.3701206, %v1764_v19  ;;  %v1765_v35 = vmov -1.3623803  }
  0x97   :  { %7915 = vst [vmem:[#allocation108_spill] sm:$0xff] %v2731_v27  ;;  %v2735_v43 = vsel %vm2145_vm2, -1.3546575, %v1765_v35  ;;  %v1766_v51 = vmov -1.3469524  }
  0x98   :  { %7916 = vst [vmem:[#allocation109_spill] sm:$0xff] %v2735_v43  ;;  %v2739_v59 = vsel %vm2145_vm2, -1.3392648, %v1766_v51  ;;  %v1767_v63 = vmov -1.3315942  }
  0x99   :  { %7917 = vst [vmem:[#allocation110_spill] sm:$0xff] %v2739_v59  ;;  %v2743_v3 = vsel %vm2145_vm2, -1.3239409, %v1767_v63  ;;  %v1768_v11 = vmov -1.3163046  }
  0x9a   :  { %7918 = vst [vmem:[#allocation111_spill] sm:$0xff] %v2743_v3  ;;  %v2747_v19 = vsel %vm2145_vm2, -1.308685, %v1768_v11  ;;  %v1769_v27 = vmov -1.301082  }
  0x9b   :  { %7919 = vst [vmem:[#allocation112_spill] sm:$0xff] %v2747_v19  ;;  %v2751_v35 = vsel %vm2145_vm2, -1.2934957, %v1769_v27  ;;  %v1770_v43 = vmov -1.2859255  }
  0x9c   :  { %7920 = vst [vmem:[#allocation113_spill] sm:$0xff] %v2751_v35  ;;  %v2755_v51 = vsel %vm2145_vm2, -1.2783717, %v1770_v43  ;;  %v1771_v59 = vmov -1.270834  }
  0x9d   :  { %7921 = vst [vmem:[#allocation114_spill] sm:$0xff] %v2755_v51  ;;  %v2759_v63 = vsel %vm2145_vm2, -1.2633122, %v1771_v59  ;;  %v1772_v3 = vmov -1.2558062  }
  0x9e   :  { %7922 = vst [vmem:[#allocation115_spill] sm:$0xff] %v2759_v63  ;;  %v2763_v11 = vsel %vm2145_vm2, -1.2483159, %v1772_v3  ;;  %v1773_v19 = vmov -1.2408412  }
  0x9f   :  { %7923 = vst [vmem:[#allocation116_spill] sm:$0xff] %v2763_v11  ;;  %v2767_v27 = vsel %vm2145_vm2, -1.2333816, %v1773_v19  ;;  %v1774_v35 = vmov -1.2259375  }
  0xa0   :  { %7924 = vst [vmem:[#allocation117_spill] sm:$0xff] %v2767_v27  ;;  %v2771_v43 = vsel %vm2145_vm2, -1.2185085, %v1774_v35  ;;  %v1775_v51 = vmov -1.2110944  }
  0xa1   :  { %7925 = vst [vmem:[#allocation118_spill] sm:$0xff] %v2771_v43  ;;  %v2775_v59 = vsel %vm2145_vm2, -1.2036952, %v1775_v51  ;;  %v1776_v63 = vmov -1.1963108  }
  0xa2   :  { %7926 = vst [vmem:[#allocation119_spill] sm:$0xff] %v2775_v59  ;;  %v2779_v3 = vsel %vm2145_vm2, -1.1889408, %v1776_v63  ;;  %v1777_v11 = vmov -1.1815854  }
  0xa3   :  { %7927 = vst [vmem:[#allocation120_spill] sm:$0xff] %v2779_v3  ;;  %v2783_v19 = vsel %vm2145_vm2, -1.1742443, %v1777_v11  ;;  %v1778_v27 = vmov -1.1669174  }
  0xa4   :  { %7928 = vst [vmem:[#allocation121_spill] sm:$0xff] %v2783_v19  ;;  %v2787_v35 = vsel %vm2145_vm2, -1.1596045, %v1778_v27  ;;  %v1779_v43 = vmov -1.1523057  }
  0xa5   :  { %7929 = vst [vmem:[#allocation122_spill] sm:$0xff] %v2787_v35  ;;  %v2791_v51 = vsel %vm2145_vm2, -1.1450207, %v1779_v43  ;;  %v1780_v59 = vmov -1.1377494  }
  0xa6   :  { %7930 = vst [vmem:[#allocation123_spill] sm:$0xff] %v2791_v51  ;;  %v2795_v63 = vsel %vm2145_vm2, -1.1304917, %v1780_v59  ;;  %v1781_v3 = vmov -1.1232475  }
  0xa7   :  { %7931 = vst [vmem:[#allocation124_spill] sm:$0xff] %v2795_v63  ;;  %v2799_v11 = vsel %vm2145_vm2, -1.1160166, %v1781_v3  ;;  %v1782_v19 = vmov -1.108799  }
  0xa8   :  { %7932 = vst [vmem:[#allocation125_spill] sm:$0xff] %v2799_v11  ;;  %v2803_v27 = vsel %vm2145_vm2, -1.1015943, %v1782_v19  ;;  %v1783_v35 = vmov -1.0944028  }
  0xa9   :  { %7933 = vst [vmem:[#allocation126_spill] sm:$0xff] %v2803_v27  ;;  %v2807_v43 = vsel %vm2145_vm2, -1.0872241, %v1783_v35  ;;  %v1784_v51 = vmov -1.0800582  }
  0xaa   :  { %7934 = vst [vmem:[#allocation127_spill] sm:$0xff] %v2807_v43  ;;  %v2811_v59 = vsel %vm2145_vm2, -1.072905, %v1784_v51  ;;  %v1785_v63 = vmov -1.0657642  }
  0xab   :  { %7935 = vst [vmem:[#allocation128_spill] sm:$0xff] %v2811_v59  ;;  %v2815_v3 = vsel %vm2145_vm2, -1.058636, %v1785_v63  ;;  %v1786_v11 = vmov -1.0515199  }
  0xac   :  { %7936 = vst [vmem:[#allocation129_spill] sm:$0xff] %v2815_v3  ;;  %v2819_v19 = vsel %vm2145_vm2, -1.0444161, %v1786_v11  ;;  %v1787_v27 = vmov -1.0373243  }
  0xad   :  { %7937 = vst [vmem:[#allocation130_spill] sm:$0xff] %v2819_v19  ;;  %v2823_v35 = vsel %vm2145_vm2, -1.0302446, %v1787_v27  ;;  %v1788_v43 = vmov -1.0231767  }
  0xae   :  { %7938 = vst [vmem:[#allocation131_spill] sm:$0xff] %v2823_v35  ;;  %v2827_v51 = vsel %vm2145_vm2, -1.0161206, %v1788_v43  ;;  %v1789_v59 = vmov -1.0090761  }
  0xaf   :  { %7939 = vst [vmem:[#allocation132_spill] sm:$0xff] %v2827_v51  ;;  %v2831_v63 = vsel %vm2145_vm2, -1.0020432, %v1789_v59  ;;  %v1790_v3 = vmov -0.99502176  }
  0xb0   :  { %7940 = vst [vmem:[#allocation133_spill] sm:$0xff] %v2831_v63  ;;  %v2835_v11 = vsel %vm2145_vm2, -0.9880116, %v1790_v3  ;;  %v1791_v19 = vmov -0.9810127  }
  0xb1   :  { %7941 = vst [vmem:[#allocation134_spill] sm:$0xff] %v2835_v11  ;;  %v2839_v27 = vsel %vm2145_vm2, -0.9740249, %v1791_v19  ;;  %v1792_v35 = vmov -0.9670481  }
  0xb2   :  { %7942 = vst [vmem:[#allocation135_spill] sm:$0xff] %v2839_v27  ;;  %v2843_v43 = vsel %vm2145_vm2, -0.9600823, %v1792_v35  ;;  %v1793_v51 = vmov -0.95312726  }
  0xb3   :  { %7943 = vst [vmem:[#allocation136_spill] sm:$0xff] %v2843_v43  ;;  %v2847_v59 = vsel %vm2145_vm2, -0.94618297, %v1793_v51  ;;  %v1794_v63 = vmov -0.9392493  }
  0xb4   :  { %7944 = vst [vmem:[#allocation137_spill] sm:$0xff] %v2847_v59  ;;  %v2851_v3 = vsel %vm2145_vm2, -0.93232614, %v1794_v63  ;;  %v1795_v11 = vmov -0.92541337  }
  0xb5   :  { %7945 = vst [vmem:[#allocation138_spill] sm:$0xff] %v2851_v3  ;;  %v2855_v19 = vsel %vm2145_vm2, -0.918511, %v1795_v11  ;;  %v1796_v27 = vmov -0.91161877  }
  0xb6   :  { %7946 = vst [vmem:[#allocation139_spill] sm:$0xff] %v2855_v19  ;;  %v2859_v35 = vsel %vm2145_vm2, -0.9047367, %v1796_v27  ;;  %v1797_v43 = vmov -0.8978647  }
  0xb7   :  { %7947 = vst [vmem:[#allocation140_spill] sm:$0xff] %v2859_v35  ;;  %v2863_v51 = vsel %vm2145_vm2, -0.8910026, %v1797_v43  ;;  %v1798_v59 = vmov -0.8841503  }
  0xb8   :  { %7948 = vst [vmem:[#allocation141_spill] sm:$0xff] %v2863_v51  ;;  %v2867_v63 = vsel %vm2145_vm2, -0.87730783, %v1798_v59  ;;  %v1799_v3 = vmov -0.87047493  }
  0xb9   :  { %7949 = vst [vmem:[#allocation142_spill] sm:$0xff] %v2867_v63  ;;  %v2871_v11 = vsel %vm2145_vm2, -0.8636517, %v1799_v3  ;;  %v1800_v19 = vmov -0.8568378  }
  0xba   :  { %7950 = vst [vmem:[#allocation143_spill] sm:$0xff] %v2871_v11  ;;  %v2875_v27 = vsel %vm2145_vm2, -0.8500334, %v1800_v19  ;;  %v1801_v35 = vmov -0.8432382  }
  0xbb   :  { %7951 = vst [vmem:[#allocation144_spill] sm:$0xff] %v2875_v27  ;;  %v2879_v43 = vsel %vm2145_vm2, -0.8364522, %v1801_v35  ;;  %v1802_v51 = vmov -0.8296753  }
  0xbc   :  { %7952 = vst [vmem:[#allocation145_spill] sm:$0xff] %v2879_v43  ;;  %v2883_v59 = vsel %vm2145_vm2, -0.82290745, %v1802_v51  ;;  %v1803_v63 = vmov -0.8161485  }
  0xbd   :  { %7953 = vst [vmem:[#allocation146_spill] sm:$0xff] %v2883_v59  ;;  %v2887_v3 = vsel %vm2145_vm2, -0.8093984, %v1803_v63  ;;  %v1804_v11 = vmov -0.802657  }
  0xbe   :  { %7954 = vst [vmem:[#allocation147_spill] sm:$0xff] %v2887_v3  ;;  %v2891_v19 = vsel %vm2145_vm2, -0.7959243, %v1804_v11  ;;  %v1805_v27 = vmov -0.7892001  }
  0xbf   :  { %7955 = vst [vmem:[#allocation148_spill] sm:$0xff] %v2891_v19  ;;  %v2895_v35 = vsel %vm2145_vm2, -0.7824845, %v1805_v27  ;;  %v1806_v43 = vmov -0.7757772  }
  0xc0   :  { %7956 = vst [vmem:[#allocation149_spill] sm:$0xff] %v2895_v35  ;;  %v2899_v51 = vsel %vm2145_vm2, -0.76907825, %v1806_v43  ;;  %v1807_v59 = vmov -0.7623875  }
  0xc1   :  { %7957 = vst [vmem:[#allocation150_spill] sm:$0xff] %v2899_v51  ;;  %v2903_v63 = vsel %vm2145_vm2, -0.7557049, %v1807_v59  ;;  %v1808_v3 = vmov -0.74903035  }
  0xc2   :  { %7958 = vst [vmem:[#allocation151_spill] sm:$0xff] %v2903_v63  ;;  %v2907_v11 = vsel %vm2145_vm2, -0.7423638, %v1808_v3  ;;  %v1809_v19 = vmov -0.7357051  }
  0xc3   :  { %7959 = vst [vmem:[#allocation152_spill] sm:$0xff] %v2907_v11  ;;  %v2911_v27 = vsel %vm2145_vm2, -0.7290542, %v1809_v19  ;;  %v1810_v35 = vmov -0.72241104  }
  0xc4   :  { %7960 = vst [vmem:[#allocation153_spill] sm:$0xff] %v2911_v27  ;;  %v2915_v43 = vsel %vm2145_vm2, -0.71577555, %v1810_v35  ;;  %v1811_v51 = vmov -0.7091476  }
  0xc5   :  { %7961 = vst [vmem:[#allocation154_spill] sm:$0xff] %v2915_v43  ;;  %v2919_v59 = vsel %vm2145_vm2, -0.7025271, %v1811_v51  ;;  %v1812_v63 = vmov -0.695914  }
  0xc6   :  { %7962 = vst [vmem:[#allocation155_spill] sm:$0xff] %v2919_v59  ;;  %v2923_v3 = vsel %vm2145_vm2, -0.6893082, %v1812_v63  ;;  %v1813_v11 = vmov -0.68270963  }
  0xc7   :  { %7963 = vst [vmem:[#allocation156_spill] sm:$0xff] %v2923_v3  ;;  %v2927_v19 = vsel %vm2145_vm2, -0.67611825, %v1813_v11  ;;  %v1814_v27 = vmov -0.66953397  }
  0xc8   :  { %7964 = vst [vmem:[#allocation157_spill] sm:$0xff] %v2927_v19  ;;  %v2931_v35 = vsel %vm2145_vm2, -0.66295666, %v1814_v27  ;;  %v1815_v43 = vmov -0.65638626  }
  0xc9   :  { %7965 = vst [vmem:[#allocation158_spill] sm:$0xff] %v2931_v35  ;;  %v2935_v51 = vsel %vm2145_vm2, -0.64982265, %v1815_v43  ;;  %v1816_v59 = vmov -0.64326584  }
  0xca   :  { %7966 = vst [vmem:[#allocation159_spill] sm:$0xff] %v2935_v51  ;;  %v2939_v63 = vsel %vm2145_vm2, -0.63671577, %v1816_v59  ;;  %v1817_v3 = vmov -0.63017225  }
  0xcb   :  { %7967 = vst [vmem:[#allocation160_spill] sm:$0xff] %v2939_v63  ;;  %v2943_v11 = vsel %vm2145_vm2, -0.6236353, %v1817_v3  ;;  %v1818_v19 = vmov -0.61710477  }
  0xcc   :  { %7968 = vst [vmem:[#allocation161_spill] sm:$0xff] %v2943_v11  ;;  %v2947_v27 = vsel %vm2145_vm2, -0.6105806, %v1818_v19  ;;  %v1819_v35 = vmov -0.60406274  }
  0xcd   :  { %7969 = vst [vmem:[#allocation162_spill] sm:$0xff] %v2947_v27  ;;  %v2951_v43 = vsel %vm2145_vm2, -0.59755117, %v1819_v35  ;;  %v1820_v51 = vmov -0.5910457  }
  0xce   :  { %7970 = vst [vmem:[#allocation163_spill] sm:$0xff] %v2951_v43  ;;  %v2955_v59 = vsel %vm2145_vm2, -0.58454627, %v1820_v51  ;;  %v1821_v63 = vmov -0.57805294  }
  0xcf   :  { %7971 = vst [vmem:[#allocation164_spill] sm:$0xff] %v2955_v59  ;;  %v2959_v3 = vsel %vm2145_vm2, -0.57156545, %v1821_v63  ;;  %v1822_v11 = vmov -0.56508386  }
  0xd0   :  { %7972 = vst [vmem:[#allocation165_spill] sm:$0xff] %v2959_v3  ;;  %v2963_v19 = vsel %vm2145_vm2, -0.55860806, %v1822_v11  ;;  %v1823_v27 = vmov -0.552138  }
  0xd1   :  { %7973 = vst [vmem:[#allocation166_spill] sm:$0xff] %v2963_v19  ;;  %v2967_v35 = vsel %vm2145_vm2, -0.5456735, %v1823_v27  ;;  %v1824_v43 = vmov -0.53921455  }
  0xd2   :  { %7974 = vst [vmem:[#allocation167_spill] sm:$0xff] %v2967_v35  ;;  %v2971_v51 = vsel %vm2145_vm2, -0.53276116, %v1824_v43  ;;  %v1825_v59 = vmov -0.5263132  }
  0xd3   :  { %7975 = vst [vmem:[#allocation168_spill] sm:$0xff] %v2971_v51  ;;  %v2975_v63 = vsel %vm2145_vm2, -0.5198705, %v1825_v59  ;;  %v1826_v3 = vmov -0.51343316  }
  0xd4   :  { %7976 = vst [vmem:[#allocation169_spill] sm:$0xff] %v2975_v63  ;;  %v2979_v11 = vsel %vm2145_vm2, -0.507001, %v1826_v3  ;;  %v1827_v19 = vmov -0.500574  }
  0xd5   :  { %7977 = vst [vmem:[#allocation170_spill] sm:$0xff] %v2979_v11  ;;  %v2983_v27 = vsel %vm2145_vm2, -0.49415204, %v1827_v19  ;;  %v1828_v35 = vmov -0.48773506  }
  0xd6   :  { %7978 = vst [vmem:[#allocation171_spill] sm:$0xff] %v2983_v27  ;;  %v2987_v43 = vsel %vm2145_vm2, -0.48132303, %v1828_v35  ;;  %v1829_v51 = vmov -0.47491583  }
  0xd7   :  { %7979 = vst [vmem:[#allocation172_spill] sm:$0xff] %v2987_v43  ;;  %v2991_v59 = vsel %vm2145_vm2, -0.46851346, %v1829_v51  ;;  %v1830_v63 = vmov -0.46211576  }
  0xd8   :  { %7980 = vst [vmem:[#allocation173_spill] sm:$0xff] %v2991_v59  ;;  %v2995_v3 = vsel %vm2145_vm2, -0.45572275, %v1830_v63  ;;  %v1831_v11 = vmov -0.4493343  }
  0xd9   :  { %7981 = vst [vmem:[#allocation174_spill] sm:$0xff] %v2995_v3  ;;  %v2999_v19 = vsel %vm2145_vm2, -0.44295034, %v1831_v11  ;;  %v1832_v27 = vmov -0.43657085  }
  0xda   :  { %7982 = vst [vmem:[#allocation175_spill] sm:$0xff] %v2999_v19  ;;  %v3003_v35 = vsel %vm2145_vm2, -0.43019572, %v1832_v27  ;;  %v1833_v43 = vmov -0.4238249  }
  0xdb   :  { %7983 = vst [vmem:[#allocation176_spill] sm:$0xff] %v3003_v35  ;;  %v3007_v51 = vsel %vm2145_vm2, -0.41745833, %v1833_v43  ;;  %v1834_v59 = vmov -0.41109592  }
  0xdc   :  { %7984 = vst [vmem:[#allocation177_spill] sm:$0xff] %v3007_v51  ;;  %v3011_v63 = vsel %vm2145_vm2, -0.40473762, %v1834_v59  ;;  %v1835_v3 = vmov -0.39838335  }
  0xdd   :  { %7985 = vst [vmem:[#allocation178_spill] sm:$0xff] %v3011_v63  ;;  %v3015_v11 = vsel %vm2145_vm2, -0.39203307, %v1835_v3  ;;  %v1836_v19 = vmov -0.3856867  }
  0xde   :  { %7986 = vst [vmem:[#allocation179_spill] sm:$0xff] %v3015_v11  ;;  %v3019_v27 = vsel %vm2145_vm2, -0.37934414, %v1836_v19  ;;  %v1837_v35 = vmov -0.37300536  }
  0xdf   :  { %7987 = vst [vmem:[#allocation180_spill] sm:$0xff] %v3019_v27  ;;  %v3023_v43 = vsel %vm2145_vm2, -0.36667028, %v1837_v35  ;;  %v1838_v51 = vmov -0.36033887  }
  0xe0   :  { %7988 = vst [vmem:[#allocation181_spill] sm:$0xff] %v3023_v43  ;;  %v3027_v59 = vsel %vm2145_vm2, -0.354011, %v1838_v51  ;;  %v1839_v63 = vmov -0.34768665  }
  0xe1   :  { %7989 = vst [vmem:[#allocation182_spill] sm:$0xff] %v3027_v59  ;;  %v3031_v3 = vsel %vm2145_vm2, -0.34136575, %v1839_v63  ;;  %v1840_v11 = vmov -0.33504823  }
  0xe2   :  { %7990 = vst [vmem:[#allocation183_spill] sm:$0xff] %v3031_v3  ;;  %v3035_v19 = vsel %vm2145_vm2, -0.32873404, %v1840_v11  ;;  %v1841_v27 = vmov -0.32242307  }
  0xe3   :  { %7991 = vst [vmem:[#allocation184_spill] sm:$0xff] %v3035_v19  ;;  %v3039_v35 = vsel %vm2145_vm2, -0.31611532, %v1841_v27  ;;  %v1842_v43 = vmov -0.30981067  }
  0xe4   :  { %7992 = vst [vmem:[#allocation185_spill] sm:$0xff] %v3039_v35  ;;  %v3043_v51 = vsel %vm2145_vm2, -0.30350906, %v1842_v43  ;;  %v1843_v59 = vmov -0.29721045  }
  0xe5   :  { %7993 = vst [vmem:[#allocation186_spill] sm:$0xff] %v3043_v51  ;;  %v3047_v63 = vsel %vm2145_vm2, -0.2909148, %v1843_v59  ;;  %v1844_v3 = vmov -0.28462198  }
  0xe6   :  { %7994 = vst [vmem:[#allocation187_spill] sm:$0xff] %v3047_v63  ;;  %v3051_v11 = vsel %vm2145_vm2, -0.278332, %v1844_v3  ;;  %v1845_v19 = vmov -0.27204472  }
  0xe7   :  { %7995 = vst [vmem:[#allocation188_spill] sm:$0xff] %v3051_v11  ;;  %v3055_v27 = vsel %vm2145_vm2, -0.26576012, %v1845_v19  ;;  %v1846_v35 = vmov -0.25947815  }
  0xe8   :  { %7996 = vst [vmem:[#allocation189_spill] sm:$0xff] %v3055_v27  ;;  %v3059_v43 = vsel %vm2145_vm2, -0.2531987, %v1846_v35  ;;  %v1847_v51 = vmov -0.24692178  }
  0xe9   :  { %7997 = vst [vmem:[#allocation190_spill] sm:$0xff] %v3059_v43  ;;  %v3063_v59 = vsel %vm2145_vm2, -0.24064726, %v1847_v51  ;;  %v1848_v63 = vmov -0.23437509  }
  0xea   :  { %7998 = vst [vmem:[#allocation191_spill] sm:$0xff] %v3063_v59  ;;  %v3067_v3 = vsel %vm2145_vm2, -0.22810523, %v1848_v63  ;;  %v1849_v11 = vmov -0.22183761  }
  0xeb   :  { %7999 = vst [vmem:[#allocation192_spill] sm:$0xff] %v3067_v3  ;;  %v3071_v19 = vsel %vm2145_vm2, -0.21557215, %v1849_v11  ;;  %v1850_v27 = vmov -0.2093088  }
  0xec   :  { %8000 = vst [vmem:[#allocation193_spill] sm:$0xff] %v3071_v19  ;;  %v3075_v35 = vsel %vm2145_vm2, -0.20304751, %v1850_v27  ;;  %v1851_v43 = vmov -0.19678819  }
  0xed   :  { %8001 = vst [vmem:[#allocation194_spill] sm:$0xff] %v3075_v35  ;;  %v3079_v51 = vsel %vm2145_vm2, -0.1905308, %v1851_v43  ;;  %v1852_v59 = vmov -0.18427528  }
  0xee   :  { %8002 = vst [vmem:[#allocation195_spill] sm:$0xff] %v3079_v51  ;;  %v3083_v63 = vsel %vm2145_vm2, -0.17802157, %v1852_v59  ;;  %v1853_v3 = vmov -0.17176957  }
  0xef   :  { %8003 = vst [vmem:[#allocation196_spill] sm:$0xff] %v3083_v63  ;;  %v3087_v11 = vsel %vm2145_vm2, -0.16551928, %v1853_v3  ;;  %v1854_v19 = vmov -0.15927058  }
  0xf0   :  { %8004 = vst [vmem:[#allocation197_spill] sm:$0xff] %v3087_v11  ;;  %v3091_v27 = vsel %vm2145_vm2, -0.15302345, %v1854_v19  ;;  %v1855_v35 = vmov -0.14677781  }
  0xf1   :  { %8005 = vst [vmem:[#allocation198_spill] sm:$0xff] %v3091_v27  ;;  %v3095_v43 = vsel %vm2145_vm2, -0.1405336, %v1855_v35  ;;  %v1856_v51 = vmov -0.13429075  }
  0xf2   :  { %8006 = vst [vmem:[#allocation199_spill] sm:$0xff] %v3095_v43  ;;  %v3099_v59 = vsel %vm2145_vm2, -0.12804922, %v1856_v51  ;;  %v1857_v63 = vmov -0.121808946  }
  0xf3   :  { %8007 = vst [vmem:[#allocation200_spill] sm:$0xff] %v3099_v59  ;;  %v3103_v3 = vsel %vm2145_vm2, -0.11556986, %v1857_v63  ;;  %v1858_v11 = vmov -0.10933189  }
  0xf4   :  { %8008 = vst [vmem:[#allocation201_spill] sm:$0xff] %v3103_v3  ;;  %v3107_v19 = vsel %vm2145_vm2, -0.10309499, %v1858_v11  ;;  %v1859_v27 = vmov -0.09685909  }
  0xf5   :  { %8009 = vst [vmem:[#allocation202_spill] sm:$0xff] %v3107_v19  ;;  %v3111_v35 = vsel %vm2145_vm2, -0.09062414, %v1859_v27  ;;  %v1860_v43 = vmov -0.084390074  }
  0xf6   :  { %8010 = vst [vmem:[#allocation203_spill] sm:$0xff] %v3111_v35  ;;  %v3115_v51 = vsel %vm2145_vm2, -0.07815683, %v1860_v43  ;;  %v1861_v59 = vmov -0.07192434  }
  0xf7   :  { %8011 = vst [vmem:[#allocation204_spill] sm:$0xff] %v3115_v51  ;;  %v3119_v63 = vsel %vm2145_vm2, -0.06569256, %v1861_v59  ;;  %v1862_v3 = vmov -0.05946142  }
  0xf8   :  { %8012 = vst [vmem:[#allocation205_spill] sm:$0xff] %v3119_v63  ;;  %v3123_v11 = vsel %vm2145_vm2, -0.053230856, %v1862_v3  ;;  %v1863_v19 = vmov -0.047000814  }
  0xf9   :  { %8013 = vst [vmem:[#allocation206_spill] sm:$0xff] %v3123_v11  ;;  %v3127_v27 = vsel %vm2145_vm2, -0.04077123, %v1863_v19  ;;  %v1864_v35 = vmov -0.034542046  }
  0xfa   :  { %8014 = vst [vmem:[#allocation207_spill] sm:$0xff] %v3127_v27  ;;  %v3131_v43 = vsel %vm2145_vm2, -0.028313199, %v1864_v35  ;;  %v1865_v51 = vmov -0.022084631  }
  0xfb   :  { %8015 = vst [vmem:[#allocation208_spill] sm:$0xff] %v3131_v43  ;;  %v3135_v59 = vsel %vm2145_vm2, -0.015856279, %v1865_v51  ;;  %v1866_v63 = vmov -0.0096280845  }
  0xfc   :  { %8016 = vst [vmem:[#allocation209_spill] sm:$0xff] %v3135_v59  ;;  %v3139_v3 = vsel %vm2145_vm2, -0.0033999858, %v1866_v63  ;;  %v1867_v11 = vmov 0.0028280762  }
  0xfd   :  { %8017 = vst [vmem:[#allocation210_spill] sm:$0xff] %v3139_v3  ;;  %v3143_v19 = vsel %vm2145_vm2, 0.009056163, %v1867_v11  ;;  %v1868_v27 = vmov 0.015284334  }
  0xfe   :  { %8018 = vst [vmem:[#allocation211_spill] sm:$0xff] %v3143_v19  ;;  %v3147_v35 = vsel %vm2145_vm2, 0.021512652, %v1868_v27  ;;  %v1869_v43 = vmov 0.027741173  }
  0xff   :  { %8019 = vst [vmem:[#allocation212_spill] sm:$0xff] %v3147_v35  ;;  %v3151_v51 = vsel %vm2145_vm2, 0.03396996, %v1869_v43  ;;  %v1870_v59 = vmov 0.04019908  }
 0x100   :  { %8020 = vst [vmem:[#allocation213_spill] sm:$0xff] %v3151_v51  ;;  %v3155_v63 = vsel %vm2145_vm2, 0.04642858, %v1870_v59  ;;  %v1871_v3 = vmov 0.052658528  }
 0x101   :  { %8021 = vst [vmem:[#allocation214_spill] sm:$0xff] %v3155_v63  ;;  %v3159_v11 = vsel %vm2145_vm2, 0.058888987, %v1871_v3  ;;  %v1872_v19 = vmov 0.06512001  }
 0x102   :  { %8022 = vst [vmem:[#allocation215_spill] sm:$0xff] %v3159_v11  ;;  %v3163_v27 = vsel %vm2145_vm2, 0.07135167, %v1872_v19  ;;  %v1873_v35 = vmov 0.07758401  }
 0x103   :  { %8023 = vst [vmem:[#allocation216_spill] sm:$0xff] %v3163_v27  ;;  %v3167_v43 = vsel %vm2145_vm2, 0.08381711, %v1873_v35  ;;  %v1874_v51 = vmov 0.09005102  }
 0x104   :  { %8024 = vst [vmem:[#allocation217_spill] sm:$0xff] %v3167_v43  ;;  %v3171_v59 = vsel %vm2145_vm2, 0.09628579, %v1874_v51  ;;  %v1875_v63 = vmov 0.1025215  }
 0x105   :  { %8025 = vst [vmem:[#allocation218_spill] sm:$0xff] %v3171_v59  ;;  %v3175_v3 = vsel %vm2145_vm2, 0.1087582, %v1875_v63  ;;  %v1876_v11 = vmov 0.114995964  }
 0x106   :  { %8026 = vst [vmem:[#allocation219_spill] sm:$0xff] %v3175_v3  ;;  %v3179_v19 = vsel %vm2145_vm2, 0.121234834, %v1876_v11  ;;  %v1877_v27 = vmov 0.12747489  }
 0x107   :  { %8027 = vst [vmem:[#allocation220_spill] sm:$0xff] %v3179_v19  ;;  %v3183_v35 = vsel %vm2145_vm2, 0.13371617, %v1877_v27  ;;  %v1878_v43 = vmov 0.13995875  }
 0x108   :  { %8028 = vst [vmem:[#allocation221_spill] sm:$0xff] %v3183_v35  ;;  %v3187_v51 = vsel %vm2145_vm2, 0.1462027, %v1878_v43  ;;  %v1879_v59 = vmov 0.15244806  }
 0x109   :  { %8029 = vst [vmem:[#allocation222_spill] sm:$0xff] %v3187_v51  ;;  %v3191_v63 = vsel %vm2145_vm2, 0.1586949, %v1879_v59  ;;  %v1880_v3 = vmov 0.16494328  }
 0x10a   :  { %8030 = vst [vmem:[#allocation223_spill] sm:$0xff] %v3191_v63  ;;  %v3195_v11 = vsel %vm2145_vm2, 0.17119327, %v1880_v3  ;;  %v1881_v19 = vmov 0.17744493  }
 0x10b   :  { %8031 = vst [vmem:[#allocation224_spill] sm:$0xff] %v3195_v11  ;;  %v3199_v27 = vsel %vm2145_vm2, 0.18369831, %v1881_v19  ;;  %v1882_v35 = vmov 0.18995349  }
 0x10c   :  { %8032 = vst [vmem:[#allocation225_spill] sm:$0xff] %v3199_v27  ;;  %v3203_v43 = vsel %vm2145_vm2, 0.1962105, %v1882_v35  ;;  %v1883_v51 = vmov 0.20246944  }
 0x10d   :  { %8033 = vst [vmem:[#allocation226_spill] sm:$0xff] %v3203_v43  ;;  %v3207_v59 = vsel %vm2145_vm2, 0.20873035, %v1883_v51  ;;  %v1884_v63 = vmov 0.2149933  }
 0x10e   :  { %8034 = vst [vmem:[#allocation227_spill] sm:$0xff] %v3207_v59  ;;  %v3211_v3 = vsel %vm2145_vm2, 0.22125834, %v1884_v63  ;;  %v1885_v11 = vmov 0.22752555  }
 0x10f   :  { %8035 = vst [vmem:[#allocation228_spill] sm:$0xff] %v3211_v3  ;;  %v3215_v19 = vsel %vm2145_vm2, 0.23379497, %v1885_v11  ;;  %v1886_v27 = vmov 0.24006669  }
 0x110   :  { %8036 = vst [vmem:[#allocation229_spill] sm:$0xff] %v3215_v19  ;;  %v3219_v35 = vsel %vm2145_vm2, 0.24634075, %v1886_v27  ;;  %v1887_v43 = vmov 0.2526172  }
 0x111   :  { %8037 = vst [vmem:[#allocation230_spill] sm:$0xff] %v3219_v35  ;;  %v3223_v51 = vsel %vm2145_vm2, 0.25889617, %v1887_v43  ;;  %v1888_v59 = vmov 0.26517764  }
 0x112   :  { %8038 = vst [vmem:[#allocation231_spill] sm:$0xff] %v3223_v51  ;;  %v3227_v63 = vsel %vm2145_vm2, 0.27146173, %v1888_v59  ;;  %v1889_v3 = vmov 0.27774847  }
 0x113   :  { %8039 = vst [vmem:[#allocation232_spill] sm:$0xff] %v3227_v63  ;;  %v3231_v11 = vsel %vm2145_vm2, 0.28403795, %v1889_v3  ;;  %v1890_v19 = vmov 0.2903302  }
 0x114   :  { %8040 = vst [vmem:[#allocation233_spill] sm:$0xff] %v3231_v11  ;;  %v3235_v27 = vsel %vm2145_vm2, 0.29662532, %v1890_v19  ;;  %v1891_v35 = vmov 0.30292332  }
 0x115   :  { %8041 = vst [vmem:[#allocation234_spill] sm:$0xff] %v3235_v27  ;;  %v3239_v43 = vsel %vm2145_vm2, 0.30922434, %v1891_v35  ;;  %v1892_v51 = vmov 0.3155284  }
 0x116   :  { %8042 = vst [vmem:[#allocation235_spill] sm:$0xff] %v3239_v43  ;;  %v3243_v59 = vsel %vm2145_vm2, 0.32183555, %v1892_v51  ;;  %v1893_v63 = vmov 0.3281459  }
 0x117   :  { %8043 = vst [vmem:[#allocation236_spill] sm:$0xff] %v3243_v59  ;;  %v3247_v3 = vsel %vm2145_vm2, 0.33445945, %v1893_v63  ;;  %v1894_v11 = vmov 0.34077632  }
 0x118   :  { %8044 = vst [vmem:[#allocation237_spill] sm:$0xff] %v3247_v3  ;;  %v3251_v19 = vsel %vm2145_vm2, 0.34709656, %v1894_v11  ;;  %v1895_v27 = vmov 0.35342023  }
 0x119   :  { %8045 = vst [vmem:[#allocation238_spill] sm:$0xff] %v3251_v19  ;;  %v3255_v35 = vsel %vm2145_vm2, 0.35974738, %v1895_v27  ;;  %v1896_v43 = vmov 0.3660781  }
 0x11a   :  { %8046 = vst [vmem:[#allocation239_spill] sm:$0xff] %v3255_v35  ;;  %v3259_v51 = vsel %vm2145_vm2, 0.37241247, %v1896_v43  ;;  %v1897_v59 = vmov 0.37875053  }
 0x11b   :  { %8047 = vst [vmem:[#allocation240_spill] sm:$0xff] %v3259_v51  ;;  %v3263_v63 = vsel %vm2145_vm2, 0.38509232, %v1897_v59  ;;  %v1898_v3 = vmov 0.39143795  }
 0x11c   :  { %8048 = vst [vmem:[#allocation241_spill] sm:$0xff] %v3263_v63  ;;  %v3267_v11 = vsel %vm2145_vm2, 0.39778748, %v1898_v3  ;;  %v1899_v19 = vmov 0.40414098  }
 0x11d   :  { %8049 = vst [vmem:[#allocation242_spill] sm:$0xff] %v3267_v11  ;;  %v3271_v27 = vsel %vm2145_vm2, 0.41049847, %v1899_v19  ;;  %v1900_v35 = vmov 0.41686007  }
 0x11e   :  { %8050 = vst [vmem:[#allocation243_spill] sm:$0xff] %v3271_v27  ;;  %v3275_v43 = vsel %vm2145_vm2, 0.42322582, %v1900_v35  ;;  %v1901_v51 = vmov 0.4295958  }
 0x11f   :  { %8051 = vst [vmem:[#allocation244_spill] sm:$0xff] %v3275_v43  ;;  %v3279_v59 = vsel %vm2145_vm2, 0.43597007, %v1901_v51  ;;  %v1902_v63 = vmov 0.44234872  }
 0x120   :  { %8052 = vst [vmem:[#allocation245_spill] sm:$0xff] %v3279_v59  ;;  %v3283_v3 = vsel %vm2145_vm2, 0.44873178, %v1902_v63  ;;  %v1903_v11 = vmov 0.45511934  }
 0x121   :  { %8053 = vst [vmem:[#allocation246_spill] sm:$0xff] %v3283_v3  ;;  %v3287_v19 = vsel %vm2145_vm2, 0.46151146, %v1903_v11  ;;  %v1904_v27 = vmov 0.4679082  }
 0x122   :  { %8054 = vst [vmem:[#allocation247_spill] sm:$0xff] %v3287_v19  ;;  %v3291_v35 = vsel %vm2145_vm2, 0.47430968, %v1904_v27  ;;  %v1905_v43 = vmov 0.4807159  }
 0x123   :  { %8055 = vst [vmem:[#allocation248_spill] sm:$0xff] %v3291_v35  ;;  %v3295_v51 = vsel %vm2145_vm2, 0.48712698, %v1905_v43  ;;  %v1906_v59 = vmov 0.49354297  }
 0x124   :  { %8056 = vst [vmem:[#allocation249_spill] sm:$0xff] %v3295_v51  ;;  %v3299_v63 = vsel %vm2145_vm2, 0.49996394, %v1906_v59  ;;  %v1907_v3 = vmov 0.5063899  }
 0x125   :  { %8057 = vst [vmem:[#allocation250_spill] sm:$0xff] %v3299_v63  ;;  %v3303_v11 = vsel %vm2145_vm2, 0.5128211, %v1907_v3  ;;  %v1908_v19 = vmov 0.5192574  }
 0x126   :  { %8058 = vst [vmem:[#allocation251_spill] sm:$0xff] %v3303_v11  ;;  %v3307_v27 = vsel %vm2145_vm2, 0.525699, %v1908_v19  ;;  %v1909_v35 = vmov 0.5321459  }
 0x127   :  { %8059 = vst [vmem:[#allocation252_spill] sm:$0xff] %v3307_v27  ;;  %v3311_v43 = vsel %vm2145_vm2, 0.53859824, %v1909_v35  ;;  %v1910_v51 = vmov 0.54505605  }
 0x128   :  { %8060 = vst [vmem:[#allocation253_spill] sm:$0xff] %v3311_v43  ;;  %v3315_v59 = vsel %vm2145_vm2, 0.5515194, %v1910_v51  ;;  %v1911_v63 = vmov 0.5579884  }
 0x129   :  { %8061 = vst [vmem:[#allocation254_spill] sm:$0xff] %v3315_v59  ;;  %v3319_v3 = vsel %vm2145_vm2, 0.564463, %v1911_v63  ;;  %v1912_v11 = vmov 0.5709435  }
 0x12a   :  { %8062 = vst [vmem:[#allocation255_spill] sm:$0xff] %v3319_v3  ;;  %v3323_v19 = vsel %vm2145_vm2, 0.5774298, %v1912_v11  ;;  %v1913_v27 = vmov 0.58392197  }
 0x12b   :  { %8063 = vst [vmem:[#allocation256_spill] sm:$0xff] %v3323_v19  ;;  %v3327_v35 = vsel %vm2145_vm2, 0.5904201, %v1913_v27  ;;  %v1914_v43 = vmov 0.59692436  }
 0x12c   :  { %8064 = vst [vmem:[#allocation257_spill] sm:$0xff] %v3327_v35  ;;  %v3331_v51 = vsel %vm2145_vm2, 0.60343474, %v1914_v43  ;;  %v1915_v59 = vmov 0.6099513  }
 0x12d   :  { %8065 = vst [vmem:[#allocation258_spill] sm:$0xff] %v3331_v51  ;;  %v3335_v63 = vsel %vm2145_vm2, 0.6164742, %v1915_v59  ;;  %v1916_v3 = vmov 0.6230034  }
 0x12e   :  { %8066 = vst [vmem:[#allocation259_spill] sm:$0xff] %v3335_v63  ;;  %v3339_v11 = vsel %vm2145_vm2, 0.6295391, %v1916_v3  ;;  %v1917_v19 = vmov 0.6360813  }
 0x12f   :  { %8067 = vst [vmem:[#allocation260_spill] sm:$0xff] %v3339_v11  ;;  %v3343_v27 = vsel %vm2145_vm2, 0.64263004, %v1917_v19  ;;  %v1918_v35 = vmov 0.6491855  }
 0x130   :  { %8068 = vst [vmem:[#allocation261_spill] sm:$0xff] %v3343_v27  ;;  %v3347_v43 = vsel %vm2145_vm2, 0.6557477, %v1918_v35  ;;  %v1919_v51 = vmov 0.6623167  }
 0x131   :  { %8069 = vst [vmem:[#allocation262_spill] sm:$0xff] %v3347_v43  ;;  %v3351_v59 = vsel %vm2145_vm2, 0.6688926, %v1919_v51  ;;  %v1920_v63 = vmov 0.6754755  }
 0x132   :  { %8070 = vst [vmem:[#allocation263_spill] sm:$0xff] %v3351_v59  ;;  %v3355_v3 = vsel %vm2145_vm2, 0.6820654, %v1920_v63  ;;  %v1921_v11 = vmov 0.6886625  }
 0x133   :  { %8071 = vst [vmem:[#allocation264_spill] sm:$0xff] %v3355_v3  ;;  %v3359_v19 = vsel %vm2145_vm2, 0.69526684, %v1921_v11  ;;  %v1922_v27 = vmov 0.7018784  }
 0x134   :  { %8072 = vst [vmem:[#allocation265_spill] sm:$0xff] %v3359_v19  ;;  %v3363_v35 = vsel %vm2145_vm2, 0.7084974, %v1922_v27  ;;  %v1923_v43 = vmov 0.71512383  }
 0x135   :  { %8073 = vst [vmem:[#allocation266_spill] sm:$0xff] %v3363_v35  ;;  %v3367_v51 = vsel %vm2145_vm2, 0.7217578, %v1923_v43  ;;  %v1924_v59 = vmov 0.7283994  }
 0x136   :  { %8074 = vst [vmem:[#allocation267_spill] sm:$0xff] %v3367_v51  ;;  %v3371_v63 = vsel %vm2145_vm2, 0.7350487, %v1924_v59  ;;  %v1925_v3 = vmov 0.7417058  }
 0x137   :  { %8075 = vst [vmem:[#allocation268_spill] sm:$0xff] %v3371_v63  ;;  %v3375_v11 = vsel %vm2145_vm2, 0.7483707, %v1925_v3  ;;  %v1926_v19 = vmov 0.7550436  }
 0x138   :  { %8076 = vst [vmem:[#allocation269_spill] sm:$0xff] %v3375_v11  ;;  %v3379_v27 = vsel %vm2145_vm2, 0.76172453, %v1926_v19  ;;  %v1927_v35 = vmov 0.7684136  }
 0x139   :  { %8077 = vst [vmem:[#allocation270_spill] sm:$0xff] %v3379_v27  ;;  %v3383_v43 = vsel %vm2145_vm2, 0.77511084, %v1927_v35  ;;  %v1928_v51 = vmov 0.78181636  }
 0x13a   :  { %8078 = vst [vmem:[#allocation271_spill] sm:$0xff] %v3383_v43  ;;  %v3387_v59 = vsel %vm2145_vm2, 0.7885303, %v1928_v51  ;;  %v1929_v63 = vmov 0.7952527  }
 0x13b   :  { %8079 = vst [vmem:[#allocation272_spill] sm:$0xff] %v3387_v59  ;;  %v3391_v3 = vsel %vm2145_vm2, 0.80198365, %v1929_v63  ;;  %v1930_v11 = vmov 0.8087232  }
 0x13c   :  { %8080 = vst [vmem:[#allocation273_spill] sm:$0xff] %v3391_v3  ;;  %v3395_v19 = vsel %vm2145_vm2, 0.8154715, %v1930_v11  ;;  %v1931_v27 = vmov 0.8222286  }
 0x13d   :  { %8081 = vst [vmem:[#allocation274_spill] sm:$0xff] %v3395_v19  ;;  %v3399_v35 = vsel %vm2145_vm2, 0.8289946, %v1931_v27  ;;  %v1932_v43 = vmov 0.8357696  }
 0x13e   :  { %8082 = vst [vmem:[#allocation275_spill] sm:$0xff] %v3399_v35  ;;  %v3403_v51 = vsel %vm2145_vm2, 0.8425537, %v1932_v43  ;;  %v1933_v59 = vmov 0.8493469  }
 0x13f   :  { %8083 = vst [vmem:[#allocation276_spill] sm:$0xff] %v3403_v51  ;;  %v3407_v63 = vsel %vm2145_vm2, 0.8561494, %v1933_v59  ;;  %v1934_v3 = vmov 0.86296123  }
 0x140   :  { %8084 = vst [vmem:[#allocation277_spill] sm:$0xff] %v3407_v63  ;;  %v3411_v11 = vsel %vm2145_vm2, 0.86978257, %v1934_v3  ;;  %v1935_v19 = vmov 0.8766134  }
 0x141   :  { %8085 = vst [vmem:[#allocation278_spill] sm:$0xff] %v3411_v11  ;;  %v3415_v27 = vsel %vm2145_vm2, 0.88345385, %v1935_v19  ;;  %v1936_v35 = vmov 0.890304  }
 0x142   :  { %8086 = vst [vmem:[#allocation279_spill] sm:$0xff] %v3415_v27  ;;  %v3419_v43 = vsel %vm2145_vm2, 0.89716405, %v1936_v35  ;;  %v1937_v51 = vmov 0.90403396  }
 0x143   :  { %8087 = vst [vmem:[#allocation280_spill] sm:$0xff] %v3419_v43  ;;  %v3423_v59 = vsel %vm2145_vm2, 0.9109139, %v1937_v51  ;;  %v1938_v63 = vmov 0.9178039  }
 0x144   :  { %8088 = vst [vmem:[#allocation281_spill] sm:$0xff] %v3423_v59  ;;  %v3427_v3 = vsel %vm2145_vm2, 0.92470413, %v1938_v63  ;;  %v1939_v11 = vmov 0.9316147  }
 0x145   :  { %8089 = vst [vmem:[#allocation282_spill] sm:$0xff] %v3427_v3  ;;  %v3431_v19 = vsel %vm2145_vm2, 0.9385356, %v1939_v11  ;;  %v1940_v27 = vmov 0.945467  }
 0x146   :  { %8090 = vst [vmem:[#allocation283_spill] sm:$0xff] %v3431_v19  ;;  %v3435_v35 = vsel %vm2145_vm2, 0.952409, %v1940_v27  ;;  %v1941_v43 = vmov 0.95936173  }
 0x147   :  { %8091 = vst [vmem:[#allocation284_spill] sm:$0xff] %v3435_v35  ;;  %v3439_v51 = vsel %vm2145_vm2, 0.9663252, %v1941_v43  ;;  %v1942_v59 = vmov 0.9732996  }
 0x148   :  { %8092 = vst [vmem:[#allocation285_spill] sm:$0xff] %v3439_v51  ;;  %v3443_v63 = vsel %vm2145_vm2, 0.98028505, %v1942_v59  ;;  %v1943_v3 = vmov 0.98728156  }
 0x149   :  { %8093 = vst [vmem:[#allocation286_spill] sm:$0xff] %v3443_v63  ;;  %v3447_v11 = vsel %vm2145_vm2, 0.9942892, %v1943_v3  ;;  %v1944_v19 = vmov 1.0013082  }
 0x14a   :  { %8094 = vst [vmem:[#allocation287_spill] sm:$0xff] %v3447_v11  ;;  %v3451_v27 = vsel %vm2145_vm2, 1.0083387, %v1944_v19  ;;  %v1945_v35 = vmov 1.0153806  }
 0x14b   :  { %8095 = vst [vmem:[#allocation288_spill] sm:$0xff] %v3451_v27  ;;  %v3455_v43 = vsel %vm2145_vm2, 1.0224342, %v1945_v35  ;;  %v1946_v51 = vmov 1.0294995  }
 0x14c   :  { %8096 = vst [vmem:[#allocation289_spill] sm:$0xff] %v3455_v43  ;;  %v3459_v59 = vsel %vm2145_vm2, 1.0365766, %v1946_v51  ;;  %v1947_v63 = vmov 1.0436658  }
 0x14d   :  { %8097 = vst [vmem:[#allocation290_spill] sm:$0xff] %v3459_v59  ;;  %v3463_v3 = vsel %vm2145_vm2, 1.0507668, %v1947_v63  ;;  %v1948_v11 = vmov 1.0578802  }
 0x14e   :  { %8098 = vst [vmem:[#allocation291_spill] sm:$0xff] %v3463_v3  ;;  %v3467_v19 = vsel %vm2145_vm2, 1.0650058, %v1948_v11  ;;  %v1949_v27 = vmov 1.0721438  }
 0x14f   :  { %8099 = vst [vmem:[#allocation292_spill] sm:$0xff] %v3467_v19  ;;  %v3471_v35 = vsel %vm2145_vm2, 1.0792942, %v1949_v27  ;;  %v1950_v43 = vmov 1.0864574  }
 0x150   :  { %8100 = vst [vmem:[#allocation293_spill] sm:$0xff] %v3471_v35  ;;  %v3475_v51 = vsel %vm2145_vm2, 1.0936332, %v1950_v43  ;;  %v1951_v59 = vmov 1.1008219  }
 0x151   :  { %8101 = vst [vmem:[#allocation294_spill] sm:$0xff] %v3475_v51  ;;  %v3479_v63 = vsel %vm2145_vm2, 1.1080235, %v1951_v59  ;;  %v1952_v3 = vmov 1.1152383  }
 0x152   :  { %8102 = vst [vmem:[#allocation295_spill] sm:$0xff] %v3479_v63  ;;  %v3483_v11 = vsel %vm2145_vm2, 1.1224662, %v1952_v3  ;;  %v1953_v19 = vmov 1.1297075  }
 0x153   :  { %8103 = vst [vmem:[#allocation296_spill] sm:$0xff] %v3483_v11  ;;  %v3487_v27 = vsel %vm2145_vm2, 1.136962, %v1953_v19  ;;  %v1954_v35 = vmov 1.1442304  }
 0x154   :  { %8104 = vst [vmem:[#allocation297_spill] sm:$0xff] %v3487_v27  ;;  %v3491_v43 = vsel %vm2145_vm2, 1.1515123, %v1954_v35  ;;  %v1955_v51 = vmov 1.158808  }
 0x155   :  { %8105 = vst [vmem:[#allocation298_spill] sm:$0xff] %v3491_v43  ;;  %v3495_v59 = vsel %vm2145_vm2, 1.1661175, %v1955_v51  ;;  %v1956_v63 = vmov 1.1734413  }
 0x156   :  { %8106 = vst [vmem:[#allocation299_spill] sm:$0xff] %v3495_v59  ;;  %v3499_v3 = vsel %vm2145_vm2, 1.1807791, %v1956_v63  ;;  %v1957_v11 = vmov 1.1881313  }
 0x157   :  { %8107 = vst [vmem:[#allocation300_spill] sm:$0xff] %v3499_v3  ;;  %v3503_v19 = vsel %vm2145_vm2, 1.1954979, %v1957_v11  ;;  %v1958_v27 = vmov 1.2028791  }
 0x158   :  { %8108 = vst [vmem:[#allocation301_spill] sm:$0xff] %v3503_v19  ;;  %v3507_v35 = vsel %vm2145_vm2, 1.2102748, %v1958_v27  ;;  %v1959_v43 = vmov 1.2176855  }
 0x159   :  { %8109 = vst [vmem:[#allocation302_spill] sm:$0xff] %v3507_v35  ;;  %v3511_v51 = vsel %vm2145_vm2, 1.2251111, %v1959_v43  ;;  %v1960_v59 = vmov 1.2325518  }
 0x15a   :  { %8110 = vst [vmem:[#allocation303_spill] sm:$0xff] %v3511_v51  ;;  %v3515_v63 = vsel %vm2145_vm2, 1.2400076, %v1960_v59  ;;  %v1961_v3 = vmov 1.2474788  }
 0x15b   :  { %8111 = vst [vmem:[#allocation304_spill] sm:$0xff] %v3515_v63  ;;  %v3519_v11 = vsel %vm2145_vm2, 1.2549655, %v1961_v3  ;;  %v1962_v19 = vmov 1.262468  }
 0x15c   :  { %8112 = vst [vmem:[#allocation305_spill] sm:$0xff] %v3519_v11  ;;  %v3523_v27 = vsel %vm2145_vm2, 1.269986, %v1962_v19  ;;  %v1963_v35 = vmov 1.2775201  }
 0x15d   :  { %8113 = vst [vmem:[#allocation306_spill] sm:$0xff] %v3523_v27  ;;  %v3527_v43 = vsel %vm2145_vm2, 1.2850701, %v1963_v35  ;;  %v1964_v51 = vmov 1.2926363  }
 0x15e   :  { %8114 = vst [vmem:[#allocation307_spill] sm:$0xff] %v3527_v43  ;;  %v3531_v59 = vsel %vm2145_vm2, 1.3002188, %v1964_v51  ;;  %v1965_v63 = vmov 1.3078179  }
 0x15f   :  { %8115 = vst [vmem:[#allocation308_spill] sm:$0xff] %v3531_v59  ;;  %v3535_v3 = vsel %vm2145_vm2, 1.3154335, %v1965_v63  ;;  %v1966_v11 = vmov 1.3230659  }
 0x160   :  { %8116 = vst [vmem:[#allocation309_spill] sm:$0xff] %v3535_v3  ;;  %v3539_v19 = vsel %vm2145_vm2, 1.3307152, %v1966_v11  ;;  %v1967_v27 = vmov 1.3383816  }
 0x161   :  { %8117 = vst [vmem:[#allocation310_spill] sm:$0xff] %v3539_v19  ;;  %v3543_v35 = vsel %vm2145_vm2, 1.3460652, %v1967_v27  ;;  %v1968_v43 = vmov 1.3537662  }
 0x162   :  { %8118 = vst [vmem:[#allocation311_spill] sm:$0xff] %v3543_v35  ;;  %v3547_v51 = vsel %vm2145_vm2, 1.3614846, %v1968_v43  ;;  %v1969_v59 = vmov 1.3692207  }
 0x163   :  { %8119 = vst [vmem:[#allocation312_spill] sm:$0xff] %v3547_v51  ;;  %v3551_v63 = vsel %vm2145_vm2, 1.3769747, %v1969_v59  ;;  %v1970_v3 = vmov 1.3847467  }
 0x164   :  { %8120 = vst [vmem:[#allocation313_spill] sm:$0xff] %v3551_v63  ;;  %v3555_v11 = vsel %vm2145_vm2, 1.3925368, %v1970_v3  ;;  %v1971_v19 = vmov 1.4003452  }
 0x165   :  { %8121 = vst [vmem:[#allocation314_spill] sm:$0xff] %v3555_v11  ;;  %v3559_v27 = vsel %vm2145_vm2, 1.4081721, %v1971_v19  ;;  %v1972_v35 = vmov 1.4160177  }
 0x166   :  { %8122 = vst [vmem:[#allocation315_spill] sm:$0xff] %v3559_v27  ;;  %v3563_v43 = vsel %vm2145_vm2, 1.423882, %v1972_v35  ;;  %v1973_v51 = vmov 1.4317652  }
 0x167   :  { %8123 = vst [vmem:[#allocation316_spill] sm:$0xff] %v3563_v43  ;;  %v3567_v59 = vsel %vm2145_vm2, 1.4396677, %v1973_v51  ;;  %v1974_v63 = vmov 1.4475894  }
 0x168   :  { %8124 = vst [vmem:[#allocation317_spill] sm:$0xff] %v3567_v59  ;;  %v3571_v3 = vsel %vm2145_vm2, 1.4555306, %v1974_v63  ;;  %v1975_v11 = vmov 1.4634914  }
 0x169   :  { %8125 = vst [vmem:[#allocation318_spill] sm:$0xff] %v3571_v3  ;;  %v3575_v19 = vsel %vm2145_vm2, 1.4714721, %v1975_v11  ;;  %v1976_v27 = vmov 1.4794729  }
 0x16a   :  { %8126 = vst [vmem:[#allocation319_spill] sm:$0xff] %v3575_v19  ;;  %v3579_v35 = vsel %vm2145_vm2, 1.4874936, %v1976_v27  ;;  %v1977_v43 = vmov 1.4955349  }
 0x16b   :  { %8127 = vst [vmem:[#allocation320_spill] sm:$0xff] %v3579_v35  ;;  %v3583_v51 = vsel %vm2145_vm2, 1.5035967, %v1977_v43  ;;  %v1978_v59 = vmov 1.5116792  }
 0x16c   :  { %8128 = vst [vmem:[#allocation321_spill] sm:$0xff] %v3583_v51  ;;  %v3587_v63 = vsel %vm2145_vm2, 1.5197825, %v1978_v59  ;;  %v1979_v3 = vmov 1.5279071  }
 0x16d   :  { %8129 = vst [vmem:[#allocation322_spill] sm:$0xff] %v3587_v63  ;;  %v3591_v11 = vsel %vm2145_vm2, 1.5360528, %v1979_v3  ;;  %v1980_v19 = vmov 1.5442202  }
 0x16e   :  { %8130 = vst [vmem:[#allocation323_spill] sm:$0xff] %v3591_v11  ;;  %v3595_v27 = vsel %vm2145_vm2, 1.552409, %v1980_v19  ;;  %v1981_v35 = vmov 1.56062  }
 0x16f   :  { %8131 = vst [vmem:[#allocation324_spill] sm:$0xff] %v3595_v27  ;;  %v3599_v43 = vsel %vm2145_vm2, 1.5688528, %v1981_v35  ;;  %v1982_v51 = vmov 1.5771079  }
 0x170   :  { %8132 = vst [vmem:[#allocation325_spill] sm:$0xff] %v3599_v43  ;;  %v3603_v59 = vsel %vm2145_vm2, 1.5853856, %v1982_v51  ;;  %v1983_v63 = vmov 1.5936859  }
 0x171   :  { %8133 = vst [vmem:[#allocation326_spill] sm:$0xff] %v3603_v59  ;;  %v3607_v3 = vsel %vm2145_vm2, 1.602009, %v1983_v63  ;;  %v1984_v11 = vmov 1.6103553  }
 0x172   :  { %8134 = vst [vmem:[#allocation327_spill] sm:$0xff] %v3607_v3  ;;  %v3611_v19 = vsel %vm2145_vm2, 1.6187248, %v1984_v11  ;;  %v1985_v27 = vmov 1.6271179  }
 0x173   :  { %8135 = vst [vmem:[#allocation328_spill] sm:$0xff] %v3611_v19  ;;  %v3615_v35 = vsel %vm2145_vm2, 1.6355346, %v1985_v27  ;;  %v1986_v43 = vmov 1.6439753  }
 0x174   :  { %8136 = vst [vmem:[#allocation329_spill] sm:$0xff] %v3615_v35  ;;  %v3619_v51 = vsel %vm2145_vm2, 1.6524402, %v1986_v43  ;;  %v1987_v59 = vmov 1.6609293  }
 0x175   :  { %8137 = vst [vmem:[#allocation330_spill] sm:$0xff] %v3619_v51  ;;  %v3623_v63 = vsel %vm2145_vm2, 1.6694432, %v1987_v59  ;;  %v1988_v3 = vmov 1.6779819  }
 0x176   :  { %8138 = vst [vmem:[#allocation331_spill] sm:$0xff] %v3623_v63  ;;  %v3627_v11 = vsel %vm2145_vm2, 1.6865455, %v1988_v3  ;;  %v1989_v19 = vmov 1.6951345  }
 0x177   :  { %8139 = vst [vmem:[#allocation332_spill] sm:$0xff] %v3627_v11  ;;  %v3631_v27 = vsel %vm2145_vm2, 1.7037491, %v1989_v19  ;;  %v1990_v35 = vmov 1.7123893  }
 0x178   :  { %8140 = vst [vmem:[#allocation333_spill] sm:$0xff] %v3631_v27  ;;  %v3635_v43 = vsel %vm2145_vm2, 1.7210555, %v1990_v35  ;;  %v1991_v51 = vmov 1.729748  }
 0x179   :  { %8141 = vst [vmem:[#allocation334_spill] sm:$0xff] %v3635_v43  ;;  %v3639_v59 = vsel %vm2145_vm2, 1.738467, %v1991_v51  ;;  %v1992_v63 = vmov 1.7472126  }
 0x17a   :  { %8142 = vst [vmem:[#allocation335_spill] sm:$0xff] %v3639_v59  ;;  %v3643_v3 = vsel %vm2145_vm2, 1.7559854, %v1992_v63  ;;  %v1993_v11 = vmov 1.7647853  }
 0x17b   :  { %8143 = vst [vmem:[#allocation336_spill] sm:$0xff] %v3643_v3  ;;  %v3647_v19 = vsel %vm2145_vm2, 1.7736126, %v1993_v11  ;;  %v1994_v27 = vmov 1.7824677  }
 0x17c   :  { %8144 = vst [vmem:[#allocation337_spill] sm:$0xff] %v3647_v19  ;;  %v3651_v35 = vsel %vm2145_vm2, 1.7913508, %v1994_v27  ;;  %v1995_v43 = vmov 1.8002622  }
 0x17d   :  { %8145 = vst [vmem:[#allocation338_spill] sm:$0xff] %v3651_v35  ;;  %v3655_v51 = vsel %vm2145_vm2, 1.8092022, %v1995_v43  ;;  %v1996_v59 = vmov 1.8181709  }
 0x17e   :  { %8146 = vst [vmem:[#allocation339_spill] sm:$0xff] %v3655_v51  ;;  %v3659_v63 = vsel %vm2145_vm2, 1.8271687, %v1996_v59  ;;  %v1997_v3 = vmov 1.8361958  }
 0x17f   :  { %8147 = vst [vmem:[#allocation340_spill] sm:$0xff] %v3659_v63  ;;  %v3663_v11 = vsel %vm2145_vm2, 1.8452526, %v1997_v3  ;;  %v1998_v19 = vmov 1.8543394  }
 0x180   :  { %8148 = vst [vmem:[#allocation341_spill] sm:$0xff] %v3663_v11  ;;  %v3667_v27 = vsel %vm2145_vm2, 1.8634562, %v1998_v19  ;;  %v1999_v35 = vmov 1.8726037  }
 0x181   :  { %8149 = vst [vmem:[#allocation342_spill] sm:$0xff] %v3667_v27  ;;  %v3671_v43 = vsel %vm2145_vm2, 1.8817819, %v1999_v35  ;;  %v2000_v51 = vmov 1.8909912  }
 0x182   :  { %8150 = vst [vmem:[#allocation343_spill] sm:$0xff] %v3671_v43  ;;  %v3675_v59 = vsel %vm2145_vm2, 1.9002318, %v2000_v51  ;;  %v2001_v63 = vmov 1.9095043  }
 0x183   :  { %8151 = vst [vmem:[#allocation344_spill] sm:$0xff] %v3675_v59  ;;  %v3679_v3 = vsel %vm2145_vm2, 1.9188086, %v2001_v63  ;;  %v2002_v11 = vmov 1.9281453  }
 0x184   :  { %8152 = vst [vmem:[#allocation345_spill] sm:$0xff] %v3679_v3  ;;  %v3683_v19 = vsel %vm2145_vm2, 1.9375147, %v2002_v11  ;;  %v2003_v27 = vmov 1.9469169  }
 0x185   :  { %8153 = vst [vmem:[#allocation346_spill] sm:$0xff] %v3683_v19  ;;  %v3687_v35 = vsel %vm2145_vm2, 1.9563525, %v2003_v27  ;;  %v2004_v43 = vmov 1.9658216  }
 0x186   :  { %8154 = vst [vmem:[#allocation347_spill] sm:$0xff] %v3687_v35  ;;  %v3691_v51 = vsel %vm2145_vm2, 1.9753247, %v2004_v43  ;;  %v2005_v59 = vmov 1.9848622  }
 0x187   :  { %8155 = vst [vmem:[#allocation348_spill] sm:$0xff] %v3691_v51  ;;  %v3695_v63 = vsel %vm2145_vm2, 1.9944341, %v2005_v59  ;;  %v2006_v3 = vmov 2.0040412  }
 0x188   :  { %8156 = vst [vmem:[#allocation349_spill] sm:$0xff] %v3695_v63  ;;  %v3699_v11 = vsel %vm2145_vm2, 2.0136833, %v2006_v3  ;;  %v2007_v19 = vmov 2.0233614  }
 0x189   :  { %8157 = vst [vmem:[#allocation350_spill] sm:$0xff] %v3699_v11  ;;  %v3703_v27 = vsel %vm2145_vm2, 2.0330753, %v2007_v19  ;;  %v2008_v35 = vmov 2.0428257  }
 0x18a   :  { %8158 = vst [vmem:[#allocation351_spill] sm:$0xff] %v3703_v27  ;;  %v3707_v43 = vsel %vm2145_vm2, 2.0526128, %v2008_v35  ;;  %v2009_v51 = vmov 2.062437  }
 0x18b   :  { %8159 = vst [vmem:[#allocation352_spill] sm:$0xff] %v3707_v43  ;;  %v3711_v59 = vsel %vm2145_vm2, 2.0722988, %v2009_v51  ;;  %v2010_v63 = vmov 2.0821984  }
 0x18c   :  { %8160 = vst [vmem:[#allocation353_spill] sm:$0xff] %v3711_v59  ;;  %v3715_v3 = vsel %vm2145_vm2, 2.0921364, %v2010_v63  ;;  %v2011_v11 = vmov 2.102113  }
 0x18d   :  { %8161 = vst [vmem:[#allocation354_spill] sm:$0xff] %v3715_v3  ;;  %v3719_v19 = vsel %vm2145_vm2, 2.1121287, %v2011_v11  ;;  %v2012_v27 = vmov 2.122184  }
 0x18e   :  { %8162 = vst [vmem:[#allocation355_spill] sm:$0xff] %v3719_v19  ;;  %v3723_v35 = vsel %vm2145_vm2, 2.1322792, %v2012_v27  ;;  %v2013_v43 = vmov 2.1424143  }
 0x18f   :  { %8163 = vst [vmem:[#allocation356_spill] sm:$0xff] %v3723_v35  ;;  %v3727_v51 = vsel %vm2145_vm2, 2.1525905, %v2013_v43  ;;  %v2014_v59 = vmov 2.162808  }
 0x190   :  { %8164 = vst [vmem:[#allocation357_spill] sm:$0xff] %v3727_v51  ;;  %v3731_v63 = vsel %vm2145_vm2, 2.1730669, %v2014_v59  ;;  %v2015_v3 = vmov 2.1833677  }
 0x191   :  { %8165 = vst [vmem:[#allocation358_spill] sm:$0xff] %v3731_v63  ;;  %v3735_v11 = vsel %vm2145_vm2, 2.193711, %v2015_v3  ;;  %v2016_v19 = vmov 2.2040975  }
 0x192   :  { %8166 = vst [vmem:[#allocation359_spill] sm:$0xff] %v3735_v11  ;;  %v3739_v27 = vsel %vm2145_vm2, 2.2145271, %v2016_v19  ;;  %v2017_v35 = vmov 2.2250009  }
 0x193   :  { %8167 = vst [vmem:[#allocation360_spill] sm:$0xff] %v3739_v27  ;;  %v3743_v43 = vsel %vm2145_vm2, 2.2355187, %v2017_v35  ;;  %v2018_v51 = vmov 2.2460816  }
 0x194   :  { %8168 = vst [vmem:[#allocation361_spill] sm:$0xff] %v3743_v43  ;;  %v3747_v59 = vsel %vm2145_vm2, 2.2566895, %v2018_v51  ;;  %v2019_v63 = vmov 2.2673435  }
 0x195   :  { %8169 = vst [vmem:[#allocation362_spill] sm:$0xff] %v3747_v59  ;;  %v3751_v3 = vsel %vm2145_vm2, 2.2780437, %v2019_v63  ;;  %v2020_v11 = vmov 2.2887907  }
 0x196   :  { %8170 = vst [vmem:[#allocation363_spill] sm:$0xff] %v3751_v3  ;;  %v3755_v19 = vsel %vm2145_vm2, 2.2995849, %v2020_v11  ;;  %v2021_v27 = vmov 2.3104272  }
 0x197   :  { %8171 = vst [vmem:[#allocation364_spill] sm:$0xff] %v3755_v19  ;;  %v3759_v35 = vsel %vm2145_vm2, 2.3213177, %v2021_v27  ;;  %v2022_v43 = vmov 2.332257  }
 0x198   :  { %8172 = vst [vmem:[#allocation365_spill] sm:$0xff] %v3759_v35  ;;  %v3763_v51 = vsel %vm2145_vm2, 2.343246, %v2022_v43  ;;  %v2023_v59 = vmov 2.354285  }
 0x199   :  { %8173 = vst [vmem:[#allocation366_spill] sm:$0xff] %v3763_v51  ;;  %v3767_v63 = vsel %vm2145_vm2, 2.3653743, %v2023_v59  ;;  %v2024_v3 = vmov 2.3765152  }
 0x19a   :  { %8174 = vst [vmem:[#allocation367_spill] sm:$0xff] %v3767_v63  ;;  %v3771_v11 = vsel %vm2145_vm2, 2.3877075, %v2024_v3  ;;  %v2025_v19 = vmov 2.3989522  }
 0x19b   :  { %8175 = vst [vmem:[#allocation368_spill] sm:$0xff] %v3771_v11  ;;  %v3775_v27 = vsel %vm2145_vm2, 2.41025, %v2025_v19  ;;  %v2026_v35 = vmov 2.4216013  }
 0x19c   :  { %8176 = vst [vmem:[#allocation369_spill] sm:$0xff] %v3775_v27  ;;  %v3779_v43 = vsel %vm2145_vm2, 2.4330068, %v2026_v35  ;;  %v2027_v51 = vmov 2.444467  }
 0x19d   :  { %8177 = vst [vmem:[#allocation370_spill] sm:$0xff] %v3779_v43  ;;  %v3783_v59 = vsel %vm2145_vm2, 2.4559827, %v2027_v51  ;;  %v2028_v63 = vmov 2.4675546  }
 0x19e   :  { %8178 = vst [vmem:[#allocation371_spill] sm:$0xff] %v3783_v59  ;;  %v3787_v3 = vsel %vm2145_vm2, 2.4791832, %v2028_v63  ;;  %v2029_v11 = vmov 2.490869  }
 0x19f   :  { %8179 = vst [vmem:[#allocation372_spill] sm:$0xff] %v3787_v3  ;;  %v3791_v19 = vsel %vm2145_vm2, 2.5026133, %v2029_v11  ;;  %v2030_v27 = vmov 2.5144162  }
 0x1a0   :  { %8180 = vst [vmem:[#allocation373_spill] sm:$0xff] %v3791_v19  ;;  %v3795_v35 = vsel %vm2145_vm2, 2.5262787, %v2030_v27  ;;  %v2031_v43 = vmov 2.5382013  }
 0x1a1   :  { %8181 = vst [vmem:[#allocation374_spill] sm:$0xff] %v3795_v35  ;;  %v3799_v51 = vsel %vm2145_vm2, 2.5501852, %v2031_v43  ;;  %v2032_v59 = vmov 2.5622306  }
 0x1a2   :  { %8182 = vst [vmem:[#allocation375_spill] sm:$0xff] %v3799_v51  ;;  %v3803_v63 = vsel %vm2145_vm2, 2.5743384, %v2032_v59  ;;  %v2033_v3 = vmov 2.5865095  }
 0x1a3   :  { %8183 = vst [vmem:[#allocation376_spill] sm:$0xff] %v3803_v63  ;;  %v3807_v11 = vsel %vm2145_vm2, 2.5987446, %v2033_v3  ;;  %v2034_v19 = vmov 2.6110446  }
 0x1a4   :  { %8184 = vst [vmem:[#allocation377_spill] sm:$0xff] %v3807_v11  ;;  %v3811_v27 = vsel %vm2145_vm2, 2.6234105, %v2034_v19  ;;  %v2035_v35 = vmov 2.6358426  }
 0x1a5   :  { %8185 = vst [vmem:[#allocation378_spill] sm:$0xff] %v3811_v27  ;;  %v3815_v43 = vsel %vm2145_vm2, 2.648342, %v2035_v35  ;;  %v2036_v51 = vmov 2.6609094  }
 0x1a6   :  { %8186 = vst [vmem:[#allocation379_spill] sm:$0xff] %v3815_v43  ;;  %v3819_v59 = vsel %vm2145_vm2, 2.673546, %v2036_v51  ;;  %v2037_v63 = vmov 2.6862526  }
 0x1a7   :  { %8187 = vst [vmem:[#allocation380_spill] sm:$0xff] %v3819_v59  ;;  %v3823_v3 = vsel %vm2145_vm2, 2.69903, %v2037_v63  ;;  %v2038_v11 = vmov 2.711879  }
 0x1a8   :  { %8188 = vst [vmem:[#allocation381_spill] sm:$0xff] %v3823_v3  ;;  %v3827_v19 = vsel %vm2145_vm2, 2.7248008, %v2038_v11  ;;  %v2039_v27 = vmov 2.737796  }
 0x1a9   :  { %8189 = vst [vmem:[#allocation382_spill] sm:$0xff] %v3827_v19  ;;  %v3831_v35 = vsel %vm2145_vm2, 2.7508662, %v2039_v27  ;;  %v2040_v43 = vmov 2.7640116  }
 0x1aa   :  { %8190 = vst [vmem:[#allocation383_spill] sm:$0xff] %v3831_v35  ;;  %v3835_v51 = vsel %vm2145_vm2, 2.7772338, %v2040_v43  ;;  %v2041_v59 = vmov 2.7905338  }
 0x1ab   :  { %8191 = vst [vmem:[#allocation384_spill] sm:$0xff] %v3835_v51  ;;  %v3839_v63 = vsel %vm2145_vm2, 2.8039122, %v2041_v59  ;;  %v2042_v3 = vmov 2.8173704  }
 0x1ac   :  { %8192 = vst [vmem:[#allocation385_spill] sm:$0xff] %v3839_v63  ;;  %v3843_v11 = vsel %vm2145_vm2, 2.8309095, %v2042_v3  ;;  %v2043_v19 = vmov 2.8445303  }
 0x1ad   :  { %8193 = vst [vmem:[#allocation386_spill] sm:$0xff] %v3843_v11  ;;  %v3847_v27 = vsel %vm2145_vm2, 2.8582344, %v2043_v19  ;;  %v2044_v35 = vmov 2.8720229  }
 0x1ae   :  { %8194 = vst [vmem:[#allocation387_spill] sm:$0xff] %v3847_v27  ;;  %v3851_v43 = vsel %vm2145_vm2, 2.8858964, %v2044_v35  ;;  %v2045_v51 = vmov 2.8998568  }
 0x1af   :  { %8195 = vst [vmem:[#allocation388_spill] sm:$0xff] %v3851_v43  ;;  %v3855_v59 = vsel %vm2145_vm2, 2.913905, %v2045_v51  ;;  %v2046_v63 = vmov 2.9280422  }
 0x1b0   :  { %8196 = vst [vmem:[#allocation389_spill] sm:$0xff] %v3855_v59  ;;  %v3859_v3 = vsel %vm2145_vm2, 2.9422696, %v2046_v63  ;;  %v2047_v11 = vmov 2.9565887  }
 0x1b1   :  { %8197 = vst [vmem:[#allocation390_spill] sm:$0xff] %v3859_v3  ;;  %v3863_v19 = vsel %vm2145_vm2, 2.9710011, %v2047_v11  ;;  %v2048_v27 = vmov 2.9855075  }
 0x1b2   :  { %8198 = vst [vmem:[#allocation391_spill] sm:$0xff] %v3863_v19  ;;  %v3867_v35 = vsel %vm2145_vm2, 3.00011, %v2048_v27  ;;  %v2049_v43 = vmov 3.0148091  }
 0x1b3   :  { %8199 = vst [vmem:[#allocation392_spill] sm:$0xff] %v3867_v35  ;;  %v3871_v51 = vsel %vm2145_vm2, 3.0296073, %v2049_v43  ;;  %v2050_v59 = vmov 3.0445054  }
 0x1b4   :  { %8200 = vst [vmem:[#allocation393_spill] sm:$0xff] %v3871_v51  ;;  %v3875_v63 = vsel %vm2145_vm2, 3.059505, %v2050_v59  ;;  %v2051_v3 = vmov 3.0746076  }
 0x1b5   :  { %8201 = vst [vmem:[#allocation394_spill] sm:$0xff] %v3875_v63  ;;  %v3879_v11 = vsel %vm2145_vm2, 3.0898151, %v2051_v3  ;;  %v2052_v19 = vmov 3.1051288  }
 0x1b6   :  { %8202 = vst [vmem:[#allocation395_spill] sm:$0xff] %v3879_v11  ;;  %v3883_v27 = vsel %vm2145_vm2, 3.1205506, %v2052_v19  ;;  %v2053_v35 = vmov 3.136082  }
 0x1b7   :  { %8203 = vst [vmem:[#allocation396_spill] sm:$0xff] %v3883_v27  ;;  %v3887_v43 = vsel %vm2145_vm2, 3.1517246, %v2053_v35  ;;  %v2054_v51 = vmov 3.1674805  }
 0x1b8   :  { %8204 = vst [vmem:[#allocation397_spill] sm:$0xff] %v3887_v43  ;;  %v3891_v59 = vsel %vm2145_vm2, 3.183351, %v2054_v51  ;;  %v2055_v63 = vmov 3.1993387  }
 0x1b9   :  { %8205 = vst [vmem:[#allocation398_spill] sm:$0xff] %v3891_v59  ;;  %v3895_v3 = vsel %vm2145_vm2, 3.2154448, %v2055_v63  ;;  %v2056_v11 = vmov 3.2316716  }
 0x1ba   :  { %8206 = vst [vmem:[#allocation399_spill] sm:$0xff] %v3895_v3  ;;  %v3899_v19 = vsel %vm2145_vm2, 3.248021, %v2056_v11  ;;  %v2057_v27 = vmov 3.2644947  }
 0x1bb   :  { %8207 = vst [vmem:[#allocation400_spill] sm:$0xff] %v3899_v19  ;;  %v3903_v35 = vsel %vm2145_vm2, 3.2810953, %v2057_v27  ;;  %v2058_v43 = vmov 3.2978249  }
 0x1bc   :  { %8208 = vst [vmem:[#allocation401_spill] sm:$0xff] %v3903_v35  ;;  %v3907_v51 = vsel %vm2145_vm2, 3.314685, %v2058_v43  ;;  %v2059_v59 = vmov 3.3316786  }
 0x1bd   :  { %8209 = vst [vmem:[#allocation402_spill] sm:$0xff] %v3907_v51  ;;  %v3911_v63 = vsel %vm2145_vm2, 3.3488078, %v2059_v59  ;;  %v2060_v3 = vmov 3.3660748  }
 0x1be   :  { %8210 = vst [vmem:[#allocation403_spill] sm:$0xff] %v3911_v63  ;;  %v3915_v11 = vsel %vm2145_vm2, 3.3834817, %v2060_v3  ;;  %v2061_v19 = vmov 3.4010317  }
 0x1bf   :  { %8211 = vst [vmem:[#allocation404_spill] sm:$0xff] %v3915_v11  ;;  %v3919_v27 = vsel %vm2145_vm2, 3.418727, %v2061_v19  ;;  %v2062_v35 = vmov 3.43657  }
 0x1c0   :  { %8212 = vst [vmem:[#allocation405_spill] sm:$0xff] %v3919_v27  ;;  %v3923_v43 = vsel %vm2145_vm2, 3.4545634, %v2062_v35  ;;  %v2063_v51 = vmov 3.4727101  }
 0x1c1   :  { %8213 = vst [vmem:[#allocation406_spill] sm:$0xff] %v3923_v43  ;;  %v3927_v59 = vsel %vm2145_vm2, 3.491013, %v2063_v51  ;;  %v2064_v63 = vmov 3.509475  }
 0x1c2   :  { %8214 = vst [vmem:[#allocation407_spill] sm:$0xff] %v3927_v59  ;;  %v3931_v3 = vsel %vm2145_vm2, 3.5280986, %v2064_v63  ;;  %v2065_v11 = vmov 3.5468874  }
 0x1c3   :  { %8215 = vst [vmem:[#allocation408_spill] sm:$0xff] %v3931_v3  ;;  %v3935_v19 = vsel %vm2145_vm2, 3.5658443, %v2065_v11  ;;  %v2066_v27 = vmov 3.5849724  }
 0x1c4   :  { %8216 = vst [vmem:[#allocation409_spill] sm:$0xff] %v3935_v19  ;;  %v3939_v35 = vsel %vm2145_vm2, 3.6042752, %v2066_v27  ;;  %v2067_v43 = vmov 3.6237562  }
 0x1c5   :  { %8217 = vst [vmem:[#allocation410_spill] sm:$0xff] %v3939_v35  ;;  %v3943_v51 = vsel %vm2145_vm2, 3.6434186, %v2067_v43  ;;  %v2068_v59 = vmov 3.6632662  }
 0x1c6   :  { %8218 = vst [vmem:[#allocation411_spill] sm:$0xff] %v3943_v51  ;;  %v3947_v63 = vsel %vm2145_vm2, 3.6833026, %v2068_v59  ;;  %v2069_v3 = vmov 3.703532  }
 0x1c7   :  { %8219 = vst [vmem:[#allocation412_spill] sm:$0xff] %v3947_v63  ;;  %v3951_v11 = vsel %vm2145_vm2, 3.7239578, %v2069_v3  ;;  %v2070_v19 = vmov 3.7445846  }
 0x1c8   :  { %8220 = vst [vmem:[#allocation413_spill] sm:$0xff] %v3951_v11  ;;  %v3955_v27 = vsel %vm2145_vm2, 3.7654161, %v2070_v19  ;;  %v2071_v35 = vmov 3.7864568  }
 0x1c9   :  { %8221 = vst [vmem:[#allocation414_spill] sm:$0xff] %v3955_v27  ;;  %v3959_v43 = vsel %vm2145_vm2, 3.8077114, %v2071_v35  ;;  %v2072_v51 = vmov 3.829184  }
 0x1ca   :  { %8222 = vst [vmem:[#allocation415_spill] sm:$0xff] %v3959_v43  ;;  %v3963_v59 = vsel %vm2145_vm2, 3.85088, %v2072_v51  ;;  %v2073_v63 = vmov 3.8728037  }
 0x1cb   :  { %8223 = vst [vmem:[#allocation416_spill] sm:$0xff] %v3963_v59  ;;  %v3967_v3 = vsel %vm2145_vm2, 3.8949604, %v2073_v63  ;;  %v2074_v11 = vmov 3.9173553  }
 0x1cc   :  { %8224 = vst [vmem:[#allocation417_spill] sm:$0xff] %v3967_v3  ;;  %v3971_v19 = vsel %vm2145_vm2, 3.9399939, %v2074_v11  ;;  %v2075_v27 = vmov 3.9628816  }
 0x1cd   :  { %8225 = vst [vmem:[#allocation418_spill] sm:$0xff] %v3971_v19  ;;  %v3975_v35 = vsel %vm2145_vm2, 3.9860241, %v2075_v27  ;;  %v2076_v43 = vmov 4.0094275  }
 0x1ce   :  { %8226 = vst [vmem:[#allocation419_spill] sm:$0xff] %v3975_v35  ;;  %v3979_v51 = vsel %vm2145_vm2, 4.0330987, %v2076_v43  ;;  %v2077_v59 = vmov 4.0570426  }
 0x1cf   :  { %8227 = vst [vmem:[#allocation420_spill] sm:$0xff] %v3979_v51  ;;  %v3983_v63 = vsel %vm2145_vm2, 4.0812674, %v2077_v59  ;;  %v2078_v3 = vmov 4.1057787  }
 0x1d0   :  { %8228 = vst [vmem:[#allocation421_spill] sm:$0xff] %v3983_v63  ;;  %v3987_v11 = vsel %vm2145_vm2, 4.1305842, %v2078_v3  ;;  %v2079_v19 = vmov 4.155691  }
 0x1d1   :  { %8229 = vst [vmem:[#allocation422_spill] sm:$0xff] %v3987_v11  ;;  %v3991_v27 = vsel %vm2145_vm2, 4.1811075, %v2079_v19  ;;  %v2080_v35 = vmov 4.2068415  }
 0x1d2   :  { %8230 = vst [vmem:[#allocation423_spill] sm:$0xff] %v3991_v27  ;;  %v3995_v43 = vsel %vm2145_vm2, 4.2329, %v2080_v35  ;;  %v2081_v51 = vmov 4.2592936  }
 0x1d3   :  { %8231 = vst [vmem:[#allocation424_spill] sm:$0xff] %v3995_v43  ;;  %v3999_v59 = vsel %vm2145_vm2, 4.2860293, %v2081_v51  ;;  %v2082_v63 = vmov 4.313118  }
 0x1d4   :  { %8232 = vst [vmem:[#allocation425_spill] sm:$0xff] %v3999_v59  ;;  %v4003_v3 = vsel %vm2145_vm2, 4.340568, %v2082_v63  ;;  %v2083_v11 = vmov 4.3683906  }
 0x1d5   :  { %8233 = vst [vmem:[#allocation426_spill] sm:$0xff] %v4003_v3  ;;  %v4007_v19 = vsel %vm2145_vm2, 4.3965955, %v2083_v11  ;;  %v2084_v27 = vmov 4.425194  }
 0x1d6   :  { %8234 = vst [vmem:[#allocation427_spill] sm:$0xff] %v4007_v19  ;;  %v4011_v35 = vsel %vm2145_vm2, 4.454197, %v2084_v27  ;;  %v2085_v43 = vmov 4.4836173  }
 0x1d7   :  { %8235 = vst [vmem:[#allocation428_spill] sm:$0xff] %v4011_v35  ;;  %v4015_v51 = vsel %vm2145_vm2, 4.513467, %v2085_v43  ;;  %v2086_v59 = vmov 4.5437584  }
 0x1d8   :  { %8236 = vst [vmem:[#allocation429_spill] sm:$0xff] %v4015_v51  ;;  %v4019_v63 = vsel %vm2145_vm2, 4.5745063, %v2086_v59  ;;  %v2087_v3 = vmov 4.605724  }
 0x1d9   :  { %8237 = vst [vmem:[#allocation430_spill] sm:$0xff] %v4019_v63  ;;  %v4023_v11 = vsel %vm2145_vm2, 4.637427, %v2087_v3  ;;  %v2088_v19 = vmov 4.6696305  }
 0x1da   :  { %8238 = vst [vmem:[#allocation431_spill] sm:$0xff] %v4023_v11  ;;  %v4027_v27 = vsel %vm2145_vm2, 4.702351, %v2088_v19  ;;  %v2089_v35 = vmov 4.735606  }
 0x1db   :  { %8239 = vst [vmem:[#allocation432_spill] sm:$0xff] %v4027_v27  ;;  %v4031_v43 = vsel %vm2145_vm2, 4.7694135, %v2089_v35  ;;  %v2090_v51 = vmov 4.803792  }
 0x1dc   :  { %8240 = vst [vmem:[#allocation433_spill] sm:$0xff] %v4031_v43  ;;  %v4035_v59 = vsel %vm2145_vm2, 4.8387623, %v2090_v51  ;;  %v2091_v63 = vmov 4.874345  }
 0x1dd   :  { %8241 = vst [vmem:[#allocation434_spill] sm:$0xff] %v4035_v59  ;;  %v4039_v3 = vsel %vm2145_vm2, 4.9105616, %v2091_v63  ;;  %v2092_v11 = vmov 4.947437  }
 0x1de   :  { %8242 = vst [vmem:[#allocation435_spill] sm:$0xff] %v4039_v3  ;;  %v4043_v19 = vsel %vm2145_vm2, 4.9849944, %v2092_v11  ;;  %v2093_v27 = vmov 5.023261  }
 0x1df   :  { %8243 = vst [vmem:[#allocation436_spill] sm:$0xff] %v4043_v19  ;;  %v4047_v35 = vsel %vm2145_vm2, 5.062264, %v2093_v27  ;;  %v2094_v43 = vmov 5.102033  }
 0x1e0   :  { %8244 = vst [vmem:[#allocation437_spill] sm:$0xff] %v4047_v35  ;;  %v4051_v51 = vsel %vm2145_vm2, 5.142599, %v2094_v43  ;;  %v2095_v59 = vmov 5.183995  }
 0x1e1   :  { %8245 = vst [vmem:[#allocation438_spill] sm:$0xff] %v4051_v51  ;;  %v4055_v63 = vsel %vm2145_vm2, 5.2262554, %v2095_v59  ;;  %v2096_v3 = vmov 5.2694187  }
 0x1e2   :  { %8246 = vst [vmem:[#allocation439_spill] sm:$0xff] %v4055_v63  ;;  %v4059_v11 = vsel %vm2145_vm2, 5.313524, %v2096_v3  ;;  %v2097_v19 = vmov 5.3586135  }
 0x1e3   :  { %8247 = vst [vmem:[#allocation440_spill] sm:$0xff] %v4059_v11  ;;  %v4063_v27 = vsel %vm2145_vm2, 5.4047337, %v2097_v19  ;;  %v2098_v35 = vmov 5.4519324  }
 0x1e4   :  { %8248 = vst [vmem:[#allocation441_spill] sm:$0xff] %v4063_v27  ;;  %v4067_v43 = vsel %vm2145_vm2, 5.500262, %v2098_v35  ;;  %v2099_v51 = vmov 5.549778  }
 0x1e5   :  { %8249 = vst [vmem:[#allocation442_spill] sm:$0xff] %v4067_v43  ;;  %v4071_v59 = vsel %vm2145_vm2, 5.6005416, %v2099_v51  ;;  %v2100_v63 = vmov 5.6526175  }
 0x1e6   :  { %8250 = vst [vmem:[#allocation443_spill] sm:$0xff] %v4071_v59  ;;  %v4075_v3 = vsel %vm2145_vm2, 5.706075, %v2100_v63  ;;  %v2101_v11 = vmov 5.760991  }
 0x1e7   :  { %8251 = vst [vmem:[#allocation444_spill] sm:$0xff] %v4075_v3  ;;  %v4079_v19 = vsel %vm2145_vm2, 5.8174477, %v2101_v11  ;;  %v2102_v27 = vmov 5.8755345  }
 0x1e8   :  { %8252 = vst [vmem:[#allocation445_spill] sm:$0xff] %v4079_v19  ;;  %v4083_v35 = vsel %vm2145_vm2, 5.935349, %v2102_v27  ;;  %v2103_v43 = vmov 5.9969974  }
 0x1e9   :  { %8253 = vst [vmem:[#allocation446_spill] sm:$0xff] %v4083_v35  ;;  %v4087_v51 = vsel %vm2145_vm2, 6.060597, %v2103_v43  ;;  %v2104_v59 = vmov 6.126275  }
 0x1ea   :  { %8254 = vst [vmem:[#allocation447_spill] sm:$0xff] %v4087_v51  ;;  %v4091_v63 = vsel %vm2145_vm2, 6.194174, %v2104_v59  ;;  %v2105_v3 = vmov 6.2644486  }
 0x1eb   :  { %8255 = vst [vmem:[#allocation448_spill] sm:$0xff] %v4091_v63  ;;  %v4095_v11 = vsel %vm2145_vm2, 6.3372726, %v2105_v3  ;;  %v2106_v19 = vmov 6.412839  }
 0x1ec   :  { %8256 = vst [vmem:[#allocation449_spill] sm:$0xff] %v4095_v11  ;;  %v4099_v27 = vsel %vm2145_vm2, 6.491363, %v2106_v19  ;;  %v2107_v35 = vmov 6.5730863  }
 0x1ed   :  { %8257 = vst [vmem:[#allocation450_spill] sm:$0xff] %v4099_v27  ;;  %v4103_v43 = vsel %vm2145_vm2, 6.6582813, %v2107_v35  ;;  %v2108_v51 = vmov 6.7472577  }
 0x1ee   :  { %8258 = vst [vmem:[#allocation451_spill] sm:$0xff] %v4103_v43  ;;  %v4107_v59 = vsel %vm2145_vm2, 6.8403673, %v2108_v51  ;;  %v2109_v63 = vmov 6.938014  }
 0x1ef   :  { %8259 = vst [vmem:[#allocation452_spill] sm:$0xff] %v4107_v59  ;;  %v4111_v3 = vsel %vm2145_vm2, 7.0406637, %v2109_v63  ;;  %v2110_v11 = vmov 7.148858  }
 0x1f0   :  { %8260 = vst [vmem:[#allocation453_spill] sm:$0xff] %v4111_v3  ;;  %v4115_v19 = vsel %vm2145_vm2, 7.2632313, %v2110_v11  ;;  %v2111_v27 = vmov 7.384534  }
 0x1f1   :  { %8261 = vst [vmem:[#allocation454_spill] sm:$0xff] %v4115_v19  ;;  %v4119_v35 = vsel %vm2145_vm2, 7.513661, %v2111_v27  ;;  %v2112_v43 = vmov 7.651694  }
 0x1f2   :  { %8262 = vst [vmem:[#allocation455_spill] sm:$0xff] %v4119_v35  ;;  %v4123_v51 = vsel %vm2145_vm2, 7.799953, %v2112_v43  ;;  %v2113_v59 = vmov 7.960079  }
 0x1f3   :  { %8263 = vst [vmem:[#allocation456_spill] sm:$0xff] %v4123_v51  ;;  %v4127_v63 = vsel %vm2145_vm2, 8.134139, %v2113_v59  ;;  %v2114_v3 = vmov 8.324793   ;;  %v530_v51 = vand.u32 2, %v2142_v4 }
 0x1f4   :  { %8264 = vst [vmem:[#allocation457_spill] sm:$0xff] %v4127_v63  ;;  %v4131_v11 = vsel %vm2145_vm2, 8.535545, %v2114_v3  ;;  %v2115_v19 = vmov 8.771138  }
 0x1f5   :  { %8265 = vst [vmem:[#allocation458_spill] sm:$0xff] %v4131_v11  ;;  %v4135_v27 = vsel %vm2145_vm2, 9.038225, %v2115_v19  ;;  %v2116_v35 = vmov 9.346548   ;;  %vm4152_vm3 = vcmp.ne.s32.totalorder %v530_v51, 0 }
 0x1f6   :  { %8266 = vst [vmem:[#allocation459_spill] sm:$0xff] %v4135_v27  ;;  %v4139_v43 = vsel %vm2145_vm2, 9.711209, %v2116_v35  ;;  %v2117_v55 = vmov 10.157511   ;;  %v8709_v39 = vld [vmem:[#allocation451_spill] sm:$0xff]  ;;  %v8720_v6 = vsel %vm4152_vm3, %v2163_v14, %v2159_v12  ;;  %v8722_v35 = vsel %vm4152_vm3, %v2171_v18, %v2167_v16 }
 0x1f7   :  { %8267 = vst [vmem:[#allocation460_spill] sm:$0xff] %v4139_v43  ;;  %v4144_v59 = vsel %vm2145_vm2, 10.732886, %v2117_v55  ;;  %v2118_v63 = vmov 11.543824   ;;  %v8710_v47 = vld [vmem:[#allocation452_spill] sm:$0xff]  ;;  %v8717_v43 = vmov %v4135_v27  ;;  %v8719_v55 = vsel %vm4152_vm3, %v2155_v10, %v2151_v8 }
 0x1f8   :  { %v4148_v3 = vsel %vm2145_vm2, 12.930123, %v2118_v63  ;;  %v8711_v51 = vld [vmem:[#allocation453_spill] sm:$0xff]  ;;  %v8712_v63 = vld [vmem:[#allocation454_spill] sm:$0xff]  ;;  %v5177_v19 = vsel %vm4993_vm4, %v8720_v6, %v8719_v55  ;;  %v8723_v27 = vsel %vm4152_vm3, %v2179_v22, %v2175_v20  ;;  %v8725_v10 = vsel %vm4152_vm3, %v2187_v26, %v2183_v24  ;;  %v8768_v55 = vld [vmem:[#allocation19_spill] sm:$0xff] }
 0x1f9   :  { %v8713_v4 = vld [vmem:[#allocation455_spill] sm:$0xff]  ;;  %8721 = vst [vmem:[#allocation451_spill] sm:$0xff] %v5177_v19  ;;  %v5191_v8 = vsel %vm4993_vm4, %v8723_v27, %v8722_v35  ;;  %v8726_v12 = vsel %vm4152_vm3, %v2195_v30, %v2191_v28  ;;  %v8728_v16 = vsel %vm4152_vm3, %v2203_v34, %v2199_v32  ;;  %v8729_v18 = vsel %vm4152_vm3, %v2211_v38, %v2207_v36  ;;  %v8767_v35 = vld [vmem:[#allocation20_spill] sm:$0xff] }
 0x1fa   :  { %v8714_v7 = vld [vmem:[#allocation456_spill] sm:$0xff]  ;;  %8724 = vst [vmem:[#allocation452_spill] sm:$0xff] %v5191_v8  ;;  %v5205_v14 = vsel %vm4993_vm4, %v8726_v12, %v8725_v10  ;;  %v5219_v20 = vsel %vm4993_vm4, %v8729_v18, %v8728_v16  ;;  %v8731_v22 = vsel %vm4152_vm3, %v2219_v42, %v2215_v40  ;;  %v8732_v24 = vsel %vm4152_vm3, %v2227_v46, %v2223_v44  ;;  %v8770_v10 = vld [vmem:[#allocation22_spill] sm:$0xff]  ;;  %v8771_v12 = vld [vmem:[#allocation21_spill] sm:$0xff] }
 0x1fb   :  { %8727 = vst [vmem:[#allocation453_spill] sm:$0xff] %v5205_v14  ;;  %8730 = vst [vmem:[#allocation454_spill] sm:$0xff] %v5219_v20  ;;  %v5233_v26 = vsel %vm4993_vm4, %v8732_v24, %v8731_v22  ;;  %v8734_v28 = vsel %vm4152_vm3, %v2235_v50, %v2231_v48  ;;  %v8735_v30 = vsel %vm4152_vm3, %v2243_v54, %v2239_v52  ;;  %v8773_v22 = vld [vmem:[#allocation24_spill] sm:$0xff]  ;;  %v8774_v24 = vld [vmem:[#allocation23_spill] sm:$0xff] }
 0x1fc   :  { %v8716_v31 = vld [vmem:[#allocation458_spill] sm:$0xff]  ;;  %8733 = vst [vmem:[#allocation455_spill] sm:$0xff] %v5233_v26  ;;  %v5247_v32 = vsel %vm4993_vm4, %v8735_v30, %v8734_v28  ;;  %v8737_v34 = vsel %vm4152_vm3, %v2251_v58, %v2247_v56  ;;  %v8738_v36 = vsel %vm4152_vm3, %v2259_v62, %v2255_v60  ;;  %v8740_v40 = vsel %vm4152_vm3, %v2267_v2, %v2263_v0 }
 0x1fd   :  { %8736 = vst [vmem:[#allocation456_spill] sm:$0xff] %v5247_v32  ;;  %v5261_v38 = vsel %vm4993_vm4, %v8738_v36, %v8737_v34  ;;  %v8741_v42 = vsel %vm4152_vm3, %v2275_v9, %v2271_v5  ;;  %v8743_v46 = vsel %vm4152_vm3, %v2283_v17, %v2279_v13  ;;  %v8744_v48 = vsel %vm4152_vm3, %v2291_v25, %v2287_v21  ;;  %v8752_v2 = vld [vmem:[#allocation10_spill] sm:$0xff]  ;;  %v8753_v5 = vld [vmem:[#allocation9_spill] sm:$0xff]  ;;  %v8755_v17 = vld [vmem:[#allocation12_spill] sm:$0xff] }
 0x1fe   :  { %v8718_v23 = vld [vmem:[#allocation460_spill] sm:$0xff]  ;;  %8739 = vst [vmem:[#allocation458_spill] sm:$0xff] %v5261_v38  ;;  %v5275_v44 = vsel %vm4993_vm4, %v8741_v42, %v8740_v40  ;;  %v5289_v50 = vsel %vm4993_vm4, %v8744_v48, %v8743_v46  ;;  %v8746_v52 = vsel %vm4152_vm3, %v2299_v33, %v2295_v29  ;;  %v8747_v54 = vsel %vm4152_vm3, %v2307_v41, %v2303_v37  ;;  %v8756_v21 = vld [vmem:[#allocation11_spill] sm:$0xff]  ;;  %v8758_v29 = vld [vmem:[#allocation14_spill] sm:$0xff] }
 0x1ff   :  { %8742 = vst [vmem:[#allocation459_spill] sm:$0xff] %v5275_v44  ;;  %8745 = vst [vmem:[#allocation460_spill] sm:$0xff] %v5289_v50  ;;  %v5303_v56 = vsel %vm4993_vm4, %v8747_v54, %v8746_v52  ;;  %v8749_v58 = vsel %vm4152_vm3, %v2315_v49, %v2311_v45  ;;  %v8750_v60 = vsel %vm4152_vm3, %v2323_v57, %v2319_v53  ;;  %v8759_v33 = vld [vmem:[#allocation13_spill] sm:$0xff]  ;;  %v8761_v45 = vld [vmem:[#allocation16_spill] sm:$0xff] }
 0x200   :  { %8748 = vst [vmem:[#allocation461_spill] sm:$0xff] %v5303_v56  ;;  %v5317_v62 = vsel %vm4993_vm4, %v8750_v60, %v8749_v58  ;;  %v8751_v0 = vsel %vm4152_vm3, %v2331_v1, %v2327_v61  ;;  %v8754_v9 = vsel %vm4152_vm3, %v8752_v2, %v8753_v5  ;;  %v8757_v25 = vsel %vm4152_vm3, %v8755_v17, %v8756_v21  ;;  %v8762_v49 = vld [vmem:[#allocation15_spill] sm:$0xff]  ;;  %v8764_v57 = vld [vmem:[#allocation18_spill] sm:$0xff]  ;;  %v8765_v61 = vld [vmem:[#allocation17_spill] sm:$0xff] }
 0x201   :  { %v5331_v13 = vsel %vm4993_vm4, %v8754_v9, %v8751_v0  ;;  %v8760_v37 = vsel %vm4152_vm3, %v8758_v29, %v8759_v33  ;;  %v8763_v53 = vsel %vm4152_vm3, %v8761_v45, %v8762_v49  ;;  %v8766_v1 = vsel %vm4152_vm3, %v8764_v57, %v8765_v61  ;;  %v8776_v30 = vld [vmem:[#allocation26_spill] sm:$0xff]  ;;  %v8777_v34 = vld [vmem:[#allocation25_spill] sm:$0xff]  ;;  %v8779_v42 = vld [vmem:[#allocation28_spill] sm:$0xff] }
 0x202   :  { %v5345_v41 = vsel %vm4993_vm4, %v8760_v37, %v8757_v25  ;;  %v5359_v27 = vsel %vm4993_vm4, %v8766_v1, %v8763_v53  ;;  %v8769_v6 = vsel %vm4152_vm3, %v8767_v35, %v8768_v55  ;;  %v8772_v16 = vsel %vm4152_vm3, %v8770_v10, %v8771_v12  ;;  %v8780_v46 = vld [vmem:[#allocation27_spill] sm:$0xff]  ;;  %v8782_v52 = vld [vmem:[#allocation30_spill] sm:$0xff]  ;;  %v8783_v54 = vld [vmem:[#allocation29_spill] sm:$0xff] }
 0x203   :  { %v5373_v18 = vsel %vm4993_vm4, %v8772_v16, %v8769_v6  ;;  %v8775_v28 = vsel %vm4152_vm3, %v8773_v22, %v8774_v24  ;;  %v8778_v36 = vsel %vm4152_vm3, %v8776_v30, %v8777_v34  ;;  %v8781_v48 = vsel %vm4152_vm3, %v8779_v42, %v8780_v46  ;;  %v8785_v0 = vld [vmem:[#allocation32_spill] sm:$0xff]  ;;  %v8786_v2 = vld [vmem:[#allocation31_spill] sm:$0xff]  ;;  %v8788_v9 = vld [vmem:[#allocation34_spill] sm:$0xff] }
 0x204   :  { %v5387_v40 = vsel %vm4993_vm4, %v8778_v36, %v8775_v28  ;;  %v8784_v58 = vsel %vm4152_vm3, %v8782_v52, %v8783_v54  ;;  %v8787_v5 = vsel %vm4152_vm3, %v8785_v0, %v8786_v2  ;;  %v8789_v17 = vld [vmem:[#allocation33_spill] sm:$0xff]  ;;  %v8791_v29 = vld [vmem:[#allocation36_spill] sm:$0xff]  ;;  %v8792_v33 = vld [vmem:[#allocation35_spill] sm:$0xff] }
 0x205   :  { %v5401_v60 = vsel %vm4993_vm4, %v8784_v58, %v8781_v48  ;;  %v8790_v21 = vsel %vm4152_vm3, %v8788_v9, %v8789_v17  ;;  %v8793_v37 = vsel %vm4152_vm3, %v8791_v29, %v8792_v33  ;;  %v8794_v45 = vld [vmem:[#allocation38_spill] sm:$0xff]  ;;  %v8795_v49 = vld [vmem:[#allocation37_spill] sm:$0xff]  ;;  %v8797_v61 = vld [vmem:[#allocation40_spill] sm:$0xff] }
 0x206   :  { %v5415_v25 = vsel %vm4993_vm4, %v8790_v21, %v8787_v5  ;;  %v8796_v53 = vsel %vm4152_vm3, %v8794_v45, %v8795_v49  ;;  %v8798_v1 = vld [vmem:[#allocation39_spill] sm:$0xff]  ;;  %v8800_v55 = vld [vmem:[#allocation42_spill] sm:$0xff]  ;;  %v8801_v6 = vld [vmem:[#allocation41_spill] sm:$0xff] }
 0x207   :  { %v5429_v57 = vsel %vm4993_vm4, %v8796_v53, %v8793_v37  ;;  %v8799_v35 = vsel %vm4152_vm3, %v8797_v61, %v8798_v1  ;;  %v8802_v10 = vsel %vm4152_vm3, %v8800_v55, %v8801_v6  ;;  %v8803_v16 = vld [vmem:[#allocation44_spill] sm:$0xff]  ;;  %v8804_v22 = vld [vmem:[#allocation43_spill] sm:$0xff]  ;;  %v8806_v28 = vld [vmem:[#allocation46_spill] sm:$0xff] }
 0x208   :  { %v5443_v12 = vsel %vm4993_vm4, %v8802_v10, %v8799_v35  ;;  %v8805_v24 = vsel %vm4152_vm3, %v8803_v16, %v8804_v22  ;;  %v8807_v30 = vld [vmem:[#allocation45_spill] sm:$0xff]  ;;  %v8809_v42 = vld [vmem:[#allocation48_spill] sm:$0xff]  ;;  %v8810_v46 = vld [vmem:[#allocation47_spill] sm:$0xff] }
 0x209   :  { %v8808_v34 = vsel %vm4152_vm3, %v8806_v28, %v8807_v30  ;;  %v8811_v48 = vsel %vm4152_vm3, %v8809_v42, %v8810_v46  ;;  %v8812_v52 = vld [vmem:[#allocation50_spill] sm:$0xff]  ;;  %v8813_v54 = vld [vmem:[#allocation49_spill] sm:$0xff]  ;;  %v8815_v2 = vld [vmem:[#allocation52_spill] sm:$0xff] }
 0x20a   :  { %v5457_v36 = vsel %vm4993_vm4, %v8808_v34, %v8805_v24  ;;  %v8814_v58 = vsel %vm4152_vm3, %v8812_v52, %v8813_v54  ;;  %v8816_v5 = vld [vmem:[#allocation51_spill] sm:$0xff]  ;;  %v8818_v17 = vld [vmem:[#allocation54_spill] sm:$0xff]  ;;  %v8819_v21 = vld [vmem:[#allocation53_spill] sm:$0xff] }
 0x20b   :  { %v5471_v0 = vsel %vm4993_vm4, %v8814_v58, %v8811_v48  ;;  %v8817_v9 = vsel %vm4152_vm3, %v8815_v2, %v8816_v5  ;;  %v8820_v29 = vsel %vm4152_vm3, %v8818_v17, %v8819_v21  ;;  %v8821_v37 = vld [vmem:[#allocation56_spill] sm:$0xff]  ;;  %v8822_v45 = vld [vmem:[#allocation55_spill] sm:$0xff]  ;;  %v8824_v53 = vld [vmem:[#allocation58_spill] sm:$0xff] }
 0x20c   :  { %v5485_v33 = vsel %vm4993_vm4, %v8820_v29, %v8817_v9  ;;  %v8823_v49 = vsel %vm4152_vm3, %v8821_v37, %v8822_v45  ;;  %v8825_v61 = vld [vmem:[#allocation57_spill] sm:$0xff]  ;;  %v8827_v55 = vld [vmem:[#allocation60_spill] sm:$0xff]  ;;  %v8828_v6 = vld [vmem:[#allocation59_spill] sm:$0xff] }
 0x20d   :  { %v8826_v1 = vsel %vm4152_vm3, %v8824_v53, %v8825_v61  ;;  %v8829_v10 = vsel %vm4152_vm3, %v8827_v55, %v8828_v6  ;;  %v8830_v16 = vld [vmem:[#allocation62_spill] sm:$0xff]  ;;  %v8831_v22 = vld [vmem:[#allocation61_spill] sm:$0xff]  ;;  %v8833_v30 = vld [vmem:[#allocation64_spill] sm:$0xff] }
 0x20e   :  { %v5499_v35 = vsel %vm4993_vm4, %v8826_v1, %v8823_v49  ;;  %v8832_v24 = vsel %vm4152_vm3, %v8830_v16, %v8831_v22  ;;  %v8834_v34 = vld [vmem:[#allocation63_spill] sm:$0xff]  ;;  %v8836_v46 = vld [vmem:[#allocation66_spill] sm:$0xff]  ;;  %v8837_v48 = vld [vmem:[#allocation65_spill] sm:$0xff] }
 0x20f   :  { %v5513_v28 = vsel %vm4993_vm4, %v8832_v24, %v8829_v10  ;;  %v8835_v42 = vsel %vm4152_vm3, %v8833_v30, %v8834_v34  ;;  %v8838_v52 = vsel %vm4152_vm3, %v8836_v46, %v8837_v48  ;;  %v8839_v58 = vld [vmem:[#allocation68_spill] sm:$0xff]  ;;  %v8840_v2 = vld [vmem:[#allocation67_spill] sm:$0xff]  ;;  %v8842_v9 = vld [vmem:[#allocation70_spill] sm:$0xff] }
 0x210   :  { %v5527_v54 = vsel %vm4993_vm4, %v8838_v52, %v8835_v42  ;;  %v8841_v5 = vsel %vm4152_vm3, %v8839_v58, %v8840_v2  ;;  %v8843_v17 = vld [vmem:[#allocation69_spill] sm:$0xff]  ;;  %v8845_v37 = vld [vmem:[#allocation72_spill] sm:$0xff]  ;;  %v8846_v45 = vld [vmem:[#allocation71_spill] sm:$0xff] }
 0x211   :  { %v8844_v21 = vsel %vm4152_vm3, %v8842_v9, %v8843_v17  ;;  %v8847_v49 = vsel %vm4152_vm3, %v8845_v37, %v8846_v45  ;;  %v8848_v53 = vld [vmem:[#allocation74_spill] sm:$0xff]  ;;  %v8849_v61 = vld [vmem:[#allocation73_spill] sm:$0xff]  ;;  %v8851_v6 = vld [vmem:[#allocation76_spill] sm:$0xff] }
 0x212   :  { %v5541_v29 = vsel %vm4993_vm4, %v8844_v21, %v8841_v5  ;;  %v8850_v1 = vsel %vm4152_vm3, %v8848_v53, %v8849_v61  ;;  %v8852_v10 = vld [vmem:[#allocation75_spill] sm:$0xff]  ;;  %v8854_v22 = vld [vmem:[#allocation78_spill] sm:$0xff]  ;;  %v8855_v24 = vld [vmem:[#allocation77_spill] sm:$0xff] }
 0x213   :  { %v5555_v55 = vsel %vm4993_vm4, %v8850_v1, %v8847_v49  ;;  %v8853_v16 = vsel %vm4152_vm3, %v8851_v6, %v8852_v10  ;;  %v8856_v30 = vsel %vm4152_vm3, %v8854_v22, %v8855_v24  ;;  %v8857_v42 = vld [vmem:[#allocation80_spill] sm:$0xff]  ;;  %v8858_v46 = vld [vmem:[#allocation79_spill] sm:$0xff]  ;;  %v8860_v52 = vld [vmem:[#allocation82_spill] sm:$0xff] }
 0x214   :  { %v5569_v34 = vsel %vm4993_vm4, %v8856_v30, %v8853_v16  ;;  %v8859_v48 = vsel %vm4152_vm3, %v8857_v42, %v8858_v46  ;;  %v8861_v58 = vld [vmem:[#allocation81_spill] sm:$0xff]  ;;  %v8863_v9 = vld [vmem:[#allocation84_spill] sm:$0xff]  ;;  %v8864_v17 = vld [vmem:[#allocation83_spill] sm:$0xff] }
 0x215   :  { %v8862_v2 = vsel %vm4152_vm3, %v8860_v52, %v8861_v58  ;;  %v8865_v21 = vsel %vm4152_vm3, %v8863_v9, %v8864_v17  ;;  %v8866_v37 = vld [vmem:[#allocation86_spill] sm:$0xff]  ;;  %v8867_v45 = vld [vmem:[#allocation85_spill] sm:$0xff]  ;;  %v8869_v61 = vld [vmem:[#allocation88_spill] sm:$0xff] }
 0x216   :  { %v5583_v5 = vsel %vm4993_vm4, %v8862_v2, %v8859_v48  ;;  %v8868_v49 = vsel %vm4152_vm3, %v8866_v37, %v8867_v45  ;;  %v8870_v1 = vld [vmem:[#allocation87_spill] sm:$0xff]  ;;  %v8872_v10 = vld [vmem:[#allocation90_spill] sm:$0xff]  ;;  %v8873_v16 = vld [vmem:[#allocation89_spill] sm:$0xff] }
 0x217   :  { %v5597_v53 = vsel %vm4993_vm4, %v8868_v49, %v8865_v21  ;;  %v8871_v6 = vsel %vm4152_vm3, %v8869_v61, %v8870_v1  ;;  %v8874_v22 = vsel %vm4152_vm3, %v8872_v10, %v8873_v16  ;;  %v8875_v30 = vld [vmem:[#allocation92_spill] sm:$0xff]  ;;  %v8876_v42 = vld [vmem:[#allocation91_spill] sm:$0xff]  ;;  %v8878_v48 = vld [vmem:[#allocation94_spill] sm:$0xff] }
 0x218   :  { %v5611_v24 = vsel %vm4993_vm4, %v8874_v22, %v8871_v6  ;;  %v8877_v46 = vsel %vm4152_vm3, %v8875_v30, %v8876_v42  ;;  %v8879_v52 = vld [vmem:[#allocation93_spill] sm:$0xff]  ;;  %v8881_v9 = vld [vmem:[#allocation96_spill] sm:$0xff]  ;;  %v8882_v17 = vld [vmem:[#allocation95_spill] sm:$0xff] }
 0x219   :  { %v8880_v58 = vsel %vm4152_vm3, %v8878_v48, %v8879_v52  ;;  %v8883_v21 = vsel %vm4152_vm3, %v8881_v9, %v8882_v17  ;;  %v8884_v37 = vld [vmem:[#allocation98_spill] sm:$0xff]  ;;  %v8885_v45 = vld [vmem:[#allocation97_spill] sm:$0xff]  ;;  %v8887_v1 = vld [vmem:[#allocation100_spill] sm:$0xff] }
 0x21a   :  { %v5625_v2 = vsel %vm4993_vm4, %v8880_v58, %v8877_v46  ;;  %v8886_v49 = vsel %vm4152_vm3, %v8884_v37, %v8885_v45  ;;  %v8888_v6 = vld [vmem:[#allocation99_spill] sm:$0xff]  ;;  %v8890_v16 = vld [vmem:[#allocation102_spill] sm:$0xff]  ;;  %v8891_v22 = vld [vmem:[#allocation101_spill] sm:$0xff] }
 0x21b   :  { %v5639_v61 = vsel %vm4993_vm4, %v8886_v49, %v8883_v21  ;;  %v8889_v10 = vsel %vm4152_vm3, %v8887_v1, %v8888_v6  ;;  %v8892_v30 = vsel %vm4152_vm3, %v8890_v16, %v8891_v22  ;;  %v8893_v46 = vld [vmem:[#allocation104_spill] sm:$0xff]  ;;  %v8894_v48 = vld [vmem:[#allocation103_spill] sm:$0xff]  ;;  %v8896_v58 = vld [vmem:[#allocation106_spill] sm:$0xff] }
 0x21c   :  { %v5653_v42 = vsel %vm4993_vm4, %v8892_v30, %v8889_v10  ;;  %v8895_v52 = vsel %vm4152_vm3, %v8893_v46, %v8894_v48  ;;  %v8897_v9 = vld [vmem:[#allocation105_spill] sm:$0xff]  ;;  %v8899_v37 = vld [vmem:[#allocation108_spill] sm:$0xff]  ;;  %v8900_v45 = vld [vmem:[#allocation107_spill] sm:$0xff] }
 0x21d   :  { %v8898_v17 = vsel %vm4152_vm3, %v8896_v58, %v8897_v9  ;;  %v8901_v49 = vsel %vm4152_vm3, %v8899_v37, %v8900_v45  ;;  %v8902_v1 = vld [vmem:[#allocation110_spill] sm:$0xff]  ;;  %v8903_v6 = vld [vmem:[#allocation109_spill] sm:$0xff]  ;;  %v8905_v22 = vld [vmem:[#allocation112_spill] sm:$0xff] }
 0x21e   :  { %v5667_v21 = vsel %vm4993_vm4, %v8898_v17, %v8895_v52  ;;  %v8904_v10 = vsel %vm4152_vm3, %v8902_v1, %v8903_v6  ;;  %v8906_v30 = vld [vmem:[#allocation111_spill] sm:$0xff]  ;;  %v8908_v48 = vld [vmem:[#allocation114_spill] sm:$0xff]  ;;  %v8909_v52 = vld [vmem:[#allocation113_spill] sm:$0xff] }
 0x21f   :  { %v5681_v16 = vsel %vm4993_vm4, %v8904_v10, %v8901_v49  ;;  %v8907_v46 = vsel %vm4152_vm3, %v8905_v22, %v8906_v30  ;;  %v8910_v58 = vsel %vm4152_vm3, %v8908_v48, %v8909_v52  ;;  %v8911_v17 = vld [vmem:[#allocation116_spill] sm:$0xff]  ;;  %v8912_v37 = vld [vmem:[#allocation115_spill] sm:$0xff]  ;;  %v8914_v49 = vld [vmem:[#allocation118_spill] sm:$0xff] }
 0x220   :  { %v5695_v9 = vsel %vm4993_vm4, %v8910_v58, %v8907_v46  ;;  %v8913_v45 = vsel %vm4152_vm3, %v8911_v17, %v8912_v37  ;;  %v8915_v1 = vld [vmem:[#allocation117_spill] sm:$0xff]  ;;  %v8918_v22 = vld [vmem:[#allocation120_spill] sm:$0xff]  ;;  %v8919_v30 = vld [vmem:[#allocation119_spill] sm:$0xff] }
 0x221   :  { %v8916_v6 = vsel %vm4152_vm3, %v8914_v49, %v8915_v1  ;;  %v8920_v46 = vsel %vm4152_vm3, %v8918_v22, %v8919_v30  ;;  %v8921_v48 = vld [vmem:[#allocation122_spill] sm:$0xff]  ;;  %v8922_v52 = vld [vmem:[#allocation121_spill] sm:$0xff]  ;;  %v8925_v37 = vld [vmem:[#allocation124_spill] sm:$0xff] }
 0x222   :  { %v5709_v10 = vsel %vm4993_vm4, %v8916_v6, %v8913_v45  ;;  %v8923_v58 = vsel %vm4152_vm3, %v8921_v48, %v8922_v52  ;;  %v8926_v49 = vld [vmem:[#allocation123_spill] sm:$0xff]  ;;  %v8928_v1 = vld [vmem:[#allocation126_spill] sm:$0xff]  ;;  %v8929_v6 = vld [vmem:[#allocation125_spill] sm:$0xff] }
 0x223   :  { %8917 = vst [vmem:[#allocation10_spill] sm:$0xff] %v5709_v10  ;;  %v5723_v17 = vsel %vm4993_vm4, %v8923_v58, %v8920_v46  ;;  %v8927_v45 = vsel %vm4152_vm3, %v8925_v37, %v8926_v49  ;;  %v8930_v10 = vsel %vm4152_vm3, %v8928_v1, %v8929_v6  ;;  %v8932_v30 = vld [vmem:[#allocation128_spill] sm:$0xff]  ;;  %v8933_v48 = vld [vmem:[#allocation127_spill] sm:$0xff]  ;;  %v8935_v52 = vld [vmem:[#allocation130_spill] sm:$0xff] }
 0x224   :  { %8924 = vst [vmem:[#allocation9_spill] sm:$0xff] %v5723_v17  ;;  %v5737_v22 = vsel %vm4993_vm4, %v8930_v10, %v8927_v45  ;;  %v8934_v46 = vsel %vm4152_vm3, %v8932_v30, %v8933_v48  ;;  %v8936_v58 = vld [vmem:[#allocation129_spill] sm:$0xff]  ;;  %v8939_v49 = vld [vmem:[#allocation132_spill] sm:$0xff]  ;;  %v8940_v1 = vld [vmem:[#allocation131_spill] sm:$0xff] }
 0x225   :  { %8931 = vst [vmem:[#allocation12_spill] sm:$0xff] %v5737_v22  ;;  %v8937_v17 = vsel %vm4152_vm3, %v8935_v52, %v8936_v58  ;;  %v8941_v10 = vsel %vm4152_vm3, %v8939_v49, %v8940_v1  ;;  %v8942_v45 = vld [vmem:[#allocation134_spill] sm:$0xff]  ;;  %v8943_v6 = vld [vmem:[#allocation133_spill] sm:$0xff]  ;;  %v8946_v48 = vld [vmem:[#allocation136_spill] sm:$0xff] }
 0x226   :  { %v5751_v37 = vsel %vm4993_vm4, %v8937_v17, %v8934_v46  ;;  %v8944_v22 = vsel %vm4152_vm3, %v8942_v45, %v8943_v6  ;;  %v8947_v52 = vld [vmem:[#allocation135_spill] sm:$0xff]  ;;  %v8949_v46 = vld [vmem:[#allocation138_spill] sm:$0xff]  ;;  %v8950_v58 = vld [vmem:[#allocation137_spill] sm:$0xff] }
 0x227   :  { %8938 = vst [vmem:[#allocation11_spill] sm:$0xff] %v5751_v37  ;;  %v5765_v30 = vsel %vm4993_vm4, %v8944_v22, %v8941_v10  ;;  %v8948_v17 = vsel %vm4152_vm3, %v8946_v48, %v8947_v52  ;;  %v8951_v37 = vsel %vm4152_vm3, %v8949_v46, %v8950_v58  ;;  %v8953_v1 = vld [vmem:[#allocation140_spill] sm:$0xff]  ;;  %v8954_v45 = vld [vmem:[#allocation139_spill] sm:$0xff]  ;;  %v8956_v10 = vld [vmem:[#allocation142_spill] sm:$0xff] }
 0x228   :  { %8945 = vst [vmem:[#allocation14_spill] sm:$0xff] %v5765_v30  ;;  %v5779_v49 = vsel %vm4993_vm4, %v8951_v37, %v8948_v17  ;;  %v8955_v22 = vsel %vm4152_vm3, %v8953_v1, %v8954_v45  ;;  %v8957_v6 = vld [vmem:[#allocation141_spill] sm:$0xff]  ;;  %v8960_v52 = vld [vmem:[#allocation144_spill] sm:$0xff]  ;;  %v8961_v46 = vld [vmem:[#allocation143_spill] sm:$0xff] }
 0x229   :  { %8952 = vst [vmem:[#allocation13_spill] sm:$0xff] %v5779_v49  ;;  %v8958_v30 = vsel %vm4152_vm3, %v8956_v10, %v8957_v6  ;;  %v8962_v37 = vsel %vm4152_vm3, %v8960_v52, %v8961_v46  ;;  %v8963_v17 = vld [vmem:[#allocation146_spill] sm:$0xff]  ;;  %v8964_v58 = vld [vmem:[#allocation145_spill] sm:$0xff]  ;;  %v8967_v45 = vld [vmem:[#allocation148_spill] sm:$0xff] }
 0x22a   :  { %v5793_v48 = vsel %vm4993_vm4, %v8958_v30, %v8955_v22  ;;  %v8965_v49 = vsel %vm4152_vm3, %v8963_v17, %v8964_v58  ;;  %v8968_v10 = vld [vmem:[#allocation147_spill] sm:$0xff]  ;;  %v8970_v22 = vld [vmem:[#allocation150_spill] sm:$0xff]  ;;  %v8971_v6 = vld [vmem:[#allocation149_spill] sm:$0xff] }
 0x22b   :  { %8959 = vst [vmem:[#allocation16_spill] sm:$0xff] %v5793_v48  ;;  %v5807_v1 = vsel %vm4993_vm4, %v8965_v49, %v8962_v37  ;;  %v8969_v30 = vsel %vm4152_vm3, %v8967_v45, %v8968_v10  ;;  %v8972_v48 = vsel %vm4152_vm3, %v8970_v22, %v8971_v6  ;;  %v8974_v46 = vld [vmem:[#allocation152_spill] sm:$0xff]  ;;  %v8975_v17 = vld [vmem:[#allocation151_spill] sm:$0xff]  ;;  %v8977_v37 = vld [vmem:[#allocation154_spill] sm:$0xff] }
 0x22c   :  { %8966 = vst [vmem:[#allocation15_spill] sm:$0xff] %v5807_v1  ;;  %v5821_v52 = vsel %vm4993_vm4, %v8972_v48, %v8969_v30  ;;  %v8976_v49 = vsel %vm4152_vm3, %v8974_v46, %v8975_v17  ;;  %v8978_v58 = vld [vmem:[#allocation153_spill] sm:$0xff]  ;;  %v8981_v10 = vld [vmem:[#allocation156_spill] sm:$0xff]  ;;  %v8982_v22 = vld [vmem:[#allocation155_spill] sm:$0xff] }
 0x22d   :  { %8973 = vst [vmem:[#allocation18_spill] sm:$0xff] %v5821_v52  ;;  %v8979_v1 = vsel %vm4152_vm3, %v8977_v37, %v8978_v58  ;;  %v8983_v48 = vsel %vm4152_vm3, %v8981_v10, %v8982_v22  ;;  %v8984_v30 = vld [vmem:[#allocation158_spill] sm:$0xff]  ;;  %v8985_v6 = vld [vmem:[#allocation157_spill] sm:$0xff]  ;;  %v8988_v17 = vld [vmem:[#allocation160_spill] sm:$0xff] }
 0x22e   :  { %v5835_v45 = vsel %vm4993_vm4, %v8979_v1, %v8976_v49  ;;  %v8986_v52 = vsel %vm4152_vm3, %v8984_v30, %v8985_v6  ;;  %v8989_v37 = vld [vmem:[#allocation159_spill] sm:$0xff]  ;;  %v8991_v49 = vld [vmem:[#allocation162_spill] sm:$0xff]  ;;  %v8992_v58 = vld [vmem:[#allocation161_spill] sm:$0xff] }
 0x22f   :  { %8980 = vst [vmem:[#allocation17_spill] sm:$0xff] %v5835_v45  ;;  %v5849_v46 = vsel %vm4993_vm4, %v8986_v52, %v8983_v48  ;;  %v8990_v1 = vsel %vm4152_vm3, %v8988_v17, %v8989_v37  ;;  %v8993_v45 = vsel %vm4152_vm3, %v8991_v49, %v8992_v58  ;;  %v8995_v22 = vld [vmem:[#allocation164_spill] sm:$0xff]  ;;  %v8996_v30 = vld [vmem:[#allocation163_spill] sm:$0xff]  ;;  %v8998_v48 = vld [vmem:[#allocation166_spill] sm:$0xff] }
 0x230   :  { %8987 = vst [vmem:[#allocation20_spill] sm:$0xff] %v5849_v46  ;;  %v5863_v10 = vsel %vm4993_vm4, %v8993_v45, %v8990_v1  ;;  %v8997_v52 = vsel %vm4152_vm3, %v8995_v22, %v8996_v30  ;;  %v8999_v6 = vld [vmem:[#allocation165_spill] sm:$0xff]  ;;  %v9002_v37 = vld [vmem:[#allocation168_spill] sm:$0xff]  ;;  %v9003_v49 = vld [vmem:[#allocation167_spill] sm:$0xff] }
 0x231   :  { %8994 = vst [vmem:[#allocation19_spill] sm:$0xff] %v5863_v10  ;;  %v9000_v46 = vsel %vm4152_vm3, %v8998_v48, %v8999_v6  ;;  %v9004_v45 = vsel %vm4152_vm3, %v9002_v37, %v9003_v49  ;;  %v9005_v1 = vld [vmem:[#allocation170_spill] sm:$0xff]  ;;  %v9006_v58 = vld [vmem:[#allocation169_spill] sm:$0xff]  ;;  %v9009_v30 = vld [vmem:[#allocation172_spill] sm:$0xff] }
 0x232   :  { %v5877_v17 = vsel %vm4993_vm4, %v9000_v46, %v8997_v52  ;;  %v9007_v10 = vsel %vm4152_vm3, %v9005_v1, %v9006_v58  ;;  %v9010_v48 = vld [vmem:[#allocation171_spill] sm:$0xff]  ;;  %v9012_v52 = vld [vmem:[#allocation174_spill] sm:$0xff]  ;;  %v9013_v6 = vld [vmem:[#allocation173_spill] sm:$0xff] }
 0x233   :  { %9001 = vst [vmem:[#allocation22_spill] sm:$0xff] %v5877_v17  ;;  %v5891_v22 = vsel %vm4993_vm4, %v9007_v10, %v9004_v45  ;;  %v9011_v46 = vsel %vm4152_vm3, %v9009_v30, %v9010_v48  ;;  %v9014_v17 = vsel %vm4152_vm3, %v9012_v52, %v9013_v6  ;;  %v9016_v49 = vld [vmem:[#allocation176_spill] sm:$0xff]  ;;  %v9017_v1 = vld [vmem:[#allocation175_spill] sm:$0xff]  ;;  %v9019_v45 = vld [vmem:[#allocation178_spill] sm:$0xff] }
 0x234   :  { %9008 = vst [vmem:[#allocation21_spill] sm:$0xff] %v5891_v22  ;;  %v5905_v37 = vsel %vm4993_vm4, %v9014_v17, %v9011_v46  ;;  %v9018_v10 = vsel %vm4152_vm3, %v9016_v49, %v9017_v1  ;;  %v9020_v58 = vld [vmem:[#allocation177_spill] sm:$0xff]  ;;  %v9023_v48 = vld [vmem:[#allocation180_spill] sm:$0xff]  ;;  %v9024_v52 = vld [vmem:[#allocation179_spill] sm:$0xff] }
 0x235   :  { %9015 = vst [vmem:[#allocation24_spill] sm:$0xff] %v5905_v37  ;;  %v9021_v22 = vsel %vm4152_vm3, %v9019_v45, %v9020_v58  ;;  %v9025_v17 = vsel %vm4152_vm3, %v9023_v48, %v9024_v52  ;;  %v9026_v46 = vld [vmem:[#allocation182_spill] sm:$0xff]  ;;  %v9027_v6 = vld [vmem:[#allocation181_spill] sm:$0xff]  ;;  %v9030_v1 = vld [vmem:[#allocation184_spill] sm:$0xff] }
 0x236   :  { %v5919_v30 = vsel %vm4993_vm4, %v9021_v22, %v9018_v10  ;;  %v9028_v37 = vsel %vm4152_vm3, %v9026_v46, %v9027_v6  ;;  %v9031_v45 = vld [vmem:[#allocation183_spill] sm:$0xff]  ;;  %v9033_v10 = vld [vmem:[#allocation186_spill] sm:$0xff]  ;;  %v9034_v58 = vld [vmem:[#allocation185_spill] sm:$0xff] }
 0x237   :  { %9022 = vst [vmem:[#allocation23_spill] sm:$0xff] %v5919_v30  ;;  %v5933_v49 = vsel %vm4993_vm4, %v9028_v37, %v9025_v17  ;;  %v9032_v22 = vsel %vm4152_vm3, %v9030_v1, %v9031_v45  ;;  %v9035_v30 = vsel %vm4152_vm3, %v9033_v10, %v9034_v58  ;;  %v9037_v52 = vld [vmem:[#allocation188_spill] sm:$0xff]  ;;  %v9038_v46 = vld [vmem:[#allocation187_spill] sm:$0xff]  ;;  %v9040_v17 = vld [vmem:[#allocation190_spill] sm:$0xff] }
 0x238   :  { %9029 = vst [vmem:[#allocation26_spill] sm:$0xff] %v5933_v49  ;;  %v5947_v48 = vsel %vm4993_vm4, %v9035_v30, %v9032_v22  ;;  %v9039_v37 = vsel %vm4152_vm3, %v9037_v52, %v9038_v46  ;;  %v9041_v6 = vld [vmem:[#allocation189_spill] sm:$0xff]  ;;  %v9044_v45 = vld [vmem:[#allocation192_spill] sm:$0xff]  ;;  %v9045_v10 = vld [vmem:[#allocation191_spill] sm:$0xff] }
 0x239   :  { %9036 = vst [vmem:[#allocation25_spill] sm:$0xff] %v5947_v48  ;;  %v9042_v49 = vsel %vm4152_vm3, %v9040_v17, %v9041_v6  ;;  %v9046_v30 = vsel %vm4152_vm3, %v9044_v45, %v9045_v10  ;;  %v9047_v22 = vld [vmem:[#allocation194_spill] sm:$0xff]  ;;  %v9048_v58 = vld [vmem:[#allocation193_spill] sm:$0xff]  ;;  %v9051_v46 = vld [vmem:[#allocation196_spill] sm:$0xff] }
 0x23a   :  { %v5961_v1 = vsel %vm4993_vm4, %v9042_v49, %v9039_v37  ;;  %v9049_v48 = vsel %vm4152_vm3, %v9047_v22, %v9048_v58  ;;  %v9052_v17 = vld [vmem:[#allocation195_spill] sm:$0xff]  ;;  %v9054_v37 = vld [vmem:[#allocation198_spill] sm:$0xff]  ;;  %v9055_v6 = vld [vmem:[#allocation197_spill] sm:$0xff] }
 0x23b   :  { %9043 = vst [vmem:[#allocation28_spill] sm:$0xff] %v5961_v1  ;;  %v5975_v52 = vsel %vm4993_vm4, %v9049_v48, %v9046_v30  ;;  %v9053_v49 = vsel %vm4152_vm3, %v9051_v46, %v9052_v17  ;;  %v9056_v1 = vsel %vm4152_vm3, %v9054_v37, %v9055_v6  ;;  %v9058_v10 = vld [vmem:[#allocation200_spill] sm:$0xff]  ;;  %v9059_v22 = vld [vmem:[#allocation199_spill] sm:$0xff]  ;;  %v9061_v30 = vld [vmem:[#allocation202_spill] sm:$0xff] }
 0x23c   :  { %9050 = vst [vmem:[#allocation27_spill] sm:$0xff] %v5975_v52  ;;  %v5989_v45 = vsel %vm4993_vm4, %v9056_v1, %v9053_v49  ;;  %v9060_v48 = vsel %vm4152_vm3, %v9058_v10, %v9059_v22  ;;  %v9062_v58 = vld [vmem:[#allocation201_spill] sm:$0xff]  ;;  %v9065_v17 = vld [vmem:[#allocation204_spill] sm:$0xff]  ;;  %v9066_v37 = vld [vmem:[#allocation203_spill] sm:$0xff] }
 0x23d   :  { %9057 = vst [vmem:[#allocation30_spill] sm:$0xff] %v5989_v45  ;;  %v9063_v52 = vsel %vm4152_vm3, %v9061_v30, %v9062_v58  ;;  %v9067_v1 = vsel %vm4152_vm3, %v9065_v17, %v9066_v37  ;;  %v9068_v49 = vld [vmem:[#allocation206_spill] sm:$0xff]  ;;  %v9069_v6 = vld [vmem:[#allocation205_spill] sm:$0xff]  ;;  %v9072_v22 = vld [vmem:[#allocation208_spill] sm:$0xff] }
 0x23e   :  { %v6003_v46 = vsel %vm4993_vm4, %v9063_v52, %v9060_v48  ;;  %v9070_v45 = vsel %vm4152_vm3, %v9068_v49, %v9069_v6  ;;  %v9073_v30 = vld [vmem:[#allocation207_spill] sm:$0xff]  ;;  %v9075_v48 = vld [vmem:[#allocation210_spill] sm:$0xff]  ;;  %v9076_v58 = vld [vmem:[#allocation209_spill] sm:$0xff] }
 0x23f   :  { %9064 = vst [vmem:[#allocation29_spill] sm:$0xff] %v6003_v46  ;;  %v6017_v10 = vsel %vm4993_vm4, %v9070_v45, %v9067_v1  ;;  %v9074_v52 = vsel %vm4152_vm3, %v9072_v22, %v9073_v30  ;;  %v9077_v46 = vsel %vm4152_vm3, %v9075_v48, %v9076_v58  ;;  %v9079_v37 = vld [vmem:[#allocation212_spill] sm:$0xff]  ;;  %v9080_v49 = vld [vmem:[#allocation211_spill] sm:$0xff]  ;;  %v9082_v1 = vld [vmem:[#allocation214_spill] sm:$0xff] }
 0x240   :  { %9071 = vst [vmem:[#allocation32_spill] sm:$0xff] %v6017_v10  ;;  %v6031_v17 = vsel %vm4993_vm4, %v9077_v46, %v9074_v52  ;;  %v9081_v45 = vsel %vm4152_vm3, %v9079_v37, %v9080_v49  ;;  %v9083_v6 = vld [vmem:[#allocation213_spill] sm:$0xff]  ;;  %v9086_v30 = vld [vmem:[#allocation216_spill] sm:$0xff]  ;;  %v9087_v48 = vld [vmem:[#allocation215_spill] sm:$0xff] }
 0x241   :  { %9078 = vst [vmem:[#allocation31_spill] sm:$0xff] %v6031_v17  ;;  %v9084_v10 = vsel %vm4152_vm3, %v9082_v1, %v9083_v6  ;;  %v9088_v46 = vsel %vm4152_vm3, %v9086_v30, %v9087_v48  ;;  %v9089_v52 = vld [vmem:[#allocation218_spill] sm:$0xff]  ;;  %v9090_v58 = vld [vmem:[#allocation217_spill] sm:$0xff]  ;;  %v9093_v49 = vld [vmem:[#allocation220_spill] sm:$0xff] }
 0x242   :  { %v6045_v22 = vsel %vm4993_vm4, %v9084_v10, %v9081_v45  ;;  %v9091_v17 = vsel %vm4152_vm3, %v9089_v52, %v9090_v58  ;;  %v9094_v1 = vld [vmem:[#allocation219_spill] sm:$0xff]  ;;  %v9096_v45 = vld [vmem:[#allocation222_spill] sm:$0xff]  ;;  %v9097_v6 = vld [vmem:[#allocation221_spill] sm:$0xff] }
 0x243   :  { %9085 = vst [vmem:[#allocation34_spill] sm:$0xff] %v6045_v22  ;;  %v6059_v37 = vsel %vm4993_vm4, %v9091_v17, %v9088_v46  ;;  %v9095_v10 = vsel %vm4152_vm3, %v9093_v49, %v9094_v1  ;;  %v9098_v22 = vsel %vm4152_vm3, %v9096_v45, %v9097_v6  ;;  %v9100_v48 = vld [vmem:[#allocation224_spill] sm:$0xff]  ;;  %v9101_v52 = vld [vmem:[#allocation223_spill] sm:$0xff]  ;;  %v9103_v46 = vld [vmem:[#allocation226_spill] sm:$0xff] }
 0x244   :  { %9092 = vst [vmem:[#allocation33_spill] sm:$0xff] %v6059_v37  ;;  %v6073_v30 = vsel %vm4993_vm4, %v9098_v22, %v9095_v10  ;;  %v9102_v17 = vsel %vm4152_vm3, %v9100_v48, %v9101_v52  ;;  %v9104_v58 = vld [vmem:[#allocation225_spill] sm:$0xff]  ;;  %v9107_v1 = vld [vmem:[#allocation228_spill] sm:$0xff]  ;;  %v9108_v45 = vld [vmem:[#allocation227_spill] sm:$0xff] }
 0x245   :  { %9099 = vst [vmem:[#allocation36_spill] sm:$0xff] %v6073_v30  ;;  %v9105_v37 = vsel %vm4152_vm3, %v9103_v46, %v9104_v58  ;;  %v9109_v22 = vsel %vm4152_vm3, %v9107_v1, %v9108_v45  ;;  %v9110_v10 = vld [vmem:[#allocation230_spill] sm:$0xff]  ;;  %v9111_v6 = vld [vmem:[#allocation229_spill] sm:$0xff]  ;;  %v9114_v52 = vld [vmem:[#allocation232_spill] sm:$0xff] }
 0x246   :  { %v6087_v49 = vsel %vm4993_vm4, %v9105_v37, %v9102_v17  ;;  %v9112_v30 = vsel %vm4152_vm3, %v9110_v10, %v9111_v6  ;;  %v9115_v46 = vld [vmem:[#allocation231_spill] sm:$0xff]  ;;  %v9117_v17 = vld [vmem:[#allocation234_spill] sm:$0xff]  ;;  %v9118_v58 = vld [vmem:[#allocation233_spill] sm:$0xff] }
 0x247   :  { %9106 = vst [vmem:[#allocation35_spill] sm:$0xff] %v6087_v49  ;;  %v6101_v48 = vsel %vm4993_vm4, %v9112_v30, %v9109_v22  ;;  %v9116_v37 = vsel %vm4152_vm3, %v9114_v52, %v9115_v46  ;;  %v9119_v49 = vsel %vm4152_vm3, %v9117_v17, %v9118_v58  ;;  %v9121_v45 = vld [vmem:[#allocation236_spill] sm:$0xff]  ;;  %v9122_v10 = vld [vmem:[#allocation235_spill] sm:$0xff]  ;;  %v9124_v22 = vld [vmem:[#allocation238_spill] sm:$0xff] }
 0x248   :  { %9113 = vst [vmem:[#allocation38_spill] sm:$0xff] %v6101_v48  ;;  %v6115_v1 = vsel %vm4993_vm4, %v9119_v49, %v9116_v37  ;;  %v9123_v30 = vsel %vm4152_vm3, %v9121_v45, %v9122_v10  ;;  %v9125_v6 = vld [vmem:[#allocation237_spill] sm:$0xff]  ;;  %v9128_v46 = vld [vmem:[#allocation240_spill] sm:$0xff]  ;;  %v9129_v17 = vld [vmem:[#allocation239_spill] sm:$0xff] }
 0x249   :  { %9120 = vst [vmem:[#allocation37_spill] sm:$0xff] %v6115_v1  ;;  %v9126_v48 = vsel %vm4152_vm3, %v9124_v22, %v9125_v6  ;;  %v9130_v49 = vsel %vm4152_vm3, %v9128_v46, %v9129_v17  ;;  %v9131_v37 = vld [vmem:[#allocation242_spill] sm:$0xff]  ;;  %v9132_v58 = vld [vmem:[#allocation241_spill] sm:$0xff]  ;;  %v9135_v10 = vld [vmem:[#allocation244_spill] sm:$0xff] }
 0x24a   :  { %v6129_v52 = vsel %vm4993_vm4, %v9126_v48, %v9123_v30  ;;  %v9133_v1 = vsel %vm4152_vm3, %v9131_v37, %v9132_v58  ;;  %v9136_v22 = vld [vmem:[#allocation243_spill] sm:$0xff]  ;;  %v9138_v30 = vld [vmem:[#allocation246_spill] sm:$0xff]  ;;  %v9139_v6 = vld [vmem:[#allocation245_spill] sm:$0xff] }
 0x24b   :  { %9127 = vst [vmem:[#allocation40_spill] sm:$0xff] %v6129_v52  ;;  %v6143_v45 = vsel %vm4993_vm4, %v9133_v1, %v9130_v49  ;;  %v9137_v48 = vsel %vm4152_vm3, %v9135_v10, %v9136_v22  ;;  %v9140_v52 = vsel %vm4152_vm3, %v9138_v30, %v9139_v6  ;;  %v9142_v17 = vld [vmem:[#allocation248_spill] sm:$0xff]  ;;  %v9143_v37 = vld [vmem:[#allocation247_spill] sm:$0xff]  ;;  %v9145_v49 = vld [vmem:[#allocation250_spill] sm:$0xff] }
 0x24c   :  { %9134 = vst [vmem:[#allocation39_spill] sm:$0xff] %v6143_v45  ;;  %v6157_v46 = vsel %vm4993_vm4, %v9140_v52, %v9137_v48  ;;  %v9144_v1 = vsel %vm4152_vm3, %v9142_v17, %v9143_v37  ;;  %v9146_v58 = vld [vmem:[#allocation249_spill] sm:$0xff]  ;;  %v9149_v22 = vld [vmem:[#allocation252_spill] sm:$0xff]  ;;  %v9150_v30 = vld [vmem:[#allocation251_spill] sm:$0xff] }
 0x24d   :  { %9141 = vst [vmem:[#allocation42_spill] sm:$0xff] %v6157_v46  ;;  %v9147_v45 = vsel %vm4152_vm3, %v9145_v49, %v9146_v58  ;;  %v9151_v52 = vsel %vm4152_vm3, %v9149_v22, %v9150_v30  ;;  %v9152_v48 = vld [vmem:[#allocation254_spill] sm:$0xff]  ;;  %v9153_v6 = vld [vmem:[#allocation253_spill] sm:$0xff]  ;;  %v9156_v37 = vld [vmem:[#allocation256_spill] sm:$0xff] }
 0x24e   :  { %v6171_v10 = vsel %vm4993_vm4, %v9147_v45, %v9144_v1  ;;  %v9154_v46 = vsel %vm4152_vm3, %v9152_v48, %v9153_v6  ;;  %v9157_v49 = vld [vmem:[#allocation255_spill] sm:$0xff]  ;;  %v9159_v1 = vld [vmem:[#allocation258_spill] sm:$0xff]  ;;  %v9160_v58 = vld [vmem:[#allocation257_spill] sm:$0xff] }
 0x24f   :  { %9148 = vst [vmem:[#allocation41_spill] sm:$0xff] %v6171_v10  ;;  %v6185_v17 = vsel %vm4993_vm4, %v9154_v46, %v9151_v52  ;;  %v9158_v45 = vsel %vm4152_vm3, %v9156_v37, %v9157_v49  ;;  %v9161_v10 = vsel %vm4152_vm3, %v9159_v1, %v9160_v58  ;;  %v9163_v30 = vld [vmem:[#allocation260_spill] sm:$0xff]  ;;  %v9164_v48 = vld [vmem:[#allocation259_spill] sm:$0xff]  ;;  %v9166_v52 = vld [vmem:[#allocation262_spill] sm:$0xff] }
 0x250   :  { %9155 = vst [vmem:[#allocation44_spill] sm:$0xff] %v6185_v17  ;;  %v6199_v22 = vsel %vm4993_vm4, %v9161_v10, %v9158_v45  ;;  %v9165_v46 = vsel %vm4152_vm3, %v9163_v30, %v9164_v48  ;;  %v9167_v6 = vld [vmem:[#allocation261_spill] sm:$0xff]  ;;  %v9170_v49 = vld [vmem:[#allocation264_spill] sm:$0xff]  ;;  %v9171_v1 = vld [vmem:[#allocation263_spill] sm:$0xff] }
 0x251   :  { %9162 = vst [vmem:[#allocation43_spill] sm:$0xff] %v6199_v22  ;;  %v9168_v17 = vsel %vm4152_vm3, %v9166_v52, %v9167_v6  ;;  %v9172_v10 = vsel %vm4152_vm3, %v9170_v49, %v9171_v1  ;;  %v9173_v45 = vld [vmem:[#allocation266_spill] sm:$0xff]  ;;  %v9174_v58 = vld [vmem:[#allocation265_spill] sm:$0xff]  ;;  %v9177_v48 = vld [vmem:[#allocation268_spill] sm:$0xff] }
 0x252   :  { %v6213_v37 = vsel %vm4993_vm4, %v9168_v17, %v9165_v46  ;;  %v9175_v22 = vsel %vm4152_vm3, %v9173_v45, %v9174_v58  ;;  %v9178_v52 = vld [vmem:[#allocation267_spill] sm:$0xff]  ;;  %v9180_v46 = vld [vmem:[#allocation270_spill] sm:$0xff]  ;;  %v9181_v6 = vld [vmem:[#allocation269_spill] sm:$0xff] }
 0x253   :  { %9169 = vst [vmem:[#allocation46_spill] sm:$0xff] %v6213_v37  ;;  %v6227_v30 = vsel %vm4993_vm4, %v9175_v22, %v9172_v10  ;;  %v9179_v17 = vsel %vm4152_vm3, %v9177_v48, %v9178_v52  ;;  %v9182_v37 = vsel %vm4152_vm3, %v9180_v46, %v9181_v6  ;;  %v9184_v1 = vld [vmem:[#allocation272_spill] sm:$0xff]  ;;  %v9185_v45 = vld [vmem:[#allocation271_spill] sm:$0xff]  ;;  %v9187_v10 = vld [vmem:[#allocation274_spill] sm:$0xff] }
 0x254   :  { %9176 = vst [vmem:[#allocation45_spill] sm:$0xff] %v6227_v30  ;;  %v6241_v49 = vsel %vm4993_vm4, %v9182_v37, %v9179_v17  ;;  %v9186_v22 = vsel %vm4152_vm3, %v9184_v1, %v9185_v45  ;;  %v9188_v58 = vld [vmem:[#allocation273_spill] sm:$0xff]  ;;  %v9191_v52 = vld [vmem:[#allocation276_spill] sm:$0xff]  ;;  %v9192_v46 = vld [vmem:[#allocation275_spill] sm:$0xff] }
 0x255   :  { %9183 = vst [vmem:[#allocation48_spill] sm:$0xff] %v6241_v49  ;;  %v9189_v30 = vsel %vm4152_vm3, %v9187_v10, %v9188_v58  ;;  %v9193_v37 = vsel %vm4152_vm3, %v9191_v52, %v9192_v46  ;;  %v9194_v17 = vld [vmem:[#allocation278_spill] sm:$0xff]  ;;  %v9195_v6 = vld [vmem:[#allocation277_spill] sm:$0xff]  ;;  %v9198_v45 = vld [vmem:[#allocation280_spill] sm:$0xff] }
 0x256   :  { %v6255_v48 = vsel %vm4993_vm4, %v9189_v30, %v9186_v22  ;;  %v9196_v49 = vsel %vm4152_vm3, %v9194_v17, %v9195_v6  ;;  %v9199_v10 = vld [vmem:[#allocation279_spill] sm:$0xff]  ;;  %v9201_v22 = vld [vmem:[#allocation282_spill] sm:$0xff]  ;;  %v9202_v58 = vld [vmem:[#allocation281_spill] sm:$0xff] }
 0x257   :  { %9190 = vst [vmem:[#allocation47_spill] sm:$0xff] %v6255_v48  ;;  %v6269_v1 = vsel %vm4993_vm4, %v9196_v49, %v9193_v37  ;;  %v9200_v30 = vsel %vm4152_vm3, %v9198_v45, %v9199_v10  ;;  %v9203_v48 = vsel %vm4152_vm3, %v9201_v22, %v9202_v58  ;;  %v9205_v46 = vld [vmem:[#allocation284_spill] sm:$0xff]  ;;  %v9206_v17 = vld [vmem:[#allocation283_spill] sm:$0xff]  ;;  %v9208_v37 = vld [vmem:[#allocation286_spill] sm:$0xff] }
 0x258   :  { %9197 = vst [vmem:[#allocation50_spill] sm:$0xff] %v6269_v1  ;;  %v6283_v52 = vsel %vm4993_vm4, %v9203_v48, %v9200_v30  ;;  %v9207_v49 = vsel %vm4152_vm3, %v9205_v46, %v9206_v17  ;;  %v9209_v6 = vld [vmem:[#allocation285_spill] sm:$0xff]  ;;  %v9212_v10 = vld [vmem:[#allocation288_spill] sm:$0xff]  ;;  %v9213_v22 = vld [vmem:[#allocation287_spill] sm:$0xff] }
 0x259   :  { %9204 = vst [vmem:[#allocation49_spill] sm:$0xff] %v6283_v52  ;;  %v9210_v1 = vsel %vm4152_vm3, %v9208_v37, %v9209_v6  ;;  %v9214_v48 = vsel %vm4152_vm3, %v9212_v10, %v9213_v22  ;;  %v9215_v30 = vld [vmem:[#allocation290_spill] sm:$0xff]  ;;  %v9216_v58 = vld [vmem:[#allocation289_spill] sm:$0xff]  ;;  %v9219_v17 = vld [vmem:[#allocation292_spill] sm:$0xff] }
 0x25a   :  { %v6297_v45 = vsel %vm4993_vm4, %v9210_v1, %v9207_v49  ;;  %v9217_v52 = vsel %vm4152_vm3, %v9215_v30, %v9216_v58  ;;  %v9220_v37 = vld [vmem:[#allocation291_spill] sm:$0xff]  ;;  %v9222_v49 = vld [vmem:[#allocation294_spill] sm:$0xff]  ;;  %v9223_v6 = vld [vmem:[#allocation293_spill] sm:$0xff] }
 0x25b   :  { %9211 = vst [vmem:[#allocation52_spill] sm:$0xff] %v6297_v45  ;;  %v6311_v46 = vsel %vm4993_vm4, %v9217_v52, %v9214_v48  ;;  %v9221_v1 = vsel %vm4152_vm3, %v9219_v17, %v9220_v37  ;;  %v9224_v45 = vsel %vm4152_vm3, %v9222_v49, %v9223_v6  ;;  %v9226_v22 = vld [vmem:[#allocation296_spill] sm:$0xff]  ;;  %v9227_v30 = vld [vmem:[#allocation295_spill] sm:$0xff]  ;;  %v9229_v48 = vld [vmem:[#allocation298_spill] sm:$0xff] }
 0x25c   :  { %9218 = vst [vmem:[#allocation51_spill] sm:$0xff] %v6311_v46  ;;  %v6325_v10 = vsel %vm4993_vm4, %v9224_v45, %v9221_v1  ;;  %v9228_v52 = vsel %vm4152_vm3, %v9226_v22, %v9227_v30  ;;  %v9230_v58 = vld [vmem:[#allocation297_spill] sm:$0xff]  ;;  %v9233_v37 = vld [vmem:[#allocation300_spill] sm:$0xff]  ;;  %v9234_v49 = vld [vmem:[#allocation299_spill] sm:$0xff] }
 0x25d   :  { %9225 = vst [vmem:[#allocation54_spill] sm:$0xff] %v6325_v10  ;;  %v9231_v46 = vsel %vm4152_vm3, %v9229_v48, %v9230_v58  ;;  %v9235_v45 = vsel %vm4152_vm3, %v9233_v37, %v9234_v49  ;;  %v9236_v1 = vld [vmem:[#allocation302_spill] sm:$0xff]  ;;  %v9237_v6 = vld [vmem:[#allocation301_spill] sm:$0xff]  ;;  %v9240_v30 = vld [vmem:[#allocation304_spill] sm:$0xff] }
 0x25e   :  { %v6339_v17 = vsel %vm4993_vm4, %v9231_v46, %v9228_v52  ;;  %v9238_v10 = vsel %vm4152_vm3, %v9236_v1, %v9237_v6  ;;  %v9241_v48 = vld [vmem:[#allocation303_spill] sm:$0xff]  ;;  %v9243_v52 = vld [vmem:[#allocation306_spill] sm:$0xff]  ;;  %v9244_v58 = vld [vmem:[#allocation305_spill] sm:$0xff] }
 0x25f   :  { %9232 = vst [vmem:[#allocation53_spill] sm:$0xff] %v6339_v17  ;;  %v6353_v22 = vsel %vm4993_vm4, %v9238_v10, %v9235_v45  ;;  %v9242_v46 = vsel %vm4152_vm3, %v9240_v30, %v9241_v48  ;;  %v9245_v17 = vsel %vm4152_vm3, %v9243_v52, %v9244_v58  ;;  %v9247_v49 = vld [vmem:[#allocation308_spill] sm:$0xff]  ;;  %v9248_v1 = vld [vmem:[#allocation307_spill] sm:$0xff]  ;;  %v9250_v45 = vld [vmem:[#allocation310_spill] sm:$0xff] }
 0x260   :  { %9239 = vst [vmem:[#allocation56_spill] sm:$0xff] %v6353_v22  ;;  %v6367_v37 = vsel %vm4993_vm4, %v9245_v17, %v9242_v46  ;;  %v9249_v10 = vsel %vm4152_vm3, %v9247_v49, %v9248_v1  ;;  %v9251_v6 = vld [vmem:[#allocation309_spill] sm:$0xff]  ;;  %v9254_v48 = vld [vmem:[#allocation312_spill] sm:$0xff]  ;;  %v9255_v52 = vld [vmem:[#allocation311_spill] sm:$0xff] }
 0x261   :  { %9246 = vst [vmem:[#allocation55_spill] sm:$0xff] %v6367_v37  ;;  %v9252_v22 = vsel %vm4152_vm3, %v9250_v45, %v9251_v6  ;;  %v9256_v17 = vsel %vm4152_vm3, %v9254_v48, %v9255_v52  ;;  %v9257_v46 = vld [vmem:[#allocation314_spill] sm:$0xff]  ;;  %v9258_v58 = vld [vmem:[#allocation313_spill] sm:$0xff]  ;;  %v9261_v1 = vld [vmem:[#allocation316_spill] sm:$0xff] }
 0x262   :  { %v6381_v30 = vsel %vm4993_vm4, %v9252_v22, %v9249_v10  ;;  %v9259_v37 = vsel %vm4152_vm3, %v9257_v46, %v9258_v58  ;;  %v9262_v45 = vld [vmem:[#allocation315_spill] sm:$0xff]  ;;  %v9264_v10 = vld [vmem:[#allocation318_spill] sm:$0xff]  ;;  %v9265_v6 = vld [vmem:[#allocation317_spill] sm:$0xff] }
 0x263   :  { %9253 = vst [vmem:[#allocation58_spill] sm:$0xff] %v6381_v30  ;;  %v6395_v49 = vsel %vm4993_vm4, %v9259_v37, %v9256_v17  ;;  %v9263_v22 = vsel %vm4152_vm3, %v9261_v1, %v9262_v45  ;;  %v9266_v30 = vsel %vm4152_vm3, %v9264_v10, %v9265_v6  ;;  %v9268_v52 = vld [vmem:[#allocation320_spill] sm:$0xff]  ;;  %v9269_v46 = vld [vmem:[#allocation319_spill] sm:$0xff]  ;;  %v9271_v17 = vld [vmem:[#allocation322_spill] sm:$0xff] }
 0x264   :  { %9260 = vst [vmem:[#allocation57_spill] sm:$0xff] %v6395_v49  ;;  %v6409_v48 = vsel %vm4993_vm4, %v9266_v30, %v9263_v22  ;;  %v9270_v37 = vsel %vm4152_vm3, %v9268_v52, %v9269_v46  ;;  %v9272_v58 = vld [vmem:[#allocation321_spill] sm:$0xff]  ;;  %v9275_v45 = vld [vmem:[#allocation324_spill] sm:$0xff]  ;;  %v9276_v10 = vld [vmem:[#allocation323_spill] sm:$0xff] }
 0x265   :  { %9267 = vst [vmem:[#allocation60_spill] sm:$0xff] %v6409_v48  ;;  %v9273_v49 = vsel %vm4152_vm3, %v9271_v17, %v9272_v58  ;;  %v9277_v30 = vsel %vm4152_vm3, %v9275_v45, %v9276_v10  ;;  %v9278_v22 = vld [vmem:[#allocation326_spill] sm:$0xff]  ;;  %v9279_v6 = vld [vmem:[#allocation325_spill] sm:$0xff]  ;;  %v9282_v46 = vld [vmem:[#allocation328_spill] sm:$0xff] }
 0x266   :  { %v6423_v1 = vsel %vm4993_vm4, %v9273_v49, %v9270_v37  ;;  %v9280_v48 = vsel %vm4152_vm3, %v9278_v22, %v9279_v6  ;;  %v9283_v17 = vld [vmem:[#allocation327_spill] sm:$0xff]  ;;  %v9285_v37 = vld [vmem:[#allocation330_spill] sm:$0xff]  ;;  %v9286_v58 = vld [vmem:[#allocation329_spill] sm:$0xff] }
 0x267   :  { %9274 = vst [vmem:[#allocation59_spill] sm:$0xff] %v6423_v1  ;;  %v6437_v52 = vsel %vm4993_vm4, %v9280_v48, %v9277_v30  ;;  %v9284_v49 = vsel %vm4152_vm3, %v9282_v46, %v9283_v17  ;;  %v9287_v1 = vsel %vm4152_vm3, %v9285_v37, %v9286_v58  ;;  %v9289_v10 = vld [vmem:[#allocation332_spill] sm:$0xff]  ;;  %v9290_v22 = vld [vmem:[#allocation331_spill] sm:$0xff]  ;;  %v9292_v30 = vld [vmem:[#allocation334_spill] sm:$0xff] }
 0x268   :  { %9281 = vst [vmem:[#allocation62_spill] sm:$0xff] %v6437_v52  ;;  %v6451_v45 = vsel %vm4993_vm4, %v9287_v1, %v9284_v49  ;;  %v9291_v48 = vsel %vm4152_vm3, %v9289_v10, %v9290_v22  ;;  %v9293_v6 = vld [vmem:[#allocation333_spill] sm:$0xff]  ;;  %v9296_v17 = vld [vmem:[#allocation336_spill] sm:$0xff]  ;;  %v9297_v37 = vld [vmem:[#allocation335_spill] sm:$0xff] }
 0x269   :  { %9288 = vst [vmem:[#allocation61_spill] sm:$0xff] %v6451_v45  ;;  %v9294_v52 = vsel %vm4152_vm3, %v9292_v30, %v9293_v6  ;;  %v9298_v1 = vsel %vm4152_vm3, %v9296_v17, %v9297_v37  ;;  %v9299_v49 = vld [vmem:[#allocation338_spill] sm:$0xff]  ;;  %v9300_v58 = vld [vmem:[#allocation337_spill] sm:$0xff]  ;;  %v9303_v22 = vld [vmem:[#allocation340_spill] sm:$0xff] }
 0x26a   :  { %v6465_v46 = vsel %vm4993_vm4, %v9294_v52, %v9291_v48  ;;  %v9301_v45 = vsel %vm4152_vm3, %v9299_v49, %v9300_v58  ;;  %v9304_v30 = vld [vmem:[#allocation339_spill] sm:$0xff]  ;;  %v9306_v48 = vld [vmem:[#allocation342_spill] sm:$0xff]  ;;  %v9307_v6 = vld [vmem:[#allocation341_spill] sm:$0xff] }
 0x26b   :  { %9295 = vst [vmem:[#allocation64_spill] sm:$0xff] %v6465_v46  ;;  %v6479_v10 = vsel %vm4993_vm4, %v9301_v45, %v9298_v1  ;;  %v9305_v52 = vsel %vm4152_vm3, %v9303_v22, %v9304_v30  ;;  %v9308_v46 = vsel %vm4152_vm3, %v9306_v48, %v9307_v6  ;;  %v9310_v37 = vld [vmem:[#allocation344_spill] sm:$0xff]  ;;  %v9311_v49 = vld [vmem:[#allocation343_spill] sm:$0xff]  ;;  %v9313_v1 = vld [vmem:[#allocation346_spill] sm:$0xff] }
 0x26c   :  { %9302 = vst [vmem:[#allocation63_spill] sm:$0xff] %v6479_v10  ;;  %v6493_v17 = vsel %vm4993_vm4, %v9308_v46, %v9305_v52  ;;  %v9312_v45 = vsel %vm4152_vm3, %v9310_v37, %v9311_v49  ;;  %v9314_v58 = vld [vmem:[#allocation345_spill] sm:$0xff]  ;;  %v9317_v30 = vld [vmem:[#allocation348_spill] sm:$0xff]  ;;  %v9318_v48 = vld [vmem:[#allocation347_spill] sm:$0xff] }
 0x26d   :  { %9309 = vst [vmem:[#allocation66_spill] sm:$0xff] %v6493_v17  ;;  %v9315_v10 = vsel %vm4152_vm3, %v9313_v1, %v9314_v58  ;;  %v9319_v46 = vsel %vm4152_vm3, %v9317_v30, %v9318_v48  ;;  %v9320_v52 = vld [vmem:[#allocation350_spill] sm:$0xff]  ;;  %v9321_v6 = vld [vmem:[#allocation349_spill] sm:$0xff]  ;;  %v9324_v49 = vld [vmem:[#allocation352_spill] sm:$0xff] }
 0x26e   :  { %v6507_v22 = vsel %vm4993_vm4, %v9315_v10, %v9312_v45  ;;  %v9322_v17 = vsel %vm4152_vm3, %v9320_v52, %v9321_v6  ;;  %v9325_v1 = vld [vmem:[#allocation351_spill] sm:$0xff]  ;;  %v9327_v45 = vld [vmem:[#allocation354_spill] sm:$0xff]  ;;  %v9328_v58 = vld [vmem:[#allocation353_spill] sm:$0xff] }
 0x26f   :  { %9316 = vst [vmem:[#allocation65_spill] sm:$0xff] %v6507_v22  ;;  %v6521_v37 = vsel %vm4993_vm4, %v9322_v17, %v9319_v46  ;;  %v9326_v10 = vsel %vm4152_vm3, %v9324_v49, %v9325_v1  ;;  %v9329_v22 = vsel %vm4152_vm3, %v9327_v45, %v9328_v58  ;;  %v9331_v48 = vld [vmem:[#allocation356_spill] sm:$0xff]  ;;  %v9332_v52 = vld [vmem:[#allocation355_spill] sm:$0xff]  ;;  %v9334_v46 = vld [vmem:[#allocation358_spill] sm:$0xff] }
 0x270   :  { %9323 = vst [vmem:[#allocation68_spill] sm:$0xff] %v6521_v37  ;;  %v6535_v30 = vsel %vm4993_vm4, %v9329_v22, %v9326_v10  ;;  %v9333_v17 = vsel %vm4152_vm3, %v9331_v48, %v9332_v52  ;;  %v9335_v6 = vld [vmem:[#allocation357_spill] sm:$0xff]  ;;  %v9338_v1 = vld [vmem:[#allocation360_spill] sm:$0xff]  ;;  %v9339_v45 = vld [vmem:[#allocation359_spill] sm:$0xff] }
 0x271   :  { %9330 = vst [vmem:[#allocation67_spill] sm:$0xff] %v6535_v30  ;;  %v9336_v37 = vsel %vm4152_vm3, %v9334_v46, %v9335_v6  ;;  %v9340_v22 = vsel %vm4152_vm3, %v9338_v1, %v9339_v45  ;;  %v9341_v10 = vld [vmem:[#allocation362_spill] sm:$0xff]  ;;  %v9342_v58 = vld [vmem:[#allocation361_spill] sm:$0xff]  ;;  %v9345_v52 = vld [vmem:[#allocation364_spill] sm:$0xff] }
 0x272   :  { %v6549_v49 = vsel %vm4993_vm4, %v9336_v37, %v9333_v17  ;;  %v9343_v30 = vsel %vm4152_vm3, %v9341_v10, %v9342_v58  ;;  %v9346_v46 = vld [vmem:[#allocation363_spill] sm:$0xff]  ;;  %v9348_v17 = vld [vmem:[#allocation366_spill] sm:$0xff]  ;;  %v9349_v6 = vld [vmem:[#allocation365_spill] sm:$0xff] }
 0x273   :  { %9337 = vst [vmem:[#allocation70_spill] sm:$0xff] %v6549_v49  ;;  %v6563_v48 = vsel %vm4993_vm4, %v9343_v30, %v9340_v22  ;;  %v9347_v37 = vsel %vm4152_vm3, %v9345_v52, %v9346_v46  ;;  %v9350_v49 = vsel %vm4152_vm3, %v9348_v17, %v9349_v6  ;;  %v9352_v45 = vld [vmem:[#allocation368_spill] sm:$0xff]  ;;  %v9353_v10 = vld [vmem:[#allocation367_spill] sm:$0xff]  ;;  %v9355_v22 = vld [vmem:[#allocation370_spill] sm:$0xff] }
 0x274   :  { %9344 = vst [vmem:[#allocation69_spill] sm:$0xff] %v6563_v48  ;;  %v6577_v1 = vsel %vm4993_vm4, %v9350_v49, %v9347_v37  ;;  %v9354_v30 = vsel %vm4152_vm3, %v9352_v45, %v9353_v10  ;;  %v9356_v58 = vld [vmem:[#allocation369_spill] sm:$0xff]  ;;  %v9359_v46 = vld [vmem:[#allocation372_spill] sm:$0xff]  ;;  %v9360_v17 = vld [vmem:[#allocation371_spill] sm:$0xff] }
 0x275   :  { %9351 = vst [vmem:[#allocation72_spill] sm:$0xff] %v6577_v1  ;;  %v9357_v48 = vsel %vm4152_vm3, %v9355_v22, %v9356_v58  ;;  %v9361_v49 = vsel %vm4152_vm3, %v9359_v46, %v9360_v17  ;;  %v9362_v37 = vld [vmem:[#allocation374_spill] sm:$0xff]  ;;  %v9363_v6 = vld [vmem:[#allocation373_spill] sm:$0xff]  ;;  %v9366_v10 = vld [vmem:[#allocation376_spill] sm:$0xff] }
 0x276   :  { %v6591_v52 = vsel %vm4993_vm4, %v9357_v48, %v9354_v30  ;;  %v9364_v1 = vsel %vm4152_vm3, %v9362_v37, %v9363_v6  ;;  %v9367_v22 = vld [vmem:[#allocation375_spill] sm:$0xff]  ;;  %v9369_v30 = vld [vmem:[#allocation378_spill] sm:$0xff]  ;;  %v9370_v58 = vld [vmem:[#allocation377_spill] sm:$0xff] }
 0x277   :  { %9358 = vst [vmem:[#allocation71_spill] sm:$0xff] %v6591_v52  ;;  %v6605_v45 = vsel %vm4993_vm4, %v9364_v1, %v9361_v49  ;;  %v9368_v48 = vsel %vm4152_vm3, %v9366_v10, %v9367_v22  ;;  %v9371_v52 = vsel %vm4152_vm3, %v9369_v30, %v9370_v58  ;;  %v9373_v17 = vld [vmem:[#allocation380_spill] sm:$0xff]  ;;  %v9374_v37 = vld [vmem:[#allocation379_spill] sm:$0xff]  ;;  %v9376_v49 = vld [vmem:[#allocation382_spill] sm:$0xff] }
 0x278   :  { %9365 = vst [vmem:[#allocation74_spill] sm:$0xff] %v6605_v45  ;;  %v6619_v46 = vsel %vm4993_vm4, %v9371_v52, %v9368_v48  ;;  %v9375_v1 = vsel %vm4152_vm3, %v9373_v17, %v9374_v37  ;;  %v9377_v6 = vld [vmem:[#allocation381_spill] sm:$0xff]  ;;  %v9380_v22 = vld [vmem:[#allocation384_spill] sm:$0xff]  ;;  %v9381_v30 = vld [vmem:[#allocation383_spill] sm:$0xff] }
 0x279   :  { %9372 = vst [vmem:[#allocation73_spill] sm:$0xff] %v6619_v46  ;;  %v9378_v45 = vsel %vm4152_vm3, %v9376_v49, %v9377_v6  ;;  %v9382_v52 = vsel %vm4152_vm3, %v9380_v22, %v9381_v30  ;;  %v9383_v48 = vld [vmem:[#allocation386_spill] sm:$0xff]  ;;  %v9384_v58 = vld [vmem:[#allocation385_spill] sm:$0xff]  ;;  %v9387_v37 = vld [vmem:[#allocation388_spill] sm:$0xff] }
 0x27a   :  { %v6633_v10 = vsel %vm4993_vm4, %v9378_v45, %v9375_v1  ;;  %v9385_v46 = vsel %vm4152_vm3, %v9383_v48, %v9384_v58  ;;  %v9388_v49 = vld [vmem:[#allocation387_spill] sm:$0xff]  ;;  %v9390_v1 = vld [vmem:[#allocation390_spill] sm:$0xff]  ;;  %v9391_v6 = vld [vmem:[#allocation389_spill] sm:$0xff] }
 0x27b   :  { %9379 = vst [vmem:[#allocation76_spill] sm:$0xff] %v6633_v10  ;;  %v6647_v17 = vsel %vm4993_vm4, %v9385_v46, %v9382_v52  ;;  %v9389_v45 = vsel %vm4152_vm3, %v9387_v37, %v9388_v49  ;;  %v9392_v10 = vsel %vm4152_vm3, %v9390_v1, %v9391_v6  ;;  %v9394_v30 = vld [vmem:[#allocation392_spill] sm:$0xff]  ;;  %v9395_v48 = vld [vmem:[#allocation391_spill] sm:$0xff]  ;;  %v9397_v52 = vld [vmem:[#allocation394_spill] sm:$0xff] }
 0x27c   :  { %9386 = vst [vmem:[#allocation75_spill] sm:$0xff] %v6647_v17  ;;  %v6661_v22 = vsel %vm4993_vm4, %v9392_v10, %v9389_v45  ;;  %v9396_v46 = vsel %vm4152_vm3, %v9394_v30, %v9395_v48  ;;  %v9398_v58 = vld [vmem:[#allocation393_spill] sm:$0xff]  ;;  %v9401_v49 = vld [vmem:[#allocation396_spill] sm:$0xff]  ;;  %v9402_v1 = vld [vmem:[#allocation395_spill] sm:$0xff] }
 0x27d   :  { %9393 = vst [vmem:[#allocation78_spill] sm:$0xff] %v6661_v22  ;;  %v9399_v17 = vsel %vm4152_vm3, %v9397_v52, %v9398_v58  ;;  %v9403_v10 = vsel %vm4152_vm3, %v9401_v49, %v9402_v1  ;;  %v9404_v45 = vld [vmem:[#allocation398_spill] sm:$0xff]  ;;  %v9405_v6 = vld [vmem:[#allocation397_spill] sm:$0xff]  ;;  %v9408_v48 = vld [vmem:[#allocation400_spill] sm:$0xff] }
 0x27e   :  { %v6675_v37 = vsel %vm4993_vm4, %v9399_v17, %v9396_v46  ;;  %v9406_v22 = vsel %vm4152_vm3, %v9404_v45, %v9405_v6  ;;  %v9409_v52 = vld [vmem:[#allocation399_spill] sm:$0xff]  ;;  %v9411_v46 = vld [vmem:[#allocation402_spill] sm:$0xff]  ;;  %v9412_v58 = vld [vmem:[#allocation401_spill] sm:$0xff] }
 0x27f   :  { %9400 = vst [vmem:[#allocation77_spill] sm:$0xff] %v6675_v37  ;;  %v6689_v30 = vsel %vm4993_vm4, %v9406_v22, %v9403_v10  ;;  %v9410_v17 = vsel %vm4152_vm3, %v9408_v48, %v9409_v52  ;;  %v9413_v37 = vsel %vm4152_vm3, %v9411_v46, %v9412_v58  ;;  %v9415_v1 = vld [vmem:[#allocation404_spill] sm:$0xff]  ;;  %v9416_v45 = vld [vmem:[#allocation403_spill] sm:$0xff]  ;;  %v9418_v10 = vld [vmem:[#allocation406_spill] sm:$0xff] }
 0x280   :  { %9407 = vst [vmem:[#allocation80_spill] sm:$0xff] %v6689_v30  ;;  %v6703_v49 = vsel %vm4993_vm4, %v9413_v37, %v9410_v17  ;;  %v9417_v22 = vsel %vm4152_vm3, %v9415_v1, %v9416_v45  ;;  %v9419_v6 = vld [vmem:[#allocation405_spill] sm:$0xff]  ;;  %v9422_v52 = vld [vmem:[#allocation408_spill] sm:$0xff]  ;;  %v9423_v46 = vld [vmem:[#allocation407_spill] sm:$0xff] }
 0x281   :  { %9414 = vst [vmem:[#allocation79_spill] sm:$0xff] %v6703_v49  ;;  %v9420_v30 = vsel %vm4152_vm3, %v9418_v10, %v9419_v6  ;;  %v9424_v37 = vsel %vm4152_vm3, %v9422_v52, %v9423_v46  ;;  %v9425_v17 = vld [vmem:[#allocation410_spill] sm:$0xff]  ;;  %v9426_v58 = vld [vmem:[#allocation409_spill] sm:$0xff]  ;;  %v9429_v45 = vld [vmem:[#allocation412_spill] sm:$0xff] }
 0x282   :  { %v6717_v48 = vsel %vm4993_vm4, %v9420_v30, %v9417_v22  ;;  %v9427_v49 = vsel %vm4152_vm3, %v9425_v17, %v9426_v58  ;;  %v9430_v10 = vld [vmem:[#allocation411_spill] sm:$0xff]  ;;  %v9432_v22 = vld [vmem:[#allocation414_spill] sm:$0xff]  ;;  %v9433_v6 = vld [vmem:[#allocation413_spill] sm:$0xff] }
 0x283   :  { %9421 = vst [vmem:[#allocation82_spill] sm:$0xff] %v6717_v48  ;;  %v6731_v1 = vsel %vm4993_vm4, %v9427_v49, %v9424_v37  ;;  %v9431_v30 = vsel %vm4152_vm3, %v9429_v45, %v9430_v10  ;;  %v9434_v48 = vsel %vm4152_vm3, %v9432_v22, %v9433_v6  ;;  %v9436_v46 = vld [vmem:[#allocation416_spill] sm:$0xff]  ;;  %v9437_v17 = vld [vmem:[#allocation415_spill] sm:$0xff]  ;;  %v9439_v37 = vld [vmem:[#allocation418_spill] sm:$0xff] }
 0x284   :  { %9428 = vst [vmem:[#allocation81_spill] sm:$0xff] %v6731_v1  ;;  %v6745_v52 = vsel %vm4993_vm4, %v9434_v48, %v9431_v30  ;;  %v9438_v49 = vsel %vm4152_vm3, %v9436_v46, %v9437_v17  ;;  %v9440_v58 = vld [vmem:[#allocation417_spill] sm:$0xff]  ;;  %v9443_v10 = vld [vmem:[#allocation420_spill] sm:$0xff]  ;;  %v9444_v22 = vld [vmem:[#allocation419_spill] sm:$0xff] }
 0x285   :  { %9435 = vst [vmem:[#allocation84_spill] sm:$0xff] %v6745_v52  ;;  %v9441_v1 = vsel %vm4152_vm3, %v9439_v37, %v9440_v58  ;;  %v9445_v48 = vsel %vm4152_vm3, %v9443_v10, %v9444_v22  ;;  %v9446_v30 = vld [vmem:[#allocation422_spill] sm:$0xff]  ;;  %v9447_v6 = vld [vmem:[#allocation421_spill] sm:$0xff]  ;;  %v9450_v17 = vld [vmem:[#allocation424_spill] sm:$0xff] }
 0x286   :  { %v6759_v45 = vsel %vm4993_vm4, %v9441_v1, %v9438_v49  ;;  %v9448_v52 = vsel %vm4152_vm3, %v9446_v30, %v9447_v6  ;;  %v9451_v37 = vld [vmem:[#allocation423_spill] sm:$0xff]  ;;  %v9453_v49 = vld [vmem:[#allocation426_spill] sm:$0xff]  ;;  %v9454_v58 = vld [vmem:[#allocation425_spill] sm:$0xff] }
 0x287   :  { %9442 = vst [vmem:[#allocation83_spill] sm:$0xff] %v6759_v45  ;;  %v6773_v46 = vsel %vm4993_vm4, %v9448_v52, %v9445_v48  ;;  %v9452_v1 = vsel %vm4152_vm3, %v9450_v17, %v9451_v37  ;;  %v9455_v45 = vsel %vm4152_vm3, %v9453_v49, %v9454_v58  ;;  %v9457_v22 = vld [vmem:[#allocation428_spill] sm:$0xff]  ;;  %v9458_v30 = vld [vmem:[#allocation427_spill] sm:$0xff]  ;;  %v9460_v48 = vld [vmem:[#allocation430_spill] sm:$0xff] }
 0x288   :  { %9449 = vst [vmem:[#allocation86_spill] sm:$0xff] %v6773_v46  ;;  %v6787_v10 = vsel %vm4993_vm4, %v9455_v45, %v9452_v1  ;;  %v9459_v52 = vsel %vm4152_vm3, %v9457_v22, %v9458_v30  ;;  %v9461_v6 = vld [vmem:[#allocation429_spill] sm:$0xff]  ;;  %v9464_v37 = vld [vmem:[#allocation432_spill] sm:$0xff]  ;;  %v9465_v49 = vld [vmem:[#allocation431_spill] sm:$0xff] }
 0x289   :  { %9456 = vst [vmem:[#allocation85_spill] sm:$0xff] %v6787_v10  ;;  %v9462_v46 = vsel %vm4152_vm3, %v9460_v48, %v9461_v6  ;;  %v9466_v45 = vsel %vm4152_vm3, %v9464_v37, %v9465_v49  ;;  %v9467_v1 = vld [vmem:[#allocation434_spill] sm:$0xff]  ;;  %v9468_v58 = vld [vmem:[#allocation433_spill] sm:$0xff]  ;;  %v9471_v30 = vld [vmem:[#allocation436_spill] sm:$0xff] }
 0x28a   :  { %v6801_v17 = vsel %vm4993_vm4, %v9462_v46, %v9459_v52  ;;  %v9469_v10 = vsel %vm4152_vm3, %v9467_v1, %v9468_v58  ;;  %v9472_v48 = vld [vmem:[#allocation435_spill] sm:$0xff]  ;;  %v9474_v52 = vld [vmem:[#allocation438_spill] sm:$0xff]  ;;  %v9475_v6 = vld [vmem:[#allocation437_spill] sm:$0xff] }
 0x28b   :  { %9463 = vst [vmem:[#allocation88_spill] sm:$0xff] %v6801_v17  ;;  %v6815_v22 = vsel %vm4993_vm4, %v9469_v10, %v9466_v45  ;;  %v9473_v46 = vsel %vm4152_vm3, %v9471_v30, %v9472_v48  ;;  %v9476_v17 = vsel %vm4152_vm3, %v9474_v52, %v9475_v6  ;;  %v9478_v49 = vld [vmem:[#allocation440_spill] sm:$0xff]  ;;  %v9479_v1 = vld [vmem:[#allocation439_spill] sm:$0xff]  ;;  %v9481_v45 = vld [vmem:[#allocation442_spill] sm:$0xff] }
 0x28c   :  { %9470 = vst [vmem:[#allocation87_spill] sm:$0xff] %v6815_v22  ;;  %v6829_v37 = vsel %vm4993_vm4, %v9476_v17, %v9473_v46  ;;  %v9480_v10 = vsel %vm4152_vm3, %v9478_v49, %v9479_v1  ;;  %v9482_v58 = vld [vmem:[#allocation441_spill] sm:$0xff]  ;;  %v9485_v48 = vld [vmem:[#allocation444_spill] sm:$0xff]  ;;  %v9486_v52 = vld [vmem:[#allocation443_spill] sm:$0xff] }
 0x28d   :  { %9477 = vst [vmem:[#allocation90_spill] sm:$0xff] %v6829_v37  ;;  %v9483_v22 = vsel %vm4152_vm3, %v9481_v45, %v9482_v58  ;;  %v9487_v17 = vsel %vm4152_vm3, %v9485_v48, %v9486_v52  ;;  %v9488_v46 = vld [vmem:[#allocation446_spill] sm:$0xff]  ;;  %v9489_v6 = vld [vmem:[#allocation445_spill] sm:$0xff]  ;;  %v9492_v1 = vld [vmem:[#allocation448_spill] sm:$0xff]  ;;  %v9500_v52 = vsel %vm4152_vm3, %v8712_v63, %v8711_v51  ;;  %v9507_v63 = vsel %vm4152_vm3, %v4148_v3, %v4144_v59 }
 0x28e   :  { %v6843_v30 = vsel %vm4993_vm4, %v9483_v22, %v9480_v10  ;;  %v9490_v37 = vsel %vm4152_vm3, %v9488_v46, %v9489_v6  ;;  %v9493_v45 = vld [vmem:[#allocation447_spill] sm:$0xff]  ;;  %v9495_v10 = vld [vmem:[#allocation450_spill] sm:$0xff]  ;;  %v9496_v58 = vld [vmem:[#allocation449_spill] sm:$0xff] }
 0x28f   :  { %9484 = vst [vmem:[#allocation89_spill] sm:$0xff] %v6843_v30  ;;  %v6857_v49 = vsel %vm4993_vm4, %v9490_v37, %v9487_v17  ;;  %v9494_v22 = vsel %vm4152_vm3, %v9492_v1, %v9493_v45  ;;  %v9497_v30 = vsel %vm4152_vm3, %v9495_v10, %v9496_v58  ;;  %v9499_v37 = vsel %vm4152_vm3, %v8710_v47, %v8709_v39  ;;  %v9503_v46 = vld [vmem:[#allocation457_spill] sm:$0xff]  ;;  %v9509_v51 = vld [vmem:[#allocation8_spill] sm:$0xff]  ;;  %v9526_v10 = vld [vmem:[#allocation22_spill] sm:$0xff] }
 0x290   :  { %9491 = vst [vmem:[#allocation92_spill] sm:$0xff] %v6857_v49  ;;  %v6871_v48 = vsel %vm4993_vm4, %v9497_v30, %v9494_v22  ;;  %v6885_v17 = vsel %vm4993_vm4, %v9500_v52, %v9499_v37  ;;  %v9502_v30 = vsel %vm4152_vm3, %v8714_v7, %v8713_v4  ;;  %v9504_v6 = vsel %vm4152_vm3, %v8716_v31, %v9503_v46  ;;  %v9527_v58 = vld [vmem:[#allocation21_spill] sm:$0xff]  ;;  %v9528_v52 = vld [vmem:[#allocation24_spill] sm:$0xff]  ;;  %v9553_v59 = vld [vmem:[#allocation47_spill] sm:$0xff] }
 0x291   :  { %9498 = vst [vmem:[#allocation91_spill] sm:$0xff] %v6871_v48  ;;  %9501 = vst [vmem:[#allocation94_spill] sm:$0xff] %v6885_v17  ;;  %v6899_v39 = vsel %vm4993_vm4, %v9504_v6, %v9502_v30  ;;  %v9506_v47 = vsel %vm4152_vm3, %v8718_v23, %v8717_v43  ;;  %v9510_v31 = vand.u32 8, %v9509_v51  ;;  %v9511_v7 = vmov 0  ;;  %v9529_v30 = vld [vmem:[#allocation23_spill] sm:$0xff]  ;;  %v9530_v6 = vld [vmem:[#allocation26_spill] sm:$0xff] }
 0x292   :  { %9505 = vst [vmem:[#allocation93_spill] sm:$0xff] %v6899_v39  ;;  %v6913_v4 = vsel %vm4993_vm4, %v9507_v63, %v9506_v47  ;;  %v9531_v47 = vld [vmem:[#allocation25_spill] sm:$0xff]  ;;  %v9557_v15 = vld [vmem:[#allocation51_spill] sm:$0xff] }
 0x293   :  { %9508 = vst [vmem:[#allocation96_spill] sm:$0xff] %v6913_v4  ;;  %vm6917_vm5 = vcmp.ne.s32.totalorder %v9510_v31, 0  ;;  %v9532_v31 = vld [vmem:[#allocation28_spill] sm:$0xff]  ;;  %v9555_v43 = vld [vmem:[#allocation49_spill] sm:$0xff]  ;;  %v9561_v23 = vld [vmem:[#allocation55_spill] sm:$0xff] }
 0x294   :  { %v9512_v7 = vsel %vm6917_vm5, 4294967295, %v9511_v7  ;;  %v916_v3 = vsel %vm6917_vm5, %v5331_v13, %v5317_v62  ;;  %v917_v1 = vsel %vm6917_vm5, %v5359_v27, %v5345_v41  ;;  %v918_v45 = vsel %vm6917_vm5, %v5387_v40, %v5373_v18  ;;  %v9559_v11 = vld [vmem:[#allocation53_spill] sm:$0xff]  ;;  %v9565_v56 = vld [vmem:[#allocation59_spill] sm:$0xff] }
 0x295   :  { %9513 = vst [vmem:[#allocation95_spill] sm:$0xff] %v9512_v7  ;;  %v919_v22 = vsel %vm6917_vm5, %v5415_v25, %v5401_v60  ;;  %v920_v62 = vsel %vm6917_vm5, %v5443_v12, %v5429_v57  ;;  %v921_v13 = vsel %vm6917_vm5, %v5471_v0, %v5457_v36  ;;  %v922_v41 = vsel %vm6917_vm5, %v5499_v35, %v5485_v33  ;;  %v9514_v36 = vld [vmem:[#allocation10_spill] sm:$0xff]  ;;  %v9515_v0 = vld [vmem:[#allocation9_spill] sm:$0xff]  ;;  %v9516_v35 = vld [vmem:[#allocation12_spill] sm:$0xff] }
 0x296   :  { %v923_v27 = vsel %vm6917_vm5, %v5527_v54, %v5513_v28  ;;  %v924_v18 = vsel %vm6917_vm5, %v5555_v55, %v5541_v29  ;;  %v925_v40 = vsel %vm6917_vm5, %v5583_v5, %v5569_v34  ;;  %v926_v60 = vsel %vm6917_vm5, %v5611_v24, %v5597_v53  ;;  %v9517_v28 = vld [vmem:[#allocation11_spill] sm:$0xff]  ;;  %v9518_v29 = vld [vmem:[#allocation14_spill] sm:$0xff]  ;;  %v9519_v55 = vld [vmem:[#allocation13_spill] sm:$0xff] }
 0x297   :  { %v927_v25 = vsel %vm6917_vm5, %v5639_v61, %v5625_v2  ;;  %v928_v57 = vsel %vm6917_vm5, %v5667_v21, %v5653_v42  ;;  %v929_v12 = vsel %vm6917_vm5, %v5695_v9, %v5681_v16  ;;  %v930_v33 = vsel %vm6917_vm5, %v9515_v0, %v9514_v36  ;;  %v9520_v5 = vld [vmem:[#allocation16_spill] sm:$0xff]  ;;  %v9521_v53 = vld [vmem:[#allocation15_spill] sm:$0xff]  ;;  %v9522_v2 = vld [vmem:[#allocation18_spill] sm:$0xff] }
 0x298   :  { %v931_v54 = vsel %vm6917_vm5, %v9517_v28, %v9516_v35  ;;  %v932_v34 = vsel %vm6917_vm5, %v9519_v55, %v9518_v29  ;;  %v933_v24 = vsel %vm6917_vm5, %v9521_v53, %v9520_v5  ;;  %v9523_v61 = vld [vmem:[#allocation17_spill] sm:$0xff]  ;;  %v9524_v21 = vld [vmem:[#allocation20_spill] sm:$0xff]  ;;  %v9525_v16 = vld [vmem:[#allocation19_spill] sm:$0xff]  ;;  %v936_v37 = vsel %vm6917_vm5, %v9527_v58, %v9526_v10 }
 0x299   :  { %v934_v42 = vsel %vm6917_vm5, %v9523_v61, %v9522_v2  ;;  %v935_v9 = vsel %vm6917_vm5, %v9525_v16, %v9524_v21  ;;  %v937_v46 = vsel %vm6917_vm5, %v9529_v30, %v9528_v52  ;;  %v938_v63 = vsel %vm6917_vm5, %v9531_v47, %v9530_v6  ;;  %v9533_v36 = vld [vmem:[#allocation27_spill] sm:$0xff]  ;;  %v9534_v35 = vld [vmem:[#allocation30_spill] sm:$0xff]  ;;  %v9535_v28 = vld [vmem:[#allocation29_spill] sm:$0xff] }
 0x29a   :  { %v939_v0 = vsel %vm6917_vm5, %v9533_v36, %v9532_v31  ;;  %v940_v29 = vsel %vm6917_vm5, %v9535_v28, %v9534_v35  ;;  %v9536_v55 = vld [vmem:[#allocation32_spill] sm:$0xff]  ;;  %v9537_v5 = vld [vmem:[#allocation31_spill] sm:$0xff]  ;;  %v9538_v2 = vld [vmem:[#allocation34_spill] sm:$0xff] }
 0x29b   :  { %v941_v53 = vsel %vm6917_vm5, %v9537_v5, %v9536_v55  ;;  %v9539_v61 = vld [vmem:[#allocation33_spill] sm:$0xff]  ;;  %v9540_v16 = vld [vmem:[#allocation36_spill] sm:$0xff]  ;;  %v9541_v10 = vld [vmem:[#allocation35_spill] sm:$0xff] }
 0x29c   :  { %v942_v21 = vsel %vm6917_vm5, %v9539_v61, %v9538_v2  ;;  %v943_v58 = vsel %vm6917_vm5, %v9541_v10, %v9540_v16  ;;  %v9542_v52 = vld [vmem:[#allocation38_spill] sm:$0xff]  ;;  %v9543_v30 = vld [vmem:[#allocation37_spill] sm:$0xff]  ;;  %v9544_v47 = vld [vmem:[#allocation40_spill] sm:$0xff] }
 0x29d   :  { %v944_v6 = vsel %vm6917_vm5, %v9543_v30, %v9542_v52  ;;  %v9545_v31 = vld [vmem:[#allocation39_spill] sm:$0xff]  ;;  %v9546_v35 = vld [vmem:[#allocation42_spill] sm:$0xff]  ;;  %v9547_v28 = vld [vmem:[#allocation41_spill] sm:$0xff] }
 0x29e   :  { %v945_v36 = vsel %vm6917_vm5, %v9545_v31, %v9544_v47  ;;  %v946_v55 = vsel %vm6917_vm5, %v9547_v28, %v9546_v35  ;;  %v9548_v5 = vld [vmem:[#allocation44_spill] sm:$0xff]  ;;  %v9549_v2 = vld [vmem:[#allocation43_spill] sm:$0xff]  ;;  %v9550_v16 = vld [vmem:[#allocation46_spill] sm:$0xff] }
 0x29f   :  { %v947_v61 = vsel %vm6917_vm5, %v9549_v2, %v9548_v5  ;;  %v9551_v10 = vld [vmem:[#allocation45_spill] sm:$0xff]  ;;  %v9552_v30 = vld [vmem:[#allocation48_spill] sm:$0xff]  ;;  %v9554_v31 = vld [vmem:[#allocation50_spill] sm:$0xff] }
 0x2a0   :  { %v948_v52 = vsel %vm6917_vm5, %v9551_v10, %v9550_v16  ;;  %v949_v47 = vsel %vm6917_vm5, %v9553_v59, %v9552_v30  ;;  %v950_v35 = vsel %vm6917_vm5, %v9555_v43, %v9554_v31  ;;  %v9556_v28 = vld [vmem:[#allocation52_spill] sm:$0xff]  ;;  %v9558_v2 = vld [vmem:[#allocation54_spill] sm:$0xff]  ;;  %v9563_v50 = vld [vmem:[#allocation57_spill] sm:$0xff] }
 0x2a1   :  { %v951_v5 = vsel %vm6917_vm5, %v9557_v15, %v9556_v28  ;;  %v952_v16 = vsel %vm6917_vm5, %v9559_v11, %v9558_v2  ;;  %v9560_v10 = vld [vmem:[#allocation56_spill] sm:$0xff]  ;;  %v9562_v30 = vld [vmem:[#allocation58_spill] sm:$0xff]  ;;  %v9567_v38 = vld [vmem:[#allocation61_spill] sm:$0xff] }
 0x2a2   :  { %v953_v59 = vsel %vm6917_vm5, %v9561_v23, %v9560_v10  ;;  %v954_v43 = vsel %vm6917_vm5, %v9563_v50, %v9562_v30  ;;  %v9564_v31 = vld [vmem:[#allocation60_spill] sm:$0xff]  ;;  %v9566_v28 = vld [vmem:[#allocation62_spill] sm:$0xff]  ;;  %v9569_v44 = vld [vmem:[#allocation63_spill] sm:$0xff] }
 0x2a3   :  { %v955_v15 = vsel %vm6917_vm5, %v9565_v56, %v9564_v31  ;;  %v956_v11 = vsel %vm6917_vm5, %v9567_v38, %v9566_v28  ;;  %v9568_v2 = vld [vmem:[#allocation64_spill] sm:$0xff]  ;;  %v9570_v10 = vld [vmem:[#allocation66_spill] sm:$0xff]  ;;  %v9571_v26 = vld [vmem:[#allocation65_spill] sm:$0xff] }
 0x2a4   :  { %v957_v23 = vsel %vm6917_vm5, %v9569_v44, %v9568_v2  ;;  %v958_v50 = vsel %vm6917_vm5, %v9571_v26, %v9570_v10  ;;  %v9572_v30 = vld [vmem:[#allocation68_spill] sm:$0xff]  ;;  %v9573_v32 = vld [vmem:[#allocation67_spill] sm:$0xff]  ;;  %v9574_v31 = vld [vmem:[#allocation70_spill] sm:$0xff] }
 0x2a5   :  { %v959_v56 = vsel %vm6917_vm5, %v9573_v32, %v9572_v30  ;;  %v9575_v14 = vld [vmem:[#allocation69_spill] sm:$0xff]  ;;  %v9576_v28 = vld [vmem:[#allocation72_spill] sm:$0xff]  ;;  %v9577_v20 = vld [vmem:[#allocation71_spill] sm:$0xff] }
 0x2a6   :  { %v960_v38 = vsel %vm6917_vm5, %v9575_v14, %v9574_v31  ;;  %v961_v44 = vsel %vm6917_vm5, %v9577_v20, %v9576_v28  ;;  %v9578_v2 = vld [vmem:[#allocation74_spill] sm:$0xff]  ;;  %v9579_v19 = vld [vmem:[#allocation73_spill] sm:$0xff]  ;;  %v9580_v10 = vld [vmem:[#allocation76_spill] sm:$0xff] }
 0x2a7   :  { %v962_v26 = vsel %vm6917_vm5, %v9579_v19, %v9578_v2  ;;  %v9581_v8 = vld [vmem:[#allocation75_spill] sm:$0xff]  ;;  %v9582_v30 = vld [vmem:[#allocation78_spill] sm:$0xff]  ;;  %v9583_v51 = vld [vmem:[#allocation77_spill] sm:$0xff] }
 0x2a8   :  { %v963_v32 = vsel %vm6917_vm5, %v9581_v8, %v9580_v10  ;;  %v964_v14 = vsel %vm6917_vm5, %v9583_v51, %v9582_v30  ;;  %v9584_v31 = vld [vmem:[#allocation80_spill] sm:$0xff]  ;;  %v9585_v4 = vld [vmem:[#allocation79_spill] sm:$0xff]  ;;  %v9586_v28 = vld [vmem:[#allocation82_spill] sm:$0xff] }
 0x2a9   :  { %v965_v20 = vsel %vm6917_vm5, %v9585_v4, %v9584_v31  ;;  %v9587_v39 = vld [vmem:[#allocation81_spill] sm:$0xff]  ;;  %v9588_v2 = vld [vmem:[#allocation84_spill] sm:$0xff]  ;;  %v9589_v17 = vld [vmem:[#allocation83_spill] sm:$0xff] }
 0x2aa   :  { %v966_v19 = vsel %vm6917_vm5, %v9587_v39, %v9586_v28  ;;  %v967_v8 = vsel %vm6917_vm5, %v9589_v17, %v9588_v2  ;;  %v9590_v10 = vld [vmem:[#allocation86_spill] sm:$0xff]  ;;  %v9591_v48 = vld [vmem:[#allocation85_spill] sm:$0xff]  ;;  %v9592_v30 = vld [vmem:[#allocation88_spill] sm:$0xff] }
 0x2ab   :  { %v968_v51 = vsel %vm6917_vm5, %v9591_v48, %v9590_v10  ;;  %v9593_v49 = vld [vmem:[#allocation87_spill] sm:$0xff]  ;;  %v9594_v31 = vld [vmem:[#allocation90_spill] sm:$0xff]  ;;  %v9595_v28 = vld [vmem:[#allocation89_spill] sm:$0xff] }
 0x2ac   :  { %v969_v4 = vsel %vm6917_vm5, %v9593_v49, %v9592_v30  ;;  %v970_v39 = vsel %vm6917_vm5, %v9595_v28, %v9594_v31  ;;  %v9596_v2 = vld [vmem:[#allocation92_spill] sm:$0xff]  ;;  %v9597_v17 = vld [vmem:[#allocation91_spill] sm:$0xff]  ;;  %v9598_v48 = vld [vmem:[#allocation94_spill] sm:$0xff] }
 0x2ad   :  { %v971_v10 = vsel %vm6917_vm5, %v9597_v17, %v9596_v2  ;;  %v9599_v30 = vld [vmem:[#allocation93_spill] sm:$0xff]  ;;  %v9600_v28 = vld [vmem:[#allocation96_spill] sm:$0xff] }
 0x2ae   :  { %v972_v49 = vsel %vm6917_vm5, %v9599_v30, %v9598_v48  ;;  %v973_v31 = vsel %vm6917_vm5, 19.837881, %v9600_v28  ;;  %v9601_v2 = vld [vmem:[#allocation8_spill] sm:$0xff]  ;;  %v9603_v30 = vmov 0  ;;  %v9607_v28 = vld [vmem:[#allocation451_spill] sm:$0xff] }
 0x2af   :  { %v9602_v17 = vand.u32 16, %v9601_v2  ;;  %v9606_v48 = vld [vmem:[#allocation452_spill] sm:$0xff] }
 0x2b0   :  { %v9608_v2 = vsel %vm6917_vm5, %v9606_v48, %v9607_v28  ;;  %v9615_v48 = vld [vmem:[#allocation455_spill] sm:$0xff] }
 0x2b1   :  { %vm7174_vm6 = vcmp.ne.s32.totalorder %v9602_v17, 0  ;;  %v9609_v17 = vld [vmem:[#allocation454_spill] sm:$0xff] }
 0x2b2   :  { %v9604_v30 = vsel %vm7174_vm6, 4294967295, %v9603_v30 }
 0x2b3   :  { %9605 = vst [vmem:[#allocation98_spill] sm:$0xff] %v9604_v30  ;;  %v9610_v30 = vld [vmem:[#allocation453_spill] sm:$0xff] }
 0x2b4   :  { %v9611_v28 = vsel %vm6917_vm5, %v9609_v17, %v9610_v30  ;;  %v9614_v30 = vld [vmem:[#allocation456_spill] sm:$0xff]  ;;  %v9622_v17 = vld [vmem:[#allocation461_spill] sm:$0xff] }
 0x2b5   :  { %v976_v7 = vsel %vm7174_vm6, %v9611_v28, %v9608_v2  ;;  %v9616_v2 = vsel %vm6917_vm5, %v9614_v30, %v9615_v48  ;;  %v9617_v28 = vld [vmem:[#allocation459_spill] sm:$0xff]  ;;  %v9618_v30 = vld [vmem:[#allocation458_spill] sm:$0xff] }
 0x2b6   :  { %v9619_v48 = vsel %vm6917_vm5, %v9617_v28, %v9618_v30 }
 0x2b7   :  { %v977_v28 = vsel %vm7174_vm6, %v9619_v48, %v9616_v2  ;;  %v9623_v2 = vld [vmem:[#allocation460_spill] sm:$0xff] }
 0x2b8   :  { %v9624_v48 = vsel %vm6917_vm5, %v9622_v17, %v9623_v2  ;;  %v979_v17 = vsel %vm7174_vm6, %v918_v45, %v917_v1  ;;  %v982_v1 = vsel %vm7174_vm6, %v924_v18, %v923_v27  ;;  %v983_v45 = vsel %vm7174_vm6, %v926_v60, %v925_v40 }
 0x2b9   :  { %v978_v2 = vsel %vm7174_vm6, %v916_v3, %v9624_v48  ;;  %v980_v3 = vsel %vm7174_vm6, %v920_v62, %v919_v22  ;;  %v981_v48 = vsel %vm7174_vm6, %v922_v41, %v921_v13  ;;  %v984_v22 = vsel %vm7174_vm6, %v928_v57, %v927_v25 }
 0x2ba   :  { %v985_v62 = vsel %vm7174_vm6, %v930_v33, %v929_v12  ;;  %v986_v13 = vsel %vm7174_vm6, %v932_v34, %v931_v54  ;;  %v987_v41 = vsel %vm7174_vm6, %v934_v42, %v933_v24  ;;  %v988_v18 = vsel %vm7174_vm6, %v936_v37, %v935_v9 }
 0x2bb   :  { %v989_v27 = vsel %vm7174_vm6, %v938_v63, %v937_v46  ;;  %v990_v40 = vsel %vm7174_vm6, %v940_v29, %v939_v0  ;;  %v991_v60 = vsel %vm7174_vm6, %v942_v21, %v941_v53  ;;  %v992_v25 = vsel %vm7174_vm6, %v944_v6, %v943_v58  ;;  %v9626_v58 = vld [vmem:[#allocation8_spill] sm:$0xff] }
 0x2bc   :  { %v993_v57 = vsel %vm7174_vm6, %v946_v55, %v945_v36  ;;  %v994_v12 = vsel %vm7174_vm6, %v948_v52, %v947_v61  ;;  %v995_v33 = vsel %vm7174_vm6, %v950_v35, %v949_v47  ;;  %v996_v54 = vsel %vm7174_vm6, %v952_v16, %v951_v5 }
 0x2bd   :  { %v997_v34 = vsel %vm7174_vm6, %v954_v43, %v953_v59  ;;  %v998_v24 = vsel %vm7174_vm6, %v956_v11, %v955_v15  ;;  %v999_v42 = vsel %vm7174_vm6, %v958_v50, %v957_v23  ;;  %v1000_v9 = vsel %vm7174_vm6, %v960_v38, %v959_v56 }
 0x2be   :  { %v1001_v37 = vsel %vm7174_vm6, %v962_v26, %v961_v44  ;;  %v1002_v46 = vsel %vm7174_vm6, %v964_v14, %v963_v32  ;;  %v1003_v63 = vsel %vm7174_vm6, %v966_v19, %v965_v20  ;;  %v1004_v0 = vsel %vm7174_vm6, %v968_v51, %v967_v8 }
 0x2bf   :  { %v1005_v29 = vsel %vm7174_vm6, %v970_v39, %v969_v4  ;;  %v1006_v53 = vsel %vm7174_vm6, %v972_v49, %v971_v10  ;;  %v1007_v21 = vsel %vm7174_vm6, 19.837881, %v973_v31  ;;  %v9627_v6 = vand.u32 32, %v9626_v58 }
 0x2c0   :  { %v9630_v55 = vand.u32 64, %v9626_v58  ;;  %v1036_v52 = vand.u32 128, %v9626_v58  ;;  %v1042_v47 = vand.u32 256, %v9626_v58  ;;  %v1046_v31 = vand.u32 512, %v9626_v58 }
 0x2c1   :  { %vm7269_vm7 = vcmp.ne.s32.totalorder %v9627_v6, 0 }
 0x2c2   :  { %vm7275_vm8 = vcmp.ne.s32.totalorder %v9630_v55, 0  ;;  %v1010_v35 = vsel %vm7269_vm7, %v977_v28, %v976_v7  ;;  %v1011_v5 = vsel %vm7269_vm7, %v979_v17, %v978_v2  ;;  %v1012_v16 = vsel %vm7269_vm7, %v981_v48, %v980_v3 }
 0x2c3   :  { %v1013_v59 = vsel %vm7269_vm7, %v983_v45, %v982_v1  ;;  %v1014_v43 = vsel %vm7269_vm7, %v985_v62, %v984_v22  ;;  %v1015_v15 = vsel %vm7269_vm7, %v987_v41, %v986_v13  ;;  %v1016_v11 = vsel %vm7269_vm7, %v989_v27, %v988_v18 }
 0x2c4   :  { %v1017_v7 = vsel %vm7269_vm7, %v991_v60, %v990_v40  ;;  %v1018_v23 = vsel %vm7269_vm7, %v993_v57, %v992_v25  ;;  %v1019_v50 = vsel %vm7269_vm7, %v995_v33, %v994_v12  ;;  %v1020_v56 = vsel %vm7269_vm7, %v997_v34, %v996_v54 }
 0x2c5   :  { %v1021_v38 = vsel %vm7269_vm7, %v999_v42, %v998_v24  ;;  %v1022_v44 = vsel %vm7269_vm7, %v1001_v37, %v1000_v9  ;;  %v1023_v26 = vsel %vm7269_vm7, %v1003_v63, %v1002_v46  ;;  %v1024_v32 = vsel %vm7269_vm7, %v1005_v29, %v1004_v0 }
 0x2c6   :  { %v1025_v14 = vsel %vm7269_vm7, %v1007_v21, %v1006_v53  ;;  %v1028_v20 = vsel %vm7275_vm8, %v1011_v5, %v1010_v35  ;;  %v1029_v19 = vsel %vm7275_vm8, %v1013_v59, %v1012_v16  ;;  %v1030_v8 = vsel %vm7275_vm8, %v1015_v15, %v1014_v43 }
 0x2c7   :  { %v1031_v51 = vsel %vm7275_vm8, %v1017_v7, %v1016_v11  ;;  %v1032_v4 = vsel %vm7275_vm8, %v1019_v50, %v1018_v23  ;;  %v1033_v39 = vsel %vm7275_vm8, %v1021_v38, %v1020_v56  ;;  %v1034_v10 = vsel %vm7275_vm8, %v1023_v26, %v1022_v44 }
 0x2c8   :  { %v1035_v49 = vsel %vm7275_vm8, %v1025_v14, %v1024_v32  ;;  %vm1037_vm9 = vcmp.ne.s32.totalorder %v1036_v52, 0  ;;  %vm1043_vm10 = vcmp.ne.s32.totalorder %v1042_v47, 0  ;;  %vm1047_vm11 = vcmp.ne.s32.totalorder %v1046_v31, 0 }
 0x2c9   :  { %v1038_v28 = vsel %vm1037_vm9, %v1029_v19, %v1028_v20  ;;  %v1039_v30 = vsel %vm1037_vm9, %v1031_v51, %v1030_v8  ;;  %v1040_v2 = vsel %vm1037_vm9, %v1033_v39, %v1032_v4  ;;  %v1041_v17 = vsel %vm1037_vm9, %v1035_v49, %v1034_v10 }
 0x2ca   :  { %v1044_v3 = vsel %vm1043_vm10, %v1039_v30, %v1038_v28  ;;  %v1045_v48 = vsel %vm1043_vm10, %v1041_v17, %v1040_v2 }
 0x2cb   :  { %v1048_v1 = vsel %vm1047_vm11, %v1045_v48, %v1044_v3 }
 0x2cc   :  { %1049 = vst [vmem:[#allocation5] sm:$0xff] %v1048_v1 }
 0x2cd   :  { %1603 = shalt.err (!%p1600_p12)
}
 0x2ce   :  { %s1604_s22 = scalar_lea.hbm %s7343_s1, 128 }
 0x2cf   :  { %p1605_p13 = scmp.ne.s32.totalorder %s7343_s1, %s1604_s22  ;;  %p1608_p0 = scmp.lt.u32.totalorder %s1604_s22, %s7343_s1 }
 0x2d1   :  { %p1610_p1 = pnand %p1608_p0, %p1605_p13 }
 0x2d3   :  { %1613 = shalt.err (!%p1610_p1)
}
 0x2d4   :  { %1059 = dma.vmem_to_hbm [thread:$0]  %s1057_s18, 128, %s7343_s1, [#allocation4]  }
 0x2d5   :  { %1616 = dma.done.wait [#allocation4], 128  }
 0x2d6   :  { %1617 = vsyncadd [#allocation4], 4294967168 }
 0x2d7   :  { %1063 = vsyncpa [#allocation3], 1 }
 0x2d8   :  { %1064 = vsyncpa [#allocation4], 1 }

</bundles_post_ra>
